<compile_context>
chip_gen: v7x
topology: tpu7x:2x2x1
jax: 0.10.0
libtpu: 0.0.40
codegen_flags: <defaults>
</compile_context>

<pallas_src>
import numpy as np

import jax
import jax.numpy as jnp
from jax.experimental import pallas as pl
from jax.experimental.pallas import tpu as pltpu

BN_EPS = 1e-5  # PyTorch BatchNorm2d default


# ------------------------------ static geometry ------------------------------

def _geometry(B, nz, ngf, nc):
    chans = [nz, ngf * 8, ngf * 4, ngf * 2, ngf, nc]
    # (kernel, transposed-conv padding, nearest-upsample factor applied after)
    conv_cfg = [(2, 0, 2), (4, 0, 1), (3, 1, 2), (3, 1, 2), (3, 1, 0)]
    G, h = [], 1
    for i, (k, p_t, up) in enumerate(conv_cfg):
        pad = k - 1 - p_t          # transposed conv == regular conv with this pad
        hp = h + 2 * pad           # padded input spatial size
        h_out = hp - (k - 1)       # conv output spatial size
        G.append(dict(k=k, pad=pad, hp=hp, h_out=h_out, up=up,
                      lp=B * hp * hp,                # lanes = flattened padded grid
                      margin=(k - 1) * (hp + 1),     # trailing zero lanes for shifted slices
                      n_valid=B * h_out * h_out,
                      c_in=chans[i], c_out=chans[i + 1]))
        h = h_out * up if up else h_out
    return G


def _make_repack(B, hp_src, up, hp_dst, pad_dst, margin_dst):
    """0/1 matrix mapping valid pixels of the src padded grid onto the dst
    padded grid (folds `up`x nearest upsample + zero-padding + re-layout)."""
    h_in_dst = hp_dst - 2 * pad_dst
    S = np.zeros((B * hp_src * hp_src, B * hp_dst * hp_dst + margin_dst), np.float32)
    for b in range(B):
        for r in range(h_in_dst):
            for c in range(h_in_dst):
                p = b * hp_src * hp_src + (r // up) * hp_src + (c // up)
                q = b * hp_dst * hp_dst + (r + pad_dst) * hp_dst + (c + pad_dst)
                S[p, q] = 1.0
    return S


def _make_mask(B, hp, h_out):
    """(1, B*hp*hp) {0,1} mask of the valid (top-left h_out x h_out) positions."""
    m = np.zeros((1, B * hp * hp), np.float32)
    for b in range(B):
        for r in range(h_out):
            m[0, b * hp * hp + r * hp: b * hp * hp + r * hp + h_out] = 1.0
    return m


def _w_mat(w_t, c_out_pad=None):
    """ConvTranspose2d weight (C_in, C_out, k, k) -> flipped-conv matmul weight
    (C_out[,padded to >=8], k*k*C_in) in bf16, column order (dh, dw, c_in)."""
    c_in, c_out, k, _ = w_t.shape
    wm = jnp.transpose(w_t[:, :, ::-1, ::-1], (1, 2, 3, 0)).reshape(c_out, k * k * c_in)
    if c_out_pad is not None and c_out_pad > c_out:
        wm = jnp.concatenate(
            [wm, jnp.zeros((c_out_pad - c_out, k * k * c_in), wm.dtype)], axis=0)
    return wm.astype(jnp.bfloat16)


# --------------------------------- the kernel --------------------------------

def _make_kernel(G):
    n = len(G)

    def kernel(*refs):
        # inputs: xp1, then per BN layer (w, gamma, beta, mask, S), then w_last
        xp_in = refs[0]
        layer_refs = [refs[1 + 5 * i: 6 + 5 * i] for i in range(n - 1)]
        w_last = refs[1 + 5 * (n - 1)]
        out_ref = refs[2 + 5 * (n - 1)]
        a_refs = list(refs[3 + 5 * (n - 1): 3 + 5 * (n - 1) + n])
        xp_scr = list(refs[3 + 5 * (n - 1) + n:])
        xp_refs = [xp_in] + xp_scr   # padded-input ref for every layer

        for i, geo in enumerate(G):
            k, hp, lp, c_in = geo["k"], geo["hp"], geo["lp"], geo["c_in"]
            a_ref, xp_ref = a_refs[i], xp_refs[i]

            # ---- in-VMEM im2col: k*k lane-shifted slices stacked on sublanes ----
            t = 0
            for dh in range(k):
                for dw in range(k):
                    sh = dh * hp + dw
                    a_ref[t * c_in:(t + 1) * c_in, :] = (
                        xp_ref[:, sh:sh + lp].astype(a_ref.dtype))
                    t += 1

            # ---- conv as a single MXU matmul (bf16 operands, f32 accumulate) ----
            w_val = layer_refs[i][0][...] if i < n - 1 else w_last[...]
            a_val = a_ref[...]
            if w_val.dtype != a_val.dtype:          # layer 1 keeps its tiny A in f32
                w_val = w_val.astype(jnp.float32)
                a_val = a_val.astype(jnp.float32)
            y = jnp.dot(w_val, a_val, preferred_element_type=jnp.float32)

            if i < n - 1:
                # ---- fused BatchNorm (masked batch stats) + ReLU epilogue ----
                _, gam_ref, bet_ref, m_ref, s_ref = layer_refs[i]
                mask = m_ref[...]
                inv_n = 1.0 / float(geo["n_valid"])
                mean = jnp.sum(y * mask, axis=1, keepdims=True) * inv_n
                diff = y - mean
                var = jnp.sum(diff * diff * mask, axis=1, keepdims=True) * inv_n
                act = jnp.maximum(
                    diff * jax.lax.rsqrt(var + BN_EPS) * gam_ref[...] + bet_ref[...],
                    0.0)
                # ---- fused upsample + zero-pad + re-layout via repack matmul ----
                xp_refs[i + 1][...] = jnp.dot(act.astype(jnp.bfloat16), s_ref[...],
                                              preferred_element_type=jnp.float32)
            else:
                out_ref[...] = jnp.tanh(y)          # fused final tanh

    return kernel


# --------------------------------- the wrapper --------------------------------

def dcgan_mnist_forward(x, params):
    """x: (B, nz, 1, 1) NCHW latent -> (B, nc, 28, 28), matching DCGAN_MNIST."""
    B, nz = x.shape[0], x.shape[1]
    assert x.shape[2] == 1 and x.shape[3] == 1
    ngf = params["w4"].shape[1]
    nc = params["w5"].shape[1]
    G = _geometry(B, nz, ngf, nc)
    n = len(G)
    nc_pad = max(8, -(-nc // 8) * 8)        # keep the last matmul's M a full sublane tile

    # -------- trace-time constants: repack/upsample matrices + BN masks --------
    s_mats, masks = [], []
    for i in range(n - 1):
        a, b = G[i], G[i + 1]
        assert a["up"] * a["h_out"] == b["hp"] - 2 * b["pad"]
        s_mats.append(jnp.asarray(
            _make_repack(B, a["hp"], a["up"], b["hp"], b["pad"], b["margin"]),
            dtype=jnp.bfloat16))
        masks.append(jnp.asarray(_make_mask(B, a["hp"], a["h_out"])))

    wmats = [_w_mat(params[f"w{i + 1}"]) for i in range(n - 1)]
    wmats.append(_w_mat(params[f"w{n}"], c_out_pad=nc_pad))

    # layer-1 padded input: channels on sublanes, flattened padded 3x3 spatial
    g0 = G[0]
    xp1 = jnp.zeros((nz, g0["lp"] + g0["margin"]), jnp.float32)
    cols = np.asarray([b * g0["hp"] * g0["hp"] + g0["pad"] * (g0["hp"] + 1)
                       for b in range(B)], np.int32)
    xp1 = xp1.at[:, cols].set(jnp.transpose(x[:, :, 0, 0]).astype(jnp.float32))

    args = [xp1]
    for i in range(n - 1):
        args += [wmats[i],
                 params[f"g{i + 1}"].reshape(-1, 1).astype(jnp.float32),
                 params[f"b{i + 1}"].reshape(-1, 1).astype(jnp.float32),
                 masks[i], s_mats[i]]
    args.append(wmats[-1])

    # A (im2col) scratch per layer + padded-activation scratch for layers 2..5
    scratch = [pltpu.VMEM((g["k"] ** 2 * g["c_in"], g["lp"]),
                          jnp.bfloat16 if g["c_in"] % 16 == 0 else jnp.float32)
               for g in G]
    scratch += [pltpu.VMEM((G[i]["c_out"], G[i + 1]["lp"] + G[i + 1]["margin"]),
                           jnp.float32) for i in range(n - 1)]

    gl = G[-1]
    vmem = pl.BlockSpec(memory_space=pltpu.MemorySpace.VMEM)

    flops = 0
    for i, g in enumerate(G):
        co = nc_pad if i == n - 1 else g["c_out"]
        flops += 2 * co * (g["k"] ** 2 * g["c_in"]) * g["lp"]
    for i in range(n - 1):
        flops += 2 * G[i]["c_out"] * s_mats[i].shape[0] * s_mats[i].shape[1]
    bytes_accessed = sum(int(np.prod(a.shape)) * jnp.dtype(a.dtype).itemsize
                         for a in args) + nc_pad * gl["lp"] * 4
    cost = pl.CostEstimate(
        flops=int(flops),
        transcendentals=int(nc_pad * gl["lp"] + sum(g["c_out"] for g in G[:-1])),
        bytes_accessed=int(bytes_accessed))

    out2d = pl.pallas_call(
        _make_kernel(G),
        out_shape=jax.ShapeDtypeStruct((nc_pad, gl["lp"]), jnp.float32),
        in_specs=[vmem] * len(args),
        out_specs=vmem,
        scratch_shapes=scratch,
        compiler_params=pltpu.CompilerParams(vmem_limit_bytes=32 * 1024 * 1024),
        cost_estimate=cost,
    )(*args)

    h_out = gl["h_out"]
    out = out2d[:nc].reshape(nc, B, gl["hp"], gl["hp"])[:, :, :h_out, :h_out]
    return jnp.transpose(out, (1, 0, 2, 3))


# --------------------------- parameter creation (test) ---------------------------

def make_params(key, nz, ngf, nc):
    ks = jax.random.split(key, 16)
    p = {}
    p["w1"] = 0.05 * jax.random.normal(ks[0], (nz, ngf * 8, 2, 2), jnp.float32)
    p["w2"] = 0.05 * jax.random.normal(ks[1], (ngf * 8, ngf * 4, 4, 4), jnp.float32)
    p["w3"] = 0.05 * jax.random.normal(ks[2], (ngf * 4, ngf * 2, 3, 3), jnp.float32)
    p["w4"] = 0.05 * jax.random.normal(ks[3], (ngf * 2, ngf, 3, 3), jnp.float32)
    p["w5"] = 0.05 * jax.random.normal(ks[4], (ngf, nc, 3, 3), jnp.float32)
    for i, c in zip((1, 2, 3, 4), (ngf * 8, ngf * 4, ngf * 2, ngf)):
        p[f"g{i}"] = 1.0 + 0.1 * jax.random.normal(ks[4 + 2 * i], (c,), jnp.float32)
        p[f"b{i}"] = 0.1 * jax.random.normal(ks[5 + 2 * i], (c,), jnp.float32)
    return p


# ------------------------- plain-JAX reference (test only) -------------------------

def _reference_forward(x_nchw, params):
    """Pure-XLA reference with the same bf16 matmul rounding points as the kernel."""
    def conv_t(x, w_t, padding):
        B, H, W, C_in = x.shape
        _, C_out, k, _ = w_t.shape
        pad = k - 1 - padding
        H_out = H + k - 1 - 2 * padding
        xp = jnp.pad(x, ((0, 0), (pad, pad), (pad, pad), (0, 0)))
        w_conv = jnp.transpose(w_t[:, :, ::-1, ::-1], (2, 3, 0, 1))
        w_mat = w_conv.reshape(k * k * C_in, C_out).astype(jnp.bfloat16)
        patches = [xp[:, dh:dh + H_out, dw:dw + H_out, :]
                   for dh in range(k) for dw in range(k)]
        a = jnp.stack(patches, axis=3).reshape(B * H_out * H_out, k * k * C_in)
        out = jnp.dot(a.astype(jnp.bfloat16), w_mat, preferred_element_type=jnp.float32)
        return out.reshape(B, H_out, H_out, C_out)

    def bn_relu(x, g, b):
        mean = jnp.mean(x, axis=(0, 1, 2), keepdims=True)
        var = jnp.mean(jnp.square(x - mean), axis=(0, 1, 2), keepdims=True)
        y = (x - mean) * jax.lax.rsqrt(var + BN_EPS) * g + b
        return jnp.maximum(y, 0.0).astype(jnp.bfloat16).astype(jnp.float32)

    def up2(x):
        return jnp.repeat(jnp.repeat(x, 2, axis=1), 2, axis=2)

    x = jnp.transpose(x_nchw, (0, 2, 3, 1)).astype(jnp.float32)
    x = up2(bn_relu(conv_t(x, params["w1"], 0), params["g1"], params["b1"]))
    x = bn_relu(conv_t(x, params["w2"], 0), params["g2"], params["b2"])
    x = up2(bn_relu(conv_t(x, params["w3"], 1), params["g3"], params["b3"]))
    x = up2(bn_relu(conv_t(x, params["w4"], 1), params["g4"], params["b4"]))
    x = jnp.tanh(conv_t(x, params["w5"], 1))
    return jnp.transpose(x, (0, 3, 1, 2))


if __name__ == "__main__":
    batch, nz, ngf, nc = 2, 8, 16, 1

    key = jax.random.PRNGKey(0)
    k_x, k_p = jax.random.split(key)
    x = jax.random.normal(k_x, (batch, nz, 1, 1), jnp.float32)
    params = make_params(k_p, nz, ngf, nc)

    out = jax.block_until_ready(jax.jit(dcgan_mnist_forward)(x, params))

    assert out.shape == (batch, nc, 28, 28), out.shape
    assert bool(jnp.all(jnp.isfinite(out)))
    assert bool(jnp.all(jnp.abs(out) <= 1.0 + 1e-6))      # tanh range

    # numerical sanity vs a plain-JAX reference (identical bf16 rounding points)
    ref = jax.jit(_reference_forward)(x, params)
    err = float(jnp.max(jnp.abs(out - ref)))
    assert err < 2e-2, err

    print("KERNEL_OK")
</pallas_src>

<mosaic_0001>
module attributes {stable_mosaic.version = 11 : i64} {
  func.func @kernel(%arg0: memref<8x22xf32, #tpu.memory_space<vmem>>, %arg1: memref<128x32xbf16, #tpu.memory_space<vmem>>, %arg2: memref<128x1xf32, #tpu.memory_space<vmem>>, %arg3: memref<128x1xf32, #tpu.memory_space<vmem>>, %arg4: memref<1x18xf32, #tpu.memory_space<vmem>>, %arg5: memref<18x233xbf16, #tpu.memory_space<vmem>>, %arg6: memref<64x2048xbf16, #tpu.memory_space<vmem>>, %arg7: memref<64x1xf32, #tpu.memory_space<vmem>>, %arg8: memref<64x1xf32, #tpu.memory_space<vmem>>, %arg9: memref<1x200xf32, #tpu.memory_space<vmem>>, %arg10: memref<200x182xbf16, #tpu.memory_space<vmem>>, %arg11: memref<32x576xbf16, #tpu.memory_space<vmem>>, %arg12: memref<32x1xf32, #tpu.memory_space<vmem>>, %arg13: memref<32x1xf32, #tpu.memory_space<vmem>>, %arg14: memref<1x162xf32, #tpu.memory_space<vmem>>, %arg15: memref<162x546xbf16, #tpu.memory_space<vmem>>, %arg16: memref<16x288xbf16, #tpu.memory_space<vmem>>, %arg17: memref<16x1xf32, #tpu.memory_space<vmem>>, %arg18: memref<16x1xf32, #tpu.memory_space<vmem>>, %arg19: memref<1x512xf32, #tpu.memory_space<vmem>>, %arg20: memref<512x1862xbf16, #tpu.memory_space<vmem>>, %arg21: memref<8x144xbf16, #tpu.memory_space<vmem>>, %arg22: memref<8x1800xf32, #tpu.memory_space<vmem>>, %arg23: memref<32x18xf32, #tpu.memory_space<vmem>>, %arg24: memref<2048x200xbf16, #tpu.memory_space<vmem>>, %arg25: memref<576x162xbf16, #tpu.memory_space<vmem>>, %arg26: memref<288x512xbf16, #tpu.memory_space<vmem>>, %arg27: memref<144x1800xbf16, #tpu.memory_space<vmem>>, %arg28: memref<128x233xf32, #tpu.memory_space<vmem>>, %arg29: memref<64x182xf32, #tpu.memory_space<vmem>>, %arg30: memref<32x546xf32, #tpu.memory_space<vmem>>, %arg31: memref<16x1862xf32, #tpu.memory_space<vmem>>) attributes {dimension_semantics = [], scalar_prefetch = 0 : i64, scratch_operands = 9 : i64, tpu.core_type = #tpu.core_type<tc>} {
    %c0 = arith.constant 0 : index
    %c0_0 = arith.constant 0 : index
    %0 = vector.load %arg0[%c0, %c0_0] : memref<8x22xf32, #tpu.memory_space<vmem>>, vector<8x18xf32>
    %c0_1 = arith.constant 0 : index
    %c0_2 = arith.constant 0 : index
    %1 = vector.load %arg23[%c0_1, %c0_2] : memref<32x18xf32, #tpu.memory_space<vmem>>, vector<8x18xf32>
    tpu.vector_store %arg23[%c0_1, %c0_2], %0 {strides = array<i32>} : memref<32x18xf32, #tpu.memory_space<vmem>>, vector<8x18xf32>,
    %c0_3 = arith.constant 0 : index
    %c1 = arith.constant 1 : index
    %2 = vector.load %arg0[%c0_3, %c1] : memref<8x22xf32, #tpu.memory_space<vmem>>, vector<8x18xf32>
    %c8 = arith.constant 8 : index
    %c0_4 = arith.constant 0 : index
    %3 = vector.load %arg23[%c8, %c0_4] : memref<32x18xf32, #tpu.memory_space<vmem>>, vector<8x18xf32>
    tpu.vector_store %arg23[%c8, %c0_4], %2 {strides = array<i32>} : memref<32x18xf32, #tpu.memory_space<vmem>>, vector<8x18xf32>,
    %c0_5 = arith.constant 0 : index
    %c3 = arith.constant 3 : index
    %4 = vector.load %arg0[%c0_5, %c3] : memref<8x22xf32, #tpu.memory_space<vmem>>, vector<8x18xf32>
    %c16 = arith.constant 16 : index
    %c0_6 = arith.constant 0 : index
    %5 = vector.load %arg23[%c16, %c0_6] : memref<32x18xf32, #tpu.memory_space<vmem>>, vector<8x18xf32>
    tpu.vector_store %arg23[%c16, %c0_6], %4 {strides = array<i32>} : memref<32x18xf32, #tpu.memory_space<vmem>>, vector<8x18xf32>,
    %c0_7 = arith.constant 0 : index
    %c4 = arith.constant 4 : index
    %6 = vector.load %arg0[%c0_7, %c4] : memref<8x22xf32, #tpu.memory_space<vmem>>, vector<8x18xf32>
    %c24 = arith.constant 24 : index
    %c0_8 = arith.constant 0 : index
    %7 = vector.load %arg23[%c24, %c0_8] : memref<32x18xf32, #tpu.memory_space<vmem>>, vector<8x18xf32>
    tpu.vector_store %arg23[%c24, %c0_8], %6 {strides = array<i32>} : memref<32x18xf32, #tpu.memory_space<vmem>>, vector<8x18xf32>,
    %c0_9 = arith.constant 0 : index
    %c0_10 = arith.constant 0 : index
    %8 = vector.load %arg1[%c0_9, %c0_10] : memref<128x32xbf16, #tpu.memory_space<vmem>>, vector<128x32xbf16>
    %c0_11 = arith.constant 0 : index
    %c0_12 = arith.constant 0 : index
    %9 = vector.load %arg23[%c0_11, %c0_12] : memref<32x18xf32, #tpu.memory_space<vmem>>, vector<32x18xf32>
    %10 = arith.extf %8 : vector<128x32xbf16> to vector<128x32xf32>
    %cst = arith.constant dense<0.000000e+00> : vector<128x18xf32>
    %11 = tpu.matmul %10, %9, %cst {dimension_numbers = #tpu.dot_dimension_numbers<[1], [0], [0], [1], [0, 0, 1, 1], [], []>} : vector<128x32xf32>, vector<32x18xf32>, vector<128x18xf32> -> vector<128x18xf32>
    %c0_13 = arith.constant 0 : index
    %c0_14 = arith.constant 0 : index
    %12 = vector.load %arg4[%c0_13, %c0_14] : memref<1x18xf32, #tpu.memory_space<vmem>>, vector<1x18xf32>
    %13 = vector.broadcast %12 : vector<1x18xf32> to vector<128x18xf32>
    %14 = arith.mulf %11, %13 : vector<128x18xf32>
    %cst_15 = arith.constant dense<0.000000e+00> : vector<128xf32>
    %15 = vector.multi_reduction <add>, %14, %cst_15 [1] : vector<128x18xf32> to vector<128xf32>
    %16 = vector.shape_cast %15 : vector<128xf32> to vector<128x1xf32>
    %cst_16 = arith.constant 1.250000e-01 : f32
    %17 = vector.broadcast %cst_16 : f32 to vector<128x1xf32>
    %18 = arith.mulf %16, %17 : vector<128x1xf32>
    %19 = vector.broadcast %18 : vector<128x1xf32> to vector<128x18xf32>
    %20 = arith.subf %11, %19 : vector<128x18xf32>
    %21 = arith.mulf %20, %20 : vector<128x18xf32>
    %22 = vector.broadcast %12 : vector<1x18xf32> to vector<128x18xf32>
    %23 = arith.mulf %21, %22 : vector<128x18xf32>
    %cst_17 = arith.constant dense<0.000000e+00> : vector<128xf32>
    %24 = vector.multi_reduction <add>, %23, %cst_17 [1] : vector<128x18xf32> to vector<128xf32>
    %25 = vector.shape_cast %24 : vector<128xf32> to vector<128x1xf32>
    %cst_18 = arith.constant 1.250000e-01 : f32
    %26 = vector.broadcast %cst_18 : f32 to vector<128x1xf32>
    %27 = arith.mulf %25, %26 : vector<128x1xf32>
    %cst_19 = arith.constant 9.99999974E-6 : f32
    %28 = vector.broadcast %cst_19 : f32 to vector<128x1xf32>
    %29 = arith.addf %27, %28 : vector<128x1xf32>
    %30 = math.rsqrt %29 : vector<128x1xf32>
    %31 = vector.broadcast %30 : vector<128x1xf32> to vector<128x18xf32>
    %32 = arith.mulf %20, %31 : vector<128x18xf32>
    %c0_20 = arith.constant 0 : index
    %c0_21 = arith.constant 0 : index
    %33 = vector.load %arg2[%c0_20, %c0_21] : memref<128x1xf32, #tpu.memory_space<vmem>>, vector<128x1xf32>
    %34 = vector.broadcast %33 : vector<128x1xf32> to vector<128x18xf32>
    %35 = arith.mulf %32, %34 : vector<128x18xf32>
    %c0_22 = arith.constant 0 : index
    %c0_23 = arith.constant 0 : index
    %36 = vector.load %arg3[%c0_22, %c0_23] : memref<128x1xf32, #tpu.memory_space<vmem>>, vector<128x1xf32>
    %37 = vector.broadcast %36 : vector<128x1xf32> to vector<128x18xf32>
    %38 = arith.addf %35, %37 : vector<128x18xf32>
    %cst_24 = arith.constant 0.000000e+00 : f32
    %39 = vector.broadcast %cst_24 : f32 to vector<128x18xf32>
    %40 = arith.maximumf %38, %39 : vector<128x18xf32>
    %41 = arith.truncf %40 : vector<128x18xf32> to vector<128x18xbf16>
    %c0_25 = arith.constant 0 : index
    %c0_26 = arith.constant 0 : index
    %42 = vector.load %arg5[%c0_25, %c0_26] : memref<18x233xbf16, #tpu.memory_space<vmem>>, vector<18x233xbf16>
    %cst_27 = arith.constant dense<0.000000e+00> : vector<128x233xf32>
    %43 = tpu.matmul %41, %42, %cst_27 {dimension_numbers = #tpu.dot_dimension_numbers<[1], [0], [0], [1], [0, 0, 1, 1], [], []>} : vector<128x18xbf16>, vector<18x233xbf16>, vector<128x233xf32> -> vector<128x233xf32>
    %c0_28 = arith.constant 0 : index
    %c0_29 = arith.constant 0 : index
    %44 = vector.load %arg28[%c0_28, %c0_29] : memref<128x233xf32, #tpu.memory_space<vmem>>, vector<128x233xf32>
    tpu.vector_store %arg28[%c0_28, %c0_29], %43 {strides = array<i32>} : memref<128x233xf32, #tpu.memory_space<vmem>>, vector<128x233xf32>,
    %c0_30 = arith.constant 0 : index
    %c0_31 = arith.constant 0 : index
    %45 = vector.load %arg28[%c0_30, %c0_31] : memref<128x233xf32, #tpu.memory_space<vmem>>, vector<128x200xf32>
    %46 = arith.truncf %45 : vector<128x200xf32> to vector<128x200xbf16>
    %c0_32 = arith.constant 0 : index
    %c0_33 = arith.constant 0 : index
    %47 = vector.load %arg24[%c0_32, %c0_33] : memref<2048x200xbf16, #tpu.memory_space<vmem>>, vector<128x200xbf16>
    tpu.vector_store %arg24[%c0_32, %c0_33], %46 {strides = array<i32>} : memref<2048x200xbf16, #tpu.memory_space<vmem>>, vector<128x200xbf16>,
    %c0_34 = arith.constant 0 : index
    %c1_35 = arith.constant 1 : index
    %48 = vector.load %arg28[%c0_34, %c1_35] : memref<128x233xf32, #tpu.memory_space<vmem>>, vector<128x200xf32>
    %49 = arith.truncf %48 : vector<128x200xf32> to vector<128x200xbf16>
    %c128 = arith.constant 128 : index
    %c0_36 = arith.constant 0 : index
    %50 = vector.load %arg24[%c128, %c0_36] : memref<2048x200xbf16, #tpu.memory_space<vmem>>, vector<128x200xbf16>
    tpu.vector_store %arg24[%c128, %c0_36], %49 {strides = array<i32>} : memref<2048x200xbf16, #tpu.memory_space<vmem>>, vector<128x200xbf16>,
    %c0_37 = arith.constant 0 : index
    %c2 = arith.constant 2 : index
    %51 = vector.load %arg28[%c0_37, %c2] : memref<128x233xf32, #tpu.memory_space<vmem>>, vector<128x200xf32>
    %52 = arith.truncf %51 : vector<128x200xf32> to vector<128x200xbf16>
    %c256 = arith.constant 256 : index
    %c0_38 = arith.constant 0 : index
    %53 = vector.load %arg24[%c256, %c0_38] : memref<2048x200xbf16, #tpu.memory_space<vmem>>, vector<128x200xbf16>
    tpu.vector_store %arg24[%c256, %c0_38], %52 {strides = array<i32>} : memref<2048x200xbf16, #tpu.memory_space<vmem>>, vector<128x200xbf16>,
    %c0_39 = arith.constant 0 : index
    %c3_40 = arith.constant 3 : index
    %54 = vector.load %arg28[%c0_39, %c3_40] : memref<128x233xf32, #tpu.memory_space<vmem>>, vector<128x200xf32>
    %55 = arith.truncf %54 : vector<128x200xf32> to vector<128x200xbf16>
    %c384 = arith.constant 384 : index
    %c0_41 = arith.constant 0 : index
    %56 = vector.load %arg24[%c384, %c0_41] : memref<2048x200xbf16, #tpu.memory_space<vmem>>, vector<128x200xbf16>
    tpu.vector_store %arg24[%c384, %c0_41], %55 {strides = array<i32>} : memref<2048x200xbf16, #tpu.memory_space<vmem>>, vector<128x200xbf16>,
    %c0_42 = arith.constant 0 : index
    %c10 = arith.constant 10 : index
    %57 = vector.load %arg28[%c0_42, %c10] : memref<128x233xf32, #tpu.memory_space<vmem>>, vector<128x200xf32>
    %58 = arith.truncf %57 : vector<128x200xf32> to vector<128x200xbf16>
    %c512 = arith.constant 512 : index
    %c0_43 = arith.constant 0 : index
    %59 = vector.load %arg24[%c512, %c0_43] : memref<2048x200xbf16, #tpu.memory_space<vmem>>, vector<128x200xbf16>
    tpu.vector_store %arg24[%c512, %c0_43], %58 {strides = array<i32>} : memref<2048x200xbf16, #tpu.memory_space<vmem>>, vector<128x200xbf16>,
    %c0_44 = arith.constant 0 : index
    %c11 = arith.constant 11 : index
    %60 = vector.load %arg28[%c0_44, %c11] : memref<128x233xf32, #tpu.memory_space<vmem>>, vector<128x200xf32>
    %61 = arith.truncf %60 : vector<128x200xf32> to vector<128x200xbf16>
    %c640 = arith.constant 640 : index
    %c0_45 = arith.constant 0 : index
    %62 = vector.load %arg24[%c640, %c0_45] : memref<2048x200xbf16, #tpu.memory_space<vmem>>, vector<128x200xbf16>
    tpu.vector_store %arg24[%c640, %c0_45], %61 {strides = array<i32>} : memref<2048x200xbf16, #tpu.memory_space<vmem>>, vector<128x200xbf16>,
    %c0_46 = arith.constant 0 : index
    %c12 = arith.constant 12 : index
    %63 = vector.load %arg28[%c0_46, %c12] : memref<128x233xf32, #tpu.memory_space<vmem>>, vector<128x200xf32>
    %64 = arith.truncf %63 : vector<128x200xf32> to vector<128x200xbf16>
    %c768 = arith.constant 768 : index
    %c0_47 = arith.constant 0 : index
    %65 = vector.load %arg24[%c768, %c0_47] : memref<2048x200xbf16, #tpu.memory_space<vmem>>, vector<128x200xbf16>
    tpu.vector_store %arg24[%c768, %c0_47], %64 {strides = array<i32>} : memref<2048x200xbf16, #tpu.memory_space<vmem>>, vector<128x200xbf16>,
    %c0_48 = arith.constant 0 : index
    %c13 = arith.constant 13 : index
    %66 = vector.load %arg28[%c0_48, %c13] : memref<128x233xf32, #tpu.memory_space<vmem>>, vector<128x200xf32>
    %67 = arith.truncf %66 : vector<128x200xf32> to vector<128x200xbf16>
    %c896 = arith.constant 896 : index
    %c0_49 = arith.constant 0 : index
    %68 = vector.load %arg24[%c896, %c0_49] : memref<2048x200xbf16, #tpu.memory_space<vmem>>, vector<128x200xbf16>
    tpu.vector_store %arg24[%c896, %c0_49], %67 {strides = array<i32>} : memref<2048x200xbf16, #tpu.memory_space<vmem>>, vector<128x200xbf16>,
    %c0_50 = arith.constant 0 : index
    %c20 = arith.constant 20 : index
    %69 = vector.load %arg28[%c0_50, %c20] : memref<128x233xf32, #tpu.memory_space<vmem>>, vector<128x200xf32>
    %70 = arith.truncf %69 : vector<128x200xf32> to vector<128x200xbf16>
    %c1024 = arith.constant 1024 : index
    %c0_51 = arith.constant 0 : index
    %71 = vector.load %arg24[%c1024, %c0_51] : memref<2048x200xbf16, #tpu.memory_space<vmem>>, vector<128x200xbf16>
    tpu.vector_store %arg24[%c1024, %c0_51], %70 {strides = array<i32>} : memref<2048x200xbf16, #tpu.memory_space<vmem>>, vector<128x200xbf16>,
    %c0_52 = arith.constant 0 : index
    %c21 = arith.constant 21 : index
    %72 = vector.load %arg28[%c0_52, %c21] : memref<128x233xf32, #tpu.memory_space<vmem>>, vector<128x200xf32>
    %73 = arith.truncf %72 : vector<128x200xf32> to vector<128x200xbf16>
    %c1152 = arith.constant 1152 : index
    %c0_53 = arith.constant 0 : index
    %74 = vector.load %arg24[%c1152, %c0_53] : memref<2048x200xbf16, #tpu.memory_space<vmem>>, vector<128x200xbf16>
    tpu.vector_store %arg24[%c1152, %c0_53], %73 {strides = array<i32>} : memref<2048x200xbf16, #tpu.memory_space<vmem>>, vector<128x200xbf16>,
    %c0_54 = arith.constant 0 : index
    %c22 = arith.constant 22 : index
    %75 = vector.load %arg28[%c0_54, %c22] : memref<128x233xf32, #tpu.memory_space<vmem>>, vector<128x200xf32>
    %76 = arith.truncf %75 : vector<128x200xf32> to vector<128x200xbf16>
    %c1280 = arith.constant 1280 : index
    %c0_55 = arith.constant 0 : index
    %77 = vector.load %arg24[%c1280, %c0_55] : memref<2048x200xbf16, #tpu.memory_space<vmem>>, vector<128x200xbf16>
    tpu.vector_store %arg24[%c1280, %c0_55], %76 {strides = array<i32>} : memref<2048x200xbf16, #tpu.memory_space<vmem>>, vector<128x200xbf16>,
    %c0_56 = arith.constant 0 : index
    %c23 = arith.constant 23 : index
    %78 = vector.load %arg28[%c0_56, %c23] : memref<128x233xf32, #tpu.memory_space<vmem>>, vector<128x200xf32>
    %79 = arith.truncf %78 : vector<128x200xf32> to vector<128x200xbf16>
    %c1408 = arith.constant 1408 : index
    %c0_57 = arith.constant 0 : index
    %80 = vector.load %arg24[%c1408, %c0_57] : memref<2048x200xbf16, #tpu.memory_space<vmem>>, vector<128x200xbf16>
    tpu.vector_store %arg24[%c1408, %c0_57], %79 {strides = array<i32>} : memref<2048x200xbf16, #tpu.memory_space<vmem>>, vector<128x200xbf16>,
    %c0_58 = arith.constant 0 : index
    %c30 = arith.constant 30 : index
    %81 = vector.load %arg28[%c0_58, %c30] : memref<128x233xf32, #tpu.memory_space<vmem>>, vector<128x200xf32>
    %82 = arith.truncf %81 : vector<128x200xf32> to vector<128x200xbf16>
    %c1536 = arith.constant 1536 : index
    %c0_59 = arith.constant 0 : index
    %83 = vector.load %arg24[%c1536, %c0_59] : memref<2048x200xbf16, #tpu.memory_space<vmem>>, vector<128x200xbf16>
    tpu.vector_store %arg24[%c1536, %c0_59], %82 {strides = array<i32>} : memref<2048x200xbf16, #tpu.memory_space<vmem>>, vector<128x200xbf16>,
    %c0_60 = arith.constant 0 : index
    %c31 = arith.constant 31 : index
    %84 = vector.load %arg28[%c0_60, %c31] : memref<128x233xf32, #tpu.memory_space<vmem>>, vector<128x200xf32>
    %85 = arith.truncf %84 : vector<128x200xf32> to vector<128x200xbf16>
    %c1664 = arith.constant 1664 : index
    %c0_61 = arith.constant 0 : index
    %86 = vector.load %arg24[%c1664, %c0_61] : memref<2048x200xbf16, #tpu.memory_space<vmem>>, vector<128x200xbf16>
    tpu.vector_store %arg24[%c1664, %c0_61], %85 {strides = array<i32>} : memref<2048x200xbf16, #tpu.memory_space<vmem>>, vector<128x200xbf16>,
    %c0_62 = arith.constant 0 : index
    %c32 = arith.constant 32 : index
    %87 = vector.load %arg28[%c0_62, %c32] : memref<128x233xf32, #tpu.memory_space<vmem>>, vector<128x200xf32>
    %88 = arith.truncf %87 : vector<128x200xf32> to vector<128x200xbf16>
    %c1792 = arith.constant 1792 : index
    %c0_63 = arith.constant 0 : index
    %89 = vector.load %arg24[%c1792, %c0_63] : memref<2048x200xbf16, #tpu.memory_space<vmem>>, vector<128x200xbf16>
    tpu.vector_store %arg24[%c1792, %c0_63], %88 {strides = array<i32>} : memref<2048x200xbf16, #tpu.memory_space<vmem>>, vector<128x200xbf16>,
    %c0_64 = arith.constant 0 : index
    %c33 = arith.constant 33 : index
    %90 = vector.load %arg28[%c0_64, %c33] : memref<128x233xf32, #tpu.memory_space<vmem>>, vector<128x200xf32>
    %91 = arith.truncf %90 : vector<128x200xf32> to vector<128x200xbf16>
    %c1920 = arith.constant 1920 : index
    %c0_65 = arith.constant 0 : index
    %92 = vector.load %arg24[%c1920, %c0_65] : memref<2048x200xbf16, #tpu.memory_space<vmem>>, vector<128x200xbf16>
    tpu.vector_store %arg24[%c1920, %c0_65], %91 {strides = array<i32>} : memref<2048x200xbf16, #tpu.memory_space<vmem>>, vector<128x200xbf16>,
    %c0_66 = arith.constant 0 : index
    %c0_67 = arith.constant 0 : index
    %93 = vector.load %arg6[%c0_66, %c0_67] : memref<64x2048xbf16, #tpu.memory_space<vmem>>, vector<64x2048xbf16>
    %c0_68 = arith.constant 0 : index
    %c0_69 = arith.constant 0 : index
    %94 = vector.load %arg24[%c0_68, %c0_69] : memref<2048x200xbf16, #tpu.memory_space<vmem>>, vector<2048x200xbf16>
    %cst_70 = arith.constant dense<0.000000e+00> : vector<64x200xf32>
    %95 = tpu.matmul %93, %94, %cst_70 {dimension_numbers = #tpu.dot_dimension_numbers<[1], [0], [0], [1], [0, 0, 1, 1], [], []>} : vector<64x2048xbf16>, vector<2048x200xbf16>, vector<64x200xf32> -> vector<64x200xf32>
    %c0_71 = arith.constant 0 : index
    %c0_72 = arith.constant 0 : index
    %96 = vector.load %arg9[%c0_71, %c0_72] : memref<1x200xf32, #tpu.memory_space<vmem>>, vector<1x200xf32>
    %97 = vector.broadcast %96 : vector<1x200xf32> to vector<64x200xf32>
    %98 = arith.mulf %95, %97 : vector<64x200xf32>
    %cst_73 = arith.constant dense<0.000000e+00> : vector<64xf32>
    %99 = vector.multi_reduction <add>, %98, %cst_73 [1] : vector<64x200xf32> to vector<64xf32>
    %100 = vector.shape_cast %99 : vector<64xf32> to vector<64x1xf32>
    %cst_74 = arith.constant 0.0102040814 : f32
    %101 = vector.broadcast %cst_74 : f32 to vector<64x1xf32>
    %102 = arith.mulf %100, %101 : vector<64x1xf32>
    %103 = vector.broadcast %102 : vector<64x1xf32> to vector<64x200xf32>
    %104 = arith.subf %95, %103 : vector<64x200xf32>
    %105 = arith.mulf %104, %104 : vector<64x200xf32>
    %106 = vector.broadcast %96 : vector<1x200xf32> to vector<64x200xf32>
    %107 = arith.mulf %105, %106 : vector<64x200xf32>
    %cst_75 = arith.constant dense<0.000000e+00> : vector<64xf32>
    %108 = vector.multi_reduction <add>, %107, %cst_75 [1] : vector<64x200xf32> to vector<64xf32>
    %109 = vector.shape_cast %108 : vector<64xf32> to vector<64x1xf32>
    %cst_76 = arith.constant 0.0102040814 : f32
    %110 = vector.broadcast %cst_76 : f32 to vector<64x1xf32>
    %111 = arith.mulf %109, %110 : vector<64x1xf32>
    %cst_77 = arith.constant 9.99999974E-6 : f32
    %112 = vector.broadcast %cst_77 : f32 to vector<64x1xf32>
    %113 = arith.addf %111, %112 : vector<64x1xf32>
    %114 = math.rsqrt %113 : vector<64x1xf32>
    %115 = vector.broadcast %114 : vector<64x1xf32> to vector<64x200xf32>
    %116 = arith.mulf %104, %115 : vector<64x200xf32>
    %c0_78 = arith.constant 0 : index
    %c0_79 = arith.constant 0 : index
    %117 = vector.load %arg7[%c0_78, %c0_79] : memref<64x1xf32, #tpu.memory_space<vmem>>, vector<64x1xf32>
    %118 = vector.broadcast %117 : vector<64x1xf32> to vector<64x200xf32>
    %119 = arith.mulf %116, %118 : vector<64x200xf32>
    %c0_80 = arith.constant 0 : index
    %c0_81 = arith.constant 0 : index
    %120 = vector.load %arg8[%c0_80, %c0_81] : memref<64x1xf32, #tpu.memory_space<vmem>>, vector<64x1xf32>
    %121 = vector.broadcast %120 : vector<64x1xf32> to vector<64x200xf32>
    %122 = arith.addf %119, %121 : vector<64x200xf32>
    %cst_82 = arith.constant 0.000000e+00 : f32
    %123 = vector.broadcast %cst_82 : f32 to vector<64x200xf32>
    %124 = arith.maximumf %122, %123 : vector<64x200xf32>
    %125 = arith.truncf %124 : vector<64x200xf32> to vector<64x200xbf16>
    %c0_83 = arith.constant 0 : index
    %c0_84 = arith.constant 0 : index
    %126 = vector.load %arg10[%c0_83, %c0_84] : memref<200x182xbf16, #tpu.memory_space<vmem>>, vector<200x182xbf16>
    %cst_85 = arith.constant dense<0.000000e+00> : vector<64x182xf32>
    %127 = tpu.matmul %125, %126, %cst_85 {dimension_numbers = #tpu.dot_dimension_numbers<[1], [0], [0], [1], [0, 0, 1, 1], [], []>} : vector<64x200xbf16>, vector<200x182xbf16>, vector<64x182xf32> -> vector<64x182xf32>
    %c0_86 = arith.constant 0 : index
    %c0_87 = arith.constant 0 : index
    %128 = vector.load %arg29[%c0_86, %c0_87] : memref<64x182xf32, #tpu.memory_space<vmem>>, vector<64x182xf32>
    tpu.vector_store %arg29[%c0_86, %c0_87], %127 {strides = array<i32>} : memref<64x182xf32, #tpu.memory_space<vmem>>, vector<64x182xf32>,
    %c0_88 = arith.constant 0 : index
    %c0_89 = arith.constant 0 : index
    %129 = vector.load %arg29[%c0_88, %c0_89] : memref<64x182xf32, #tpu.memory_space<vmem>>, vector<64x162xf32>
    %130 = arith.truncf %129 : vector<64x162xf32> to vector<64x162xbf16>
    %c0_90 = arith.constant 0 : index
    %c0_91 = arith.constant 0 : index
    %131 = vector.load %arg25[%c0_90, %c0_91] : memref<576x162xbf16, #tpu.memory_space<vmem>>, vector<64x162xbf16>
    tpu.vector_store %arg25[%c0_90, %c0_91], %130 {strides = array<i32>} : memref<576x162xbf16, #tpu.memory_space<vmem>>, vector<64x162xbf16>,
    %c0_92 = arith.constant 0 : index
    %c1_93 = arith.constant 1 : index
    %132 = vector.load %arg29[%c0_92, %c1_93] : memref<64x182xf32, #tpu.memory_space<vmem>>, vector<64x162xf32>
    %133 = arith.truncf %132 : vector<64x162xf32> to vector<64x162xbf16>
    %c64 = arith.constant 64 : index
    %c0_94 = arith.constant 0 : index
    %134 = vector.load %arg25[%c64, %c0_94] : memref<576x162xbf16, #tpu.memory_space<vmem>>, vector<64x162xbf16>
    tpu.vector_store %arg25[%c64, %c0_94], %133 {strides = array<i32>} : memref<576x162xbf16, #tpu.memory_space<vmem>>, vector<64x162xbf16>,
    %c0_95 = arith.constant 0 : index
    %c2_96 = arith.constant 2 : index
    %135 = vector.load %arg29[%c0_95, %c2_96] : memref<64x182xf32, #tpu.memory_space<vmem>>, vector<64x162xf32>
    %136 = arith.truncf %135 : vector<64x162xf32> to vector<64x162xbf16>
    %c128_97 = arith.constant 128 : index
    %c0_98 = arith.constant 0 : index
    %137 = vector.load %arg25[%c128_97, %c0_98] : memref<576x162xbf16, #tpu.memory_space<vmem>>, vector<64x162xbf16>
    tpu.vector_store %arg25[%c128_97, %c0_98], %136 {strides = array<i32>} : memref<576x162xbf16, #tpu.memory_space<vmem>>, vector<64x162xbf16>,
    %c0_99 = arith.constant 0 : index
    %c9 = arith.constant 9 : index
    %138 = vector.load %arg29[%c0_99, %c9] : memref<64x182xf32, #tpu.memory_space<vmem>>, vector<64x162xf32>
    %139 = arith.truncf %138 : vector<64x162xf32> to vector<64x162xbf16>
    %c192 = arith.constant 192 : index
    %c0_100 = arith.constant 0 : index
    %140 = vector.load %arg25[%c192, %c0_100] : memref<576x162xbf16, #tpu.memory_space<vmem>>, vector<64x162xbf16>
    tpu.vector_store %arg25[%c192, %c0_100], %139 {strides = array<i32>} : memref<576x162xbf16, #tpu.memory_space<vmem>>, vector<64x162xbf16>,
    %c0_101 = arith.constant 0 : index
    %c10_102 = arith.constant 10 : index
    %141 = vector.load %arg29[%c0_101, %c10_102] : memref<64x182xf32, #tpu.memory_space<vmem>>, vector<64x162xf32>
    %142 = arith.truncf %141 : vector<64x162xf32> to vector<64x162xbf16>
    %c256_103 = arith.constant 256 : index
    %c0_104 = arith.constant 0 : index
    %143 = vector.load %arg25[%c256_103, %c0_104] : memref<576x162xbf16, #tpu.memory_space<vmem>>, vector<64x162xbf16>
    tpu.vector_store %arg25[%c256_103, %c0_104], %142 {strides = array<i32>} : memref<576x162xbf16, #tpu.memory_space<vmem>>, vector<64x162xbf16>,
    %c0_105 = arith.constant 0 : index
    %c11_106 = arith.constant 11 : index
    %144 = vector.load %arg29[%c0_105, %c11_106] : memref<64x182xf32, #tpu.memory_space<vmem>>, vector<64x162xf32>
    %145 = arith.truncf %144 : vector<64x162xf32> to vector<64x162xbf16>
    %c320 = arith.constant 320 : index
    %c0_107 = arith.constant 0 : index
    %146 = vector.load %arg25[%c320, %c0_107] : memref<576x162xbf16, #tpu.memory_space<vmem>>, vector<64x162xbf16>
    tpu.vector_store %arg25[%c320, %c0_107], %145 {strides = array<i32>} : memref<576x162xbf16, #tpu.memory_space<vmem>>, vector<64x162xbf16>,
    %c0_108 = arith.constant 0 : index
    %c18 = arith.constant 18 : index
    %147 = vector.load %arg29[%c0_108, %c18] : memref<64x182xf32, #tpu.memory_space<vmem>>, vector<64x162xf32>
    %148 = arith.truncf %147 : vector<64x162xf32> to vector<64x162xbf16>
    %c384_109 = arith.constant 384 : index
    %c0_110 = arith.constant 0 : index
    %149 = vector.load %arg25[%c384_109, %c0_110] : memref<576x162xbf16, #tpu.memory_space<vmem>>, vector<64x162xbf16>
    tpu.vector_store %arg25[%c384_109, %c0_110], %148 {strides = array<i32>} : memref<576x162xbf16, #tpu.memory_space<vmem>>, vector<64x162xbf16>,
    %c0_111 = arith.constant 0 : index
    %c19 = arith.constant 19 : index
    %150 = vector.load %arg29[%c0_111, %c19] : memref<64x182xf32, #tpu.memory_space<vmem>>, vector<64x162xf32>
    %151 = arith.truncf %150 : vector<64x162xf32> to vector<64x162xbf16>
    %c448 = arith.constant 448 : index
    %c0_112 = arith.constant 0 : index
    %152 = vector.load %arg25[%c448, %c0_112] : memref<576x162xbf16, #tpu.memory_space<vmem>>, vector<64x162xbf16>
    tpu.vector_store %arg25[%c448, %c0_112], %151 {strides = array<i32>} : memref<576x162xbf16, #tpu.memory_space<vmem>>, vector<64x162xbf16>,
    %c0_113 = arith.constant 0 : index
    %c20_114 = arith.constant 20 : index
    %153 = vector.load %arg29[%c0_113, %c20_114] : memref<64x182xf32, #tpu.memory_space<vmem>>, vector<64x162xf32>
    %154 = arith.truncf %153 : vector<64x162xf32> to vector<64x162xbf16>
    %c512_115 = arith.constant 512 : index
    %c0_116 = arith.constant 0 : index
    %155 = vector.load %arg25[%c512_115, %c0_116] : memref<576x162xbf16, #tpu.memory_space<vmem>>, vector<64x162xbf16>
    tpu.vector_store %arg25[%c512_115, %c0_116], %154 {strides = array<i32>} : memref<576x162xbf16, #tpu.memory_space<vmem>>, vector<64x162xbf16>,
    %c0_117 = arith.constant 0 : index
    %c0_118 = arith.constant 0 : index
    %156 = vector.load %arg11[%c0_117, %c0_118] : memref<32x576xbf16, #tpu.memory_space<vmem>>, vector<32x576xbf16>
    %c0_119 = arith.constant 0 : index
    %c0_120 = arith.constant 0 : index
    %157 = vector.load %arg25[%c0_119, %c0_120] : memref<576x162xbf16, #tpu.memory_space<vmem>>, vector<576x162xbf16>
    %cst_121 = arith.constant dense<0.000000e+00> : vector<32x162xf32>
    %158 = tpu.matmul %156, %157, %cst_121 {dimension_numbers = #tpu.dot_dimension_numbers<[1], [0], [0], [1], [0, 0, 1, 1], [], []>} : vector<32x576xbf16>, vector<576x162xbf16>, vector<32x162xf32> -> vector<32x162xf32>
    %c0_122 = arith.constant 0 : index
    %c0_123 = arith.constant 0 : index
    %159 = vector.load %arg14[%c0_122, %c0_123] : memref<1x162xf32, #tpu.memory_space<vmem>>, vector<1x162xf32>
    %160 = vector.broadcast %159 : vector<1x162xf32> to vector<32x162xf32>
    %161 = arith.mulf %158, %160 : vector<32x162xf32>
    %cst_124 = arith.constant dense<0.000000e+00> : vector<32xf32>
    %162 = vector.multi_reduction <add>, %161, %cst_124 [1] : vector<32x162xf32> to vector<32xf32>
    %163 = vector.shape_cast %162 : vector<32xf32> to vector<32x1xf32>
    %cst_125 = arith.constant 0.0102040814 : f32
    %164 = vector.broadcast %cst_125 : f32 to vector<32x1xf32>
    %165 = arith.mulf %163, %164 : vector<32x1xf32>
    %166 = vector.broadcast %165 : vector<32x1xf32> to vector<32x162xf32>
    %167 = arith.subf %158, %166 : vector<32x162xf32>
    %168 = arith.mulf %167, %167 : vector<32x162xf32>
    %169 = vector.broadcast %159 : vector<1x162xf32> to vector<32x162xf32>
    %170 = arith.mulf %168, %169 : vector<32x162xf32>
    %cst_126 = arith.constant dense<0.000000e+00> : vector<32xf32>
    %171 = vector.multi_reduction <add>, %170, %cst_126 [1] : vector<32x162xf32> to vector<32xf32>
    %172 = vector.shape_cast %171 : vector<32xf32> to vector<32x1xf32>
    %cst_127 = arith.constant 0.0102040814 : f32
    %173 = vector.broadcast %cst_127 : f32 to vector<32x1xf32>
    %174 = arith.mulf %172, %173 : vector<32x1xf32>
    %cst_128 = arith.constant 9.99999974E-6 : f32
    %175 = vector.broadcast %cst_128 : f32 to vector<32x1xf32>
    %176 = arith.addf %174, %175 : vector<32x1xf32>
    %177 = math.rsqrt %176 : vector<32x1xf32>
    %178 = vector.broadcast %177 : vector<32x1xf32> to vector<32x162xf32>
    %179 = arith.mulf %167, %178 : vector<32x162xf32>
    %c0_129 = arith.constant 0 : index
    %c0_130 = arith.constant 0 : index
    %180 = vector.load %arg12[%c0_129, %c0_130] : memref<32x1xf32, #tpu.memory_space<vmem>>, vector<32x1xf32>
    %181 = vector.broadcast %180 : vector<32x1xf32> to vector<32x162xf32>
    %182 = arith.mulf %179, %181 : vector<32x162xf32>
    %c0_131 = arith.constant 0 : index
    %c0_132 = arith.constant 0 : index
    %183 = vector.load %arg13[%c0_131, %c0_132] : memref<32x1xf32, #tpu.memory_space<vmem>>, vector<32x1xf32>
    %184 = vector.broadcast %183 : vector<32x1xf32> to vector<32x162xf32>
    %185 = arith.addf %182, %184 : vector<32x162xf32>
    %cst_133 = arith.constant 0.000000e+00 : f32
    %186 = vector.broadcast %cst_133 : f32 to vector<32x162xf32>
    %187 = arith.maximumf %185, %186 : vector<32x162xf32>
    %188 = arith.truncf %187 : vector<32x162xf32> to vector<32x162xbf16>
    %c0_134 = arith.constant 0 : index
    %c0_135 = arith.constant 0 : index
    %189 = vector.load %arg15[%c0_134, %c0_135] : memref<162x546xbf16, #tpu.memory_space<vmem>>, vector<162x546xbf16>
    %cst_136 = arith.constant dense<0.000000e+00> : vector<32x546xf32>
    %190 = tpu.matmul %188, %189, %cst_136 {dimension_numbers = #tpu.dot_dimension_numbers<[1], [0], [0], [1], [0, 0, 1, 1], [], []>} : vector<32x162xbf16>, vector<162x546xbf16>, vector<32x546xf32> -> vector<32x546xf32>
    %c0_137 = arith.constant 0 : index
    %c0_138 = arith.constant 0 : index
    %191 = vector.load %arg30[%c0_137, %c0_138] : memref<32x546xf32, #tpu.memory_space<vmem>>, vector<32x546xf32>
    tpu.vector_store %arg30[%c0_137, %c0_138], %190 {strides = array<i32>} : memref<32x546xf32, #tpu.memory_space<vmem>>, vector<32x546xf32>,
    %c0_139 = arith.constant 0 : index
    %c0_140 = arith.constant 0 : index
    %192 = vector.load %arg30[%c0_139, %c0_140] : memref<32x546xf32, #tpu.memory_space<vmem>>, vector<32x512xf32>
    %193 = arith.truncf %192 : vector<32x512xf32> to vector<32x512xbf16>
    %c0_141 = arith.constant 0 : index
    %c0_142 = arith.constant 0 : index
    %194 = vector.load %arg26[%c0_141, %c0_142] : memref<288x512xbf16, #tpu.memory_space<vmem>>, vector<32x512xbf16>
    tpu.vector_store %arg26[%c0_141, %c0_142], %193 {strides = array<i32>} : memref<288x512xbf16, #tpu.memory_space<vmem>>, vector<32x512xbf16>,
    %c0_143 = arith.constant 0 : index
    %c1_144 = arith.constant 1 : index
    %195 = vector.load %arg30[%c0_143, %c1_144] : memref<32x546xf32, #tpu.memory_space<vmem>>, vector<32x512xf32>
    %196 = arith.truncf %195 : vector<32x512xf32> to vector<32x512xbf16>
    %c32_145 = arith.constant 32 : index
    %c0_146 = arith.constant 0 : index
    %197 = vector.load %arg26[%c32_145, %c0_146] : memref<288x512xbf16, #tpu.memory_space<vmem>>, vector<32x512xbf16>
    tpu.vector_store %arg26[%c32_145, %c0_146], %196 {strides = array<i32>} : memref<288x512xbf16, #tpu.memory_space<vmem>>, vector<32x512xbf16>,
    %c0_147 = arith.constant 0 : index
    %c2_148 = arith.constant 2 : index
    %198 = vector.load %arg30[%c0_147, %c2_148] : memref<32x546xf32, #tpu.memory_space<vmem>>, vector<32x512xf32>
    %199 = arith.truncf %198 : vector<32x512xf32> to vector<32x512xbf16>
    %c64_149 = arith.constant 64 : index
    %c0_150 = arith.constant 0 : index
    %200 = vector.load %arg26[%c64_149, %c0_150] : memref<288x512xbf16, #tpu.memory_space<vmem>>, vector<32x512xbf16>
    tpu.vector_store %arg26[%c64_149, %c0_150], %199 {strides = array<i32>} : memref<288x512xbf16, #tpu.memory_space<vmem>>, vector<32x512xbf16>,
    %c0_151 = arith.constant 0 : index
    %c16_152 = arith.constant 16 : index
    %201 = vector.load %arg30[%c0_151, %c16_152] : memref<32x546xf32, #tpu.memory_space<vmem>>, vector<32x512xf32>
    %202 = arith.truncf %201 : vector<32x512xf32> to vector<32x512xbf16>
    %c96 = arith.constant 96 : index
    %c0_153 = arith.constant 0 : index
    %203 = vector.load %arg26[%c96, %c0_153] : memref<288x512xbf16, #tpu.memory_space<vmem>>, vector<32x512xbf16>
    tpu.vector_store %arg26[%c96, %c0_153], %202 {strides = array<i32>} : memref<288x512xbf16, #tpu.memory_space<vmem>>, vector<32x512xbf16>,
    %c0_154 = arith.constant 0 : index
    %c17 = arith.constant 17 : index
    %204 = vector.load %arg30[%c0_154, %c17] : memref<32x546xf32, #tpu.memory_space<vmem>>, vector<32x512xf32>
    %205 = arith.truncf %204 : vector<32x512xf32> to vector<32x512xbf16>
    %c128_155 = arith.constant 128 : index
    %c0_156 = arith.constant 0 : index
    %206 = vector.load %arg26[%c128_155, %c0_156] : memref<288x512xbf16, #tpu.memory_space<vmem>>, vector<32x512xbf16>
    tpu.vector_store %arg26[%c128_155, %c0_156], %205 {strides = array<i32>} : memref<288x512xbf16, #tpu.memory_space<vmem>>, vector<32x512xbf16>,
    %c0_157 = arith.constant 0 : index
    %c18_158 = arith.constant 18 : index
    %207 = vector.load %arg30[%c0_157, %c18_158] : memref<32x546xf32, #tpu.memory_space<vmem>>, vector<32x512xf32>
    %208 = arith.truncf %207 : vector<32x512xf32> to vector<32x512xbf16>
    %c160 = arith.constant 160 : index
    %c0_159 = arith.constant 0 : index
    %209 = vector.load %arg26[%c160, %c0_159] : memref<288x512xbf16, #tpu.memory_space<vmem>>, vector<32x512xbf16>
    tpu.vector_store %arg26[%c160, %c0_159], %208 {strides = array<i32>} : memref<288x512xbf16, #tpu.memory_space<vmem>>, vector<32x512xbf16>,
    %c0_160 = arith.constant 0 : index
    %c32_161 = arith.constant 32 : index
    %210 = vector.load %arg30[%c0_160, %c32_161] : memref<32x546xf32, #tpu.memory_space<vmem>>, vector<32x512xf32>
    %211 = arith.truncf %210 : vector<32x512xf32> to vector<32x512xbf16>
    %c192_162 = arith.constant 192 : index
    %c0_163 = arith.constant 0 : index
    %212 = vector.load %arg26[%c192_162, %c0_163] : memref<288x512xbf16, #tpu.memory_space<vmem>>, vector<32x512xbf16>
    tpu.vector_store %arg26[%c192_162, %c0_163], %211 {strides = array<i32>} : memref<288x512xbf16, #tpu.memory_space<vmem>>, vector<32x512xbf16>,
    %c0_164 = arith.constant 0 : index
    %c33_165 = arith.constant 33 : index
    %213 = vector.load %arg30[%c0_164, %c33_165] : memref<32x546xf32, #tpu.memory_space<vmem>>, vector<32x512xf32>
    %214 = arith.truncf %213 : vector<32x512xf32> to vector<32x512xbf16>
    %c224 = arith.constant 224 : index
    %c0_166 = arith.constant 0 : index
    %215 = vector.load %arg26[%c224, %c0_166] : memref<288x512xbf16, #tpu.memory_space<vmem>>, vector<32x512xbf16>
    tpu.vector_store %arg26[%c224, %c0_166], %214 {strides = array<i32>} : memref<288x512xbf16, #tpu.memory_space<vmem>>, vector<32x512xbf16>,
    %c0_167 = arith.constant 0 : index
    %c34 = arith.constant 34 : index
    %216 = vector.load %arg30[%c0_167, %c34] : memref<32x546xf32, #tpu.memory_space<vmem>>, vector<32x512xf32>
    %217 = arith.truncf %216 : vector<32x512xf32> to vector<32x512xbf16>
    %c256_168 = arith.constant 256 : index
    %c0_169 = arith.constant 0 : index
    %218 = vector.load %arg26[%c256_168, %c0_169] : memref<288x512xbf16, #tpu.memory_space<vmem>>, vector<32x512xbf16>
    tpu.vector_store %arg26[%c256_168, %c0_169], %217 {strides = array<i32>} : memref<288x512xbf16, #tpu.memory_space<vmem>>, vector<32x512xbf16>,
    %c0_170 = arith.constant 0 : index
    %c0_171 = arith.constant 0 : index
    %219 = vector.load %arg16[%c0_170, %c0_171] : memref<16x288xbf16, #tpu.memory_space<vmem>>, vector<16x288xbf16>
    %c0_172 = arith.constant 0 : index
    %c0_173 = arith.constant 0 : index
    %220 = vector.load %arg26[%c0_172, %c0_173] : memref<288x512xbf16, #tpu.memory_space<vmem>>, vector<288x512xbf16>
    %cst_174 = arith.constant dense<0.000000e+00> : vector<16x512xf32>
    %221 = tpu.matmul %219, %220, %cst_174 {dimension_numbers = #tpu.dot_dimension_numbers<[1], [0], [0], [1], [0, 0, 1, 1], [], []>} : vector<16x288xbf16>, vector<288x512xbf16>, vector<16x512xf32> -> vector<16x512xf32>
    %c0_175 = arith.constant 0 : index
    %c0_176 = arith.constant 0 : index
    %222 = vector.load %arg19[%c0_175, %c0_176] : memref<1x512xf32, #tpu.memory_space<vmem>>, vector<1x512xf32>
    %223 = vector.broadcast %222 : vector<1x512xf32> to vector<16x512xf32>
    %224 = arith.mulf %221, %223 : vector<16x512xf32>
    %cst_177 = arith.constant dense<0.000000e+00> : vector<16xf32>
    %225 = vector.multi_reduction <add>, %224, %cst_177 [1] : vector<16x512xf32> to vector<16xf32>
    %226 = vector.shape_cast %225 : vector<16xf32> to vector<16x1xf32>
    %cst_178 = arith.constant 0.00255102036 : f32
    %227 = vector.broadcast %cst_178 : f32 to vector<16x1xf32>
    %228 = arith.mulf %226, %227 : vector<16x1xf32>
    %229 = vector.broadcast %228 : vector<16x1xf32> to vector<16x512xf32>
    %230 = arith.subf %221, %229 : vector<16x512xf32>
    %231 = arith.mulf %230, %230 : vector<16x512xf32>
    %232 = vector.broadcast %222 : vector<1x512xf32> to vector<16x512xf32>
    %233 = arith.mulf %231, %232 : vector<16x512xf32>
    %cst_179 = arith.constant dense<0.000000e+00> : vector<16xf32>
    %234 = vector.multi_reduction <add>, %233, %cst_179 [1] : vector<16x512xf32> to vector<16xf32>
    %235 = vector.shape_cast %234 : vector<16xf32> to vector<16x1xf32>
    %cst_180 = arith.constant 0.00255102036 : f32
    %236 = vector.broadcast %cst_180 : f32 to vector<16x1xf32>
    %237 = arith.mulf %235, %236 : vector<16x1xf32>
    %cst_181 = arith.constant 9.99999974E-6 : f32
    %238 = vector.broadcast %cst_181 : f32 to vector<16x1xf32>
    %239 = arith.addf %237, %238 : vector<16x1xf32>
    %240 = math.rsqrt %239 : vector<16x1xf32>
    %241 = vector.broadcast %240 : vector<16x1xf32> to vector<16x512xf32>
    %242 = arith.mulf %230, %241 : vector<16x512xf32>
    %c0_182 = arith.constant 0 : index
    %c0_183 = arith.constant 0 : index
    %243 = vector.load %arg17[%c0_182, %c0_183] : memref<16x1xf32, #tpu.memory_space<vmem>>, vector<16x1xf32>
    %244 = vector.broadcast %243 : vector<16x1xf32> to vector<16x512xf32>
    %245 = arith.mulf %242, %244 : vector<16x512xf32>
    %c0_184 = arith.constant 0 : index
    %c0_185 = arith.constant 0 : index
    %246 = vector.load %arg18[%c0_184, %c0_185] : memref<16x1xf32, #tpu.memory_space<vmem>>, vector<16x1xf32>
    %247 = vector.broadcast %246 : vector<16x1xf32> to vector<16x512xf32>
    %248 = arith.addf %245, %247 : vector<16x512xf32>
    %cst_186 = arith.constant 0.000000e+00 : f32
    %249 = vector.broadcast %cst_186 : f32 to vector<16x512xf32>
    %250 = arith.maximumf %248, %249 : vector<16x512xf32>
    %251 = arith.truncf %250 : vector<16x512xf32> to vector<16x512xbf16>
    %c0_187 = arith.constant 0 : index
    %c0_188 = arith.constant 0 : index
    %252 = vector.load %arg20[%c0_187, %c0_188] : memref<512x1862xbf16, #tpu.memory_space<vmem>>, vector<512x1862xbf16>
    %cst_189 = arith.constant dense<0.000000e+00> : vector<16x1862xf32>
    %253 = tpu.matmul %251, %252, %cst_189 {dimension_numbers = #tpu.dot_dimension_numbers<[1], [0], [0], [1], [0, 0, 1, 1], [], []>} : vector<16x512xbf16>, vector<512x1862xbf16>, vector<16x1862xf32> -> vector<16x1862xf32>
    %c0_190 = arith.constant 0 : index
    %c0_191 = arith.constant 0 : index
    %254 = vector.load %arg31[%c0_190, %c0_191] : memref<16x1862xf32, #tpu.memory_space<vmem>>, vector<16x1862xf32>
    tpu.vector_store %arg31[%c0_190, %c0_191], %253 {strides = array<i32>} : memref<16x1862xf32, #tpu.memory_space<vmem>>, vector<16x1862xf32>,
    %c0_192 = arith.constant 0 : index
    %c0_193 = arith.constant 0 : index
    %255 = vector.load %arg31[%c0_192, %c0_193] : memref<16x1862xf32, #tpu.memory_space<vmem>>, vector<16x1800xf32>
    %256 = arith.truncf %255 : vector<16x1800xf32> to vector<16x1800xbf16>
    %c0_194 = arith.constant 0 : index
    %c0_195 = arith.constant 0 : index
    %257 = vector.load %arg27[%c0_194, %c0_195] : memref<144x1800xbf16, #tpu.memory_space<vmem>>, vector<16x1800xbf16>
    tpu.vector_store %arg27[%c0_194, %c0_195], %256 {strides = array<i32>} : memref<144x1800xbf16, #tpu.memory_space<vmem>>, vector<16x1800xbf16>,
    %c0_196 = arith.constant 0 : index
    %c1_197 = arith.constant 1 : index
    %258 = vector.load %arg31[%c0_196, %c1_197] : memref<16x1862xf32, #tpu.memory_space<vmem>>, vector<16x1800xf32>
    %259 = arith.truncf %258 : vector<16x1800xf32> to vector<16x1800xbf16>
    %c16_198 = arith.constant 16 : index
    %c0_199 = arith.constant 0 : index
    %260 = vector.load %arg27[%c16_198, %c0_199] : memref<144x1800xbf16, #tpu.memory_space<vmem>>, vector<16x1800xbf16>
    tpu.vector_store %arg27[%c16_198, %c0_199], %259 {strides = array<i32>} : memref<144x1800xbf16, #tpu.memory_space<vmem>>, vector<16x1800xbf16>,
    %c0_200 = arith.constant 0 : index
    %c2_201 = arith.constant 2 : index
    %261 = vector.load %arg31[%c0_200, %c2_201] : memref<16x1862xf32, #tpu.memory_space<vmem>>, vector<16x1800xf32>
    %262 = arith.truncf %261 : vector<16x1800xf32> to vector<16x1800xbf16>
    %c32_202 = arith.constant 32 : index
    %c0_203 = arith.constant 0 : index
    %263 = vector.load %arg27[%c32_202, %c0_203] : memref<144x1800xbf16, #tpu.memory_space<vmem>>, vector<16x1800xbf16>
    tpu.vector_store %arg27[%c32_202, %c0_203], %262 {strides = array<i32>} : memref<144x1800xbf16, #tpu.memory_space<vmem>>, vector<16x1800xbf16>,
    %c0_204 = arith.constant 0 : index
    %c30_205 = arith.constant 30 : index
    %264 = vector.load %arg31[%c0_204, %c30_205] : memref<16x1862xf32, #tpu.memory_space<vmem>>, vector<16x1800xf32>
    %265 = arith.truncf %264 : vector<16x1800xf32> to vector<16x1800xbf16>
    %c48 = arith.constant 48 : index
    %c0_206 = arith.constant 0 : index
    %266 = vector.load %arg27[%c48, %c0_206] : memref<144x1800xbf16, #tpu.memory_space<vmem>>, vector<16x1800xbf16>
    tpu.vector_store %arg27[%c48, %c0_206], %265 {strides = array<i32>} : memref<144x1800xbf16, #tpu.memory_space<vmem>>, vector<16x1800xbf16>,
    %c0_207 = arith.constant 0 : index
    %c31_208 = arith.constant 31 : index
    %267 = vector.load %arg31[%c0_207, %c31_208] : memref<16x1862xf32, #tpu.memory_space<vmem>>, vector<16x1800xf32>
    %268 = arith.truncf %267 : vector<16x1800xf32> to vector<16x1800xbf16>
    %c64_209 = arith.constant 64 : index
    %c0_210 = arith.constant 0 : index
    %269 = vector.load %arg27[%c64_209, %c0_210] : memref<144x1800xbf16, #tpu.memory_space<vmem>>, vector<16x1800xbf16>
    tpu.vector_store %arg27[%c64_209, %c0_210], %268 {strides = array<i32>} : memref<144x1800xbf16, #tpu.memory_space<vmem>>, vector<16x1800xbf16>,
    %c0_211 = arith.constant 0 : index
    %c32_212 = arith.constant 32 : index
    %270 = vector.load %arg31[%c0_211, %c32_212] : memref<16x1862xf32, #tpu.memory_space<vmem>>, vector<16x1800xf32>
    %271 = arith.truncf %270 : vector<16x1800xf32> to vector<16x1800xbf16>
    %c80 = arith.constant 80 : index
    %c0_213 = arith.constant 0 : index
    %272 = vector.load %arg27[%c80, %c0_213] : memref<144x1800xbf16, #tpu.memory_space<vmem>>, vector<16x1800xbf16>
    tpu.vector_store %arg27[%c80, %c0_213], %271 {strides = array<i32>} : memref<144x1800xbf16, #tpu.memory_space<vmem>>, vector<16x1800xbf16>,
    %c0_214 = arith.constant 0 : index
    %c60 = arith.constant 60 : index
    %273 = vector.load %arg31[%c0_214, %c60] : memref<16x1862xf32, #tpu.memory_space<vmem>>, vector<16x1800xf32>
    %274 = arith.truncf %273 : vector<16x1800xf32> to vector<16x1800xbf16>
    %c96_215 = arith.constant 96 : index
    %c0_216 = arith.constant 0 : index
    %275 = vector.load %arg27[%c96_215, %c0_216] : memref<144x1800xbf16, #tpu.memory_space<vmem>>, vector<16x1800xbf16>
    tpu.vector_store %arg27[%c96_215, %c0_216], %274 {strides = array<i32>} : memref<144x1800xbf16, #tpu.memory_space<vmem>>, vector<16x1800xbf16>,
    %c0_217 = arith.constant 0 : index
    %c61 = arith.constant 61 : index
    %276 = vector.load %arg31[%c0_217, %c61] : memref<16x1862xf32, #tpu.memory_space<vmem>>, vector<16x1800xf32>
    %277 = arith.truncf %276 : vector<16x1800xf32> to vector<16x1800xbf16>
    %c112 = arith.constant 112 : index
    %c0_218 = arith.constant 0 : index
    %278 = vector.load %arg27[%c112, %c0_218] : memref<144x1800xbf16, #tpu.memory_space<vmem>>, vector<16x1800xbf16>
    tpu.vector_store %arg27[%c112, %c0_218], %277 {strides = array<i32>} : memref<144x1800xbf16, #tpu.memory_space<vmem>>, vector<16x1800xbf16>,
    %c0_219 = arith.constant 0 : index
    %c62 = arith.constant 62 : index
    %279 = vector.load %arg31[%c0_219, %c62] : memref<16x1862xf32, #tpu.memory_space<vmem>>, vector<16x1800xf32>
    %280 = arith.truncf %279 : vector<16x1800xf32> to vector<16x1800xbf16>
    %c128_220 = arith.constant 128 : index
    %c0_221 = arith.constant 0 : index
    %281 = vector.load %arg27[%c128_220, %c0_221] : memref<144x1800xbf16, #tpu.memory_space<vmem>>, vector<16x1800xbf16>
    tpu.vector_store %arg27[%c128_220, %c0_221], %280 {strides = array<i32>} : memref<144x1800xbf16, #tpu.memory_space<vmem>>, vector<16x1800xbf16>,
    %c0_222 = arith.constant 0 : index
    %c0_223 = arith.constant 0 : index
    %282 = vector.load %arg21[%c0_222, %c0_223] : memref<8x144xbf16, #tpu.memory_space<vmem>>, vector<8x144xbf16>
    %c0_224 = arith.constant 0 : index
    %c0_225 = arith.constant 0 : index
    %283 = vector.load %arg27[%c0_224, %c0_225] : memref<144x1800xbf16, #tpu.memory_space<vmem>>, vector<144x1800xbf16>
    %cst_226 = arith.constant dense<0.000000e+00> : vector<8x1800xf32>
    %284 = tpu.matmul %282, %283, %cst_226 {dimension_numbers = #tpu.dot_dimension_numbers<[1], [0], [0], [1], [0, 0, 1, 1], [], []>} : vector<8x144xbf16>, vector<144x1800xbf16>, vector<8x1800xf32> -> vector<8x1800xf32>
    %285 = math.tanh %284 : vector<8x1800xf32>
    %c0_227 = arith.constant 0 : index
    %c0_228 = arith.constant 0 : index
    %286 = vector.load %arg22[%c0_227, %c0_228] : memref<8x1800xf32, #tpu.memory_space<vmem>>, vector<8x1800xf32>
    tpu.vector_store %arg22[%c0_227, %c0_228], %285 {strides = array<i32>} : memref<8x1800xf32, #tpu.memory_space<vmem>>, vector<8x1800xf32>,
    return
  }
}

</mosaic_0001>

<bundles_post_ra>
// kernel: dcgan_mnist_forward.1
= control target key start
LH: loop header
LB: loop body
LE: loop exit
PB: predicated region body
PF: predicated region fallthrough
CT: control target
= control target key end

     0   :  { %vm73_vm0 = vcmask 146432   ;;  %s14922_s30 = smov 127   ;;  %vm129_vm1 = vcmask 261120   ;;  %v14925_v3 = vmov 0   ;;  %vm860_vm2 = vcmask 1040384   ;;  %s14927_s23 = smov 118   ;;  %s20316_s0 = inlined_call_operand.vmem [shape: f32[8,22], index: 0, kind: input, shape index: {}]   ;;  %s20317_s1 = inlined_call_operand.vmem [shape: bf16[128,32], index: 1, kind: input, shape index: {}]   ;;  %s20318_s2 = inlined_call_operand.vmem [shape: f32[128,1], index: 2, kind: input, shape index: {}]   ;;  %s20319_s3 = inlined_call_operand.vmem [shape: f32[128,1], index: 3, kind: input, shape index: {}]   ;;  %s20320_s4 = inlined_call_operand.vmem [shape: f32[1,18], index: 4, kind: input, shape index: {}]   ;;  %s20321_s5 = inlined_call_operand.vmem [shape: bf16[18,233], index: 5, kind: input, shape index: {}]   ;;  %s20322_s6 = inlined_call_operand.vmem [shape: bf16[64,2048], index: 6, kind: input, shape index: {}]   ;;  %s20323_s7 = inlined_call_operand.vmem [shape: f32[64,1], index: 7, kind: input, shape index: {}]   ;;  %s20324_s8 = inlined_call_operand.vmem [shape: f32[64,1], index: 8, kind: input, shape index: {}]   ;;  %s20325_s9 = inlined_call_operand.vmem [shape: f32[1,200], index: 9, kind: input, shape index: {}]   ;;  %s20326_s10 = inlined_call_operand.vmem [shape: bf16[200,182], index: 10, kind: input, shape index: {}]   ;;  %s20327_s11 = inlined_call_operand.vmem [shape: bf16[32,576], index: 11, kind: input, shape index: {}]   ;;  %s20328_s14 = inlined_call_operand.vmem [shape: f32[1,162], index: 14, kind: input, shape index: {}]   ;;  %s20329_s12 = inlined_call_operand.vmem [shape: f32[32,1], index: 12, kind: input, shape index: {}]   ;;  %s20330_s13 = inlined_call_operand.vmem [shape: f32[32,1], index: 13, kind: input, shape index: {}]   ;;  %s20331_s15 = inlined_call_operand.vmem [shape: bf16[162,546], index: 15, kind: input, shape index: {}]   ;;  %s20332_s16 = inlined_call_operand.vmem [shape: bf16[16,288], index: 16, kind: input, shape index: {}]   ;;  %s20333_s19 = inlined_call_operand.vmem [shape: f32[1,512], index: 19, kind: input, shape index: {}]   ;;  %s20334_s17 = inlined_call_operand.vmem [shape: f32[16,1], index: 17, kind: input, shape index: {}]   ;;  %s20335_s20 = inlined_call_operand.vmem [shape: bf16[512,1862], index: 20, kind: input, shape index: {}]   ;;  %s20336_s18 = inlined_call_operand.vmem [shape: f32[16,1], index: 18, kind: input, shape index: {}]   ;;  %s20337_s21 = inlined_call_operand.vmem [shape: bf16[8,144], index: 21, kind: input, shape index: {}]   ;;  %s20338_s22 = inlined_call_operand.vmem [shape: f32[8,1800], index: 22, kind: output, shape index: {}]  }
   0x1   :  { %20350 = sst [smem:[#allocation11_spill]] %s20316_s0  ;;  %13990 = vset.pattern.permute.xlu1 %v14925_v3  ;;  %13989 = vset.pattern.permute.xlu0 %v14925_v3  ;;  %vm981_vm3 = vcmask 859136   ;;  %vm1062_vm4 = vcmask 588800   ;;  %vm1174_vm5 = vcmask 1039360   ;;  %vm1311_vm6 = vcmask 1031168   ;;  %s14931_s26 = smov 108  }
   0x2   :  { %20351 = sst [smem:[#allocation12_spill]] %s20317_s1  ;;  %s20357_s29 = sld [smem:[#allocation11_spill]]  ;;  %vm1448_vm7 = vcmask 1022976   ;;  %vm1585_vm8 = vcmask 965632   ;;  %vm1722_vm9 = vcmask 957440   ;;  %vm1859_vm10 = vcmask 949248  }
   0x3   :  { %20352 = sst [smem:[#allocation13_spill]] %s20318_s2  ;;  %s20358_s1 = sld [smem:[#allocation12_spill]]  ;;  %vm1996_vm11 = vcmask 941056   ;;  %vm2133_vm12 = vcmask 883712   ;;  %vm2270_vm13 = vcmask 875520   ;;  %vm2407_vm14 = vcmask 867328  }
   0x4   :  { %20353 = sst [smem:[#allocation14_spill]] %s20319_s3  ;;  %s20359_s25 = sld [smem:[#allocation13_spill]]  ;;  %vm2681_vm15 = vcmask 801792  }
   0x5   :  { %20354 = sst [smem:[#allocation15_spill]] %s20320_s4  ;;  %s14923_s4 = smov 124  }
   0x6   :  { %20355 = sst [smem:[#allocation16_spill]] %s20321_s5  ;;  %s14924_s5 = smov 125  }
   0x7   :  { %20356 = sst [smem:[#allocation17_spill]] %s20322_s6  ;;  %s20360_s27 = sld [smem:[#allocation14_spill]] }
   0x8   :  { %v75_v0 = vld [vmem:[%s20357_s29] sm:$0xff]  ;;  %s20361_s0 = sld [smem:[#allocation15_spill]]  ;;  %s20362_s29 = sld [smem:[#allocation16_spill]] }
   0x9   :  { %77 = vrot.lane.b32.xlu0 %v75_v0, %s14922_s30  ;;  %74 = vst.msk [vmem:[#allocation2] sm:$0xff] %vm73_vm0, %v75_v0  ;;  %89 = vrot.lane.b32.xlu1 %v75_v0, %s14923_s4  ;;  %v15071_v1 = vld [vmem:[%s20358_s1] sm:$0xff]   ;;  %v13688_v39 = vld [vmem:[%s20358_s1 + $0x8] sm:$0xff]   ;;  %s20363_s4 = sld [smem:[#allocation17_spill]]  ;;  %s14933_s6 = smov 106  }
   0xa   :  { %v13658_v2 = vunpack.c.l.bf16 %v15071_v1  ;;  %v571_v4 = vld [vmem:[%s20359_s25 + $0x8] sm:$0xff]  ;;  %v572_v7 = vld [vmem:[%s20359_s25 + $0x10] sm:$0xff]  ;;  %v570_v8 = vld [vmem:[%s20359_s25] sm:$0xff]  ;;  %v13659_v40 = vunpack.c.h.bf16 %v15071_v1  ;;  %v13662_v41 = vunpack.c.l.bf16 %v13688_v39  ;;  %v13663_v43 = vunpack.c.h.bf16 %v13688_v39  ;;  %s20346_s2 = smov 98   ;;  %s20348_s28 = smov 96  }
   0xb   :  { %v573_v9 = vld [vmem:[%s20359_s25 + $0x18] sm:$0xff]  ;;  %v575_v11 = vld [vmem:[%s20359_s25 + $0x28] sm:$0xff]  ;;  %v576_v13 = vld [vmem:[%s20359_s25 + $0x30] sm:$0xff]  ;;  %s20364_s24 = smov 96  }
   0xc   :  { %13767 = vmatprep.mubr.msk.f32.mxu1 %vm129_vm1, %v13658_v2  ;;  %v574_v14 = vld [vmem:[%s20359_s25 + $0x20] sm:$0xff]  ;;  %v577_v20 = vld [vmem:[%s20359_s25 + $0x38] sm:$0xff]  ;;  %v579_v24 = vld [vmem:[%s20359_s25 + $0x48] sm:$0xff] }
   0xd   :  { %83 = vrot.lane.b32.xlu0 %v75_v0, %s14924_s5  ;;  %593 = vperm.xlu1 %13990, %v571_v4   ;;  %v682_v5 = vld [vmem:[%s20360_s27] sm:$0xff]  ;;  %v683_v6 = vld [vmem:[%s20360_s27 + $0x8] sm:$0xff]  ;;  %v684_v10 = vld [vmem:[%s20360_s27 + $0x10] sm:$0xff] }
   0xe   :  { %v685_v12 = vld [vmem:[%s20360_s27 + $0x18] sm:$0xff]  ;;  %v686_v16 = vld [vmem:[%s20360_s27 + $0x20] sm:$0xff]  ;;  %v687_v18 = vld [vmem:[%s20360_s27 + $0x28] sm:$0xff] }
   0xf   :  { %v689_v15 = vld [vmem:[%s20360_s27 + $0x38] sm:$0xff]  ;;  %v578_v17 = vld [vmem:[%s20359_s25 + $0x40] sm:$0xff]  ;;  %v691_v19 = vld [vmem:[%s20360_s27 + $0x48] sm:$0xff] }
  0x10   :  { %v581_v21 = vld [vmem:[%s20359_s25 + $0x58] sm:$0xff]  ;;  %v688_v22 = vld [vmem:[%s20360_s27 + $0x30] sm:$0xff]  ;;  %v583_v25 = vld [vmem:[%s20359_s25 + $0x68] sm:$0xff] }
  0x11   :  { %700 = vperm.xlu1 %13990, %v682_v5   ;;  %588 = vperm.xlu0 %13989, %v570_v8   ;;  %v693_v23 = vld [vmem:[%s20360_s27 + $0x58] sm:$0xff]  ;;  %v690_v26 = vld [vmem:[%s20360_s27 + $0x40] sm:$0xff]  ;;  %v580_v27 = vld [vmem:[%s20359_s25 + $0x50] sm:$0xff] }
  0x12   :  { %v692_v28 = vld [vmem:[%s20360_s27 + $0x50] sm:$0xff]  ;;  %v582_v29 = vld [vmem:[%s20359_s25 + $0x60] sm:$0xff]  ;;  %v13690_v45 = vld [vmem:[%s20358_s1 + $0x18] sm:$0xff]  }
  0x13   :  { %v109_v33 = vld [vmem:[#allocation2] sm:$0xff]  ;;  %v13689_v42 = vld [vmem:[%s20358_s1 + $0x10] sm:$0xff]   ;;  %v13670_v47 = vunpack.c.l.bf16 %v13690_v45  ;;  %v13671_v49 = vunpack.c.h.bf16 %v13690_v45  ;;  %v13692_v51 = vld [vmem:[%s20358_s1 + $0x28] sm:$0xff]  }
  0x14   :  { %v13666_v44 = vunpack.c.l.bf16 %v13689_v42  ;;  %v13667_v46 = vunpack.c.h.bf16 %v13689_v42  ;;  %v13691_v48 = vld [vmem:[%s20358_s1 + $0x20] sm:$0xff]   ;;  %v13678_v53 = vunpack.c.l.bf16 %v13692_v51  ;;  %v13693_v54 = vld [vmem:[%s20358_s1 + $0x30] sm:$0xff]   ;;  %v13679_v55 = vunpack.c.h.bf16 %v13692_v51  ;;  %v13694_v57 = vld [vmem:[%s20358_s1 + $0x38] sm:$0xff]   ;;  %s14945_s1 = smov 68  }
  0x15   :  { %705 = vperm.xlu1 %13990, %v683_v6   ;;  %603 = vperm.xlu0 %13989, %v573_v9   ;;  %v13674_v50 = vunpack.c.l.bf16 %v13691_v48  ;;  %v13675_v52 = vunpack.c.h.bf16 %v13691_v48  ;;  %v13682_v56 = vunpack.c.l.bf16 %v13693_v54  ;;  %v13683_v58 = vunpack.c.h.bf16 %v13693_v54  ;;  %v15200_v61 = vld [vmem:[%s20361_s0] ss:$0 sm:$0xff]  ;;  %s14930_s0 = smov 115  }
  0x16   :  { %v13686_v59 = vunpack.c.l.bf16 %v13694_v57  ;;  %v13687_v60 = vunpack.c.h.bf16 %v13694_v57 }
  0x19   :  { %598 = vperm.xlu1 %13990, %v572_v7   ;;  %613 = vperm.xlu0 %13989, %v575_v11  }
  0x1d   :  { %710 = vperm.xlu1 %13990, %v684_v10   ;;  %618 = vperm.xlu0 %13989, %v576_v13  }
  0x21   :  { %715 = vperm.xlu1 %13990, %v685_v12   ;;  %735 = vperm.xlu0 %13989, %v689_v15  }
  0x25   :  { %608 = vperm.xlu1 %13990, %v574_v14   ;;  %628 = vperm.xlu0 %13989, %v578_v17  }
  0x29   :  { %720 = vperm.xlu1 %13990, %v686_v16   ;;  %745 = vperm.xlu0 %13989, %v691_v19  }
  0x2d   :  { %725 = vperm.xlu1 %13990, %v687_v18   ;;  %643 = vperm.xlu0 %13989, %v581_v21  }
  0x31   :  { %623 = vperm.xlu1 %13990, %v577_v20   ;;  %755 = vperm.xlu0 %13989, %v693_v23  }
  0x35   :  { %730 = vperm.xlu1 %13990, %v688_v22   ;;  %653 = vperm.xlu0 %13989, %v583_v25  }
  0x39   :  { %633 = vperm.xlu1 %13990, %v579_v24  }
  0x3d   :  { %740 = vperm.xlu1 %13990, %v690_v26  }
  0x41   :  { %638 = vperm.xlu1 %13990, %v580_v27  }
  0x45   :  { %750 = vperm.xlu1 %13990, %v692_v28  }
  0x49   :  { %648 = vperm.xlu1 %13990, %v582_v29  }
  0x7b   :  { %v78_v30 = vpop.permute.xlu0 %77  ;;  %v90_v31 = vpop.permute.xlu1 %89 }
  0x7c   :  { %80 = vst.msk [vmem:[#allocation2 + $0x8] sm:$0xff] %vm73_vm0, %v78_v30  ;;  %92 = vst.msk [vmem:[#allocation2 + $0x18] sm:$0xff] %vm73_vm0, %v90_v31 }
  0x7f   :  { %v84_v32 = vpop.permute.xlu0 %83 }
  0x80   :  { %86 = vst.msk [vmem:[#allocation2 + $0x10] sm:$0xff] %vm73_vm0, %v84_v32 }
  0x83   :  { %v110_v34 = vld [vmem:[#allocation2 + $0x8] sm:$0xff]  ;;  %v112_v36 = vld [vmem:[#allocation2 + $0x18] sm:$0xff] }
  0x84   :  { %v13791_v35 = vpack.c.bf16 %v110_v34, %v109_v33 }
  0x86   :  { %13792 = vmatprep.subr.bf16.mxu1 %v13791_v35 }
  0x87   :  { %13794 = vmatpush3.bf16.msra.mxu1 %v13791_v35  ;;  %v111_v37 = vld [vmem:[#allocation2 + $0x10] sm:$0xff] }
  0x88   :  { %v13795_v38 = vpack.c.bf16 %v112_v36, %v111_v37  ;;  %v694_v37 = vld [vmem:[%s20360_s27 + $0x60] sm:$0xff] }
  0x8a   :  { %13796 = vmatprep.subr.bf16.mxu1 %v13795_v38 }
  0x8b   :  { %13798 = vmatpush3.bf16.msra.mxu1 %v13795_v38  ;;  %v695_v38 = vld [vmem:[%s20360_s27 + $0x68] sm:$0xff] }
  0x8c   :  { %v15273_v39 = vpop.permute.xlu1 %593 }
  0x8e   :  { %13768 = vmatmul.mubr.msk.f32.vlgmr.msra.gmra.mrb[0].mxu1 %vm129_vm1, %v13659_v40 }
  0x8f   :  { %13770 = vmatprep.mubr.msk.f32.mxu1 %vm129_vm1, %v13662_v41 }
  0x90   :  { %v15275_v40 = vpop.permute.xlu1 %700 }
  0x92   :  { %13771 = vmatmul.mubr.msk.f32.gmra.mrb[2].mxu1 %vm129_vm1, %v13663_v43 }
  0x93   :  { %13773 = vmatprep.mubr.msk.f32.mxu1 %vm129_vm1, %v13666_v44 }
  0x94   :  { %v15277_v41 = vpop.permute.xlu1 %705 }
  0x96   :  { %13774 = vmatmul.mubr.msk.f32.gmra.mrb[4].mxu1 %vm129_vm1, %v13667_v46 }
  0x97   :  { %13776 = vmatprep.mubr.msk.f32.mxu1 %vm129_vm1, %v13670_v47 }
  0x98   :  { %v15281_v43 = vpop.permute.xlu1 %598 }
  0x9a   :  { %13777 = vmatmul.mubr.msk.f32.gmra.mrb[6].mxu1 %vm129_vm1, %v13671_v49 }
  0x9b   :  { %13779 = vmatprep.mubr.msk.f32.mxu1 %vm129_vm1, %v13674_v50 }
  0x9c   :  { %v15294_v51 = vpop.permute.xlu1 %710 }
  0x9e   :  { %13780 = vmatmul.mubr.msk.f32.gmra.mrb[8].mxu1 %vm129_vm1, %v13675_v52 }
  0x9f   :  { %13782 = vmatprep.mubr.msk.f32.mxu1 %vm129_vm1, %v13678_v53 }
  0xa0   :  { %v15298_v54 = vpop.permute.xlu1 %715 }
  0xa2   :  { %13783 = vmatmul.mubr.msk.f32.gmra.mrb[10].mxu1 %vm129_vm1, %v13679_v55  ;;  %v15300_v55 = vpop.permute.xlu0 %588 }
  0xa3   :  { %13785 = vmatprep.mubr.msk.f32.mxu1 %vm129_vm1, %v13682_v56 }
  0xa4   :  { %v15302_v56 = vpop.permute.xlu1 %608 }
  0xa6   :  { %13786 = vmatmul.mubr.msk.f32.gmra.mrb[12].mxu1 %vm129_vm1, %v13683_v58  ;;  %v15304_v57 = vpop.permute.xlu0 %603 }
  0xa7   :  { %13788 = vmatprep.mubr.msk.f32.mxu1 %vm129_vm1, %v13686_v59 }
  0xa8   :  { %v15306_v58 = vpop.permute.xlu1 %720 }
  0xaa   :  { %13789 = vmatmul.mubr.msk.f32.gmra.mrb[14].mxu1 %vm129_vm1, %v13687_v60  ;;  %v15308_v59 = vpop.permute.xlu0 %613 }
  0xab   :  { %899 = vmatprep.mubr.bf16.mxu1 %v14925_v3 }
  0xac   :  { %v15310_v60 = vpop.permute.xlu1 %725 }
 0x161   :  { %v15202_v62 = vpop.f32.mrb[0].mxu1 }
 0x162   :  { %v331_v63 = vmul.f32 %v15202_v62, %v15200_v61  ;;  %v15206_v0 = vpop.f32.mrb[1].mxu1 }
 0x163   :  { %v330_v1 = vmul.f32 %v15200_v61, %v15206_v0 }
 0x164   :  { %v349_v2 = vsel %vm73_vm0, %v331_v63, 0.0  ;;  %v15312_v63 = vpop.permute.xlu0 %618 }
 0x165   :  { %350 = vadd.xlane.f32.xlu0 %v349_v2  ;;  %v15211_v4 = vpop.f32.mrb[2].mxu1  ;;  %v346_v5 = vsel %vm73_vm0, %v330_v1, 0.0  ;;  %v15314_v1 = vpop.permute.xlu1 %623 }
 0x166   :  { %v333_v6 = vmul.f32 %v15211_v4, %v15200_v61  ;;  %347 = vadd.xlane.f32.xlu1 %v346_v5  ;;  %v15216_v7 = vpop.f32.mrb[3].mxu1 }
 0x167   :  { %v332_v8 = vmul.f32 %v15200_v61, %v15216_v7 }
 0x168   :  { %v355_v9 = vsel %vm73_vm0, %v333_v6, 0.0  ;;  %v15316_v2 = vpop.permute.xlu0 %735 }
 0x169   :  { %v15221_v10 = vpop.f32.mrb[4].mxu1  ;;  %v352_v11 = vsel %vm73_vm0, %v332_v8, 0.0  ;;  %v15318_v5 = vpop.permute.xlu1 %730 }
 0x16a   :  { %v335_v12 = vmul.f32 %v15221_v10, %v15200_v61  ;;  %356 = vadd.xlane.f32.xlu1 %v355_v9  ;;  %353 = vadd.xlane.f32.xlu0 %v352_v11  ;;  %v15226_v13 = vpop.f32.mrb[5].mxu1 }
 0x16b   :  { %v334_v14 = vmul.f32 %v15200_v61, %v15226_v13 }
 0x16c   :  { %v361_v15 = vsel %vm73_vm0, %v335_v12, 0.0  ;;  %v15320_v6 = vpop.permute.xlu0 %628 }
 0x16d   :  { %v15231_v16 = vpop.f32.mrb[6].mxu1  ;;  %v358_v17 = vsel %vm73_vm0, %v334_v14, 0.0  ;;  %v15322_v8 = vpop.permute.xlu1 %633 }
 0x16e   :  { %v337_v18 = vmul.f32 %v15231_v16, %v15200_v61  ;;  %362 = vadd.xlane.f32.xlu1 %v361_v15  ;;  %359 = vadd.xlane.f32.xlu0 %v358_v17  ;;  %v15236_v19 = vpop.f32.mrb[7].mxu1 }
 0x16f   :  { %v336_v20 = vmul.f32 %v15200_v61, %v15236_v19 }
 0x170   :  { %v367_v21 = vsel %vm73_vm0, %v337_v18, 0.0  ;;  %v15324_v9 = vpop.permute.xlu0 %745 }
 0x171   :  { %v15241_v22 = vpop.f32.mrb[8].mxu1  ;;  %v364_v23 = vsel %vm73_vm0, %v336_v20, 0.0  ;;  %v15326_v11 = vpop.permute.xlu1 %740 }
 0x172   :  { %v339_v24 = vmul.f32 %v15241_v22, %v15200_v61  ;;  %368 = vadd.xlane.f32.xlu1 %v367_v21  ;;  %365 = vadd.xlane.f32.xlu0 %v364_v23  ;;  %v15246_v25 = vpop.f32.mrb[9].mxu1 }
 0x173   :  { %v338_v26 = vmul.f32 %v15200_v61, %v15246_v25 }
 0x174   :  { %v373_v27 = vsel %vm73_vm0, %v339_v24, 0.0  ;;  %v15328_v12 = vpop.permute.xlu0 %643 }
 0x175   :  { %v15251_v28 = vpop.f32.mrb[10].mxu1  ;;  %v370_v29 = vsel %vm73_vm0, %v338_v26, 0.0  ;;  %v15330_v14 = vpop.permute.xlu1 %638 }
 0x176   :  { %374 = vadd.xlane.f32.xlu1 %v373_v27  ;;  %371 = vadd.xlane.f32.xlu0 %v370_v29  ;;  %v15254_v30 = vpop.f32.mrb[11].mxu1  ;;  %v341_v42 = vmul.f32 %v15251_v28, %v15200_v61 }
 0x177   :  { %v340_v31 = vmul.f32 %v15200_v61, %v15254_v30 }
 0x178   :  { %v379_v45 = vsel %vm73_vm0, %v341_v42, 0.0  ;;  %v15332_v15 = vpop.permute.xlu0 %755 }
 0x179   :  { %v376_v32 = vsel %vm73_vm0, %v340_v31, 0.0  ;;  %v15259_v33 = vpop.f32.mrb[12].mxu1  ;;  %v15334_v17 = vpop.permute.xlu1 %750 }
 0x17a   :  { %377 = vadd.xlane.f32.xlu0 %v376_v32  ;;  %v15261_v34 = vpop.f32.mrb[13].mxu1  ;;  %v343_v44 = vmul.f32 %v15259_v33, %v15200_v61 }
 0x17b   :  { %v342_v46 = vmul.f32 %v15200_v61, %v15261_v34 }
 0x17c   :  { %v385_v48 = vsel %vm73_vm0, %v343_v44, 0.0  ;;  %v15336_v18 = vpop.permute.xlu0 %653 }
 0x17d   :  { %v15263_v35 = vpop.f32.mrb[14].mxu1  ;;  %v382_v49 = vsel %vm73_vm0, %v342_v46, 0.0  ;;  %v15338_v20 = vpop.permute.xlu1 %648 }
 0x17e   :  { %v15265_v36 = vpop.f32.mrb[15].mxu1  ;;  %v345_v47 = vmul.f32 %v15263_v35, %v15200_v61 }
 0x17f   :  { %v344_v50 = vmul.f32 %v15200_v61, %v15265_v36 }
 0x180   :  { %v391_v52 = vsel %vm73_vm0, %v345_v47, 0.0 }
 0x181   :  { %v388_v53 = vsel %vm73_vm0, %v344_v50, 0.0 }
 0x187   :  { %760 = vperm.xlu1 %13990, %v694_v37  }
 0x190   :  { %765 = vperm.xlu0 %13989, %v695_v38  }
 0x1ab   :  { %380 = vadd.xlane.f32.xlu1 %v379_v45 }
 0x1af   :  { %386 = vadd.xlane.f32.xlu1 %v385_v48  ;;  %383 = vadd.xlane.f32.xlu0 %v382_v49 }
 0x1b3   :  { %392 = vadd.xlane.f32.xlu1 %v391_v52  ;;  %389 = vadd.xlane.f32.xlu0 %v388_v53 }
 0x1f2   :  { %v351_v21 = vpop.xlane.xlu0 %350 }
 0x1f3   :  { %v395_v23 = vmul.f32 0.125, %v351_v21  ;;  %v348_v24 = vpop.xlane.xlu1 %347 }
 0x1f4   :  { %v394_v26 = vmul.f32 0.125, %v348_v24 }
 0x1f5   :  { %v15341_v27 = vsub.f32 %v15202_v62, %v395_v23 }
 0x1f6   :  { %v15344_v29 = vsub.f32 %v15206_v0, %v394_v26 }
 0x1f7   :  { %v357_v31 = vpop.xlane.xlu1 %356  ;;  %v354_v32 = vpop.xlane.xlu0 %353  ;;  %v427_v37 = vmul.f32 %v15341_v27, %v15341_v27 }
 0x1f8   :  { %v397_v38 = vmul.f32 0.125, %v357_v31  ;;  %v396_v42 = vmul.f32 0.125, %v354_v32  ;;  %v426_v44 = vmul.f32 %v15344_v29, %v15344_v29 }
 0x1f9   :  { %v443_v45 = vmul.f32 %v15200_v61, %v427_v37 }
 0x1fa   :  { %v15352_v46 = vsub.f32 %v15211_v4, %v397_v38  ;;  %v15355_v62 = vsub.f32 %v15216_v7, %v396_v42  ;;  %v442_v0 = vmul.f32 %v15200_v61, %v426_v44 }
 0x1fb   :  { %v363_v47 = vpop.xlane.xlu1 %362  ;;  %v360_v48 = vpop.xlane.xlu0 %359  ;;  %v461_v49 = vsel %vm73_vm0, %v443_v45, 0.0 }
 0x1fc   :  { %v399_v50 = vmul.f32 0.125, %v363_v47  ;;  %v398_v52 = vmul.f32 0.125, %v360_v48  ;;  %462 = vadd.xlane.f32.xlu1 %v461_v49  ;;  %v458_v53 = vsel %vm73_vm0, %v442_v0, 0.0  ;;  %v429_v21 = vmul.f32 %v15352_v46, %v15352_v46 }
 0x1fd   :  { %459 = vadd.xlane.f32.xlu0 %v458_v53  ;;  %v428_v4 = vmul.f32 %v15355_v62, %v15355_v62 }
 0x1fe   :  { %v15365_v7 = vsub.f32 %v15221_v10, %v399_v50  ;;  %v15368_v23 = vsub.f32 %v15226_v13, %v398_v52  ;;  %v445_v24 = vmul.f32 %v15200_v61, %v429_v21 }
 0x1ff   :  { %v369_v26 = vpop.xlane.xlu1 %368  ;;  %v366_v31 = vpop.xlane.xlu0 %365  ;;  %v444_v32 = vmul.f32 %v15200_v61, %v428_v4 }
 0x200   :  { %v401_v37 = vmul.f32 0.125, %v369_v26  ;;  %v400_v38 = vmul.f32 0.125, %v366_v31  ;;  %v467_v42 = vsel %vm73_vm0, %v445_v24, 0.0  ;;  %v431_v44 = vmul.f32 %v15365_v7, %v15365_v7 }
 0x201   :  { %468 = vadd.xlane.f32.xlu1 %v467_v42  ;;  %v464_v10 = vsel %vm73_vm0, %v444_v32, 0.0  ;;  %v430_v13 = vmul.f32 %v15368_v23, %v15368_v23 }
 0x202   :  { %v15379_v45 = vsub.f32 %v15231_v16, %v401_v37  ;;  %v15382_v0 = vsub.f32 %v15236_v19, %v400_v38  ;;  %465 = vadd.xlane.f32.xlu0 %v464_v10  ;;  %v447_v47 = vmul.f32 %v15200_v61, %v431_v44 }
 0x203   :  { %v375_v48 = vpop.xlane.xlu1 %374  ;;  %v372_v49 = vpop.xlane.xlu0 %371  ;;  %v446_v50 = vmul.f32 %v15200_v61, %v430_v13 }
 0x204   :  { %v403_v52 = vmul.f32 0.125, %v375_v48  ;;  %v402_v53 = vmul.f32 0.125, %v372_v49  ;;  %v473_v21 = vsel %vm73_vm0, %v447_v47, 0.0  ;;  %v433_v4 = vmul.f32 %v15379_v45, %v15379_v45  ;;  %v584_v47 = vld [vmem:[%s20359_s25 + $0x70] sm:$0xff]  ;;  %v13993_v48 = vld [vmem:[%s20362_s29 + $0x4] ss:$8 sps:$4 sm:$0xff]  }
 0x205   :  { %474 = vadd.xlane.f32.xlu1 %v473_v21  ;;  %v470_v16 = vsel %vm73_vm0, %v446_v50, 0.0  ;;  %v432_v19 = vmul.f32 %v15382_v0, %v15382_v0  ;;  %v13991_v49 = vld [vmem:[%s20362_s29] ss:$8 sps:$4 sm:$0xff]   ;;  %867 = vmatprep.subr.bf16.mxu1 %v13993_v48  ;;  %v820_v50 = vld [vmem:[%s20362_s29 + $0x10] sm:$0x11]  ;;  %s14932_s29 = smov 107  }
 0x206   :  { %v15393_v24 = vsub.f32 %v15241_v22, %v403_v52  ;;  %v15396_v26 = vsub.f32 %v15246_v25, %v402_v53  ;;  %471 = vadd.xlane.f32.xlu0 %v470_v16  ;;  %v449_v31 = vmul.f32 %v15200_v61, %v433_v4  ;;  %868 = vmatpush1.bf16.msra.mxu1 %v13991_v49 }
 0x207   :  { %v448_v32 = vmul.f32 %v15200_v61, %v432_v19  ;;  %v12981_v52 = vcombine.high %v820_v50, %v820_v50  ;;  %v12980_v53 = vcombine.low %v820_v50, %v820_v50  ;;  %v378_v4 = vpop.xlane.xlu0 %377  ;;  %v15424_v19 = vpop.permute.xlu1 %760 }
 0x208   :  { %v479_v37 = vsel %vm73_vm0, %v449_v31, 0.0  ;;  %v434_v38 = vmul.f32 %v15396_v26, %v15396_v26  ;;  %v435_v42 = vmul.f32 %v15393_v24, %v15393_v24  ;;  %v404_v16 = vmul.f32 0.125, %v378_v4 }
 0x209   :  { %480 = vadd.xlane.f32.xlu1 %v479_v37  ;;  %v476_v22 = vsel %vm73_vm0, %v448_v32, 0.0  ;;  %12982 = vmatprep.subr.msk.bf16.mxu1 %vm860_vm2, %v12981_v52  ;;  %v862_v21 = vsel %vm860_vm2, %v12980_v53, 0 }
 0x20a   :  { %477 = vadd.xlane.f32.xlu0 %v476_v22  ;;  %v450_v25 = vmul.f32 %v15200_v61, %v434_v38  ;;  %v451_v44 = vmul.f32 %v15200_v61, %v435_v42  ;;  %870 = vmatpush1.bf16.msra.mxu1 %v862_v21  ;;  %v15427_v31 = vsub.f32 %v15254_v30, %v404_v16 }
 0x20c   :  { %v482_v10 = vsel %vm73_vm0, %v450_v25, 0.0  ;;  %v485_v13 = vsel %vm73_vm0, %v451_v44, 0.0  ;;  %v436_v42 = vmul.f32 %v15427_v31, %v15427_v31 }
 0x20d   :  { %483 = vadd.xlane.f32.xlu1 %v482_v10 }
 0x20e   :  { %486 = vadd.xlane.f32.xlu0 %v485_v13  ;;  %v452_v10 = vmul.f32 %v15200_v61, %v436_v42 }
 0x20f   :  { %v15429_v32 = vpop.permute.xlu0 %765 }
 0x210   :  { %v488_v50 = vsel %vm73_vm0, %v452_v10, 0.0 }
 0x21e   :  { %658 = vperm.xlu1 %13990, %v584_v47  }
 0x238   :  { %v381_v37 = vpop.xlane.xlu1 %380 }
 0x239   :  { %v405_v38 = vmul.f32 0.125, %v381_v37 }
 0x23b   :  { %v15434_v22 = vsub.f32 %v15251_v28, %v405_v38  ;;  %v585_v38 = vld [vmem:[%s20359_s25 + $0x78] sm:$0xff]  ;;  %s14929_s25 = smov 116  }
 0x23c   :  { %v384_v25 = vpop.xlane.xlu0 %383  ;;  %v387_v42 = vpop.xlane.xlu1 %386 }
 0x23d   :  { %v406_v44 = vmul.f32 0.125, %v384_v25  ;;  %v437_v13 = vmul.f32 %v15434_v22, %v15434_v22  ;;  %v407_v25 = vmul.f32 0.125, %v387_v42 }
 0x23f   :  { %v15440_v30 = vsub.f32 %v15261_v34, %v406_v44  ;;  %v453_v47 = vmul.f32 %v15200_v61, %v437_v13  ;;  %v15463_v10 = vsub.f32 %v15259_v33, %v407_v25 }
 0x240   :  { %v390_v48 = vpop.xlane.xlu0 %389  ;;  %v393_v44 = vpop.xlane.xlu1 %392 }
 0x241   :  { %v408_v49 = vmul.f32 0.125, %v390_v48  ;;  %v491_v52 = vsel %vm73_vm0, %v453_v47, 0.0  ;;  %v438_v28 = vmul.f32 %v15440_v30, %v15440_v30  ;;  %v409_v13 = vmul.f32 0.125, %v393_v44 }
 0x242   :  { %489 = vadd.xlane.f32.xlu1 %v488_v50  ;;  %492 = vadd.xlane.f32.xlu0 %v491_v52  ;;  %v439_v48 = vmul.f32 %v15463_v10, %v15463_v10 }
 0x243   :  { %v15448_v53 = vsub.f32 %v15265_v36, %v408_v49  ;;  %v454_v21 = vmul.f32 %v15200_v61, %v438_v28  ;;  %v696_v36 = vld [vmem:[%s20360_s27 + $0x70] sm:$0xff]  ;;  %v15466_v47 = vsub.f32 %v15263_v35, %v409_v13 }
 0x244   :  { %v455_v49 = vmul.f32 %v15200_v61, %v439_v48 }
 0x245   :  { %v494_v34 = vsel %vm73_vm0, %v454_v21, 0.0  ;;  %v440_v4 = vmul.f32 %v15448_v53, %v15448_v53  ;;  %v441_v50 = vmul.f32 %v15466_v47, %v15466_v47 }
 0x246   :  { %495 = vadd.xlane.f32.xlu1 %v494_v34  ;;  %v497_v52 = vsel %vm73_vm0, %v455_v49, 0.0 }
 0x247   :  { %v456_v16 = vmul.f32 %v15200_v61, %v440_v4  ;;  %v457_v28 = vmul.f32 %v15200_v61, %v441_v50 }
 0x249   :  { %v500_v37 = vsel %vm73_vm0, %v456_v16, 0.0  ;;  %v503_v33 = vsel %vm73_vm0, %v457_v28, 0.0 }
 0x24a   :  { %501 = vadd.xlane.f32.xlu1 %v500_v37 }
 0x258   :  { %663 = vperm.xlu0 %13989, %v585_v38  }
 0x25b   :  { %770 = vperm.xlu1 %13990, %v696_v36   ;;  %v697_v36 = vld [vmem:[%s20360_s27 + $0x78] sm:$0xff]  ;;  %s14926_s27 = smov 126  }
 0x277   :  { %498 = vadd.xlane.f32.xlu0 %v497_v52 }
 0x27b   :  { %504 = vadd.xlane.f32.xlu0 %v503_v33 }
 0x289   :  { %v463_v21 = vpop.xlane.xlu1 %462 }
 0x28a   :  { %v507_v34 = vmul.f32 0.125, %v463_v21  ;;  %v460_v35 = vpop.xlane.xlu0 %459 }
 0x28b   :  { %v506_v4 = vmul.f32 0.125, %v460_v35 }
 0x28c   :  { %v523_v16 = vadd.f32 1e-05, %v507_v34 }
 0x28d   :  { %v522_v37 = vadd.f32 1e-05, %v506_v4 }
 0x28e   :  { %14832 = vrsqrt.f32 %v523_v16  ;;  %v469_v38 = vpop.xlane.xlu1 %468 }
 0x28f   :  { %14834 = vrsqrt.f32 %v522_v37  ;;  %v509_v42 = vmul.f32 0.125, %v469_v38  ;;  %v466_v25 = vpop.xlane.xlu0 %465 }
 0x290   :  { %v508_v61 = vmul.f32 0.125, %v466_v25 }
 0x291   :  { %v525_v44 = vadd.f32 1e-05, %v509_v42  ;;  %775 = vperm.xlu0 %13989, %v697_v36  }
 0x292   :  { %v524_v13 = vadd.f32 1e-05, %v508_v61  ;;  %v475_v48 = vpop.xlane.xlu1 %474 }
 0x293   :  { %14836 = vrsqrt.f32 %v525_v44  ;;  %v511_v49 = vmul.f32 0.125, %v475_v48  ;;  %v472_v50 = vpop.xlane.xlu0 %471 }
 0x294   :  { %14838 = vrsqrt.f32 %v524_v13  ;;  %v510_v52 = vmul.f32 0.125, %v472_v50 }
 0x295   :  { %v527_v28 = vadd.f32 1e-05, %v511_v49 }
 0x296   :  { %v526_v33 = vadd.f32 1e-05, %v510_v52  ;;  %v481_v21 = vpop.xlane.xlu1 %480 }
 0x297   :  { %14840 = vrsqrt.f32 %v527_v28  ;;  %v513_v34 = vmul.f32 0.125, %v481_v21  ;;  %v478_v35 = vpop.xlane.xlu0 %477 }
 0x298   :  { %v14833_v4 = vpop.eup %14832  ;;  %14842 = vrsqrt.f32 %v526_v33  ;;  %v512_v16 = vmul.f32 0.125, %v478_v35 }
 0x299   :  { %v14835_v37 = vpop.eup %14834  ;;  %v555_v38 = vmul.f32 %v14833_v4, %v15341_v27  ;;  %v529_v36 = vadd.f32 1e-05, %v513_v34 }
 0x29a   :  { %v554_v42 = vmul.f32 %v14835_v37, %v15344_v29  ;;  %v528_v25 = vadd.f32 1e-05, %v512_v16  ;;  %v484_v61 = vpop.xlane.xlu1 %483 }
 0x29b   :  { %v667_v44 = vmul.f32 %v15273_v39, %v555_v38  ;;  %v487_v13 = vpop.xlane.xlu0 %486  ;;  %14844 = vrsqrt.f32 %v529_v36  ;;  %v514_v49 = vmul.f32 0.125, %v484_v61 }
 0x29c   :  { %v666_v48 = vmul.f32 %v15300_v55, %v554_v42  ;;  %14846 = vrsqrt.f32 %v528_v25  ;;  %v515_v28 = vmul.f32 0.125, %v487_v13 }
 0x29d   :  { %v14837_v50 = vpop.eup %14836  ;;  %v779_v52 = vadd.f32 %v15277_v41, %v667_v44  ;;  %v530_v39 = vadd.f32 1e-05, %v514_v49 }
 0x29e   :  { %v14839_v33 = vpop.eup %14838  ;;  %v778_v27 = vadd.f32 %v15275_v40, %v666_v48  ;;  %v557_v21 = vmul.f32 %v14837_v50, %v15352_v46  ;;  %v531_v16 = vadd.f32 1e-05, %v515_v28 }
 0x29f   :  { %v795_v29 = vmax.f32 %v779_v52, 0.0  ;;  %v556_v34 = vmul.f32 %v14839_v33, %v15355_v62  ;;  %14848 = vrsqrt.f32 %v530_v39 }
 0x2a0   :  { %v794_v35 = vmax.f32 %v778_v27, 0.0  ;;  %v669_v4 = vmul.f32 %v15304_v57, %v557_v21  ;;  %14850 = vrsqrt.f32 %v531_v16 }
 0x2a1   :  { %v14841_v55 = vpop.eup %14840  ;;  %v668_v37 = vmul.f32 %v15281_v43, %v556_v34  ;;  %v659_v34 = vpop.permute.xlu1 %658 }
 0x2a2   :  { %v14843_v38 = vpop.eup %14842  ;;  %v559_v41 = vmul.f32 %v14841_v55, %v15365_v7  ;;  %v810_v36 = vpack.c.bf16 %v795_v29, %v794_v35  ;;  %v781_v42 = vadd.f32 %v15298_v54, %v669_v4 }
 0x2a3   :  { %v558_v40 = vmul.f32 %v14843_v38, %v15368_v23  ;;  %v780_v46 = vadd.f32 %v15294_v51, %v668_v37 }
 0x2a4   :  { %12983 = vmatmul.mubr.msk.bf16.vlgmr.msra.gmra.mrb[16].mxu1 %vm73_vm0, %v810_v36  ;;  %v797_v25 = vmax.f32 %v781_v42, 0.0  ;;  %v671_v7 = vmul.f32 %v15308_v59, %v559_v41 }
 0x2a5   :  { %909 = vmatprep.mubr.bf16.mxu1 %v14925_v3  ;;  %v14845_v57 = vpop.eup %14844  ;;  %v796_v62 = vmax.f32 %v780_v46, 0.0  ;;  %v670_v43 = vmul.f32 %v15302_v56, %v558_v40 }
 0x2a6   :  { %v14847_v61 = vpop.eup %14846  ;;  %v561_v54 = vmul.f32 %v14845_v57, %v15379_v45  ;;  %v783_v13 = vadd.f32 %v15310_v60, %v671_v7 }
 0x2a7   :  { %v560_v23 = vmul.f32 %v14847_v61, %v15382_v0  ;;  %v811_v44 = vpack.c.bf16 %v797_v25, %v796_v62  ;;  %v782_v51 = vadd.f32 %v15306_v58, %v670_v43 }
 0x2a8   :  { %v799_v50 = vmax.f32 %v783_v13, 0.0  ;;  %v673_v59 = vmul.f32 %v15314_v1, %v561_v54 }
 0x2a9   :  { %v14849_v48 = vpop.eup %14848  ;;  %v798_v49 = vmax.f32 %v782_v51, 0.0  ;;  %v672_v56 = vmul.f32 %v15312_v63, %v560_v23 }
 0x2aa   :  { %v14851_v52 = vpop.eup %14850  ;;  %v562_v45 = vmul.f32 %v14849_v48, %v15396_v26  ;;  %v785_v60 = vadd.f32 %v15316_v2, %v673_v59 }
 0x2ab   :  { %v563_v0 = vmul.f32 %v14851_v52, %v15393_v24  ;;  %v812_v28 = vpack.c.bf16 %v799_v50, %v798_v49  ;;  %v784_v58 = vadd.f32 %v15318_v5, %v672_v56 }
 0x2ac   :  { %12984 = vmatmul.mubr.msk.bf16.gmra.mrb[20].mxu1 %vm73_vm0, %v811_v44  ;;  %v801_v27 = vmax.f32 %v785_v60, 0.0  ;;  %v674_v63 = vmul.f32 %v15320_v6, %v562_v45 }
 0x2ad   :  { %919 = vmatprep.mubr.bf16.mxu1 %v14925_v3  ;;  %v800_v33 = vmax.f32 %v784_v58, 0.0  ;;  %v675_v1 = vmul.f32 %v15322_v8, %v563_v0 }
 0x2ae   :  { %v786_v26 = vadd.f32 %v15326_v11, %v674_v63 }
 0x2af   :  { %v813_v21 = vpack.c.bf16 %v801_v27, %v800_v33  ;;  %v787_v24 = vadd.f32 %v15324_v9, %v675_v1 }
 0x2b0   :  { %v802_v2 = vmax.f32 %v786_v26, 0.0 }
 0x2b1   :  { %v803_v5 = vmax.f32 %v787_v24, 0.0 }
 0x2b3   :  { %v814_v29 = vpack.c.bf16 %v803_v5, %v802_v2 }
 0x2b4   :  { %12985 = vmatmul.mubr.msk.bf16.gmra.mrb[24].mxu1 %vm73_vm0, %v812_v28 }
 0x2b5   :  { %929 = vmatprep.mubr.bf16.mxu1 %v14925_v3 }
 0x2bc   :  { %12986 = vmatmul.mubr.msk.bf16.gmra.mrb[28].mxu1 %vm73_vm0, %v813_v21 }
 0x2bd   :  { %939 = vmatprep.mubr.bf16.mxu1 %v14925_v3 }
 0x2c4   :  { %12987 = vmatmul.mubr.msk.bf16.gmra.mrb[32].mxu1 %vm73_vm0, %v814_v29 }
 0x2c5   :  { %949 = vmatprep.mubr.bf16.mxu1 %v14925_v3 }
 0x2cf   :  { %v490_v6 = vpop.xlane.xlu1 %489  ;;  %v493_v35 = vpop.xlane.xlu0 %492 }
 0x2d0   :  { %v516_v8 = vmul.f32 0.125, %v490_v6  ;;  %v517_v39 = vmul.f32 0.125, %v493_v35 }
 0x2d2   :  { %v532_v4 = vadd.f32 1e-05, %v516_v8  ;;  %v533_v11 = vadd.f32 1e-05, %v517_v39 }
 0x2d3   :  { %v496_v62 = vpop.xlane.xlu1 %495 }
 0x2d4   :  { %14852 = vrsqrt.f32 %v532_v4  ;;  %v518_v25 = vmul.f32 0.125, %v496_v62 }
 0x2d5   :  { %14854 = vrsqrt.f32 %v533_v11 }
 0x2d7   :  { %v502_v43 = vpop.xlane.xlu1 %501  ;;  %v664_v7 = vpop.permute.xlu0 %663 }
 0x2db   :  { %v771_v1 = vpop.permute.xlu1 %770 }
 0x2de   :  { %v14853_v9 = vpop.eup %14852 }
 0x2df   :  { %v14855_v55 = vpop.eup %14854  ;;  %v564_v16 = vmul.f32 %v14853_v9, %v15427_v31  ;;  %v534_v31 = vadd.f32 1e-05, %v518_v25 }
 0x2e0   :  { %v565_v37 = vmul.f32 %v14855_v55, %v15434_v22  ;;  %v520_v22 = vmul.f32 0.125, %v502_v43 }
 0x2e1   :  { %v676_v38 = vmul.f32 %v15330_v14, %v564_v16  ;;  %14856 = vrsqrt.f32 %v534_v31 }
 0x2e2   :  { %v677_v41 = vmul.f32 %v15328_v12, %v565_v37  ;;  %v536_v14 = vadd.f32 1e-05, %v520_v22 }
 0x2e3   :  { %v788_v36 = vadd.f32 %v15334_v17, %v676_v38 }
 0x2e4   :  { %v789_v42 = vadd.f32 %v15332_v15, %v677_v41  ;;  %14858 = vrsqrt.f32 %v536_v14 }
 0x2e5   :  { %v804_v40 = vmax.f32 %v788_v36, 0.0 }
 0x2e6   :  { %v805_v46 = vmax.f32 %v789_v42, 0.0 }
 0x2e8   :  { %v815_v57 = vpack.c.bf16 %v805_v46, %v804_v40 }
 0x2ea   :  { %12988 = vmatmul.mubr.msk.bf16.gmra.mrb[36].mxu1 %vm73_vm0, %v815_v57 }
 0x2eb   :  { %959 = vmatprep.mubr.bf16.mxu1 %v14925_v3  ;;  %v14857_v23 = vpop.eup %14856 }
 0x2ec   :  { %v566_v51 = vmul.f32 %v14857_v23, %v15440_v30 }
 0x2ee   :  { %v14859_v13 = vpop.eup %14858  ;;  %v678_v48 = vmul.f32 %v15338_v20, %v566_v51 }
 0x2ef   :  { %v568_v56 = vmul.f32 %v14859_v13, %v15448_v53 }
 0x2f0   :  { %v790_v52 = vadd.f32 %v15424_v19, %v678_v48 }
 0x2f1   :  { %v680_v58 = vmul.f32 %v659_v34, %v568_v56 }
 0x2f2   :  { %v806_v30 = vmax.f32 %v790_v52, 0.0 }
 0x304   :  { %v499_v12 = vpop.xlane.xlu0 %498 }
 0x305   :  { %v519_v61 = vmul.f32 0.125, %v499_v12 }
 0x307   :  { %v535_v17 = vadd.f32 1e-05, %v519_v61 }
 0x308   :  { %v505_v15 = vpop.xlane.xlu0 %504 }
 0x309   :  { %14860 = vrsqrt.f32 %v535_v17  ;;  %v521_v54 = vmul.f32 0.125, %v505_v15 }
 0x30b   :  { %v537_v44 = vadd.f32 1e-05, %v521_v54 }
 0x30d   :  { %14862 = vrsqrt.f32 %v537_v44 }
 0x310   :  { %v776_v27 = vpop.permute.xlu0 %775 }
 0x313   :  { %v14861_v49 = vpop.eup %14860 }
 0x314   :  { %v567_v50 = vmul.f32 %v14861_v49, %v15463_v10  ;;  %v792_v10 = vadd.f32 %v771_v1, %v680_v58 }
 0x316   :  { %v679_v59 = vmul.f32 %v15336_v18, %v567_v50  ;;  %v808_v19 = vmax.f32 %v792_v10, 0.0 }
 0x317   :  { %v14863_v45 = vpop.eup %14862 }
 0x318   :  { %v569_v0 = vmul.f32 %v14863_v45, %v15466_v47  ;;  %v791_v28 = vadd.f32 %v15429_v32, %v679_v59 }
 0x31a   :  { %v681_v60 = vmul.f32 %v664_v7, %v569_v0  ;;  %v807_v33 = vmax.f32 %v791_v28, 0.0 }
 0x31c   :  { %v793_v20 = vadd.f32 %v776_v27, %v681_v60  ;;  %v816_v63 = vpack.c.bf16 %v807_v33, %v806_v30 }
 0x31e   :  { %12989 = vmatmul.mubr.msk.bf16.gmra.mrb[40].mxu1 %vm73_vm0, %v816_v63  ;;  %v809_v18 = vmax.f32 %v793_v20, 0.0 }
 0x31f   :  { %969 = vmatprep.mubr.bf16.mxu1 %v14925_v3 }
 0x320   :  { %v817_v53 = vpack.c.bf16 %v809_v18, %v808_v19 }
 0x326   :  { %12990 = vmatmul.mubr.msk.bf16.gmra.mrb[44].mxu1 %vm73_vm0, %v817_v53  ;;  %vm2818_vm0 = vcmask 793600  }
 0x377   :  { %v901_v32 = vpop.f32.mrb[16].mxu1 }
 0x378   :  { %980 = vst [vmem:[#allocation7] sm:$0xff] %v901_v32  ;;  %v903_v47 = vpop.f32.mrb[17].mxu1 }
 0x379   :  { %982 = vst.msk [vmem:[#allocation7 + $0x8] sm:$0xff] %vm981_vm3, %v903_v47  ;;  %v905_v21 = vpop.f32.mrb[18].mxu1 }
 0x37a   :  { %983 = vst [vmem:[#allocation7 + $0x10] sm:$0xff] %v905_v21  ;;  %v907_v26 = vpop.f32.mrb[19].mxu1  ;;  %v15539_v24 = vpack.c.bf16 %v905_v21, %v901_v32 }
 0x37b   :  { %984 = vst.msk [vmem:[#allocation7 + $0x18] sm:$0xff] %vm981_vm3, %v907_v26 }
 0x37c   :  { %1142 = vrot.lane.b32.xlu1 %v15539_v24, %s14922_s30 }
 0x37f   :  { %v911_v2 = vpop.f32.mrb[20].mxu1 }
 0x380   :  { %985 = vst [vmem:[#allocation7 + $0x20] sm:$0xff] %v911_v2  ;;  %v913_v5 = vpop.f32.mrb[21].mxu1  ;;  %v1014_v34 = vld [vmem:[#allocation7 + $0x8] sm:$0xff] }
 0x381   :  { %986 = vst.msk [vmem:[#allocation7 + $0x28] sm:$0xff] %vm981_vm3, %v913_v5  ;;  %v915_v29 = vpop.f32.mrb[22].mxu1 }
 0x382   :  { %v1016_v6 = vld [vmem:[#allocation7 + $0x18] sm:$0xff]  ;;  %987 = vst [vmem:[#allocation7 + $0x30] sm:$0xff] %v915_v29  ;;  %v15545_v35 = vpack.c.bf16 %v915_v29, %v911_v2  ;;  %v917_v8 = vpop.f32.mrb[23].mxu1 }
 0x383   :  { %v15547_v39 = vpack.c.bf16 %v1016_v6, %v1014_v34  ;;  %988 = vst.msk [vmem:[#allocation7 + $0x38] sm:$0xff] %vm981_vm3, %v917_v8 }
 0x384   :  { %1146 = vrot.lane.b32.xlu1 %v15545_v35, %s14922_s30 }
 0x385   :  { %1144 = vrot.lane.b32.xlu0 %v15547_v39, %s14922_s30  ;;  %1063 = vst.msk [vmem:[#allocation3 + $0x8] sm:$0xff] %vm1062_vm4, %v15547_v39 }
 0x387   :  { %v921_v4 = vpop.f32.mrb[24].mxu1 }
 0x388   :  { %989 = vst [vmem:[#allocation7 + $0x40] sm:$0xff] %v921_v4  ;;  %v923_v11 = vpop.f32.mrb[25].mxu1  ;;  %v1018_v55 = vld [vmem:[#allocation7 + $0x28] sm:$0xff] }
 0x389   :  { %990 = vst.msk [vmem:[#allocation7 + $0x48] sm:$0xff] %vm981_vm3, %v923_v11  ;;  %v925_v9 = vpop.f32.mrb[26].mxu1 }
 0x38a   :  { %v1020_v16 = vld [vmem:[#allocation7 + $0x38] sm:$0xff]  ;;  %991 = vst [vmem:[#allocation7 + $0x50] sm:$0xff] %v925_v9  ;;  %v15557_v37 = vpack.c.bf16 %v925_v9, %v921_v4  ;;  %v927_v38 = vpop.f32.mrb[27].mxu1  ;;  %v15643_v9 = vld [vmem:[%s20363_s4] sm:$0xff] }
 0x38b   :  { %v15559_v41 = vpack.c.bf16 %v1020_v16, %v1018_v55  ;;  %992 = vst.msk [vmem:[#allocation7 + $0x58] sm:$0xff] %vm981_vm3, %v927_v38  ;;  %v15648_v55 = vld [vmem:[%s20363_s4 + $0x40] sm:$0xff] }
 0x38c   :  { %v3198_v36 = vld [vmem:[#allocation3 + $0x8] sm:$0xff]  ;;  %1150 = vrot.lane.b32.xlu1 %v15557_v37, %s14922_s30  ;;  %v12992_v38 = vcombine.high %v15643_v9, %v15648_v55 }
 0x38d   :  { %3773 = vmatprep.subr.bf16.mxu0 %v3198_v36  ;;  %1065 = vst.msk [vmem:[#allocation3 + $0x18] sm:$0xff] %vm1062_vm4, %v15559_v41  ;;  %1148 = vrot.lane.b32.xlu0 %v15559_v41, %s14922_s30 }
 0x38e   :  { %3774 = vmatpush1.bf16.msra.mxu0 %v15539_v24  ;;  %3805 = vmatprep.mubr.bf16.mxu0 %v12992_v38 }
 0x38f   :  { %v931_v42 = vpop.f32.mrb[28].mxu1 }
 0x390   :  { %993 = vst [vmem:[#allocation7 + $0x60] sm:$0xff] %v931_v42  ;;  %v933_v40 = vpop.f32.mrb[29].mxu1  ;;  %v1022_v57 = vld [vmem:[#allocation7 + $0x48] sm:$0xff] }
 0x391   :  { %994 = vst.msk [vmem:[#allocation7 + $0x68] sm:$0xff] %vm981_vm3, %v933_v40  ;;  %v935_v46 = vpop.f32.mrb[30].mxu1 }
 0x392   :  { %v1024_v62 = vld [vmem:[#allocation7 + $0x58] sm:$0xff]  ;;  %995 = vst [vmem:[#allocation7 + $0x70] sm:$0xff] %v935_v46  ;;  %v15570_v25 = vpack.c.bf16 %v935_v46, %v931_v42  ;;  %v937_v31 = vpop.f32.mrb[31].mxu1  ;;  %v12991_v42 = vcombine.low %v15643_v9, %v15648_v55  ;;  %v3173_v9 = vld [vmem:[%s20363_s4 + $0x140] sm:$0xff] }
 0x393   :  { %v15572_v43 = vpack.c.bf16 %v1024_v62, %v1022_v57  ;;  %996 = vst.msk [vmem:[#allocation7 + $0x78] sm:$0xff] %vm981_vm3, %v937_v31 }
 0x394   :  { %v3200_v22 = vld [vmem:[#allocation3 + $0x18] sm:$0xff]  ;;  %1154 = vrot.lane.b32.xlu1 %v15570_v25, %s14922_s30 }
 0x395   :  { %1067 = vst.msk [vmem:[#allocation3 + $0x28] sm:$0xff] %vm1062_vm4, %v15572_v43  ;;  %3775 = vmatprep.subr.bf16.mxu0 %v3200_v22  ;;  %1152 = vrot.lane.b32.xlu0 %v15572_v43, %s14922_s30 }
 0x396   :  { %3776 = vmatpush1.bf16.msra.mxu0 %v15545_v35 }
 0x397   :  { %v941_v7 = vpop.f32.mrb[32].mxu1 }
 0x398   :  { %997 = vst [vmem:[#allocation7 + $0x80] sm:$0xff] %v941_v7  ;;  %v943_v14 = vpop.f32.mrb[33].mxu1  ;;  %v1026_v61 = vld [vmem:[#allocation7 + $0x68] sm:$0xff] }
 0x399   :  { %998 = vst.msk [vmem:[#allocation7 + $0x88] sm:$0xff] %vm981_vm3, %v943_v14  ;;  %v945_v12 = vpop.f32.mrb[34].mxu1 }
 0x39a   :  { %v1028_v17 = vld [vmem:[#allocation7 + $0x78] sm:$0xff]  ;;  %999 = vst [vmem:[#allocation7 + $0x90] sm:$0xff] %v945_v12  ;;  %v15583_v15 = vpack.c.bf16 %v945_v12, %v941_v7  ;;  %v947_v54 = vpop.f32.mrb[35].mxu1 }
 0x39b   :  { %v15585_v23 = vpack.c.bf16 %v1028_v17, %v1026_v61  ;;  %1000 = vst.msk [vmem:[#allocation7 + $0x98] sm:$0xff] %vm981_vm3, %v947_v54 }
 0x39c   :  { %v3202_v44 = vld [vmem:[#allocation3 + $0x28] sm:$0xff]  ;;  %1158 = vrot.lane.b32.xlu1 %v15583_v15, %s14922_s30 }
 0x39d   :  { %1069 = vst.msk [vmem:[#allocation3 + $0x38] sm:$0xff] %vm1062_vm4, %v15585_v23  ;;  %3777 = vmatprep.subr.bf16.mxu0 %v3202_v44  ;;  %1156 = vrot.lane.b32.xlu0 %v15585_v23, %s14922_s30 }
 0x39e   :  { %3778 = vmatpush1.bf16.msra.mxu0 %v15557_v37 }
 0x3a0   :  { %v1030_v51 = vld [vmem:[#allocation7 + $0x88] sm:$0xff] }
 0x3a2   :  { %v1032_v13 = vld [vmem:[#allocation7 + $0x98] sm:$0xff] }
 0x3a3   :  { %v15595_v48 = vpack.c.bf16 %v1032_v13, %v1030_v51 }
 0x3a4   :  { %v3204_v49 = vld [vmem:[#allocation3 + $0x38] sm:$0xff] }
 0x3a5   :  { %1071 = vst.msk [vmem:[#allocation3 + $0x48] sm:$0xff] %vm1062_vm4, %v15595_v48  ;;  %3779 = vmatprep.subr.bf16.mxu0 %v3204_v49  ;;  %1160 = vrot.lane.b32.xlu0 %v15595_v48, %s14922_s30 }
 0x3a6   :  { %3780 = vmatpush1.bf16.msra.mxu0 %v15570_v25 }
 0x3ac   :  { %v3206_v50 = vld [vmem:[#allocation3 + $0x48] sm:$0xff] }
 0x3ad   :  { %3781 = vmatprep.subr.bf16.mxu0 %v3206_v50 }
 0x3ae   :  { %3782 = vmatpush1.bf16.msra.mxu0 %v15583_v15 }
 0x3bd   :  { %v951_v56 = vpop.f32.mrb[36].mxu1 }
 0x3be   :  { %1001 = vst [vmem:[#allocation7 + $0xa0] sm:$0xff] %v951_v56  ;;  %v953_v59 = vpop.f32.mrb[37].mxu1 }
 0x3bf   :  { %1002 = vst.msk [vmem:[#allocation7 + $0xa8] sm:$0xff] %vm981_vm3, %v953_v59  ;;  %v955_v52 = vpop.f32.mrb[38].mxu1 }
 0x3c0   :  { %1003 = vst [vmem:[#allocation7 + $0xb0] sm:$0xff] %v955_v52  ;;  %v15604_v45 = vpack.c.bf16 %v955_v52, %v951_v56  ;;  %v957_v0 = vpop.f32.mrb[39].mxu1 }
 0x3c1   :  { %1004 = vst.msk [vmem:[#allocation7 + $0xb8] sm:$0xff] %vm981_vm3, %v957_v0 }
 0x3c2   :  { %1162 = vrot.lane.b32.xlu1 %v15604_v45, %s14922_s30 }
 0x3c6   :  { %v1034_v28 = vld [vmem:[#allocation7 + $0xa8] sm:$0xff] }
 0x3c8   :  { %v1036_v58 = vld [vmem:[#allocation7 + $0xb8] sm:$0xff] }
 0x3c9   :  { %v15609_v60 = vpack.c.bf16 %v1036_v58, %v1034_v28  ;;  %v1763_v58 = vld [vmem:[#allocation7] sm:$0xff] }
 0x3cb   :  { %1073 = vst.msk [vmem:[#allocation3 + $0x58] sm:$0xff] %vm1062_vm4, %v15609_v60  ;;  %1164 = vrot.lane.b32.xlu0 %v15609_v60, %s14922_s30 }
 0x3d2   :  { %v3208_v30 = vld [vmem:[#allocation3 + $0x58] sm:$0xff] }
 0x3d3   :  { %3783 = vmatprep.subr.bf16.mxu0 %v3208_v30 }
 0x3d4   :  { %3784 = vmatpush1.bf16.msra.mxu0 %v15604_v45 }
 0x3ee   :  { %v1143_v10 = vpop.permute.xlu1 %1142 }
 0x3f1   :  { %v961_v33 = vpop.f32.mrb[40].mxu1 }
 0x3f2   :  { %1005 = vst [vmem:[#allocation7 + $0xc0] sm:$0xff] %v961_v33  ;;  %v963_v27 = vpop.f32.mrb[41].mxu1 }
 0x3f3   :  { %1006 = vst.msk [vmem:[#allocation7 + $0xc8] sm:$0xff] %vm981_vm3, %v963_v27  ;;  %v965_v20 = vpop.f32.mrb[42].mxu1 }
 0x3f4   :  { %1007 = vst [vmem:[#allocation7 + $0xd0] sm:$0xff] %v965_v20  ;;  %v15617_v63 = vpack.c.bf16 %v965_v20, %v961_v33  ;;  %v967_v1 = vpop.f32.mrb[43].mxu1  ;;  %v3149_v20 = vld [vmem:[%s20363_s4 + $0x80] sm:$0xff] }
 0x3f5   :  { %1008 = vst.msk [vmem:[#allocation7 + $0xd8] sm:$0xff] %vm981_vm3, %v967_v1 }
 0x3f6   :  { %1166 = vrot.lane.b32.xlu1 %v15617_v63, %s14922_s30  ;;  %v1147_v34 = vpop.permute.xlu1 %1146 }
 0x3f7   :  { %v1145_v18 = vpop.permute.xlu0 %1144 }
 0x3f8   :  { %v1175_v19 = vsel %vm1174_vm5, %v1143_v10, %v1145_v18  ;;  %1200 = vst.msk [vmem:[#allocation3 + $0x88] sm:$0xff] %vm1062_vm4, %v1145_v18 }
 0x3f9   :  { %v971_v53 = vpop.f32.mrb[44].mxu1 }
 0x3fa   :  { %1009 = vst [vmem:[#allocation7 + $0xe0] sm:$0xff] %v971_v53  ;;  %v973_v32 = vpop.f32.mrb[45].mxu1  ;;  %v1038_v21 = vld [vmem:[#allocation7 + $0xc8] sm:$0xff] }
 0x3fb   :  { %1010 = vst.msk [vmem:[#allocation7 + $0xe8] sm:$0xff] %vm981_vm3, %v973_v32  ;;  %v975_v47 = vpop.f32.mrb[46].mxu1  ;;  %v1767_v32 = vld [vmem:[#allocation7 + $0x20] sm:$0xff] }
 0x3fc   :  { %v1040_v26 = vld [vmem:[#allocation7 + $0xd8] sm:$0xff]  ;;  %1011 = vst [vmem:[#allocation7 + $0xf0] sm:$0xff] %v975_v47  ;;  %v15625_v2 = vpack.c.bf16 %v975_v47, %v971_v53  ;;  %v977_v5 = vpop.f32.mrb[47].mxu1 }
 0x3fd   :  { %v15627_v29 = vpack.c.bf16 %v1040_v26, %v1038_v21  ;;  %1012 = vst.msk [vmem:[#allocation7 + $0xf8] sm:$0xff] %vm981_vm3, %v977_v5  ;;  %v1766_v21 = vld [vmem:[#allocation7 + $0x18] sm:$0xff]  ;;  %v1764_v5 = vld [vmem:[#allocation7 + $0x8] sm:$0xff] }
 0x3fe   :  { %1170 = vrot.lane.b32.xlu1 %v15625_v2, %s14922_s30  ;;  %v1151_v40 = vpop.permute.xlu1 %1150 }
 0x3ff   :  { %1075 = vst.msk [vmem:[#allocation3 + $0x68] sm:$0xff] %vm1062_vm4, %v15627_v29  ;;  %1168 = vrot.lane.b32.xlu0 %v15627_v29, %s14922_s30  ;;  %v1149_v6 = vpop.permute.xlu0 %1148  ;;  %v3214_v14 = vld [vmem:[#allocation3 + $0x88] sm:$0xff] }
 0x400   :  { %v1176_v8 = vsel %vm1174_vm5, %v1147_v34, %v1149_v6  ;;  %1202 = vst.msk [vmem:[#allocation3 + $0x98] sm:$0xff] %vm1062_vm4, %v1149_v6  ;;  %v1771_v34 = vld [vmem:[#allocation7 + $0x40] sm:$0xff] }
 0x402   :  { %1279 = vrot.lane.b32.xlu1 %v15539_v24, %s14926_s27  ;;  %v1042_v4 = vld [vmem:[#allocation7 + $0xe8] sm:$0xff] }
 0x404   :  { %v1044_v11 = vld [vmem:[#allocation7 + $0xf8] sm:$0xff] }
 0x405   :  { %v15650_v16 = vpack.c.bf16 %v1044_v11, %v1042_v4  ;;  %v15823_v4 = vpack.c.bf16 %v1766_v21, %v1764_v5  ;;  %v3165_v11 = vld [vmem:[%s20363_s4 + $0x100] sm:$0xff] }
 0x406   :  { %v3210_v36 = vld [vmem:[#allocation3 + $0x68] sm:$0xff]  ;;  %1283 = vrot.lane.b32.xlu1 %v15545_v35, %s14926_s27  ;;  %v1155_v31 = vpop.permute.xlu1 %1154  ;;  %v1784_v5 = vld [vmem:[#allocation7 + $0xa8] sm:$0xff] }
 0x407   :  { %1077 = vst.msk [vmem:[#allocation3 + $0x78] sm:$0xff] %vm1062_vm4, %v15650_v16  ;;  %3785 = vmatprep.subr.bf16.mxu0 %v3210_v36  ;;  %1172 = vrot.lane.b32.xlu0 %v15650_v16, %s14922_s30  ;;  %v1153_v46 = vpop.permute.xlu0 %1152  ;;  %v3216_v12 = vld [vmem:[#allocation3 + $0x98] sm:$0xff] }
 0x408   :  { %v1177_v57 = vsel %vm1174_vm5, %v1151_v40, %v1153_v46  ;;  %1204 = vst.msk [vmem:[#allocation3 + $0xa8] sm:$0xff] %vm1062_vm4, %v1153_v46  ;;  %3786 = vmatpush1.bf16.msra.mxu0 %v15617_v63  ;;  %v1768_v40 = vld [vmem:[#allocation7 + $0x28] sm:$0xff] }
 0x40a   :  { %1287 = vrot.lane.b32.xlu1 %v15557_v37, %s14926_s27 }
 0x40b   :  { %1281 = vrot.lane.b32.xlu0 %v15547_v39, %s14926_s27 }
 0x40e   :  { %v3212_v62 = vld [vmem:[#allocation3 + $0x78] sm:$0xff]  ;;  %1291 = vrot.lane.b32.xlu1 %v15570_v25, %s14926_s27  ;;  %v1159_v61 = vpop.permute.xlu1 %1158 }
 0x40f   :  { %1285 = vrot.lane.b32.xlu0 %v15559_v41, %s14926_s27  ;;  %3787 = vmatprep.subr.bf16.mxu0 %v3212_v62  ;;  %v1157_v22 = vpop.permute.xlu0 %1156  ;;  %v3218_v44 = vld [vmem:[#allocation3 + $0xa8] sm:$0xff] }
 0x410   :  { %v1178_v7 = vsel %vm1174_vm5, %v1155_v31, %v1157_v22  ;;  %1206 = vst.msk [vmem:[#allocation3 + $0xb8] sm:$0xff] %vm1062_vm4, %v1157_v22  ;;  %3788 = vmatpush1.bf16.msra.mxu0 %v15625_v2 }
 0x411   :  { %3789 = vmatprep.subr.bf16.mxu0 %v3214_v14 }
 0x412   :  { %1295 = vrot.lane.b32.xlu1 %v15583_v15, %s14926_s27 }
 0x413   :  { %1289 = vrot.lane.b32.xlu0 %v15572_v43, %s14926_s27 }
 0x414   :  { %3790 = vmatpush1.bf16.msra.mxu0 %v1175_v19 }
 0x415   :  { %3791 = vmatprep.subr.bf16.mxu0 %v3216_v12  ;;  %v1774_v12 = vld [vmem:[#allocation7 + $0x58] sm:$0xff] }
 0x416   :  { %1299 = vrot.lane.b32.xlu1 %v15604_v45, %s14926_s27 }
 0x417   :  { %1293 = vrot.lane.b32.xlu0 %v15585_v23, %s14926_s27  ;;  %v1161_v17 = vpop.permute.xlu0 %1160  ;;  %v3220_v51 = vld [vmem:[#allocation3 + $0xb8] sm:$0xff] }
 0x418   :  { %v1179_v54 = vsel %vm1174_vm5, %v1159_v61, %v1161_v17  ;;  %1208 = vst.msk [vmem:[#allocation3 + $0xc8] sm:$0xff] %vm1062_vm4, %v1161_v17  ;;  %3792 = vmatpush1.bf16.msra.mxu0 %v1176_v8  ;;  %v1781_v17 = vld [vmem:[#allocation7 + $0x90] sm:$0xff] }
 0x419   :  { %3793 = vmatprep.subr.bf16.mxu0 %v3218_v44 }
 0x41a   :  { %1303 = vrot.lane.b32.xlu1 %v15617_v63, %s14926_s27 }
 0x41b   :  { %1297 = vrot.lane.b32.xlu0 %v15595_v48, %s14926_s27 }
 0x41c   :  { %3794 = vmatpush1.bf16.msra.mxu0 %v1177_v57  ;;  %v13024_v57 = vcombine.high %v3165_v11, %v3173_v9 }
 0x41d   :  { %3795 = vmatprep.subr.bf16.mxu0 %v3220_v51  ;;  %v1779_v51 = vld [vmem:[#allocation7 + $0x80] sm:$0xff] }
 0x41e   :  { %1307 = vrot.lane.b32.xlu1 %v15625_v2, %s14926_s27 }
 0x41f   :  { %1301 = vrot.lane.b32.xlu0 %v15609_v60, %s14926_s27  ;;  %v3222_v13 = vld [vmem:[#allocation3 + $0xc8] sm:$0xff] }
 0x420   :  { %3796 = vmatpush1.bf16.msra.mxu0 %v1178_v7  ;;  %v1775_v7 = vld [vmem:[#allocation7 + $0x60] sm:$0xff] }
 0x421   :  { %3797 = vmatprep.subr.bf16.mxu0 %v3222_v13 }
 0x422   :  { %1416 = vrot.lane.b32.xlu1 %v15539_v24, %s14924_s5 }
 0x423   :  { %1305 = vrot.lane.b32.xlu0 %v15627_v29, %s14926_s27 }
 0x424   :  { %3798 = vmatpush1.bf16.msra.mxu0 %v1179_v54  ;;  %v1772_v54 = vld [vmem:[#allocation7 + $0x48] sm:$0xff] }
 0x426   :  { %1420 = vrot.lane.b32.xlu1 %v15545_v35, %s14924_s5 }
 0x427   :  { %1309 = vrot.lane.b32.xlu0 %v15650_v16, %s14926_s27 }
 0x42a   :  { %1424 = vrot.lane.b32.xlu1 %v15557_v37, %s14924_s5 }
 0x42b   :  { %1418 = vrot.lane.b32.xlu0 %v15547_v39, %s14924_s5 }
 0x42e   :  { %1428 = vrot.lane.b32.xlu1 %v15570_v25, %s14924_s5 }
 0x42f   :  { %1422 = vrot.lane.b32.xlu0 %v15559_v41, %s14924_s5 }
 0x432   :  { %1432 = vrot.lane.b32.xlu1 %v15583_v15, %s14924_s5 }
 0x433   :  { %1426 = vrot.lane.b32.xlu0 %v15572_v43, %s14924_s5 }
 0x434   :  { %v1163_v49 = vpop.permute.xlu1 %1162 }
 0x436   :  { %1436 = vrot.lane.b32.xlu1 %v15604_v45, %s14924_s5 }
 0x437   :  { %1430 = vrot.lane.b32.xlu0 %v15585_v23, %s14924_s5 }
 0x43a   :  { %1440 = vrot.lane.b32.xlu1 %v15617_v63, %s14924_s5 }
 0x43b   :  { %1434 = vrot.lane.b32.xlu0 %v15595_v48, %s14924_s5 }
 0x43d   :  { %v1165_v50 = vpop.permute.xlu0 %1164 }
 0x43e   :  { %v1180_v56 = vsel %vm1174_vm5, %v1163_v49, %v1165_v50  ;;  %1210 = vst.msk [vmem:[#allocation3 + $0xd8] sm:$0xff] %vm1062_vm4, %v1165_v50  ;;  %1444 = vrot.lane.b32.xlu1 %v15625_v2, %s14924_s5  ;;  %v15849_v50 = vpack.c.bf16 %v1774_v12, %v1772_v54 }
 0x43f   :  { %1438 = vrot.lane.b32.xlu0 %v15609_v60, %s14924_s5 }
 0x442   :  { %1553 = vrot.lane.b32.xlu1 %v15539_v24, %s14927_s23 }
 0x443   :  { %1442 = vrot.lane.b32.xlu0 %v15627_v29, %s14924_s5 }
 0x445   :  { %v3224_v59 = vld [vmem:[#allocation3 + $0xd8] sm:$0xff] }
 0x446   :  { %3799 = vmatprep.subr.bf16.mxu0 %v3224_v59  ;;  %1557 = vrot.lane.b32.xlu1 %v15545_v35, %s14927_s23  ;;  %v3189_v59 = vld [vmem:[%s20363_s4 + $0x1c0] sm:$0xff] }
 0x447   :  { %3800 = vmatpush1.bf16.msra.mxu0 %v1180_v56  ;;  %1446 = vrot.lane.b32.xlu0 %v15650_v16, %s14924_s5  ;;  %s14928_s5 = smov 117   ;;  %v3181_v56 = vld [vmem:[%s20363_s4 + $0x180] sm:$0xff] }
 0x448   :  { %v13039_v21 = vcombine.low %v3181_v56, %v3189_v59 }
 0x44a   :  { %1561 = vrot.lane.b32.xlu1 %v15557_v37, %s14927_s23 }
 0x44b   :  { %1555 = vrot.lane.b32.xlu0 %v15547_v39, %s14927_s23 }
 0x44e   :  { %1565 = vrot.lane.b32.xlu1 %v15570_v25, %s14927_s23 }
 0x44f   :  { %1559 = vrot.lane.b32.xlu0 %v15559_v41, %s14927_s23 }
 0x452   :  { %1569 = vrot.lane.b32.xlu1 %v15583_v15, %s14927_s23 }
 0x453   :  { %1563 = vrot.lane.b32.xlu0 %v15572_v43, %s14927_s23 }
 0x456   :  { %1573 = vrot.lane.b32.xlu1 %v15604_v45, %s14927_s23 }
 0x457   :  { %1567 = vrot.lane.b32.xlu0 %v15585_v23, %s14927_s23 }
 0x45a   :  { %1577 = vrot.lane.b32.xlu1 %v15617_v63, %s14927_s23 }
 0x45b   :  { %1571 = vrot.lane.b32.xlu0 %v15595_v48, %s14927_s23 }
 0x45e   :  { %1581 = vrot.lane.b32.xlu1 %v15625_v2, %s14927_s23 }
 0x45f   :  { %1575 = vrot.lane.b32.xlu0 %v15609_v60, %s14927_s23 }
 0x462   :  { %1690 = vrot.lane.b32.xlu1 %v15539_v24, %s14928_s5 }
 0x463   :  { %1579 = vrot.lane.b32.xlu0 %v15627_v29, %s14927_s23 }
 0x466   :  { %1694 = vrot.lane.b32.xlu1 %v15545_v35, %s14928_s5 }
 0x467   :  { %1583 = vrot.lane.b32.xlu0 %v15650_v16, %s14927_s23 }
 0x468   :  { %v1167_v52 = vpop.permute.xlu1 %1166 }
 0x46a   :  { %1698 = vrot.lane.b32.xlu1 %v15557_v37, %s14928_s5 }
 0x46b   :  { %1692 = vrot.lane.b32.xlu0 %v15547_v39, %s14928_s5 }
 0x46e   :  { %1702 = vrot.lane.b32.xlu1 %v15570_v25, %s14928_s5 }
 0x46f   :  { %1696 = vrot.lane.b32.xlu0 %v15559_v41, %s14928_s5 }
 0x470   :  { %v1171_v24 = vpop.permute.xlu1 %1170 }
 0x471   :  { %v1169_v0 = vpop.permute.xlu0 %1168 }
 0x472   :  { %v1181_v35 = vsel %vm1174_vm5, %v1167_v52, %v1169_v0  ;;  %1212 = vst.msk [vmem:[#allocation3 + $0xe8] sm:$0xff] %vm1062_vm4, %v1169_v0  ;;  %1706 = vrot.lane.b32.xlu1 %v15583_v15, %s14928_s5  ;;  %v15859_v0 = vpack.c.bf16 %v1781_v17, %v1779_v51 }
 0x473   :  { %1700 = vrot.lane.b32.xlu0 %v15572_v43, %s14928_s5 }
 0x474   :  { %v1280_v39 = vpop.permute.xlu1 %1279 }
 0x476   :  { %1710 = vrot.lane.b32.xlu1 %v15604_v45, %s14928_s5  ;;  %v1765_v45 = vld [vmem:[#allocation7 + $0x10] sm:$0xff] }
 0x477   :  { %1704 = vrot.lane.b32.xlu0 %v15585_v23, %s14928_s5  ;;  %v15798_v33 = vpack.c.bf16 %v1765_v45, %v1763_v58  ;;  %v1783_v45 = vld [vmem:[#allocation7 + $0xa0] sm:$0xff]  ;;  %v1782_v58 = vld [vmem:[#allocation7 + $0x98] sm:$0xff] }
 0x478   :  { %v1284_v37 = vpop.permute.xlu1 %1283 }
 0x479   :  { %v1173_v41 = vpop.permute.xlu0 %1172  ;;  %v3226_v25 = vld [vmem:[#allocation3 + $0xe8] sm:$0xff] }
 0x47a   :  { %v1182_v28 = vsel %vm1174_vm5, %v1171_v24, %v1173_v41  ;;  %1214 = vst.msk [vmem:[#allocation3 + $0xf8] sm:$0xff] %vm1062_vm4, %v1173_v41  ;;  %3801 = vmatprep.subr.bf16.mxu0 %v3226_v25  ;;  %1714 = vrot.lane.b32.xlu1 %v15617_v63, %s14928_s5  ;;  %v3157_v63 = vld [vmem:[%s20363_s4 + $0xc0] sm:$0xff]  ;;  %v1778_v24 = vld [vmem:[#allocation7 + $0x78] sm:$0xff]  ;;  %v13040_v25 = vcombine.high %v3181_v56, %v3189_v59 }
 0x47b   :  { %1708 = vrot.lane.b32.xlu0 %v15595_v48, %s14928_s5  ;;  %3802 = vmatpush1.bf16.msra.mxu0 %v1181_v35  ;;  %v13008_v18 = vcombine.high %v3149_v20, %v3157_v63  ;;  %v13007_v36 = vcombine.low %v3149_v20, %v3157_v63  ;;  %v13023_v35 = vcombine.low %v3165_v11, %v3173_v9  ;;  %v1787_v63 = vld [vmem:[#allocation7 + $0xc0] sm:$0xff] }
 0x47c   :  { %v1288_v43 = vpop.permute.xlu1 %1287  ;;  %v1791_v9 = vld [vmem:[#allocation7 + $0xe0] sm:$0xff] }
 0x47d   :  { %v1282_v15 = vpop.permute.xlu0 %1281 }
 0x47e   :  { %v1312_v23 = vsel %vm1311_vm6, %v1280_v39, %v1282_v15  ;;  %1337 = vst.msk [vmem:[#allocation3 + $0x108] sm:$0xff] %vm1062_vm4, %v1282_v15  ;;  %1718 = vrot.lane.b32.xlu1 %v15625_v2, %s14928_s5  ;;  %v1773_v2 = vld [vmem:[#allocation7 + $0x50] sm:$0xff] }
 0x47f   :  { %1712 = vrot.lane.b32.xlu0 %v15609_v60, %s14928_s5  ;;  %v1769_v60 = vld [vmem:[#allocation7 + $0x30] sm:$0xff]  ;;  %v15833_v38 = vpack.c.bf16 %v1773_v2, %v1771_v34 }
 0x480   :  { %v1292_v30 = vpop.permute.xlu1 %1291  ;;  %v15817_v26 = vpack.c.bf16 %v1769_v60, %v1767_v32  ;;  %v1785_v39 = vld [vmem:[#allocation7 + $0xb0] sm:$0xff]  ;;  %v1786_v32 = vld [vmem:[#allocation7 + $0xb8] sm:$0xff] }
 0x481   :  { %v1286_v48 = vpop.permute.xlu0 %1285  ;;  %v3228_v27 = vld [vmem:[#allocation3 + $0xf8] sm:$0xff]  ;;  %v1793_v2 = vld [vmem:[#allocation7 + $0xf0] sm:$0xff]  ;;  %v15897_v11 = vpack.c.bf16 %v1786_v32, %v1784_v5 }
 0x482   :  { %v1313_v1 = vsel %vm1311_vm6, %v1284_v37, %v1286_v48  ;;  %1339 = vst.msk [vmem:[#allocation3 + $0x118] sm:$0xff] %vm1062_vm4, %v1286_v48  ;;  %3803 = vmatprep.subr.bf16.mxu0 %v3228_v27  ;;  %1827 = vrot.lane.b32.xlu1 %v15798_v33, %s14929_s25  ;;  %v1776_v37 = vld [vmem:[#allocation7 + $0x68] sm:$0xff]  ;;  %v1789_v48 = vld [vmem:[#allocation7 + $0xd0] sm:$0xff] }
 0x483   :  { %1716 = vrot.lane.b32.xlu0 %v15627_v29, %s14928_s5  ;;  %3804 = vmatpush1.bf16.msra.mxu0 %v1182_v28  ;;  %v15865_v15 = vpack.c.bf16 %v1778_v24, %v1776_v37  ;;  %v1780_v27 = vld [vmem:[#allocation7 + $0x88] sm:$0xff] }
 0x484   :  { %v1296_v10 = vpop.permute.xlu1 %1295 }
 0x485   :  { %v1290_v19 = vpop.permute.xlu0 %1289  ;;  %v3230_v53 = vld [vmem:[#allocation3 + $0x108] sm:$0xff] }
 0x486   :  { %v1314_v47 = vsel %vm1311_vm6, %v1288_v43, %v1290_v19  ;;  %1341 = vst.msk [vmem:[#allocation3 + $0x128] sm:$0xff] %vm1062_vm4, %v1290_v19  ;;  %3846 = vmatprep.subr.bf16.mxu0 %v3230_v53  ;;  %3806 = vmatmul.mubr.bf16.vlgmr.msra.gmra.mrb[0].mxu0 %v12991_v42  ;;  %v1777_v42 = vld [vmem:[#allocation7 + $0x70] sm:$0xff] }
 0x487   :  { %1720 = vrot.lane.b32.xlu0 %v15650_v16, %s14928_s5  ;;  %3847 = vmatpush1.bf16.msra.mxu0 %v1312_v23  ;;  %v1770_v16 = vld [vmem:[#allocation7 + $0x38] sm:$0xff]  ;;  %v15843_v61 = vpack.c.bf16 %v1777_v42, %v1775_v7  ;;  %v15885_v19 = vld [vmem:[%s20363_s4 + $0x48] sm:$0xff]  ;;  %v1788_v42 = vld [vmem:[#allocation7 + $0xc8] sm:$0xff] }
 0x488   :  { %1831 = vrot.lane.b32.xlu1 %v15817_v26, %s14929_s25  ;;  %v1300_v29 = vpop.permute.xlu1 %1299  ;;  %3815 = vmatprep.mubr.bf16.mxu0 %v13008_v18  ;;  %v15839_v22 = vpack.c.bf16 %v1770_v16, %v1768_v40  ;;  %v15880_v18 = vld [vmem:[%s20363_s4 + $0x8] sm:$0xff]  ;;  %v1790_v16 = vld [vmem:[#allocation7 + $0xd8] sm:$0xff] }
 0x489   :  { %v1294_v6 = vpop.permute.xlu0 %1293  ;;  %v3232_v8 = vld [vmem:[#allocation3 + $0x118] sm:$0xff]  ;;  %v12994_v34 = vcombine.high %v15880_v18, %v15885_v19  ;;  %v1794_v7 = vld [vmem:[#allocation7 + $0xf8] sm:$0xff] }
 0x48a   :  { %v1315_v55 = vsel %vm1311_vm6, %v1292_v30, %v1294_v6  ;;  %1343 = vst.msk [vmem:[#allocation3 + $0x138] sm:$0xff] %vm1062_vm4, %v1294_v6  ;;  %3848 = vmatprep.subr.bf16.mxu0 %v3232_v8  ;;  %v15869_v30 = vpack.c.bf16 %v1785_v39, %v1783_v45 }
 0x48b   :  { %1829 = vrot.lane.b32.xlu0 %v15823_v4, %s14929_s25  ;;  %3849 = vmatpush1.bf16.msra.mxu0 %v1313_v1 }
 0x48c   :  { %1835 = vrot.lane.b32.xlu1 %v15833_v38, %s14929_s25  ;;  %v1304_v46 = vpop.permute.xlu1 %1303 }
 0x48d   :  { %v1298_v62 = vpop.permute.xlu0 %1297  ;;  %v3234_v31 = vld [vmem:[#allocation3 + $0x128] sm:$0xff] }
 0x48e   :  { %v1316_v14 = vsel %vm1311_vm6, %v1296_v10, %v1298_v62  ;;  %1345 = vst.msk [vmem:[#allocation3 + $0x148] sm:$0xff] %vm1062_vm4, %v1298_v62  ;;  %3850 = vmatprep.subr.bf16.mxu0 %v3234_v31  ;;  %3816 = vmatmul.mubr.bf16.gmra.mrb[4].mxu0 %v13007_v36  ;;  %v15875_v10 = vpack.c.bf16 %v1782_v58, %v1780_v27 }
 0x48f   :  { %1833 = vrot.lane.b32.xlu0 %v15839_v22, %s14929_s25  ;;  %3851 = vmatpush1.bf16.msra.mxu0 %v1314_v47  ;;  %v15889_v47 = vpack.c.bf16 %v1789_v48, %v1787_v63  ;;  %v15901_v36 = vpack.c.bf16 %v1793_v2, %v1791_v9  ;;  %v15907_v62 = vpack.c.bf16 %v1790_v16, %v1788_v42 }
 0x490   :  { %1839 = vrot.lane.b32.xlu1 %v15843_v61, %s14929_s25  ;;  %v1308_v44 = vpop.permute.xlu1 %1307  ;;  %3825 = vmatprep.mubr.bf16.mxu0 %v13024_v57 }
 0x491   :  { %v1302_v13 = vpop.permute.xlu0 %1301  ;;  %v3236_v49 = vld [vmem:[#allocation3 + $0x138] sm:$0xff] }
 0x492   :  { %v1317_v52 = vsel %vm1311_vm6, %v1300_v29, %v1302_v13  ;;  %1347 = vst.msk [vmem:[#allocation3 + $0x158] sm:$0xff] %vm1062_vm4, %v1302_v13  ;;  %3852 = vmatprep.subr.bf16.mxu0 %v3236_v49 }
 0x493   :  { %1837 = vrot.lane.b32.xlu0 %v15849_v50, %s14929_s25  ;;  %3853 = vmatpush1.bf16.msra.mxu0 %v1315_v55 }
 0x494   :  { %1843 = vrot.lane.b32.xlu1 %v15859_v0, %s14929_s25  ;;  %v1417_v41 = vpop.permute.xlu1 %1416 }
 0x495   :  { %v1306_v28 = vpop.permute.xlu0 %1305  ;;  %v3238_v43 = vld [vmem:[#allocation3 + $0x148] sm:$0xff] }
 0x496   :  { %v1318_v23 = vsel %vm1311_vm6, %v1304_v46, %v1306_v28  ;;  %1349 = vst.msk [vmem:[#allocation3 + $0x168] sm:$0xff] %vm1062_vm4, %v1306_v28  ;;  %3854 = vmatprep.subr.bf16.mxu0 %v3238_v43  ;;  %3826 = vmatmul.mubr.bf16.gmra.mrb[8].mxu0 %v13023_v35 }
 0x497   :  { %1841 = vrot.lane.b32.xlu0 %v15865_v15, %s14929_s25  ;;  %3855 = vmatpush1.bf16.msra.mxu0 %v1316_v14  ;;  %v1792_v14 = vld [vmem:[#allocation7 + $0xe8] sm:$0xff] }
 0x498   :  { %1847 = vrot.lane.b32.xlu1 %v15869_v30, %s14929_s25  ;;  %v1421_v20 = vpop.permute.xlu1 %1420  ;;  %3835 = vmatprep.mubr.bf16.mxu0 %v13040_v25 }
 0x499   :  { %v1310_v1 = vpop.permute.xlu0 %1309  ;;  %v3240_v60 = vld [vmem:[#allocation3 + $0x158] sm:$0xff] }
 0x49a   :  { %v1319_v53 = vsel %vm1311_vm6, %v1308_v44, %v1310_v1  ;;  %1351 = vst.msk [vmem:[#allocation3 + $0x178] sm:$0xff] %vm1062_vm4, %v1310_v1  ;;  %3856 = vmatprep.subr.bf16.mxu0 %v3240_v60  ;;  %v15915_v44 = vpack.c.bf16 %v1794_v7, %v1792_v14 }
 0x49b   :  { %1845 = vrot.lane.b32.xlu0 %v15875_v10, %s14929_s25  ;;  %3857 = vmatpush1.bf16.msra.mxu0 %v1317_v52 }
 0x49c   :  { %1851 = vrot.lane.b32.xlu1 %v15889_v47, %s14929_s25  ;;  %v1425_v29 = vpop.permute.xlu1 %1424 }
 0x49d   :  { %v1419_v6 = vpop.permute.xlu0 %1418  ;;  %v3242_v8 = vld [vmem:[#allocation3 + $0x168] sm:$0xff] }
 0x49e   :  { %v1449_v55 = vsel %vm1448_vm7, %v1417_v41, %v1419_v6  ;;  %1474 = vst.msk [vmem:[#allocation3 + $0x188] sm:$0xff] %vm1062_vm4, %v1419_v6  ;;  %3858 = vmatprep.subr.bf16.mxu0 %v3242_v8  ;;  %3836 = vmatmul.mubr.bf16.gmra.mrb[12].mxu0 %v13039_v21  ;;  %v12993_v8 = vcombine.low %v15880_v18, %v15885_v19 }
 0x49f   :  { %1849 = vrot.lane.b32.xlu0 %v15897_v11, %s14929_s25  ;;  %3859 = vmatpush1.bf16.msra.mxu0 %v1318_v23 }
 0x4a0   :  { %1855 = vrot.lane.b32.xlu1 %v15901_v36, %s14929_s25  ;;  %v1429_v40 = vpop.permute.xlu1 %1428  ;;  %3878 = vmatprep.mubr.bf16.mxu0 %v12994_v34  ;;  %v3158_v34 = vld [vmem:[%s20363_s4 + $0xc8] sm:$0xff] }
 0x4a1   :  { %v1423_v46 = vpop.permute.xlu0 %1422  ;;  %v3244_v57 = vld [vmem:[#allocation3 + $0x178] sm:$0xff] }
 0x4a2   :  { %v1450_v31 = vsel %vm1448_vm7, %v1421_v20, %v1423_v46  ;;  %1476 = vst.msk [vmem:[#allocation3 + $0x198] sm:$0xff] %vm1062_vm4, %v1423_v46  ;;  %3860 = vmatprep.subr.bf16.mxu0 %v3244_v57  ;;  %v3166_v57 = vld [vmem:[%s20363_s4 + $0x108] sm:$0xff] }
 0x4a3   :  { %1853 = vrot.lane.b32.xlu0 %v15907_v62, %s14929_s25  ;;  %3861 = vmatpush1.bf16.msra.mxu0 %v1319_v53 }
 0x4a4   :  { %1964 = vrot.lane.b32.xlu1 %v15798_v33, %s14930_s0  ;;  %v1433_v12 = vpop.permute.xlu1 %1432 }
 0x4a5   :  { %v1427_v17 = vpop.permute.xlu0 %1426  ;;  %v3246_v54 = vld [vmem:[#allocation3 + $0x188] sm:$0xff] }
 0x4a6   :  { %v1451_v51 = vsel %vm1448_vm7, %v1425_v29, %v1427_v17  ;;  %1478 = vst.msk [vmem:[#allocation3 + $0x1a8] sm:$0xff] %vm1062_vm4, %v1427_v17  ;;  %3862 = vmatprep.subr.bf16.mxu0 %v3246_v54  ;;  %v3150_v29 = vld [vmem:[%s20363_s4 + $0x88] sm:$0xff] }
 0x4a7   :  { %1857 = vrot.lane.b32.xlu0 %v15915_v44, %s14929_s25  ;;  %3863 = vmatpush1.bf16.msra.mxu0 %v1449_v55  ;;  %v13010_v55 = vcombine.high %v3150_v29, %v3158_v34  ;;  %v13009_v14 = vcombine.low %v3150_v29, %v3158_v34 }
 0x4a8   :  { %1968 = vrot.lane.b32.xlu1 %v15817_v26, %s14930_s0  ;;  %v1437_v13 = vpop.permute.xlu1 %1436 }
 0x4a9   :  { %v1431_v49 = vpop.permute.xlu0 %1430  ;;  %v3248_v56 = vld [vmem:[#allocation3 + $0x198] sm:$0xff] }
 0x4aa   :  { %v1452_v59 = vsel %vm1448_vm7, %v1429_v40, %v1431_v49  ;;  %1480 = vst.msk [vmem:[#allocation3 + $0x1b8] sm:$0xff] %vm1062_vm4, %v1431_v49  ;;  %3864 = vmatprep.subr.bf16.mxu0 %v3248_v56 }
 0x4ab   :  { %1966 = vrot.lane.b32.xlu0 %v15823_v4, %s14930_s0  ;;  %3865 = vmatpush1.bf16.msra.mxu0 %v1450_v31  ;;  %v3174_v31 = vld [vmem:[%s20363_s4 + $0x148] sm:$0xff] }
 0x4ac   :  { %1972 = vrot.lane.b32.xlu1 %v15833_v38, %s14930_s0  ;;  %v1441_v52 = vpop.permute.xlu1 %1440  ;;  %v13026_v17 = vcombine.high %v3166_v57, %v3174_v31 }
 0x4ad   :  { %v1435_v24 = vpop.permute.xlu0 %1434  ;;  %v3250_v35 = vld [vmem:[#allocation3 + $0x1a8] sm:$0xff] }
 0x4ae   :  { %v1453_v39 = vsel %vm1448_vm7, %v1433_v12, %v1435_v24  ;;  %1482 = vst.msk [vmem:[#allocation3 + $0x1c8] sm:$0xff] %vm1062_vm4, %v1435_v24  ;;  %3866 = vmatprep.subr.bf16.mxu0 %v3250_v35  ;;  %v3190_v24 = vld [vmem:[%s20363_s4 + $0x1c8] sm:$0xff] }
 0x4af   :  { %1970 = vrot.lane.b32.xlu0 %v15839_v22, %s14930_s0  ;;  %3867 = vmatpush1.bf16.msra.mxu0 %v1451_v51 }
 0x4b0   :  { %1976 = vrot.lane.b32.xlu1 %v15843_v61, %s14930_s0  ;;  %v1445_v37 = vpop.permute.xlu1 %1444 }
 0x4b1   :  { %v1439_v41 = vpop.permute.xlu0 %1438  ;;  %v3252_v25 = vld [vmem:[#allocation3 + $0x1b8] sm:$0xff] }
 0x4b2   :  { %v1454_v28 = vsel %vm1448_vm7, %v1437_v13, %v1439_v41  ;;  %1484 = vst.msk [vmem:[#allocation3 + $0x1d8] sm:$0xff] %vm1062_vm4, %v1439_v41  ;;  %3868 = vmatprep.subr.bf16.mxu0 %v3252_v25 }
 0x4b3   :  { %1974 = vrot.lane.b32.xlu0 %v15849_v50, %s14930_s0  ;;  %3869 = vmatpush1.bf16.msra.mxu0 %v1452_v59 }
 0x4b4   :  { %1980 = vrot.lane.b32.xlu1 %v15859_v0, %s14930_s0  ;;  %v1554_v43 = vpop.permute.xlu1 %1553 }
 0x4b5   :  { %v1443_v45 = vpop.permute.xlu0 %1442  ;;  %v3254_v23 = vld [vmem:[#allocation3 + $0x1c8] sm:$0xff] }
 0x4b6   :  { %v1455_v58 = vsel %vm1448_vm7, %v1441_v52, %v1443_v45  ;;  %1486 = vst.msk [vmem:[#allocation3 + $0x1e8] sm:$0xff] %vm1062_vm4, %v1443_v45  ;;  %3870 = vmatprep.subr.bf16.mxu0 %v3254_v23  ;;  %v3182_v52 = vld [vmem:[%s20363_s4 + $0x188] sm:$0xff] }
 0x4b7   :  { %1978 = vrot.lane.b32.xlu0 %v15865_v15, %s14930_s0  ;;  %3871 = vmatpush1.bf16.msra.mxu0 %v1453_v39  ;;  %v13025_v39 = vcombine.low %v3166_v57, %v3174_v31  ;;  %v13042_v41 = vcombine.high %v3182_v52, %v3190_v24 }
 0x4b8   :  { %1984 = vrot.lane.b32.xlu1 %v15869_v30, %s14930_s0  ;;  %v1558_v48 = vpop.permute.xlu1 %1557 }
 0x4b9   :  { %v1447_v27 = vpop.permute.xlu0 %1446  ;;  %v3256_v20 = vld [vmem:[#allocation3 + $0x1d8] sm:$0xff] }
 0x4ba   :  { %v1456_v63 = vsel %vm1448_vm7, %v1445_v37, %v1447_v27  ;;  %1488 = vst.msk [vmem:[#allocation3 + $0x1f8] sm:$0xff] %vm1062_vm4, %v1447_v27  ;;  %3872 = vmatprep.subr.bf16.mxu0 %v3256_v20  ;;  %v16023_v27 = vld [vmem:[%s20363_s4 + $0x50] sm:$0xff]  ;;  %vm3092_vm7 = vcmask 777216  }
 0x4bb   :  { %1982 = vrot.lane.b32.xlu0 %v15875_v10, %s14930_s0  ;;  %3873 = vmatpush1.bf16.msra.mxu0 %v1454_v28 }
 0x4bc   :  { %1988 = vrot.lane.b32.xlu1 %v15889_v47, %s14930_s0  ;;  %v1562_v1 = vpop.permute.xlu1 %1561 }
 0x4bd   :  { %v1556_v60 = vpop.permute.xlu0 %1555  ;;  %v3258_v53 = vld [vmem:[#allocation3 + $0x1e8] sm:$0xff] }
 0x4be   :  { %v1586_v32 = vsel %vm1585_vm8, %v1554_v43, %v1556_v60  ;;  %1611 = vst.msk [vmem:[#allocation3 + $0x208] sm:$0xff] %vm1062_vm4, %v1556_v60  ;;  %3874 = vmatprep.subr.bf16.mxu0 %v3258_v53 }
 0x4bf   :  { %1986 = vrot.lane.b32.xlu0 %v15897_v11, %s14930_s0  ;;  %3875 = vmatpush1.bf16.msra.mxu0 %v1455_v58 }
 0x4c0   :  { %1992 = vrot.lane.b32.xlu1 %v15901_v36, %s14930_s0  ;;  %v1566_v21 = vpop.permute.xlu1 %1565 }
 0x4c1   :  { %v1560_v2 = vpop.permute.xlu0 %1559  ;;  %v3260_v5 = vld [vmem:[#allocation3 + $0x1f8] sm:$0xff] }
 0x4c2   :  { %v1587_v6 = vsel %vm1585_vm8, %v1558_v48, %v1560_v2  ;;  %1613 = vst.msk [vmem:[#allocation3 + $0x218] sm:$0xff] %vm1062_vm4, %v1560_v2  ;;  %3876 = vmatprep.subr.bf16.mxu0 %v3260_v5  ;;  %v16018_v48 = vld [vmem:[%s20363_s4 + $0x10] sm:$0xff] }
 0x4c3   :  { %1990 = vrot.lane.b32.xlu0 %v15907_v62, %s14930_s0  ;;  %3877 = vmatpush1.bf16.msra.mxu0 %v1456_v63  ;;  %v13041_v63 = vcombine.low %v3182_v52, %v3190_v24  ;;  %v12996_v60 = vcombine.high %v16018_v48, %v16023_v27 }
 0x4c4   :  { %2101 = vrot.lane.b32.xlu1 %v15798_v33, %s14931_s26  ;;  %v1570_v9 = vpop.permute.xlu1 %1569 }
 0x4c5   :  { %v1564_v16 = vpop.permute.xlu0 %1563  ;;  %v3262_v42 = vld [vmem:[#allocation3 + $0x208] sm:$0xff] }
 0x4c6   :  { %v1588_v40 = vsel %vm1585_vm8, %v1562_v1, %v1564_v16  ;;  %1615 = vst.msk [vmem:[#allocation3 + $0x228] sm:$0xff] %vm1062_vm4, %v1564_v16  ;;  %3919 = vmatprep.subr.bf16.mxu0 %v3262_v42  ;;  %3879 = vmatmul.mubr.bf16.vlgmr.msra.gmra.mrb[0].mxu0 %v12993_v8 }
 0x4c7   :  { %1994 = vrot.lane.b32.xlu0 %v15915_v44, %s14930_s0  ;;  %3920 = vmatpush1.bf16.msra.mxu0 %v1586_v32  ;;  %s14938_s0 = smov 95  }
 0x4c8   :  { %2105 = vrot.lane.b32.xlu1 %v15817_v26, %s14931_s26  ;;  %v1574_v18 = vpop.permute.xlu1 %1573  ;;  %3888 = vmatprep.mubr.bf16.mxu0 %v13010_v55 }
 0x4c9   :  { %v1568_v19 = vpop.permute.xlu0 %1567  ;;  %v3264_v46 = vld [vmem:[#allocation3 + $0x218] sm:$0xff] }
 0x4ca   :  { %v1589_v7 = vsel %vm1585_vm8, %v1566_v21, %v1568_v19  ;;  %1617 = vst.msk [vmem:[#allocation3 + $0x238] sm:$0xff] %vm1062_vm4, %v1568_v19  ;;  %3921 = vmatprep.subr.bf16.mxu0 %v3264_v46 }
 0x4cb   :  { %2103 = vrot.lane.b32.xlu0 %v15823_v4, %s14931_s26  ;;  %3922 = vmatpush1.bf16.msra.mxu0 %v1587_v6 }
 0x4cc   :  { %2109 = vrot.lane.b32.xlu1 %v15833_v38, %s14931_s26  ;;  %v1578_v12 = vpop.permute.xlu1 %1577 }
 0x4cd   :  { %v1572_v54 = vpop.permute.xlu0 %1571  ;;  %v3266_v51 = vld [vmem:[#allocation3 + $0x228] sm:$0xff] }
 0x4ce   :  { %v1590_v13 = vsel %vm1585_vm8, %v1570_v9, %v1572_v54  ;;  %1619 = vst.msk [vmem:[#allocation3 + $0x248] sm:$0xff] %vm1062_vm4, %v1572_v54  ;;  %3923 = vmatprep.subr.bf16.mxu0 %v3266_v51  ;;  %3889 = vmatmul.mubr.bf16.gmra.mrb[4].mxu0 %v13009_v14 }
 0x4cf   :  { %2107 = vrot.lane.b32.xlu0 %v15839_v22, %s14931_s26  ;;  %3924 = vmatpush1.bf16.msra.mxu0 %v1588_v40 }
 0x4d0   :  { %2113 = vrot.lane.b32.xlu1 %v15843_v61, %s14931_s26  ;;  %v1582_v49 = vpop.permute.xlu1 %1581  ;;  %3898 = vmatprep.mubr.bf16.mxu0 %v13026_v17 }
 0x4d1   :  { %v1576_v56 = vpop.permute.xlu0 %1575  ;;  %v3268_v59 = vld [vmem:[#allocation3 + $0x238] sm:$0xff] }
 0x4d2   :  { %v1591_v35 = vsel %vm1585_vm8, %v1574_v18, %v1576_v56  ;;  %1621 = vst.msk [vmem:[#allocation3 + $0x258] sm:$0xff] %vm1062_vm4, %v1576_v56  ;;  %3925 = vmatprep.subr.bf16.mxu0 %v3268_v59  ;;  %v3159_v59 = vld [vmem:[%s20363_s4 + $0xd0] sm:$0xff] }
 0x4d3   :  { %2111 = vrot.lane.b32.xlu0 %v15849_v50, %s14931_s26  ;;  %3926 = vmatpush1.bf16.msra.mxu0 %v1589_v7 }
 0x4d4   :  { %2117 = vrot.lane.b32.xlu1 %v15859_v0, %s14931_s26  ;;  %v1691_v37 = vpop.permute.xlu1 %1690 }
 0x4d5   :  { %v1580_v25 = vpop.permute.xlu0 %1579  ;;  %v3270_v28 = vld [vmem:[#allocation3 + $0x248] sm:$0xff] }
 0x4d6   :  { %v1592_v43 = vsel %vm1585_vm8, %v1578_v12, %v1580_v25  ;;  %1623 = vst.msk [vmem:[#allocation3 + $0x268] sm:$0xff] %vm1062_vm4, %v1580_v25  ;;  %3927 = vmatprep.subr.bf16.mxu0 %v3270_v28  ;;  %3899 = vmatmul.mubr.bf16.gmra.mrb[8].mxu0 %v13025_v39  ;;  %v2315_v25 = vld [vmem:[#allocation7 + $0x20] sm:$0xff] }
 0x4d7   :  { %2115 = vrot.lane.b32.xlu0 %v15865_v15, %s14931_s26  ;;  %3928 = vmatpush1.bf16.msra.mxu0 %v1590_v13  ;;  %v2313_v13 = vld [vmem:[#allocation7 + $0x10] sm:$0xff] }
 0x4d8   :  { %2121 = vrot.lane.b32.xlu1 %v15869_v30, %s14931_s26  ;;  %v1695_v45 = vpop.permute.xlu1 %1694  ;;  %3908 = vmatprep.mubr.bf16.mxu0 %v13042_v41 }
 0x4d9   :  { %v1584_v23 = vpop.permute.xlu0 %1583  ;;  %v3272_v58 = vld [vmem:[#allocation3 + $0x258] sm:$0xff] }
 0x4da   :  { %v1593_v20 = vsel %vm1585_vm8, %v1582_v49, %v1584_v23  ;;  %1625 = vst.msk [vmem:[#allocation3 + $0x278] sm:$0xff] %vm1062_vm4, %v1584_v23  ;;  %3929 = vmatprep.subr.bf16.mxu0 %v3272_v58  ;;  %v2312_v58 = vld [vmem:[#allocation7 + $0x8] sm:$0xff] }
 0x4db   :  { %2119 = vrot.lane.b32.xlu0 %v15875_v10, %s14931_s26  ;;  %3930 = vmatpush1.bf16.msra.mxu0 %v1591_v35  ;;  %v2317_v35 = vld [vmem:[#allocation7 + $0x30] sm:$0xff] }
 0x4dc   :  { %2125 = vrot.lane.b32.xlu1 %v15889_v47, %s14931_s26  ;;  %v1699_v1 = vpop.permute.xlu1 %1698  ;;  %v16105_v23 = vpack.c.bf16 %v2317_v35, %v2315_v25  ;;  %v2334_v25 = vld [vmem:[#allocation7 + $0xb8] sm:$0xff] }
 0x4dd   :  { %v1693_v53 = vpop.permute.xlu0 %1692  ;;  %v3274_v32 = vld [vmem:[#allocation3 + $0x268] sm:$0xff] }
 0x4de   :  { %v1723_v21 = vsel %vm1722_vm9, %v1691_v37, %v1693_v53  ;;  %1748 = vst.msk [vmem:[#allocation3 + $0x288] sm:$0xff] %vm1062_vm4, %v1693_v53  ;;  %3931 = vmatprep.subr.bf16.mxu0 %v3274_v32  ;;  %3909 = vmatmul.mubr.bf16.gmra.mrb[12].mxu0 %v13041_v63  ;;  %v2318_v53 = vld [vmem:[#allocation7 + $0x38] sm:$0xff] }
 0x4df   :  { %2123 = vrot.lane.b32.xlu0 %v15897_v11, %s14931_s26  ;;  %3932 = vmatpush1.bf16.msra.mxu0 %v1592_v43  ;;  %v2314_v43 = vld [vmem:[#allocation7 + $0x18] sm:$0xff] }
 0x4e0   :  { %2129 = vrot.lane.b32.xlu1 %v15901_v36, %s14931_s26  ;;  %v1703_v2 = vpop.permute.xlu1 %1702  ;;  %3951 = vmatprep.mubr.bf16.mxu0 %v12996_v60  ;;  %v16111_v63 = vpack.c.bf16 %v2314_v43, %v2312_v58  ;;  %v2332_v58 = vld [vmem:[#allocation7 + $0xa8] sm:$0xff] }
 0x4e1   :  { %v1697_v5 = vpop.permute.xlu0 %1696  ;;  %v3276_v29 = vld [vmem:[#allocation3 + $0x278] sm:$0xff] }
 0x4e2   :  { %v1724_v34 = vsel %vm1722_vm9, %v1695_v45, %v1697_v5  ;;  %1750 = vst.msk [vmem:[#allocation3 + $0x298] sm:$0xff] %vm1062_vm4, %v1697_v5  ;;  %3933 = vmatprep.subr.bf16.mxu0 %v3276_v29  ;;  %v2325_v5 = vld [vmem:[#allocation7 + $0x70] sm:$0xff]  ;;  %v2316_v29 = vld [vmem:[#allocation7 + $0x28] sm:$0xff] }
 0x4e3   :  { %2127 = vrot.lane.b32.xlu0 %v15907_v62, %s14931_s26  ;;  %3934 = vmatpush1.bf16.msra.mxu0 %v1593_v20 }
 0x4e4   :  { %2238 = vrot.lane.b32.xlu1 %v15798_v33, %s14932_s29  ;;  %v1707_v6 = vpop.permute.xlu1 %1706 }
 0x4e5   :  { %v1701_v8 = vpop.permute.xlu0 %1700  ;;  %v3278_v9 = vld [vmem:[#allocation3 + $0x288] sm:$0xff] }
 0x4e6   :  { %v1725_v55 = vsel %vm1722_vm9, %v1699_v1, %v1701_v8  ;;  %1752 = vst.msk [vmem:[#allocation3 + $0x2a8] sm:$0xff] %vm1062_vm4, %v1701_v8  ;;  %3935 = vmatprep.subr.bf16.mxu0 %v3278_v9  ;;  %v3167_v1 = vld [vmem:[%s20363_s4 + $0x110] sm:$0xff]  ;;  %v16127_v9 = vpack.c.bf16 %v2318_v53, %v2316_v29 }
 0x4e7   :  { %2131 = vrot.lane.b32.xlu0 %v15915_v44, %s14931_s26  ;;  %3936 = vmatpush1.bf16.msra.mxu0 %v1723_v21  ;;  %v2338_v53 = vld [vmem:[#allocation7 + $0xd8] sm:$0xff] }
 0x4e8   :  { %2242 = vrot.lane.b32.xlu1 %v15817_v26, %s14932_s29  ;;  %v1711_v16 = vpop.permute.xlu1 %1710 }
 0x4e9   :  { %v1705_v42 = vpop.permute.xlu0 %1704  ;;  %v3280_v40 = vld [vmem:[#allocation3 + $0x298] sm:$0xff] }
 0x4ea   :  { %v1726_v33 = vsel %vm1722_vm9, %v1703_v2, %v1705_v42  ;;  %1754 = vst.msk [vmem:[#allocation3 + $0x2b8] sm:$0xff] %vm1062_vm4, %v1705_v42  ;;  %3937 = vmatprep.subr.bf16.mxu0 %v3280_v40  ;;  %v2322_v42 = vld [vmem:[#allocation7 + $0x58] sm:$0xff] }
 0x4eb   :  { %2240 = vrot.lane.b32.xlu0 %v15823_v4, %s14932_s29  ;;  %3938 = vmatpush1.bf16.msra.mxu0 %v1724_v34 }
 0x4ec   :  { %2246 = vrot.lane.b32.xlu1 %v15833_v38, %s14932_s29  ;;  %v1715_v18 = vpop.permute.xlu1 %1714 }
 0x4ed   :  { %v1709_v19 = vpop.permute.xlu0 %1708  ;;  %v3282_v46 = vld [vmem:[#allocation3 + $0x2a8] sm:$0xff] }
 0x4ee   :  { %v1727_v26 = vsel %vm1722_vm9, %v1707_v6, %v1709_v19  ;;  %1756 = vst.msk [vmem:[#allocation3 + $0x2c8] sm:$0xff] %vm1062_vm4, %v1709_v19  ;;  %3939 = vmatprep.subr.bf16.mxu0 %v3282_v46  ;;  %v2320_v19 = vld [vmem:[#allocation7 + $0x48] sm:$0xff]  ;;  %v2327_v46 = vld [vmem:[#allocation7 + $0x80] sm:$0xff] }
 0x4ef   :  { %2244 = vrot.lane.b32.xlu0 %v15839_v22, %s14932_s29  ;;  %3940 = vmatpush1.bf16.msra.mxu0 %v1725_v55  ;;  %v2323_v55 = vld [vmem:[#allocation7 + $0x60] sm:$0xff] }
 0x4f0   :  { %2250 = vrot.lane.b32.xlu1 %v15843_v61, %s14932_s29  ;;  %v1719_v4 = vpop.permute.xlu1 %1718 }
 0x4f1   :  { %v1713_v57 = vpop.permute.xlu0 %1712  ;;  %v3284_v31 = vld [vmem:[#allocation3 + $0x2b8] sm:$0xff] }
 0x4f2   :  { %v1728_v38 = vsel %vm1722_vm9, %v1711_v16, %v1713_v57  ;;  %1758 = vst.msk [vmem:[#allocation3 + $0x2d8] sm:$0xff] %vm1062_vm4, %v1713_v57  ;;  %3941 = vmatprep.subr.bf16.mxu0 %v3284_v31  ;;  %v16137_v57 = vpack.c.bf16 %v2322_v42, %v2320_v19  ;;  %v3183_v31 = vld [vmem:[%s20363_s4 + $0x190] sm:$0xff]  ;;  %v2340_v42 = vld [vmem:[#allocation7 + $0xe8] sm:$0xff] }
 0x4f3   :  { %2248 = vrot.lane.b32.xlu0 %v15849_v50, %s14932_s29  ;;  %3942 = vmatpush1.bf16.msra.mxu0 %v1726_v33  ;;  %v16131_v33 = vpack.c.bf16 %v2325_v5, %v2323_v55  ;;  %v2336_v5 = vld [vmem:[#allocation7 + $0xc8] sm:$0xff]  ;;  %v2342_v55 = vld [vmem:[#allocation7 + $0xf8] sm:$0xff] }
 0x4f4   :  { %2254 = vrot.lane.b32.xlu1 %v15859_v0, %s14932_s29  ;;  %v1828_v22 = vpop.permute.xlu1 %1827  ;;  %v16203_v19 = vpack.c.bf16 %v2342_v55, %v2340_v42 }
 0x4f5   :  { %v1717_v7 = vpop.permute.xlu0 %1716  ;;  %v3286_v14 = vld [vmem:[#allocation3 + $0x2c8] sm:$0xff] }
 0x4f6   :  { %v1729_v61 = vsel %vm1722_vm9, %v1715_v18, %v1717_v7  ;;  %1760 = vst.msk [vmem:[#allocation3 + $0x2e8] sm:$0xff] %vm1062_vm4, %v1717_v7  ;;  %3943 = vmatprep.subr.bf16.mxu0 %v3286_v14  ;;  %v2329_v18 = vld [vmem:[#allocation7 + $0x90] sm:$0xff]  ;;  %v2326_v7 = vld [vmem:[#allocation7 + $0x78] sm:$0xff] }
 0x4f7   :  { %2252 = vrot.lane.b32.xlu0 %v15865_v15, %s14932_s29  ;;  %3944 = vmatpush1.bf16.msra.mxu0 %v1727_v26 }
 0x4f8   :  { %2258 = vrot.lane.b32.xlu1 %v15869_v30, %s14932_s29 }
 0x4f9   :  { %v1721_v50 = vpop.permute.xlu0 %1720  ;;  %v3288_v12 = vld [vmem:[#allocation3 + $0x2d8] sm:$0xff] }
 0x4fa   :  { %v1730_v17 = vsel %vm1722_vm9, %v1719_v4, %v1721_v50  ;;  %1762 = vst.msk [vmem:[#allocation3 + $0x2f8] sm:$0xff] %vm1062_vm4, %v1721_v50  ;;  %3945 = vmatprep.subr.bf16.mxu0 %v3288_v12  ;;  %v1832_v0 = vpop.permute.xlu1 %1831  ;;  %v2333_v12 = vld [vmem:[#allocation7 + $0xb0] sm:$0xff] }
 0x4fb   :  { %2256 = vrot.lane.b32.xlu0 %v15875_v10, %s14932_s29  ;;  %3946 = vmatpush1.bf16.msra.mxu0 %v1728_v38  ;;  %v2311_v10 = vld [vmem:[#allocation7] sm:$0xff]  ;;  %v3191_v38 = vld [vmem:[%s20363_s4 + $0x1d0] sm:$0xff] }
 0x4fc   :  { %2262 = vrot.lane.b32.xlu1 %v15889_v47, %s14932_s29  ;;  %v3151_v47 = vld [vmem:[%s20363_s4 + $0x90] sm:$0xff]  ;;  %v16097_v24 = vpack.c.bf16 %v2313_v13, %v2311_v10 }
 0x4fd   :  { %v1830_v15 = vpop.permute.xlu0 %1829  ;;  %v3290_v54 = vld [vmem:[#allocation3 + $0x2e8] sm:$0xff]  ;;  %v13012_v39 = vcombine.high %v3151_v47, %v3159_v59  ;;  %v13011_v2 = vcombine.low %v3151_v47, %v3159_v59  ;;  %v2330_v10 = vld [vmem:[#allocation7 + $0x98] sm:$0xff]  ;;  %v2328_v59 = vld [vmem:[#allocation7 + $0x88] sm:$0xff] }
 0x4fe   :  { %v1860_v30 = vsel %vm1859_vm10, %v1828_v22, %v1830_v15  ;;  %1885 = vst.msk [vmem:[#allocation3 + $0x308] sm:$0xff] %vm1062_vm4, %v1830_v15  ;;  %3947 = vmatprep.subr.bf16.mxu0 %v3290_v54  ;;  %v1836_v51 = vpop.permute.xlu1 %1835  ;;  %v2337_v47 = vld [vmem:[#allocation7 + $0xd0] sm:$0xff]  ;;  %v16163_v35 = vpack.c.bf16 %v2330_v10, %v2328_v59 }
 0x4ff   :  { %2260 = vrot.lane.b32.xlu0 %v15897_v11, %s14932_s29  ;;  %3948 = vmatpush1.bf16.msra.mxu0 %v1729_v61  ;;  %v12995_v11 = vcombine.low %v16018_v48, %v16023_v27  ;;  %v2319_v48 = vld [vmem:[#allocation7 + $0x40] sm:$0xff]  ;;  %v16147_v61 = vpack.c.bf16 %v2329_v18, %v2327_v46 }
 0x500   :  { %2266 = vrot.lane.b32.xlu1 %v15901_v36, %s14932_s29 }
 0x501   :  { %v1834_v49 = vpop.permute.xlu0 %1833  ;;  %v3292_v56 = vld [vmem:[#allocation3 + $0x2f8] sm:$0xff] }
 0x502   :  { %v1861_v52 = vsel %vm1859_vm10, %v1832_v0, %v1834_v49  ;;  %1887 = vst.msk [vmem:[#allocation3 + $0x318] sm:$0xff] %vm1062_vm4, %v1834_v49  ;;  %3949 = vmatprep.subr.bf16.mxu0 %v3292_v56  ;;  %v1840_v36 = vpop.permute.xlu1 %1839  ;;  %v13044_v0 = vcombine.high %v3183_v31, %v3191_v38 }
 0x503   :  { %2264 = vrot.lane.b32.xlu0 %v15907_v62, %s14932_s29  ;;  %3950 = vmatpush1.bf16.msra.mxu0 %v1730_v17  ;;  %v2321_v62 = vld [vmem:[#allocation7 + $0x50] sm:$0xff]  ;;  %v2324_v17 = vld [vmem:[#allocation7 + $0x68] sm:$0xff] }
 0x504   :  { %2375 = vrot.lane.b32.xlu1 %v16097_v24, %s14933_s6  ;;  %v16121_v21 = vpack.c.bf16 %v2321_v62, %v2319_v48  ;;  %v2341_v62 = vld [vmem:[#allocation7 + $0xf0] sm:$0xff] }
 0x505   :  { %v1838_v37 = vpop.permute.xlu0 %1837  ;;  %v3294_v41 = vld [vmem:[#allocation3 + $0x308] sm:$0xff] }
 0x506   :  { %v1862_v28 = vsel %vm1859_vm10, %v1836_v51, %v1838_v37  ;;  %1889 = vst.msk [vmem:[#allocation3 + $0x328] sm:$0xff] %vm1062_vm4, %v1838_v37  ;;  %3992 = vmatprep.subr.bf16.mxu0 %v3294_v41  ;;  %3952 = vmatmul.mubr.bf16.vlgmr.msra.gmra.mrb[0].mxu0 %v12995_v11  ;;  %v1844_v45 = vpop.permute.xlu1 %1843  ;;  %v2331_v51 = vld [vmem:[#allocation7 + $0xa0] sm:$0xff] }
 0x507   :  { %2268 = vrot.lane.b32.xlu0 %v15915_v44, %s14932_s29  ;;  %3993 = vmatpush1.bf16.msra.mxu0 %v1860_v30  ;;  %v3175_v44 = vld [vmem:[%s20363_s4 + $0x150] sm:$0xff]  ;;  %v16153_v30 = vpack.c.bf16 %v2326_v7, %v2324_v17  ;;  %v16157_v56 = vpack.c.bf16 %v2333_v12, %v2331_v51  ;;  %v16173_v37 = vld [vmem:[%s20363_s4 + $0x58] sm:$0xff]  ;;  %s14934_s29 = smov 105  }
 0x508   :  { %2379 = vrot.lane.b32.xlu1 %v16105_v23, %s14933_s6  ;;  %3961 = vmatprep.mubr.bf16.mxu0 %v13012_v39  ;;  %v13028_v34 = vcombine.high %v3167_v1, %v3175_v44  ;;  %v13027_v50 = vcombine.low %v3167_v1, %v3175_v44  ;;  %v16168_v39 = vld [vmem:[%s20363_s4 + $0x18] sm:$0xff]  ;;  %v16185_v1 = vpack.c.bf16 %v2334_v25, %v2332_v58 }
 0x509   :  { %v1842_v27 = vpop.permute.xlu0 %1841  ;;  %v3296_v20 = vld [vmem:[#allocation3 + $0x318] sm:$0xff]  ;;  %v12998_v48 = vcombine.high %v16168_v39, %v16173_v37 }
 0x50a   :  { %v1863_v60 = vsel %vm1859_vm10, %v1840_v36, %v1842_v27  ;;  %1891 = vst.msk [vmem:[#allocation3 + $0x338] sm:$0xff] %vm1062_vm4, %v1842_v27  ;;  %3994 = vmatprep.subr.bf16.mxu0 %v3296_v20  ;;  %v1848_v32 = vpop.permute.xlu1 %1847  ;;  %v2339_v44 = vld [vmem:[#allocation7 + $0xe0] sm:$0xff] }
 0x50b   :  { %2377 = vrot.lane.b32.xlu0 %v16111_v63, %s14933_s6  ;;  %3995 = vmatpush1.bf16.msra.mxu0 %v1861_v52  ;;  %v2335_v52 = vld [vmem:[#allocation7 + $0xc0] sm:$0xff] }
 0x50c   :  { %2383 = vrot.lane.b32.xlu1 %v16121_v21, %s14933_s6  ;;  %v16177_v43 = vpack.c.bf16 %v2337_v47, %v2335_v52  ;;  %v3152_v58 = vld [vmem:[%s20363_s4 + $0x98] sm:$0xff] }
 0x50d   :  { %v1846_v6 = vpop.permute.xlu0 %1845  ;;  %v3298_v8 = vld [vmem:[#allocation3 + $0x328] sm:$0xff] }
 0x50e   :  { %v1864_v16 = vsel %vm1859_vm10, %v1844_v45, %v1846_v6  ;;  %1893 = vst.msk [vmem:[#allocation3 + $0x348] sm:$0xff] %vm1062_vm4, %v1846_v6  ;;  %3996 = vmatprep.subr.bf16.mxu0 %v3298_v8  ;;  %v1852_v40 = vpop.permute.xlu1 %1851  ;;  %3962 = vmatmul.mubr.bf16.gmra.mrb[4].mxu0 %v13011_v2  ;;  %v13043_v45 = vcombine.low %v3183_v31, %v3191_v38 }
 0x50f   :  { %2381 = vrot.lane.b32.xlu0 %v16127_v9, %s14933_s6  ;;  %3997 = vmatpush1.bf16.msra.mxu0 %v1862_v28  ;;  %v16189_v2 = vpack.c.bf16 %v2341_v62, %v2339_v44  ;;  %v16195_v6 = vpack.c.bf16 %v2338_v53, %v2336_v5 }
 0x510   :  { %2387 = vrot.lane.b32.xlu1 %v16131_v33, %s14933_s6  ;;  %3971 = vmatprep.mubr.bf16.mxu0 %v13028_v34 }
 0x511   :  { %v1850_v26 = vpop.permute.xlu0 %1849  ;;  %v3300_v4 = vld [vmem:[#allocation3 + $0x338] sm:$0xff] }
 0x512   :  { %v1865_v22 = vsel %vm1859_vm10, %v1848_v32, %v1850_v26  ;;  %1895 = vst.msk [vmem:[#allocation3 + $0x358] sm:$0xff] %vm1062_vm4, %v1850_v26  ;;  %3998 = vmatprep.subr.bf16.mxu0 %v3300_v4  ;;  %v1856_v14 = vpop.permute.xlu1 %1855 }
 0x513   :  { %2385 = vrot.lane.b32.xlu0 %v16137_v57, %s14933_s6  ;;  %3999 = vmatpush1.bf16.msra.mxu0 %v1863_v60 }
 0x514   :  { %2391 = vrot.lane.b32.xlu1 %v16147_v61, %s14933_s6 }
 0x515   :  { %v1854_v15 = vpop.permute.xlu0 %1853  ;;  %v3302_v54 = vld [vmem:[#allocation3 + $0x348] sm:$0xff] }
 0x516   :  { %v1866_v13 = vsel %vm1859_vm10, %v1852_v40, %v1854_v15  ;;  %1897 = vst.msk [vmem:[#allocation3 + $0x368] sm:$0xff] %vm1062_vm4, %v1854_v15  ;;  %4000 = vmatprep.subr.bf16.mxu0 %v3302_v54  ;;  %v1965_v49 = vpop.permute.xlu1 %1964  ;;  %3972 = vmatmul.mubr.bf16.gmra.mrb[8].mxu0 %v13027_v50 }
 0x517   :  { %2389 = vrot.lane.b32.xlu0 %v16153_v30, %s14933_s6  ;;  %4001 = vmatpush1.bf16.msra.mxu0 %v1864_v16 }
 0x518   :  { %2395 = vrot.lane.b32.xlu1 %v16157_v56, %s14933_s6  ;;  %3981 = vmatprep.mubr.bf16.mxu0 %v13044_v0 }
 0x519   :  { %v1858_v11 = vpop.permute.xlu0 %1857  ;;  %v3304_v36 = vld [vmem:[#allocation3 + $0x358] sm:$0xff] }
 0x51a   :  { %v1867_v41 = vsel %vm1859_vm10, %v1856_v14, %v1858_v11  ;;  %1899 = vst.msk [vmem:[#allocation3 + $0x378] sm:$0xff] %vm1062_vm4, %v1858_v11  ;;  %4002 = vmatprep.subr.bf16.mxu0 %v3304_v36  ;;  %v1969_v28 = vpop.permute.xlu1 %1968  ;;  %vm4859_vm10 = vcmask 1043456  }
 0x51b   :  { %2393 = vrot.lane.b32.xlu0 %v16163_v35, %s14933_s6  ;;  %4003 = vmatpush1.bf16.msra.mxu0 %v1865_v22 }
 0x51c   :  { %2399 = vrot.lane.b32.xlu1 %v16177_v43, %s14933_s6 }
 0x51d   :  { %v1967_v27 = vpop.permute.xlu0 %1966  ;;  %v3306_v20 = vld [vmem:[#allocation3 + $0x368] sm:$0xff] }
 0x51e   :  { %v1997_v60 = vsel %vm1996_vm11, %v1965_v49, %v1967_v27  ;;  %2022 = vst.msk [vmem:[#allocation3 + $0x388] sm:$0xff] %vm1062_vm4, %v1967_v27  ;;  %4004 = vmatprep.subr.bf16.mxu0 %v3306_v20  ;;  %v1973_v32 = vpop.permute.xlu1 %1972  ;;  %3982 = vmatmul.mubr.bf16.gmra.mrb[12].mxu0 %v13043_v45  ;;  %v12997_v20 = vcombine.low %v16168_v39, %v16173_v37 }
 0x51f   :  { %2397 = vrot.lane.b32.xlu0 %v16185_v1, %s14933_s6  ;;  %4005 = vmatpush1.bf16.msra.mxu0 %v1866_v13 }
 0x520   :  { %2403 = vrot.lane.b32.xlu1 %v16189_v2, %s14933_s6  ;;  %4024 = vmatprep.mubr.bf16.mxu0 %v12998_v48  ;;  %v3160_v48 = vld [vmem:[%s20363_s4 + $0xd8] sm:$0xff] }
 0x521   :  { %v1971_v29 = vpop.permute.xlu0 %1970  ;;  %v3308_v34 = vld [vmem:[#allocation3 + $0x378] sm:$0xff]  ;;  %v13013_v42 = vcombine.low %v3152_v58, %v3160_v48 }
 0x522   :  { %v1998_v8 = vsel %vm1996_vm11, %v1969_v28, %v1971_v29  ;;  %2024 = vst.msk [vmem:[#allocation3 + $0x398] sm:$0xff] %vm1062_vm4, %v1971_v29  ;;  %4006 = vmatprep.subr.bf16.mxu0 %v3308_v34  ;;  %v1977_v16 = vpop.permute.xlu1 %1976  ;;  %v3168_v34 = vld [vmem:[%s20363_s4 + $0x118] sm:$0xff] }
 0x523   :  { %2401 = vrot.lane.b32.xlu0 %v16195_v6, %s14933_s6  ;;  %4007 = vmatpush1.bf16.msra.mxu0 %v1867_v41 }
 0x524   :  { %2512 = vrot.lane.b32.xlu1 %v16097_v24, %s14934_s29 }
 0x525   :  { %v1975_v40 = vpop.permute.xlu0 %1974  ;;  %v3310_v18 = vld [vmem:[#allocation3 + $0x388] sm:$0xff] }
 0x526   :  { %v1999_v46 = vsel %vm1996_vm11, %v1973_v32, %v1975_v40  ;;  %2026 = vst.msk [vmem:[#allocation3 + $0x3a8] sm:$0xff] %vm1062_vm4, %v1975_v40  ;;  %4008 = vmatprep.subr.bf16.mxu0 %v3310_v18  ;;  %v1981_v26 = vpop.permute.xlu1 %1980 }
 0x527   :  { %2405 = vrot.lane.b32.xlu0 %v16203_v19, %s14933_s6  ;;  %4009 = vmatpush1.bf16.msra.mxu0 %v1997_v60  ;;  %v13014_v60 = vcombine.high %v3152_v58, %v3160_v48 }
 0x528   :  { %2516 = vrot.lane.b32.xlu1 %v16105_v23, %s14934_s29 }
 0x529   :  { %v1979_v4 = vpop.permute.xlu0 %1978  ;;  %v3312_v31 = vld [vmem:[#allocation3 + $0x398] sm:$0xff] }
 0x52a   :  { %v2000_v38 = vsel %vm1996_vm11, %v1977_v16, %v1979_v4  ;;  %2028 = vst.msk [vmem:[#allocation3 + $0x3b8] sm:$0xff] %vm1062_vm4, %v1979_v4  ;;  %4010 = vmatprep.subr.bf16.mxu0 %v3312_v31  ;;  %v1985_v22 = vpop.permute.xlu1 %1984 }
 0x52b   :  { %2514 = vrot.lane.b32.xlu0 %v16111_v63, %s14934_s29  ;;  %4011 = vmatpush1.bf16.msra.mxu0 %v1998_v8  ;;  %v3176_v8 = vld [vmem:[%s20363_s4 + $0x158] sm:$0xff] }
 0x52c   :  { %2520 = vrot.lane.b32.xlu1 %v16121_v21, %s14934_s29  ;;  %v13030_v40 = vcombine.high %v3168_v34, %v3176_v8 }
 0x52d   :  { %v1983_v7 = vpop.permute.xlu0 %1982  ;;  %v3314_v14 = vld [vmem:[#allocation3 + $0x3a8] sm:$0xff] }
 0x52e   :  { %v2001_v50 = vsel %vm1996_vm11, %v1981_v26, %v1983_v7  ;;  %2030 = vst.msk [vmem:[#allocation3 + $0x3c8] sm:$0xff] %vm1062_vm4, %v1983_v7  ;;  %4012 = vmatprep.subr.bf16.mxu0 %v3314_v14  ;;  %v1989_v12 = vpop.permute.xlu1 %1988  ;;  %v3192_v7 = vld [vmem:[%s20363_s4 + $0x1d8] sm:$0xff] }
 0x52f   :  { %2518 = vrot.lane.b32.xlu0 %v16127_v9, %s14934_s29  ;;  %4013 = vmatpush1.bf16.msra.mxu0 %v1999_v46 }
 0x530   :  { %2524 = vrot.lane.b32.xlu1 %v16131_v33, %s14934_s29 }
 0x531   :  { %v1987_v17 = vpop.permute.xlu0 %1986  ;;  %v3316_v0 = vld [vmem:[#allocation3 + $0x3b8] sm:$0xff] }
 0x532   :  { %v2002_v15 = vsel %vm1996_vm11, %v1985_v22, %v1987_v17  ;;  %2032 = vst.msk [vmem:[#allocation3 + $0x3d8] sm:$0xff] %vm1062_vm4, %v1987_v17  ;;  %4014 = vmatprep.subr.bf16.mxu0 %v3316_v0  ;;  %v1993_v54 = vpop.permute.xlu1 %1992  ;;  %v3184_v22 = vld [vmem:[%s20363_s4 + $0x198] sm:$0xff] }
 0x533   :  { %2522 = vrot.lane.b32.xlu0 %v16137_v57, %s14934_s29  ;;  %4015 = vmatpush1.bf16.msra.mxu0 %v2000_v38  ;;  %v13046_v17 = vcombine.high %v3184_v22, %v3192_v7 }
 0x534   :  { %2528 = vrot.lane.b32.xlu1 %v16147_v61, %s14934_s29 }
 0x535   :  { %v1991_v51 = vpop.permute.xlu0 %1990  ;;  %v3318_v13 = vld [vmem:[#allocation3 + $0x3c8] sm:$0xff] }
 0x536   :  { %v2003_v10 = vsel %vm1996_vm11, %v1989_v12, %v1991_v51  ;;  %2034 = vst.msk [vmem:[#allocation3 + $0x3e8] sm:$0xff] %vm1062_vm4, %v1991_v51  ;;  %4016 = vmatprep.subr.bf16.mxu0 %v3318_v13  ;;  %v2102_v49 = vpop.permute.xlu1 %2101  ;;  %v13029_v12 = vcombine.low %v3168_v34, %v3176_v8 }
 0x537   :  { %2526 = vrot.lane.b32.xlu0 %v16153_v30, %s14934_s29  ;;  %4017 = vmatpush1.bf16.msra.mxu0 %v2001_v50 }
 0x538   :  { %2532 = vrot.lane.b32.xlu1 %v16157_v56, %s14934_s29 }
 0x539   :  { %v1995_v47 = vpop.permute.xlu0 %1994  ;;  %v3320_v59 = vld [vmem:[#allocation3 + $0x3d8] sm:$0xff] }
 0x53a   :  { %v2004_v52 = vsel %vm1996_vm11, %v1993_v54, %v1995_v47  ;;  %2036 = vst.msk [vmem:[#allocation3 + $0x3f8] sm:$0xff] %vm1062_vm4, %v1995_v47  ;;  %4018 = vmatprep.subr.bf16.mxu0 %v3320_v59  ;;  %v2106_v11 = vpop.permute.xlu1 %2105  ;;  %v16311_v47 = vld [vmem:[%s20363_s4 + $0x60] sm:$0xff]  ;;  %vm4940_vm11 = vcmask 441344  }
 0x53b   :  { %2530 = vrot.lane.b32.xlu0 %v16163_v35, %s14934_s29  ;;  %4019 = vmatpush1.bf16.msra.mxu0 %v2002_v15 }
 0x53c   :  { %2536 = vrot.lane.b32.xlu1 %v16177_v43, %s14934_s29 }
 0x53d   :  { %v2104_v36 = vpop.permute.xlu0 %2103  ;;  %v3322_v41 = vld [vmem:[#allocation3 + $0x3e8] sm:$0xff] }
 0x53e   :  { %v2134_v25 = vsel %vm2133_vm12, %v2102_v49, %v2104_v36  ;;  %2159 = vst.msk [vmem:[#allocation3 + $0x408] sm:$0xff] %vm1062_vm4, %v2104_v36  ;;  %4020 = vmatprep.subr.bf16.mxu0 %v3322_v41  ;;  %v2110_v28 = vpop.permute.xlu1 %2109  ;;  %v16306_v49 = vld [vmem:[%s20363_s4 + $0x20] sm:$0xff] }
 0x53f   :  { %2534 = vrot.lane.b32.xlu0 %v16185_v1, %s14934_s29  ;;  %4021 = vmatpush1.bf16.msra.mxu0 %v2003_v10  ;;  %v13000_v36 = vcombine.high %v16306_v49, %v16311_v47 }
 0x540   :  { %2540 = vrot.lane.b32.xlu1 %v16189_v2, %s14934_s29 }
 0x541   :  { %v2108_v45 = vpop.permute.xlu0 %2107  ;;  %v3324_v62 = vld [vmem:[#allocation3 + $0x3f8] sm:$0xff] }
 0x542   :  { %v2135_v27 = vsel %vm2133_vm12, %v2106_v11, %v2108_v45  ;;  %2161 = vst.msk [vmem:[#allocation3 + $0x418] sm:$0xff] %vm1062_vm4, %v2108_v45  ;;  %4022 = vmatprep.subr.bf16.mxu0 %v3324_v62  ;;  %v2114_v44 = vpop.permute.xlu1 %2113  ;;  %v13045_v11 = vcombine.low %v3184_v22, %v3192_v7  ;;  %v3161_v22 = vld [vmem:[%s20363_s4 + $0xe0] sm:$0xff] }
 0x543   :  { %2538 = vrot.lane.b32.xlu0 %v16195_v6, %s14934_s29  ;;  %4023 = vmatpush1.bf16.msra.mxu0 %v2004_v52 }
 0x544   :  { %2649 = vrot.lane.b32.xlu1 %v16097_v24, %s20346_s2 }
 0x545   :  { %v2112_v53 = vpop.permute.xlu0 %2111  ;;  %v3326_v32 = vld [vmem:[#allocation3 + $0x408] sm:$0xff] }
 0x546   :  { %v2136_v5 = vsel %vm2133_vm12, %v2110_v28, %v2112_v53  ;;  %2163 = vst.msk [vmem:[#allocation3 + $0x428] sm:$0xff] %vm1062_vm4, %v2112_v53  ;;  %4065 = vmatprep.subr.bf16.mxu0 %v3326_v32  ;;  %4025 = vmatmul.mubr.bf16.vlgmr.msra.gmra.mrb[0].mxu0 %v12997_v20  ;;  %v2118_v29 = vpop.permute.xlu1 %2117 }
 0x547   :  { %2542 = vrot.lane.b32.xlu0 %v16203_v19, %s14934_s29  ;;  %4066 = vmatpush1.bf16.msra.mxu0 %v2134_v25  ;;  %s20344_s29 = smov 97  }
 0x548   :  { %2653 = vrot.lane.b32.xlu1 %v16105_v23, %s20346_s2  ;;  %4034 = vmatprep.mubr.bf16.mxu0 %v13014_v60 }
 0x549   :  { %v2116_v39 = vpop.permute.xlu0 %2115  ;;  %v3328_v37 = vld [vmem:[#allocation3 + $0x418] sm:$0xff] }
 0x54a   :  { %v2137_v55 = vsel %vm2133_vm12, %v2114_v44, %v2116_v39  ;;  %2165 = vst.msk [vmem:[#allocation3 + $0x438] sm:$0xff] %vm1062_vm4, %v2116_v39  ;;  %4067 = vmatprep.subr.bf16.mxu0 %v3328_v37  ;;  %v2122_v16 = vpop.permute.xlu1 %2121 }
 0x54b   :  { %2651 = vrot.lane.b32.xlu0 %v16111_v63, %s20346_s2  ;;  %4068 = vmatpush1.bf16.msra.mxu0 %v2135_v27 }
 0x54c   :  { %2657 = vrot.lane.b32.xlu1 %v16121_v21, %s20346_s2 }
 0x54d   :  { %v2120_v18 = vpop.permute.xlu0 %2119  ;;  %v3330_v46 = vld [vmem:[#allocation3 + $0x428] sm:$0xff] }
 0x54e   :  { %v2138_v26 = vsel %vm2133_vm12, %v2118_v29, %v2120_v18  ;;  %2167 = vst.msk [vmem:[#allocation3 + $0x448] sm:$0xff] %vm1062_vm4, %v2120_v18  ;;  %4069 = vmatprep.subr.bf16.mxu0 %v3330_v46  ;;  %v2126_v4 = vpop.permute.xlu1 %2125  ;;  %4035 = vmatmul.mubr.bf16.gmra.mrb[4].mxu0 %v13013_v42 }
 0x54f   :  { %2655 = vrot.lane.b32.xlu0 %v16127_v9, %s20346_s2  ;;  %4070 = vmatpush1.bf16.msra.mxu0 %v2136_v5 }
 0x550   :  { %2661 = vrot.lane.b32.xlu1 %v16131_v33, %s20346_s2  ;;  %4044 = vmatprep.mubr.bf16.mxu0 %v13030_v40 }
 0x551   :  { %v2124_v31 = vpop.permute.xlu0 %2123  ;;  %v3332_v38 = vld [vmem:[#allocation3 + $0x438] sm:$0xff] }
 0x552   :  { %v2139_v14 = vsel %vm2133_vm12, %v2122_v16, %v2124_v31  ;;  %2169 = vst.msk [vmem:[#allocation3 + $0x458] sm:$0xff] %vm1062_vm4, %v2124_v31  ;;  %4071 = vmatprep.subr.bf16.mxu0 %v3332_v38  ;;  %v2130_v50 = vpop.permute.xlu1 %2129 }
 0x553   :  { %2659 = vrot.lane.b32.xlu0 %v16137_v57, %s20346_s2  ;;  %4072 = vmatpush1.bf16.msra.mxu0 %v2137_v55 }
 0x554   :  { %2665 = vrot.lane.b32.xlu1 %v16147_v61, %s20346_s2 }
 0x555   :  { %v2128_v0 = vpop.permute.xlu0 %2127  ;;  %v3334_v15 = vld [vmem:[#allocation3 + $0x448] sm:$0xff] }
 0x556   :  { %v2140_v54 = vsel %vm2133_vm12, %v2126_v4, %v2128_v0  ;;  %2171 = vst.msk [vmem:[#allocation3 + $0x468] sm:$0xff] %vm1062_vm4, %v2128_v0  ;;  %4073 = vmatprep.subr.bf16.mxu0 %v3334_v15  ;;  %v2239_v51 = vpop.permute.xlu1 %2238  ;;  %4045 = vmatmul.mubr.bf16.gmra.mrb[8].mxu0 %v13029_v12  ;;  %v2861_v4 = vld [vmem:[#allocation7 + $0x10] sm:$0xff]  ;;  %v2863_v15 = vld [vmem:[#allocation7 + $0x20] sm:$0xff] }
 0x557   :  { %2663 = vrot.lane.b32.xlu0 %v16153_v30, %s20346_s2  ;;  %4074 = vmatpush1.bf16.msra.mxu0 %v2138_v26 }
 0x558   :  { %2669 = vrot.lane.b32.xlu1 %v16157_v56, %s20346_s2  ;;  %4054 = vmatprep.mubr.bf16.mxu0 %v13046_v17 }
 0x559   :  { %v2132_v13 = vpop.permute.xlu0 %2131  ;;  %v3336_v10 = vld [vmem:[#allocation3 + $0x458] sm:$0xff] }
 0x55a   :  { %v2141_v59 = vsel %vm2133_vm12, %v2130_v50, %v2132_v13  ;;  %2173 = vst.msk [vmem:[#allocation3 + $0x478] sm:$0xff] %vm1062_vm4, %v2132_v13  ;;  %4075 = vmatprep.subr.bf16.mxu0 %v3336_v10  ;;  %v2243_v52 = vpop.permute.xlu1 %2242  ;;  %v2865_v50 = vld [vmem:[#allocation7 + $0x30] sm:$0xff] }
 0x55b   :  { %2667 = vrot.lane.b32.xlu0 %v16163_v35, %s20346_s2  ;;  %4076 = vmatpush1.bf16.msra.mxu0 %v2139_v14  ;;  %v16393_v10 = vpack.c.bf16 %v2865_v50, %v2863_v15  ;;  %v2882_v15 = vld [vmem:[#allocation7 + $0xb8] sm:$0xff] }
 0x55c   :  { %2673 = vrot.lane.b32.xlu1 %v16177_v43, %s20346_s2 }
 0x55d   :  { %v2241_v41 = vpop.permute.xlu0 %2240  ;;  %v3338_v25 = vld [vmem:[#allocation3 + $0x468] sm:$0xff] }
 0x55e   :  { %v2271_v28 = vsel %vm2270_vm13, %v2239_v51, %v2241_v41  ;;  %2296 = vst.msk [vmem:[#allocation3 + $0x488] sm:$0xff] %vm1062_vm4, %v2241_v41  ;;  %4077 = vmatprep.subr.bf16.mxu0 %v3338_v25  ;;  %v2247_v45 = vpop.permute.xlu1 %2246  ;;  %4055 = vmatmul.mubr.bf16.gmra.mrb[12].mxu0 %v13045_v11  ;;  %v2862_v51 = vld [vmem:[#allocation7 + $0x18] sm:$0xff] }
 0x55f   :  { %2671 = vrot.lane.b32.xlu0 %v16185_v1, %s20346_s2  ;;  %4078 = vmatpush1.bf16.msra.mxu0 %v2140_v54  ;;  %v2866_v25 = vld [vmem:[#allocation7 + $0x38] sm:$0xff] }
 0x560   :  { %2677 = vrot.lane.b32.xlu1 %v16189_v2, %s20346_s2  ;;  %4097 = vmatprep.mubr.bf16.mxu0 %v13000_v36  ;;  %v3169_v36 = vld [vmem:[%s20363_s4 + $0x120] sm:$0xff] }
 0x561   :  { %v2245_v62 = vpop.permute.xlu0 %2244  ;;  %v3340_v58 = vld [vmem:[#allocation3 + $0x478] sm:$0xff] }
 0x562   :  { %v2272_v48 = vsel %vm2270_vm13, %v2243_v52, %v2245_v62  ;;  %2298 = vst.msk [vmem:[#allocation3 + $0x498] sm:$0xff] %vm1062_vm4, %v2245_v62  ;;  %4079 = vmatprep.subr.bf16.mxu0 %v3340_v58  ;;  %v2251_v27 = vpop.permute.xlu1 %2250  ;;  %v2873_v58 = vld [vmem:[#allocation7 + $0x70] sm:$0xff] }
 0x563   :  { %2675 = vrot.lane.b32.xlu0 %v16195_v6, %s20346_s2  ;;  %4080 = vmatpush1.bf16.msra.mxu0 %v2141_v59 }
 0x564   :  { %2786 = vrot.lane.b32.xlu1 %v16097_v24, %s20344_s29 }
 0x565   :  { %v2249_v20 = vpop.permute.xlu0 %2248  ;;  %v3342_v44 = vld [vmem:[#allocation3 + $0x488] sm:$0xff] }
 0x566   :  { %v2273_v60 = vsel %vm2270_vm13, %v2247_v45, %v2249_v20  ;;  %2300 = vst.msk [vmem:[#allocation3 + $0x4a8] sm:$0xff] %vm1062_vm4, %v2249_v20  ;;  %4081 = vmatprep.subr.bf16.mxu0 %v3342_v44  ;;  %v2255_v53 = vpop.permute.xlu1 %2254 }
 0x567   :  { %2679 = vrot.lane.b32.xlu0 %v16203_v19, %s20346_s2  ;;  %4082 = vmatpush1.bf16.msra.mxu0 %v2271_v28  ;;  %s14944_s2 = smov 94  }
 0x568   :  { %2790 = vrot.lane.b32.xlu1 %v16105_v23, %s20344_s29 }
 0x569   :  { %v2253_v32 = vpop.permute.xlu0 %2252  ;;  %v3344_v5 = vld [vmem:[#allocation3 + $0x498] sm:$0xff] }
 0x56a   :  { %v2274_v29 = vsel %vm2270_vm13, %v2251_v27, %v2253_v32  ;;  %2302 = vst.msk [vmem:[#allocation3 + $0x4b8] sm:$0xff] %vm1062_vm4, %v2253_v32  ;;  %4083 = vmatprep.subr.bf16.mxu0 %v3344_v5  ;;  %v2259_v24 = vpop.permute.xlu1 %2258  ;;  %v2870_v5 = vld [vmem:[#allocation7 + $0x58] sm:$0xff] }
 0x56b   :  { %2788 = vrot.lane.b32.xlu0 %v16111_v63, %s20344_s29  ;;  %4084 = vmatpush1.bf16.msra.mxu0 %v2272_v48  ;;  %v2864_v48 = vld [vmem:[#allocation7 + $0x28] sm:$0xff] }
 0x56c   :  { %2794 = vrot.lane.b32.xlu1 %v16121_v21, %s20344_s29 }
 0x56d   :  { %v2257_v39 = vpop.permute.xlu0 %2256  ;;  %v3346_v37 = vld [vmem:[#allocation3 + $0x4a8] sm:$0xff] }
 0x56e   :  { %v2275_v34 = vsel %vm2270_vm13, %v2255_v53, %v2257_v39  ;;  %2304 = vst.msk [vmem:[#allocation3 + $0x4c8] sm:$0xff] %vm1062_vm4, %v2257_v39  ;;  %4085 = vmatprep.subr.bf16.mxu0 %v3346_v37  ;;  %v2263_v23 = vpop.permute.xlu1 %2262  ;;  %v2871_v53 = vld [vmem:[#allocation7 + $0x60] sm:$0xff]  ;;  %v2877_v39 = vld [vmem:[#allocation7 + $0x90] sm:$0xff]  ;;  %v2868_v37 = vld [vmem:[#allocation7 + $0x48] sm:$0xff] }
 0x56f   :  { %2792 = vrot.lane.b32.xlu0 %v16127_v9, %s20344_s29  ;;  %4086 = vmatpush1.bf16.msra.mxu0 %v2273_v60  ;;  %v16415_v60 = vpack.c.bf16 %v2866_v25, %v2864_v48  ;;  %v2886_v25 = vld [vmem:[#allocation7 + $0xd8] sm:$0xff] }
 0x570   :  { %2798 = vrot.lane.b32.xlu1 %v16131_v33, %s20344_s29 }
 0x571   :  { %v2261_v63 = vpop.permute.xlu0 %2260  ;;  %v3348_v8 = vld [vmem:[#allocation3 + $0x4b8] sm:$0xff] }
 0x572   :  { %v2276_v55 = vsel %vm2270_vm13, %v2259_v24, %v2261_v63  ;;  %2306 = vst.msk [vmem:[#allocation3 + $0x4d8] sm:$0xff] %vm1062_vm4, %v2261_v63  ;;  %4087 = vmatprep.subr.bf16.mxu0 %v3348_v8  ;;  %v2267_v21 = vpop.permute.xlu1 %2266  ;;  %v16419_v24 = vpack.c.bf16 %v2873_v58, %v2871_v53  ;;  %v16425_v8 = vpack.c.bf16 %v2870_v5, %v2868_v37  ;;  %v2884_v58 = vld [vmem:[#allocation7 + $0xc8] sm:$0xff]  ;;  %v2890_v53 = vld [vmem:[#allocation7 + $0xf8] sm:$0xff] }
 0x573   :  { %2796 = vrot.lane.b32.xlu0 %v16137_v57, %s20344_s29  ;;  %4088 = vmatpush1.bf16.msra.mxu0 %v2274_v29  ;;  %v2888_v5 = vld [vmem:[#allocation7 + $0xe8] sm:$0xff] }
 0x574   :  { %2802 = vrot.lane.b32.xlu1 %v16147_v61, %s20344_s29  ;;  %v16491_v37 = vpack.c.bf16 %v2890_v53, %v2888_v5  ;;  %v4549_v53 = vld [vmem:[%s20323_s7 + $0x20] sm:$0xff] }
 0x575   :  { %v2265_v9 = vpop.permute.xlu0 %2264  ;;  %v3350_v16 = vld [vmem:[#allocation3 + $0x4c8] sm:$0xff] }
 0x576   :  { %v2277_v42 = vsel %vm2270_vm13, %v2263_v23, %v2265_v9  ;;  %2308 = vst.msk [vmem:[#allocation3 + $0x4e8] sm:$0xff] %vm1062_vm4, %v2265_v9  ;;  %4089 = vmatprep.subr.bf16.mxu0 %v3350_v16  ;;  %v2376_v33 = vpop.permute.xlu1 %2375  ;;  %v2874_v16 = vld [vmem:[#allocation7 + $0x78] sm:$0xff] }
 0x577   :  { %2800 = vrot.lane.b32.xlu0 %v16153_v30, %s20344_s29  ;;  %4090 = vmatpush1.bf16.msra.mxu0 %v2275_v34  ;;  %v2875_v34 = vld [vmem:[#allocation7 + $0x80] sm:$0xff] }
 0x578   :  { %2806 = vrot.lane.b32.xlu1 %v16157_v56, %s20344_s29 }
 0x579   :  { %v2269_v57 = vpop.permute.xlu0 %2268  ;;  %v3352_v40 = vld [vmem:[#allocation3 + $0x4d8] sm:$0xff] }
 0x57a   :  { %v2278_v18 = vsel %vm2270_vm13, %v2267_v21, %v2269_v57  ;;  %2310 = vst.msk [vmem:[#allocation3 + $0x4f8] sm:$0xff] %vm1062_vm4, %v2269_v57  ;;  %4091 = vmatprep.subr.bf16.mxu0 %v3352_v40  ;;  %v2380_v61 = vpop.permute.xlu1 %2379  ;;  %v3193_v21 = vld [vmem:[%s20363_s4 + $0x1e0] sm:$0xff]  ;;  %v2881_v40 = vld [vmem:[#allocation7 + $0xb0] sm:$0xff]  ;;  %vm5173_vm13 = vcmask 973824  }
 0x57b   :  { %2804 = vrot.lane.b32.xlu0 %v16163_v35, %s20344_s29  ;;  %4092 = vmatpush1.bf16.msra.mxu0 %v2276_v55  ;;  %v2859_v35 = vld [vmem:[#allocation7] sm:$0xff]  ;;  %v3185_v55 = vld [vmem:[%s20363_s4 + $0x1a0] sm:$0xff] }
 0x57c   :  { %2810 = vrot.lane.b32.xlu1 %v16177_v43, %s20344_s29  ;;  %v3153_v43 = vld [vmem:[%s20363_s4 + $0xa0] sm:$0xff]  ;;  %v16385_v14 = vpack.c.bf16 %v2861_v4, %v2859_v35  ;;  %v2878_v35 = vld [vmem:[#allocation7 + $0x98] sm:$0xff] }
 0x57d   :  { %v2378_v30 = vpop.permute.xlu0 %2377  ;;  %v3354_v46 = vld [vmem:[#allocation3 + $0x4e8] sm:$0xff]  ;;  %v13016_v12 = vcombine.high %v3153_v43, %v3161_v22  ;;  %v13015_v62 = vcombine.low %v3153_v43, %v3161_v22  ;;  %v2876_v22 = vld [vmem:[#allocation7 + $0x88] sm:$0xff] }
 0x57e   :  { %v2408_v56 = vsel %vm2407_vm14, %v2376_v33, %v2378_v30  ;;  %2433 = vst.msk [vmem:[#allocation3 + $0x508] sm:$0xff] %vm1062_vm4, %v2378_v30  ;;  %4093 = vmatprep.subr.bf16.mxu0 %v3354_v46  ;;  %v2384_v26 = vpop.permute.xlu1 %2383  ;;  %v16435_v33 = vpack.c.bf16 %v2877_v39, %v2875_v34  ;;  %v2885_v43 = vld [vmem:[#allocation7 + $0xd0] sm:$0xff]  ;;  %v16451_v50 = vpack.c.bf16 %v2878_v35, %v2876_v22 }
 0x57f   :  { %2808 = vrot.lane.b32.xlu0 %v16185_v1, %s20344_s29  ;;  %4094 = vmatpush1.bf16.msra.mxu0 %v2277_v42  ;;  %v12999_v1 = vcombine.low %v16306_v49, %v16311_v47  ;;  %v2860_v49 = vld [vmem:[#allocation7 + $0x8] sm:$0xff]  ;;  %v2867_v47 = vld [vmem:[#allocation7 + $0x40] sm:$0xff]  ;;  %v3154_v22 = vld [vmem:[%s20363_s4 + $0xa8] sm:$0xff] }
 0x580   :  { %2814 = vrot.lane.b32.xlu1 %v16189_v2, %s20344_s29  ;;  %v16399_v11 = vpack.c.bf16 %v2862_v51, %v2860_v49  ;;  %v2880_v49 = vld [vmem:[#allocation7 + $0xa8] sm:$0xff] }
 0x581   :  { %v2382_v31 = vpop.permute.xlu0 %2381  ;;  %v3356_v38 = vld [vmem:[#allocation3 + $0x4f8] sm:$0xff] }
 0x582   :  { %v2409_v7 = vsel %vm2407_vm14, %v2380_v61, %v2382_v31  ;;  %2435 = vst.msk [vmem:[#allocation3 + $0x518] sm:$0xff] %vm1062_vm4, %v2382_v31  ;;  %4095 = vmatprep.subr.bf16.mxu0 %v3356_v38  ;;  %v2388_v2 = vpop.permute.xlu1 %2387  ;;  %v13048_v61 = vcombine.high %v3185_v55, %v3193_v21 }
 0x583   :  { %2812 = vrot.lane.b32.xlu0 %v16195_v6, %s20344_s29  ;;  %4096 = vmatpush1.bf16.msra.mxu0 %v2278_v18  ;;  %v2869_v6 = vld [vmem:[#allocation7 + $0x50] sm:$0xff]  ;;  %v2872_v18 = vld [vmem:[#allocation7 + $0x68] sm:$0xff] }
 0x584   :  { %2923 = vrot.lane.b32.xlu1 %v16385_v14, %s20348_s28  ;;  %v16409_v45 = vpack.c.bf16 %v2869_v6, %v2867_v47  ;;  %v2889_v6 = vld [vmem:[#allocation7 + $0xf0] sm:$0xff] }
 0x585   :  { %v2386_v17 = vpop.permute.xlu0 %2385  ;;  %v3358_v0 = vld [vmem:[#allocation3 + $0x508] sm:$0xff] }
 0x586   :  { %v2410_v54 = vsel %vm2407_vm14, %v2384_v26, %v2386_v17  ;;  %2437 = vst.msk [vmem:[#allocation3 + $0x528] sm:$0xff] %vm1062_vm4, %v2386_v17  ;;  %4138 = vmatprep.subr.bf16.mxu0 %v3358_v0  ;;  %4098 = vmatmul.mubr.bf16.vlgmr.msra.gmra.mrb[0].mxu0 %v12999_v1  ;;  %v2392_v13 = vpop.permute.xlu1 %2391  ;;  %v2879_v26 = vld [vmem:[#allocation7 + $0xa0] sm:$0xff]  ;;  %v16461_v17 = vld [vmem:[%s20363_s4 + $0x68] sm:$0xff] }
 0x587   :  { %2816 = vrot.lane.b32.xlu0 %v16203_v19, %s20344_s29  ;;  %4139 = vmatpush1.bf16.msra.mxu0 %v2408_v56  ;;  %v3177_v19 = vld [vmem:[%s20363_s4 + $0x160] sm:$0xff]  ;;  %v16441_v56 = vpack.c.bf16 %v2874_v16, %v2872_v18  ;;  %v16445_v38 = vpack.c.bf16 %v2881_v40, %v2879_v26  ;;  %s20365_s29 = smov 98  }
 0x588   :  { %2927 = vrot.lane.b32.xlu1 %v16393_v10, %s20348_s28  ;;  %4107 = vmatprep.mubr.bf16.mxu0 %v13016_v12  ;;  %v13032_v27 = vcombine.high %v3169_v36, %v3177_v19  ;;  %v13031_v57 = vcombine.low %v3169_v36, %v3177_v19  ;;  %v16456_v12 = vld [vmem:[%s20363_s4 + $0x28] sm:$0xff]  ;;  %v16473_v36 = vpack.c.bf16 %v2882_v15, %v2880_v49  ;;  %v2887_v19 = vld [vmem:[#allocation7 + $0xe0] sm:$0xff] }
 0x589   :  { %v2390_v59 = vpop.permute.xlu0 %2389  ;;  %v3360_v52 = vld [vmem:[#allocation3 + $0x518] sm:$0xff]  ;;  %v13002_v47 = vcombine.high %v16456_v12, %v16461_v17 }
 0x58a   :  { %v2411_v41 = vsel %vm2407_vm14, %v2388_v2, %v2390_v59  ;;  %2439 = vst.msk [vmem:[#allocation3 + $0x538] sm:$0xff] %vm1062_vm4, %v2390_v59  ;;  %4140 = vmatprep.subr.bf16.mxu0 %v3360_v52  ;;  %v2396_v28 = vpop.permute.xlu1 %2395 }
 0x58b   :  { %2925 = vrot.lane.b32.xlu0 %v16399_v11, %s20348_s28  ;;  %4141 = vmatpush1.bf16.msra.mxu0 %v2409_v7  ;;  %v2883_v7 = vld [vmem:[#allocation7 + $0xc0] sm:$0xff] }
 0x58c   :  { %2931 = vrot.lane.b32.xlu1 %v16409_v45, %s20348_s28  ;;  %v16465_v51 = vpack.c.bf16 %v2885_v43, %v2883_v7  ;;  %v3162_v7 = vld [vmem:[%s20363_s4 + $0xe8] sm:$0xff] }
 0x58d   :  { %v2394_v20 = vpop.permute.xlu0 %2393  ;;  %v3362_v44 = vld [vmem:[#allocation3 + $0x528] sm:$0xff] }
 0x58e   :  { %v2412_v32 = vsel %vm2407_vm14, %v2392_v13, %v2394_v20  ;;  %2441 = vst.msk [vmem:[#allocation3 + $0x548] sm:$0xff] %vm1062_vm4, %v2394_v20  ;;  %4142 = vmatprep.subr.bf16.mxu0 %v3362_v44  ;;  %v2400_v29 = vpop.permute.xlu1 %2399  ;;  %4108 = vmatmul.mubr.bf16.gmra.mrb[4].mxu0 %v13015_v62  ;;  %v13047_v13 = vcombine.low %v3185_v55, %v3193_v21 }
 0x58f   :  { %2929 = vrot.lane.b32.xlu0 %v16415_v60, %s20348_s28  ;;  %4143 = vmatpush1.bf16.msra.mxu0 %v2410_v54  ;;  %v16477_v62 = vpack.c.bf16 %v2889_v6, %v2887_v19  ;;  %v16483_v20 = vpack.c.bf16 %v2886_v25, %v2884_v58  ;;  %v4547_v6 = vld [vmem:[%s20323_s7 + $0x10] sm:$0xff]  ;;  %v4610_v25 = vld [vmem:[%s20324_s8 + $0x8] sm:$0xff] }
 0x590   :  { %2935 = vrot.lane.b32.xlu1 %v16419_v24, %s20348_s28  ;;  %4117 = vmatprep.mubr.bf16.mxu0 %v13032_v27 }
 0x591   :  { %v2398_v23 = vpop.permute.xlu0 %2397  ;;  %v3364_v63 = vld [vmem:[#allocation3 + $0x538] sm:$0xff] }
 0x592   :  { %v2413_v9 = vsel %vm2407_vm14, %v2396_v28, %v2398_v23  ;;  %2443 = vst.msk [vmem:[#allocation3 + $0x558] sm:$0xff] %vm1062_vm4, %v2398_v23  ;;  %4144 = vmatprep.subr.bf16.mxu0 %v3364_v63  ;;  %v2404_v42 = vpop.permute.xlu1 %2403 }
 0x593   :  { %2933 = vrot.lane.b32.xlu0 %v16425_v8, %s20348_s28  ;;  %4145 = vmatpush1.bf16.msra.mxu0 %v2411_v41 }
 0x594   :  { %2939 = vrot.lane.b32.xlu1 %v16435_v33, %s20348_s28 }
 0x595   :  { %v2402_v30 = vpop.permute.xlu0 %2401  ;;  %v3366_v46 = vld [vmem:[#allocation3 + $0x548] sm:$0xff] }
 0x596   :  { %v2414_v4 = vsel %vm2407_vm14, %v2400_v29, %v2402_v30  ;;  %2445 = vst.msk [vmem:[#allocation3 + $0x568] sm:$0xff] %vm1062_vm4, %v2402_v30  ;;  %4146 = vmatprep.subr.bf16.mxu0 %v3366_v46  ;;  %v2513_v31 = vpop.permute.xlu1 %2512  ;;  %4118 = vmatmul.mubr.bf16.gmra.mrb[8].mxu0 %v13031_v57 }
 0x597   :  { %2937 = vrot.lane.b32.xlu0 %v16441_v56, %s20348_s28  ;;  %4147 = vmatpush1.bf16.msra.mxu0 %v2412_v32 }
 0x598   :  { %2943 = vrot.lane.b32.xlu1 %v16445_v38, %s20348_s28  ;;  %4127 = vmatprep.mubr.bf16.mxu0 %v13048_v61 }
 0x599   :  { %v2406_v1 = vpop.permute.xlu0 %2405  ;;  %v3368_v2 = vld [vmem:[#allocation3 + $0x558] sm:$0xff] }
 0x59a   :  { %v2415_v0 = vsel %vm2407_vm14, %v2404_v42, %v2406_v1  ;;  %2447 = vst.msk [vmem:[#allocation3 + $0x578] sm:$0xff] %vm1062_vm4, %v2406_v1  ;;  %4148 = vmatprep.subr.bf16.mxu0 %v3368_v2  ;;  %v2517_v54 = vpop.permute.xlu1 %2516  ;;  %v13001_v2 = vcombine.low %v16456_v12, %v16461_v17  ;;  %v4545_v17 = vld [vmem:[%s20323_s7] sm:$0xff]  ;;  %vm6889_vm14 = vcmask 908288  }
 0x59b   :  { %2941 = vrot.lane.b32.xlu0 %v16451_v50, %s20348_s28  ;;  %4149 = vmatpush1.bf16.msra.mxu0 %v2413_v9 }
 0x59c   :  { %2947 = vrot.lane.b32.xlu1 %v16465_v51, %s20348_s28 }
 0x59d   :  { %v2515_v59 = vpop.permute.xlu0 %2514  ;;  %v3370_v52 = vld [vmem:[#allocation3 + $0x568] sm:$0xff] }
 0x59e   :  { %v2545_v41 = vsel %vm981_vm3, %v2513_v31, %v2515_v59  ;;  %2570 = vst.msk [vmem:[#allocation3 + $0x588] sm:$0xff] %vm1062_vm4, %v2515_v59  ;;  %4150 = vmatprep.subr.bf16.mxu0 %v3370_v52  ;;  %v2521_v28 = vpop.permute.xlu1 %2520  ;;  %4128 = vmatmul.mubr.bf16.gmra.mrb[12].mxu0 %v13047_v13  ;;  %v4546_v31 = vld [vmem:[%s20323_s7 + $0x8] sm:$0xff] }
 0x59f   :  { %2945 = vrot.lane.b32.xlu0 %v16473_v36, %s20348_s28  ;;  %4151 = vmatpush1.bf16.msra.mxu0 %v2414_v4  ;;  %v3170_v59 = vld [vmem:[%s20363_s4 + $0x128] sm:$0xff] }
 0x5a0   :  { %2951 = vrot.lane.b32.xlu1 %v16477_v62, %s20348_s28  ;;  %4170 = vmatprep.mubr.bf16.mxu0 %v13002_v47  ;;  %v3178_v52 = vld [vmem:[%s20363_s4 + $0x168] sm:$0xff] }
 0x5a1   :  { %v2519_v48 = vpop.permute.xlu0 %2518  ;;  %v3372_v27 = vld [vmem:[#allocation3 + $0x578] sm:$0xff] }
 0x5a2   :  { %v2546_v44 = vsel %vm981_vm3, %v2517_v54, %v2519_v48  ;;  %2572 = vst.msk [vmem:[#allocation3 + $0x598] sm:$0xff] %vm1062_vm4, %v2519_v48  ;;  %4152 = vmatprep.subr.bf16.mxu0 %v3372_v27  ;;  %v2525_v32 = vpop.permute.xlu1 %2524  ;;  %v4611_v48 = vld [vmem:[%s20324_s8 + $0x10] sm:$0xff] }
 0x5a3   :  { %2949 = vrot.lane.b32.xlu0 %v16483_v20, %s20348_s28  ;;  %4153 = vmatpush1.bf16.msra.mxu0 %v2415_v0  ;;  %v13018_v0 = vcombine.high %v3154_v22, %v3162_v7 }
 0x5a4   :  { %3060 = vrot.lane.b32.xlu1 %v16385_v14, %s14938_s0 }
 0x5a5   :  { %v2523_v29 = vpop.permute.xlu0 %2522  ;;  %v3374_v39 = vld [vmem:[#allocation3 + $0x588] sm:$0xff] }
 0x5a6   :  { %v2547_v34 = vsel %vm981_vm3, %v2521_v28, %v2523_v29  ;;  %2574 = vst.msk [vmem:[#allocation3 + $0x5a8] sm:$0xff] %vm1062_vm4, %v2523_v29  ;;  %4154 = vmatprep.subr.bf16.mxu0 %v3374_v39  ;;  %v2529_v23 = vpop.permute.xlu1 %2528  ;;  %v13034_v28 = vcombine.high %v3170_v59, %v3178_v52  ;;  %v3186_v29 = vld [vmem:[%s20363_s4 + $0x1a8] sm:$0xff] }
 0x5a7   :  { %2953 = vrot.lane.b32.xlu0 %v16491_v37, %s20348_s28  ;;  %4155 = vmatpush1.bf16.msra.mxu0 %v2545_v41  ;;  %v13017_v41 = vcombine.low %v3154_v22, %v3162_v7  ;;  %v3194_v39 = vld [vmem:[%s20363_s4 + $0x1e8] sm:$0xff] }
 0x5a8   :  { %3064 = vrot.lane.b32.xlu1 %v16393_v10, %s14938_s0 }
 0x5a9   :  { %v2527_v63 = vpop.permute.xlu0 %2526  ;;  %v3376_v55 = vld [vmem:[#allocation3 + $0x598] sm:$0xff] }
 0x5aa   :  { %v2548_v14 = vsel %vm981_vm3, %v2525_v32, %v2527_v63  ;;  %2576 = vst.msk [vmem:[#allocation3 + $0x5b8] sm:$0xff] %vm1062_vm4, %v2527_v63  ;;  %4156 = vmatprep.subr.bf16.mxu0 %v3376_v55  ;;  %v2533_v21 = vpop.permute.xlu1 %2532  ;;  %v4612_v63 = vld [vmem:[%s20324_s8 + $0x18] sm:$0xff]  ;;  %v13050_v55 = vcombine.high %v3186_v29, %v3194_v39 }
 0x5ab   :  { %3062 = vrot.lane.b32.xlu0 %v16399_v11, %s14938_s0  ;;  %4157 = vmatpush1.bf16.msra.mxu0 %v2546_v44  ;;  %v4548_v44 = vld [vmem:[%s20323_s7 + $0x18] sm:$0xff] }
 0x5ac   :  { %3068 = vrot.lane.b32.xlu1 %v16409_v45, %s14938_s0 }
 0x5ad   :  { %v2531_v9 = vpop.permute.xlu0 %2530  ;;  %v3378_v16 = vld [vmem:[#allocation3 + $0x5a8] sm:$0xff] }
 0x5ae   :  { %v2549_v42 = vsel %vm981_vm3, %v2529_v23, %v2531_v9  ;;  %2578 = vst.msk [vmem:[#allocation3 + $0x5c8] sm:$0xff] %vm1062_vm4, %v2531_v9  ;;  %4158 = vmatprep.subr.bf16.mxu0 %v3378_v16  ;;  %v2537_v10 = vpop.permute.xlu1 %2536  ;;  %v13033_v23 = vcombine.low %v3170_v59, %v3178_v52 }
 0x5af   :  { %3066 = vrot.lane.b32.xlu0 %v16415_v60, %s14938_s0  ;;  %4159 = vmatpush1.bf16.msra.mxu0 %v2547_v34 }
 0x5b0   :  { %3072 = vrot.lane.b32.xlu1 %v16419_v24, %s14938_s0 }
 0x5b1   :  { %v2535_v11 = vpop.permute.xlu0 %2534  ;;  %v3380_v57 = vld [vmem:[#allocation3 + $0x5b8] sm:$0xff] }
 0x5b2   :  { %v2550_v40 = vsel %vm981_vm3, %v2533_v21, %v2535_v11  ;;  %2580 = vst.msk [vmem:[#allocation3 + $0x5d8] sm:$0xff] %vm1062_vm4, %v2535_v11  ;;  %4160 = vmatprep.subr.bf16.mxu0 %v3380_v57  ;;  %v2541_v45 = vpop.permute.xlu1 %2540  ;;  %v16609_v11 = vld [vmem:[%s20363_s4 + $0x70] sm:$0xff] }
 0x5b3   :  { %3070 = vrot.lane.b32.xlu0 %v16425_v8, %s14938_s0  ;;  %4161 = vmatpush1.bf16.msra.mxu0 %v2548_v14 }
 0x5b4   :  { %3076 = vrot.lane.b32.xlu1 %v16435_v33, %s14938_s0 }
 0x5b5   :  { %v2539_v60 = vpop.permute.xlu0 %2538  ;;  %v3382_v18 = vld [vmem:[#allocation3 + $0x5c8] sm:$0xff] }
 0x5b6   :  { %v2551_v61 = vsel %vm981_vm3, %v2537_v10, %v2539_v60  ;;  %2582 = vst.msk [vmem:[#allocation3 + $0x5e8] sm:$0xff] %vm1062_vm4, %v2539_v60  ;;  %4162 = vmatprep.subr.bf16.mxu0 %v3382_v18  ;;  %v2650_v24 = vpop.permute.xlu1 %2649  ;;  %v16604_v10 = vld [vmem:[%s20363_s4 + $0x30] sm:$0xff]  ;;  %v13049_v18 = vcombine.low %v3186_v29, %v3194_v39 }
 0x5b7   :  { %3074 = vrot.lane.b32.xlu0 %v16441_v56, %s14938_s0  ;;  %4163 = vmatpush1.bf16.msra.mxu0 %v2549_v42  ;;  %v4550_v42 = vld [vmem:[%s20323_s7 + $0x28] sm:$0xff] }
 0x5b8   :  { %3080 = vrot.lane.b32.xlu1 %v16445_v38, %s14938_s0 }
 0x5b9   :  { %v2543_v8 = vpop.permute.xlu0 %2542  ;;  %v3384_v30 = vld [vmem:[#allocation3 + $0x5d8] sm:$0xff] }
 0x5ba   :  { %v2552_v46 = vsel %vm981_vm3, %v2541_v45, %v2543_v8  ;;  %2584 = vst.msk [vmem:[#allocation3 + $0x5f8] sm:$0xff] %vm1062_vm4, %v2543_v8  ;;  %4164 = vmatprep.subr.bf16.mxu0 %v3384_v30  ;;  %v2654_v33 = vpop.permute.xlu1 %2653  ;;  %vm2955_vm3 = vcmask 785408  }
 0x5bb   :  { %3078 = vrot.lane.b32.xlu0 %v16451_v50, %s14938_s0  ;;  %4165 = vmatpush1.bf16.msra.mxu0 %v2550_v40 }
 0x5bc   :  { %3084 = vrot.lane.b32.xlu1 %v16465_v51, %s14938_s0  ;;  %v4609_v51 = vld [vmem:[%s20324_s8] sm:$0xff] }
 0x5bd   :  { %v2652_v56 = vpop.permute.xlu0 %2651  ;;  %v3386_v26 = vld [vmem:[#allocation3 + $0x5e8] sm:$0xff] }
 0x5be   :  { %v2682_v4 = vsel %vm2681_vm15, %v2650_v24, %v2652_v56  ;;  %2707 = vst.msk [vmem:[#allocation3 + $0x608] sm:$0xff] %vm1062_vm4, %v2652_v56  ;;  %4166 = vmatprep.subr.bf16.mxu0 %v3386_v26  ;;  %v2658_v35 = vpop.permute.xlu1 %2657 }
 0x5bf   :  { %3082 = vrot.lane.b32.xlu0 %v16473_v36, %s14938_s0  ;;  %4167 = vmatpush1.bf16.msra.mxu0 %v2551_v61  ;;  %v13004_v61 = vcombine.high %v16604_v10, %v16609_v11 }
 0x5c0   :  { %3088 = vrot.lane.b32.xlu1 %v16477_v62, %s14938_s0 }
 0x5c1   :  { %v2656_v38 = vpop.permute.xlu0 %2655  ;;  %v3388_v43 = vld [vmem:[#allocation3 + $0x5f8] sm:$0xff] }
 0x5c2   :  { %v2683_v1 = vsel %vm2681_vm15, %v2654_v33, %v2656_v38  ;;  %2709 = vst.msk [vmem:[#allocation3 + $0x618] sm:$0xff] %vm1062_vm4, %v2656_v38  ;;  %4168 = vmatprep.subr.bf16.mxu0 %v3388_v43  ;;  %v2662_v50 = vpop.permute.xlu1 %2661 }
 0x5c3   :  { %3086 = vrot.lane.b32.xlu0 %v16483_v20, %s14938_s0  ;;  %4169 = vmatpush1.bf16.msra.mxu0 %v2552_v46 }
 0x5c4   :  { %4560 = vperm.xlu1 %13990, %v4546_v31  }
 0x5c5   :  { %v2660_v15 = vpop.permute.xlu0 %2659  ;;  %v3390_v54 = vld [vmem:[#allocation3 + $0x608] sm:$0xff] }
 0x5c6   :  { %v2684_v13 = vsel %vm2681_vm15, %v2658_v35, %v2660_v15  ;;  %2711 = vst.msk [vmem:[#allocation3 + $0x628] sm:$0xff] %vm1062_vm4, %v2660_v15  ;;  %4211 = vmatprep.subr.bf16.mxu0 %v3390_v54  ;;  %4171 = vmatmul.mubr.bf16.vlgmr.msra.gmra.mrb[0].mxu0 %v13001_v2  ;;  %v2666_v12 = vpop.permute.xlu1 %2665 }
 0x5c7   :  { %3090 = vrot.lane.b32.xlu0 %v16491_v37, %s14938_s0  ;;  %4212 = vmatpush1.bf16.msra.mxu0 %v2682_v4 }
 0x5c8   :  { %4619 = vperm.xlu1 %13990, %v4609_v51   ;;  %4180 = vmatprep.mubr.bf16.mxu0 %v13018_v0 }
 0x5c9   :  { %v2664_v49 = vpop.permute.xlu0 %2663  ;;  %v3392_v47 = vld [vmem:[#allocation3 + $0x618] sm:$0xff] }
 0x5ca   :  { %v2685_v36 = vsel %vm2681_vm15, %v2662_v50, %v2664_v49  ;;  %2713 = vst.msk [vmem:[#allocation3 + $0x638] sm:$0xff] %vm1062_vm4, %v2664_v49  ;;  %4213 = vmatprep.subr.bf16.mxu0 %v3392_v47  ;;  %v2670_v19 = vpop.permute.xlu1 %2669 }
 0x5cb   :  { %4555 = vperm.xlu0 %13989, %v4545_v17   ;;  %4214 = vmatpush1.bf16.msra.mxu0 %v2683_v1 }
 0x5cc   :  { %4565 = vperm.xlu1 %13990, %v4547_v6  }
 0x5cd   :  { %v2668_v62 = vpop.permute.xlu0 %2667  ;;  %v3394_v58 = vld [vmem:[#allocation3 + $0x628] sm:$0xff] }
 0x5ce   :  { %v2686_v27 = vsel %vm2681_vm15, %v2666_v12, %v2668_v62  ;;  %2715 = vst.msk [vmem:[#allocation3 + $0x648] sm:$0xff] %vm1062_vm4, %v2668_v62  ;;  %4215 = vmatprep.subr.bf16.mxu0 %v3394_v58  ;;  %v2674_v20 = vpop.permute.xlu1 %2673  ;;  %4181 = vmatmul.mubr.bf16.gmra.mrb[4].mxu0 %v13017_v41 }
 0x5cf   :  { %4624 = vperm.xlu0 %13989, %v4610_v25   ;;  %4216 = vmatpush1.bf16.msra.mxu0 %v2684_v13 }
 0x5d0   :  { %4629 = vperm.xlu1 %13990, %v4611_v48   ;;  %4190 = vmatprep.mubr.bf16.mxu0 %v13034_v28  ;;  %v3155_v48 = vld [vmem:[%s20363_s4 + $0xb0] sm:$0xff] }
 0x5d1   :  { %v2672_v32 = vpop.permute.xlu0 %2671  ;;  %v3396_v5 = vld [vmem:[#allocation3 + $0x638] sm:$0xff] }
 0x5d2   :  { %v2687_v37 = vsel %vm2681_vm15, %v2670_v19, %v2672_v32  ;;  %2717 = vst.msk [vmem:[#allocation3 + $0x658] sm:$0xff] %vm1062_vm4, %v2672_v32  ;;  %4217 = vmatprep.subr.bf16.mxu0 %v3396_v5  ;;  %v2678_v34 = vpop.permute.xlu1 %2677  ;;  %v13003_v32 = vcombine.low %v16604_v10, %v16609_v11 }
 0x5d3   :  { %4570 = vperm.xlu0 %13989, %v4548_v44   ;;  %4218 = vmatpush1.bf16.msra.mxu0 %v2685_v36 }
 0x5d4   :  { %4575 = vperm.xlu1 %13990, %v4549_v53  }
 0x5d5   :  { %v2676_v14 = vpop.permute.xlu0 %2675  ;;  %v3398_v21 = vld [vmem:[#allocation3 + $0x648] sm:$0xff] }
 0x5d6   :  { %v2688_v9 = vsel %vm2681_vm15, %v2674_v20, %v2676_v14  ;;  %2719 = vst.msk [vmem:[#allocation3 + $0x668] sm:$0xff] %vm1062_vm4, %v2676_v14  ;;  %4219 = vmatprep.subr.bf16.mxu0 %v3398_v21  ;;  %v2787_v16 = vpop.permute.xlu1 %2786  ;;  %4191 = vmatmul.mubr.bf16.gmra.mrb[8].mxu0 %v13033_v23 }
 0x5d7   :  { %4634 = vperm.xlu0 %13989, %v4612_v63   ;;  %4220 = vmatpush1.bf16.msra.mxu0 %v2686_v27  ;;  %v3163_v27 = vld [vmem:[%s20363_s4 + $0xf0] sm:$0xff] }
 0x5d8   :  { %4200 = vmatprep.mubr.bf16.mxu0 %v13050_v55  ;;  %v13020_v29 = vcombine.high %v3155_v48, %v3163_v27  ;;  %v3171_v63 = vld [vmem:[%s20363_s4 + $0x130] sm:$0xff] }
 0x5d9   :  { %v2680_v57 = vpop.permute.xlu0 %2679  ;;  %v3400_v40 = vld [vmem:[#allocation3 + $0x658] sm:$0xff]  ;;  %v3179_v55 = vld [vmem:[%s20363_s4 + $0x170] sm:$0xff] }
 0x5da   :  { %v2689_v45 = vsel %vm2681_vm15, %v2678_v34, %v2680_v57  ;;  %2721 = vst.msk [vmem:[#allocation3 + $0x678] sm:$0xff] %vm1062_vm4, %v2680_v57  ;;  %4221 = vmatprep.subr.bf16.mxu0 %v3400_v40  ;;  %v2791_v60 = vpop.permute.xlu1 %2790  ;;  %v13036_v10 = vcombine.high %v3171_v63, %v3179_v55 }
 0x5db   :  { %4580 = vperm.xlu0 %13989, %v4550_v42   ;;  %4222 = vmatpush1.bf16.msra.mxu0 %v2687_v37  ;;  %v13019_v42 = vcombine.low %v3155_v48, %v3163_v27 }
 0x5dd   :  { %v2789_v24 = vpop.permute.xlu0 %2788  ;;  %v3402_v8 = vld [vmem:[#allocation3 + $0x668] sm:$0xff] }
 0x5de   :  { %v2819_v30 = vsel %vm2818_vm0, %v2787_v16, %v2789_v24  ;;  %2844 = vst.msk [vmem:[#allocation3 + $0x688] sm:$0xff] %vm1062_vm4, %v2789_v24  ;;  %4223 = vmatprep.subr.bf16.mxu0 %v3402_v8  ;;  %v2795_v46 = vpop.permute.xlu1 %2794  ;;  %4201 = vmatmul.mubr.bf16.gmra.mrb[12].mxu0 %v13049_v18  ;;  %v3195_v18 = vld [vmem:[%s20363_s4 + $0x1f0] sm:$0xff] }
 0x5df   :  { %4224 = vmatpush1.bf16.msra.mxu0 %v2688_v9  ;;  %4243 = vmatprep.mubr.bf16.mxu0 %v13004_v61 }
 0x5e1   :  { %v2793_v33 = vpop.permute.xlu0 %2792  ;;  %v3404_v56 = vld [vmem:[#allocation3 + $0x678] sm:$0xff] }
 0x5e2   :  { %v2820_v26 = vsel %vm2818_vm0, %v2791_v60, %v2793_v33  ;;  %2846 = vst.msk [vmem:[#allocation3 + $0x698] sm:$0xff] %vm1062_vm4, %v2793_v33  ;;  %4225 = vmatprep.subr.bf16.mxu0 %v3404_v56  ;;  %v2799_v4 = vpop.permute.xlu1 %2798  ;;  %v3187_v60 = vld [vmem:[%s20363_s4 + $0x1b0] sm:$0xff] }
 0x5e3   :  { %4226 = vmatpush1.bf16.msra.mxu0 %v2689_v45  ;;  %v13052_v33 = vcombine.high %v3187_v60, %v3195_v18 }
 0x5e5   :  { %v2797_v35 = vpop.permute.xlu0 %2796  ;;  %v3406_v31 = vld [vmem:[#allocation3 + $0x688] sm:$0xff] }
 0x5e6   :  { %v2821_v38 = vsel %vm2818_vm0, %v2795_v46, %v2797_v35  ;;  %2848 = vst.msk [vmem:[#allocation3 + $0x6a8] sm:$0xff] %vm1062_vm4, %v2797_v35  ;;  %4227 = vmatprep.subr.bf16.mxu0 %v3406_v31  ;;  %v2803_v43 = vpop.permute.xlu1 %2802  ;;  %v13035_v46 = vcombine.low %v3171_v63, %v3179_v55  ;;  %v16668_v31 = vld [vmem:[%s20363_s4 + $0x38] sm:$0xff] }
 0x5e7   :  { %4228 = vmatpush1.bf16.msra.mxu0 %v2819_v30  ;;  %v3156_v63 = vld [vmem:[%s20363_s4 + $0xb8] sm:$0xff] }
 0x5e8   :  { %v3164_v55 = vld [vmem:[%s20363_s4 + $0xf8] sm:$0xff] }
 0x5e9   :  { %v2801_v22 = vpop.permute.xlu0 %2800  ;;  %v3408_v7 = vld [vmem:[#allocation3 + $0x698] sm:$0xff] }
 0x5ea   :  { %v2822_v1 = vsel %vm2818_vm0, %v2799_v4, %v2801_v22  ;;  %2850 = vst.msk [vmem:[#allocation3 + $0x6b8] sm:$0xff] %vm1062_vm4, %v2801_v22  ;;  %4229 = vmatprep.subr.bf16.mxu0 %v3408_v7  ;;  %v2807_v2 = vpop.permute.xlu1 %2806 }
 0x5eb   :  { %4230 = vmatpush1.bf16.msra.mxu0 %v2820_v26 }
 0x5ed   :  { %v2805_v50 = vpop.permute.xlu0 %2804  ;;  %v3410_v0 = vld [vmem:[#allocation3 + $0x6a8] sm:$0xff] }
 0x5ee   :  { %v2823_v15 = vsel %vm2818_vm0, %v2803_v43, %v2805_v50  ;;  %2852 = vst.msk [vmem:[#allocation3 + $0x6c8] sm:$0xff] %vm1062_vm4, %v2805_v50  ;;  %4231 = vmatprep.subr.bf16.mxu0 %v3410_v0  ;;  %v2811_v54 = vpop.permute.xlu1 %2810 }
 0x5ef   :  { %4232 = vmatpush1.bf16.msra.mxu0 %v2821_v38  ;;  %v16673_v38 = vld [vmem:[%s20363_s4 + $0x78] sm:$0xff] }
 0x5f0   :  { %v13006_v50 = vcombine.high %v16668_v31, %v16673_v38 }
 0x5f1   :  { %v2809_v51 = vpop.permute.xlu0 %2808  ;;  %v3412_v13 = vld [vmem:[#allocation3 + $0x6b8] sm:$0xff] }
 0x5f2   :  { %v2824_v12 = vsel %vm2818_vm0, %v2807_v2, %v2809_v51  ;;  %2854 = vst.msk [vmem:[#allocation3 + $0x6d8] sm:$0xff] %vm1062_vm4, %v2809_v51  ;;  %4233 = vmatprep.subr.bf16.mxu0 %v3412_v13  ;;  %v2815_v17 = vpop.permute.xlu1 %2814  ;;  %v13051_v2 = vcombine.low %v3187_v60, %v3195_v18 }
 0x5f3   :  { %4234 = vmatpush1.bf16.msra.mxu0 %v2822_v1 }
 0x5f5   :  { %v2813_v6 = vpop.permute.xlu0 %2812  ;;  %v3414_v49 = vld [vmem:[#allocation3 + $0x6c8] sm:$0xff] }
 0x5f6   :  { %v2825_v47 = vsel %vm2818_vm0, %v2811_v54, %v2813_v6  ;;  %2856 = vst.msk [vmem:[#allocation3 + $0x6e8] sm:$0xff] %vm1062_vm4, %v2813_v6  ;;  %4235 = vmatprep.subr.bf16.mxu0 %v3414_v49  ;;  %v2924_v59 = vpop.permute.xlu1 %2923 }
 0x5f7   :  { %4236 = vmatpush1.bf16.msra.mxu0 %v2823_v15 }
 0x5f9   :  { %v2817_v52 = vpop.permute.xlu0 %2816  ;;  %v3416_v36 = vld [vmem:[#allocation3 + $0x6d8] sm:$0xff] }
 0x5fa   :  { %v2826_v19 = vsel %vm2818_vm0, %v2815_v17, %v2817_v52  ;;  %2858 = vst.msk [vmem:[#allocation3 + $0x6f8] sm:$0xff] %vm1062_vm4, %v2817_v52  ;;  %4237 = vmatprep.subr.bf16.mxu0 %v3416_v36  ;;  %v2928_v41 = vpop.permute.xlu1 %2927 }
 0x5fb   :  { %4238 = vmatpush1.bf16.msra.mxu0 %v2824_v12 }
 0x5fd   :  { %v2926_v25 = vpop.permute.xlu0 %2925  ;;  %v3418_v28 = vld [vmem:[#allocation3 + $0x6e8] sm:$0xff] }
 0x5fe   :  { %v2956_v62 = vsel %vm2955_vm3, %v2924_v59, %v2926_v25  ;;  %2981 = vst.msk [vmem:[#allocation3 + $0x708] sm:$0xff] %vm1062_vm4, %v2926_v25  ;;  %4239 = vmatprep.subr.bf16.mxu0 %v3418_v28  ;;  %v2932_v58 = vpop.permute.xlu1 %2931 }
 0x5ff   :  { %4240 = vmatpush1.bf16.msra.mxu0 %v2825_v47 }
 0x601   :  { %v2930_v20 = vpop.permute.xlu0 %2929  ;;  %v3420_v44 = vld [vmem:[#allocation3 + $0x6f8] sm:$0xff] }
 0x602   :  { %v2957_v53 = vsel %vm2955_vm3, %v2928_v41, %v2930_v20  ;;  %2983 = vst.msk [vmem:[#allocation3 + $0x718] sm:$0xff] %vm1062_vm4, %v2930_v20  ;;  %4241 = vmatprep.subr.bf16.mxu0 %v3420_v44  ;;  %v2936_v5 = vpop.permute.xlu1 %2935 }
 0x603   :  { %4242 = vmatpush1.bf16.msra.mxu0 %v2826_v19 }
 0x605   :  { %v2934_v39 = vpop.permute.xlu0 %2933  ;;  %v3422_v37 = vld [vmem:[#allocation3 + $0x708] sm:$0xff] }
 0x606   :  { %v2958_v34 = vsel %vm2955_vm3, %v2932_v58, %v2934_v39  ;;  %2985 = vst.msk [vmem:[#allocation3 + $0x728] sm:$0xff] %vm1062_vm4, %v2934_v39  ;;  %4284 = vmatprep.subr.bf16.mxu0 %v3422_v37  ;;  %4244 = vmatmul.mubr.bf16.vlgmr.msra.gmra.mrb[0].mxu0 %v13003_v32  ;;  %v2940_v23 = vpop.permute.xlu1 %2939 }
 0x607   :  { %4285 = vmatpush1.bf16.msra.mxu0 %v2956_v62  ;;  %4253 = vmatprep.mubr.bf16.mxu0 %v13020_v29 }
 0x609   :  { %v2938_v14 = vpop.permute.xlu0 %2937  ;;  %v3424_v21 = vld [vmem:[#allocation3 + $0x718] sm:$0xff] }
 0x60a   :  { %v2959_v9 = vsel %vm2955_vm3, %v2936_v5, %v2938_v14  ;;  %2987 = vst.msk [vmem:[#allocation3 + $0x738] sm:$0xff] %vm1062_vm4, %v2938_v14  ;;  %4286 = vmatprep.subr.bf16.mxu0 %v3424_v21  ;;  %v2944_v16 = vpop.permute.xlu1 %2943  ;;  %v13005_v21 = vcombine.low %v16668_v31, %v16673_v38 }
 0x60b   :  { %4287 = vmatpush1.bf16.msra.mxu0 %v2957_v53 }
 0x60d   :  { %v2942_v11 = vpop.permute.xlu0 %2941  ;;  %v3426_v57 = vld [vmem:[#allocation3 + $0x728] sm:$0xff] }
 0x60e   :  { %v2960_v40 = vsel %vm2955_vm3, %v2940_v23, %v2942_v11  ;;  %2989 = vst.msk [vmem:[#allocation3 + $0x748] sm:$0xff] %vm1062_vm4, %v2942_v11  ;;  %4288 = vmatprep.subr.bf16.mxu0 %v3426_v57  ;;  %v2948_v45 = vpop.permute.xlu1 %2947  ;;  %4254 = vmatmul.mubr.bf16.gmra.mrb[4].mxu0 %v13019_v42  ;;  %v3180_v42 = vld [vmem:[%s20363_s4 + $0x178] sm:$0xff] }
 0x60f   :  { %4289 = vmatpush1.bf16.msra.mxu0 %v2958_v34  ;;  %4263 = vmatprep.mubr.bf16.mxu0 %v13036_v10  ;;  %v13021_v10 = vcombine.low %v3156_v63, %v3164_v55  ;;  %v3188_v57 = vld [vmem:[%s20363_s4 + $0x1b8] sm:$0xff] }
 0x611   :  { %v2946_v61 = vpop.permute.xlu0 %2945  ;;  %v3428_v24 = vld [vmem:[#allocation3 + $0x738] sm:$0xff] }
 0x612   :  { %v2961_v8 = vsel %vm2955_vm3, %v2944_v16, %v2946_v61  ;;  %2991 = vst.msk [vmem:[#allocation3 + $0x758] sm:$0xff] %vm1062_vm4, %v2946_v61  ;;  %4290 = vmatprep.subr.bf16.mxu0 %v3428_v24  ;;  %v2952_v30 = vpop.permute.xlu1 %2951  ;;  %v3172_v16 = vld [vmem:[%s20363_s4 + $0x138] sm:$0xff]  ;;  %v4359_v61 = vlaneseq }
 0x613   :  { %4291 = vmatpush1.bf16.msra.mxu0 %v2959_v9  ;;  %v13022_v9 = vcombine.high %v3156_v63, %v3164_v55  ;;  %v13038_v11 = vcombine.high %v3172_v16, %v3180_v42 }
 0x614   :  { %v16715_v24 = vshrl.u32 %v4359_v61, 7  ;;  %v14004_v61 = vld [vmem:[%s20326_s10 + $0x24] ss:$8 sps:$4 sm:$0xff]  }
 0x615   :  { %v2950_v56 = vpop.permute.xlu0 %2949  ;;  %v3430_v26 = vld [vmem:[#allocation3 + $0x748] sm:$0xff] }
 0x616   :  { %v2962_v4 = vsel %vm2955_vm3, %v2948_v45, %v2950_v56  ;;  %2993 = vst.msk [vmem:[#allocation3 + $0x768] sm:$0xff] %vm1062_vm4, %v2950_v56  ;;  %4292 = vmatprep.subr.bf16.mxu0 %v3430_v26  ;;  %v3061_v35 = vpop.permute.xlu1 %3060  ;;  %4264 = vmatmul.mubr.bf16.gmra.mrb[8].mxu0 %v13035_v46  ;;  %v13037_v45 = vcombine.low %v3172_v16, %v3180_v42  ;;  %v16724_v46 = vsub.s32 0, %v16715_v24  ;;  %v4613_v42 = vld [vmem:[%s20324_s8 + $0x20] sm:$0xff] }
 0x617   :  { %4293 = vmatpush1.bf16.msra.mxu0 %v2960_v40  ;;  %4273 = vmatprep.mubr.bf16.mxu0 %v13052_v33  ;;  %v3196_v40 = vld [vmem:[%s20363_s4 + $0x1f8] sm:$0xff]  ;;  %s14940_s4 = smov 110  }
 0x618   :  { %v13054_v60 = vcombine.high %v3188_v57, %v3196_v40  ;;  %v13053_v18 = vcombine.low %v3188_v57, %v3196_v40  ;;  %v13996_v57 = vld [vmem:[%s20326_s10] ss:$8 sps:$4 sm:$0xff]   ;;  %v13998_v40 = vld [vmem:[%s20326_s10 + $0x4] ss:$8 sps:$4 sm:$0xff]  }
 0x619   :  { %v2954_v43 = vpop.permute.xlu0 %2953  ;;  %v3432_v22 = vld [vmem:[#allocation3 + $0x758] sm:$0xff]  ;;  %4866 = vmatprep.subr.bf16.mxu1 %v13998_v40 }
 0x61a   :  { %v2963_v7 = vsel %vm2955_vm3, %v2952_v30, %v2954_v43  ;;  %2995 = vst.msk [vmem:[#allocation3 + $0x778] sm:$0xff] %vm1062_vm4, %v2954_v43  ;;  %4294 = vmatprep.subr.bf16.mxu0 %v3432_v22  ;;  %v3065_v1 = vpop.permute.xlu1 %3064  ;;  %v4357_v30 = vld [vmem:[%s20325_s9] sm:$0x3]  ;;  %4867 = vmatpush1.bf16.msra.mxu1 %v13996_v57 }
 0x61b   :  { %4295 = vmatpush1.bf16.msra.mxu0 %v2961_v8  ;;  %v16718_v8 = vsub.s32 1, %v16715_v24  ;;  %v16730_v56 = vrot.slane %v4357_v30, %v16724_v46 }
 0x61d   :  { %v3063_v0 = vpop.permute.xlu0 %3062  ;;  %v3434_v15 = vld [vmem:[#allocation3 + $0x768] sm:$0xff]  ;;  %v16727_v33 = vrot.slane %v4357_v30, %v16718_v8 }
 0x61e   :  { %v3093_v54 = vsel %vm3092_vm7, %v3061_v35, %v3063_v0  ;;  %3118 = vst.msk [vmem:[#allocation3 + $0x788] sm:$0xff] %vm1062_vm4, %v3063_v0  ;;  %4296 = vmatprep.subr.bf16.mxu0 %v3434_v15  ;;  %v3069_v51 = vpop.permute.xlu1 %3068  ;;  %4274 = vmatmul.mubr.bf16.gmra.mrb[12].mxu0 %v13051_v2 }
 0x61f   :  { %4297 = vmatpush1.bf16.msra.mxu0 %v2962_v4  ;;  %4316 = vmatprep.mubr.bf16.mxu0 %v13006_v50 }
 0x621   :  { %v3067_v13 = vpop.permute.xlu0 %3066  ;;  %v3436_v12 = vld [vmem:[#allocation3 + $0x778] sm:$0xff] }
 0x622   :  { %v3094_v17 = vsel %vm3092_vm7, %v3065_v1, %v3067_v13  ;;  %3120 = vst.msk [vmem:[#allocation3 + $0x798] sm:$0xff] %vm1062_vm4, %v3067_v13  ;;  %4298 = vmatprep.subr.bf16.mxu0 %v3436_v12  ;;  %v3073_v6 = vpop.permute.xlu1 %3072 }
 0x623   :  { %4299 = vmatpush1.bf16.msra.mxu0 %v2963_v7 }
 0x625   :  { %v3071_v49 = vpop.permute.xlu0 %3070  ;;  %v3438_v47 = vld [vmem:[#allocation3 + $0x788] sm:$0xff] }
 0x626   :  { %v3095_v59 = vsel %vm3092_vm7, %v3069_v51, %v3071_v49  ;;  %3122 = vst.msk [vmem:[#allocation3 + $0x7a8] sm:$0xff] %vm1062_vm4, %v3071_v49  ;;  %4300 = vmatprep.subr.bf16.mxu0 %v3438_v47  ;;  %v3077_v52 = vpop.permute.xlu1 %3076 }
 0x627   :  { %4301 = vmatpush1.bf16.msra.mxu0 %v3093_v54 }
 0x629   :  { %v3075_v36 = vpop.permute.xlu0 %3074  ;;  %v3440_v19 = vld [vmem:[#allocation3 + $0x798] sm:$0xff] }
 0x62a   :  { %v3096_v41 = vsel %vm3092_vm7, %v3073_v6, %v3075_v36  ;;  %3124 = vst.msk [vmem:[#allocation3 + $0x7b8] sm:$0xff] %vm1062_vm4, %v3075_v36  ;;  %4302 = vmatprep.subr.bf16.mxu0 %v3440_v19  ;;  %v3081_v62 = vpop.permute.xlu1 %3080 }
 0x62b   :  { %4303 = vmatpush1.bf16.msra.mxu0 %v3094_v17 }
 0x62d   :  { %v3079_v25 = vpop.permute.xlu0 %3078  ;;  %v3442_v28 = vld [vmem:[#allocation3 + $0x7a8] sm:$0xff] }
 0x62e   :  { %v3097_v58 = vsel %vm3092_vm7, %v3077_v52, %v3079_v25  ;;  %3126 = vst.msk [vmem:[#allocation3 + $0x7c8] sm:$0xff] %vm1062_vm4, %v3079_v25  ;;  %4304 = vmatprep.subr.bf16.mxu0 %v3442_v28  ;;  %v3085_v44 = vpop.permute.xlu1 %3084 }
 0x62f   :  { %4305 = vmatpush1.bf16.msra.mxu0 %v3095_v59 }
 0x631   :  { %v3083_v48 = vpop.permute.xlu0 %3082  ;;  %v3444_v27 = vld [vmem:[#allocation3 + $0x7b8] sm:$0xff] }
 0x632   :  { %v3098_v20 = vsel %vm3092_vm7, %v3081_v62, %v3083_v48  ;;  %3128 = vst.msk [vmem:[#allocation3 + $0x7d8] sm:$0xff] %vm1062_vm4, %v3083_v48  ;;  %4306 = vmatprep.subr.bf16.mxu0 %v3444_v27  ;;  %v3089_v29 = vpop.permute.xlu1 %3088 }
 0x633   :  { %4307 = vmatpush1.bf16.msra.mxu0 %v3096_v41 }
 0x635   :  { %v3087_v53 = vpop.permute.xlu0 %3086  ;;  %v3446_v32 = vld [vmem:[#allocation3 + $0x7c8] sm:$0xff] }
 0x636   :  { %v3099_v5 = vsel %vm3092_vm7, %v3085_v44, %v3087_v53  ;;  %3130 = vst.msk [vmem:[#allocation3 + $0x7e8] sm:$0xff] %vm1062_vm4, %v3087_v53  ;;  %4308 = vmatprep.subr.bf16.mxu0 %v3446_v32 }
 0x637   :  { %4309 = vmatpush1.bf16.msra.mxu0 %v3097_v58 }
 0x639   :  { %v3091_v39 = vpop.permute.xlu0 %3090  ;;  %v3448_v37 = vld [vmem:[#allocation3 + $0x7d8] sm:$0xff] }
 0x63a   :  { %v3100_v34 = vsel %vm3092_vm7, %v3089_v29, %v3091_v39  ;;  %3132 = vst.msk [vmem:[#allocation3 + $0x7f8] sm:$0xff] %vm1062_vm4, %v3091_v39  ;;  %4310 = vmatprep.subr.bf16.mxu0 %v3448_v37 }
 0x63b   :  { %4311 = vmatpush1.bf16.msra.mxu0 %v3098_v20 }
 0x63d   :  { %v3450_v23 = vld [vmem:[#allocation3 + $0x7e8] sm:$0xff] }
 0x63e   :  { %4312 = vmatprep.subr.bf16.mxu0 %v3450_v23 }
 0x63f   :  { %4313 = vmatpush1.bf16.msra.mxu0 %v3099_v5 }
 0x641   :  { %v3452_v14 = vld [vmem:[#allocation3 + $0x7f8] sm:$0xff] }
 0x642   :  { %4314 = vmatprep.subr.bf16.mxu0 %v3452_v14 }
 0x643   :  { %4315 = vmatpush1.bf16.msra.mxu0 %v3100_v34 }
 0x646   :  { %4317 = vmatmul.mubr.bf16.vlgmr.msra.gmra.mrb[0].mxu0 %v13005_v21 }
 0x647   :  { %4326 = vmatprep.mubr.bf16.mxu0 %v13022_v9 }
 0x64e   :  { %4327 = vmatmul.mubr.bf16.gmra.mrb[4].mxu0 %v13021_v10  ;;  %v4614_v10 = vld [vmem:[%s20324_s8 + $0x28] sm:$0xff] }
 0x64f   :  { %4336 = vmatprep.mubr.bf16.mxu0 %v13038_v11  ;;  %v16810_v11 = vpop.permute.xlu1 %4560 }
 0x653   :  { %v16829_v30 = vpop.permute.xlu1 %4619 }
 0x656   :  { %4337 = vmatmul.mubr.bf16.gmra.mrb[8].mxu0 %v13037_v45  ;;  %v16818_v45 = vpop.permute.xlu0 %4555 }
 0x657   :  { %4346 = vmatprep.mubr.bf16.mxu0 %v13054_v60  ;;  %v14001_v60 = vld [vmem:[%s20326_s10 + $0x14] ss:$8 sps:$4 sm:$0xff]  }
 0x658   :  { %4868 = vmatprep.subr.bf16.mxu1 %v14001_v60 }
 0x65e   :  { %4347 = vmatmul.mubr.bf16.gmra.mrb[12].mxu0 %v13053_v18  ;;  %v13999_v18 = vld [vmem:[%s20326_s10 + $0x10] ss:$8 sps:$4 sm:$0xff]  }
 0x65f   :  { %4869 = vmatpush1.bf16.msra.mxu1 %v13999_v18 }
 0x660   :  { %4870 = vmatprep.subr.bf16.mxu1 %v14004_v61 }
 0x719   :  { %v16732_v26 = vpop.f32.mrb[0].mxu0 }
 0x71a   :  { %v16734_v4 = vpop.f32.mrb[1].mxu0  ;;  %v4369_v38 = vmul.f32 %v16730_v56, %v16732_v26 }
 0x71b   :  { %v4370_v35 = vmul.f32 %v16727_v33, %v16734_v4  ;;  %v16738_v31 = vpop.f32.mrb[2].mxu0 }
 0x71c   :  { %v16742_v43 = vpop.f32.mrb[3].mxu0  ;;  %v4371_v1 = vmul.f32 %v16730_v56, %v16738_v31 }
 0x71d   :  { %v4385_v22 = vsel %vm1062_vm4, %v4370_v35, 0.0  ;;  %v4372_v7 = vmul.f32 %v16727_v33, %v16742_v43  ;;  %v14002_v35 = vld [vmem:[%s20326_s10 + $0x20] ss:$8 sps:$4 sm:$0xff]  }
 0x71e   :  { %v4386_v2 = vadd.f32 %v4385_v22, %v4369_v38  ;;  %v14007_v38 = vld [vmem:[%s20326_s10 + $0x34] ss:$8 sps:$4 sm:$0xff]   ;;  %v16837_v22 = vpop.permute.xlu0 %4624  ;;  %4871 = vmatpush1.bf16.msra.mxu1 %v14002_v35  ;;  %v14016_v35 = vld [vmem:[%s20326_s10 + $0x64] ss:$8 sps:$4 sm:$0xff]  }
 0x71f   :  { %v4389_v50 = vsel %vm1062_vm4, %v4372_v7, 0.0  ;;  %v16839_v7 = vpop.permute.xlu1 %4565  ;;  %4872 = vmatprep.subr.bf16.mxu1 %v14007_v38  ;;  %v14014_v38 = vld [vmem:[%s20326_s10 + $0x60] ss:$8 sps:$4 sm:$0xff]  }
 0x720   :  { %4387 = vadd.xlane.f32.xlu1 %v4386_v2  ;;  %v4390_v0 = vadd.f32 %v4389_v50, %v4371_v1  ;;  %v14005_v1 = vld [vmem:[%s20326_s10 + $0x30] ss:$8 sps:$4 sm:$0xff]   ;;  %v14010_v2 = vld [vmem:[%s20326_s10 + $0x44] ss:$8 sps:$4 sm:$0xff]  }
 0x721   :  { %v16750_v15 = vpop.f32.mrb[4].mxu0 }
 0x722   :  { %4391 = vadd.xlane.f32.xlu0 %v4390_v0  ;;  %v16752_v54 = vpop.f32.mrb[5].mxu0  ;;  %v4373_v12 = vmul.f32 %v16730_v56, %v16750_v15  ;;  %v16847_v50 = vpop.permute.xlu0 %4570  ;;  %4873 = vmatpush1.bf16.msra.mxu1 %v14005_v1  ;;  %v14008_v0 = vld [vmem:[%s20326_s10 + $0x40] ss:$8 sps:$4 sm:$0xff]   ;;  %v14019_v1 = vld [vmem:[%s20326_s10 + $0x74] ss:$8 sps:$4 sm:$0xff]  }
 0x723   :  { %v4374_v51 = vmul.f32 %v16727_v33, %v16752_v54  ;;  %v16756_v13 = vpop.f32.mrb[6].mxu0  ;;  %4874 = vmatprep.subr.bf16.mxu1 %v14010_v2  ;;  %v14017_v2 = vld [vmem:[%s20326_s10 + $0x70] ss:$8 sps:$4 sm:$0xff]  }
 0x724   :  { %v16760_v17 = vpop.f32.mrb[7].mxu0  ;;  %v4375_v47 = vmul.f32 %v16730_v56, %v16756_v13 }
 0x725   :  { %v4393_v6 = vsel %vm1062_vm4, %v4374_v51, 0.0  ;;  %v4376_v49 = vmul.f32 %v16727_v33, %v16760_v17  ;;  %v14013_v51 = vld [vmem:[%s20326_s10 + $0x54] ss:$8 sps:$4 sm:$0xff]  }
 0x726   :  { %v4394_v59 = vadd.f32 %v4393_v6, %v4373_v12  ;;  %v16855_v12 = vpop.permute.xlu1 %4629  ;;  %v16857_v6 = vpop.permute.xlu0 %4634  ;;  %4875 = vmatpush1.bf16.msra.mxu1 %v14008_v0  ;;  %v14022_v0 = vld [vmem:[%s20326_s10 + $0x84] ss:$8 sps:$4 sm:$0xff]  }
 0x727   :  { %v4397_v52 = vsel %vm1062_vm4, %v4376_v49, 0.0  ;;  %v14011_v49 = vld [vmem:[%s20326_s10 + $0x50] ss:$8 sps:$4 sm:$0xff]   ;;  %4876 = vmatprep.subr.bf16.mxu1 %v14013_v51  ;;  %v14020_v51 = vld [vmem:[%s20326_s10 + $0x80] ss:$8 sps:$4 sm:$0xff]  }
 0x728   :  { %4395 = vadd.xlane.f32.xlu0 %v4394_v59  ;;  %v4398_v36 = vadd.f32 %v4397_v52, %v4375_v47 }
 0x729   :  { %v16768_v19 = vpop.f32.mrb[8].mxu0 }
 0x72a   :  { %4399 = vadd.xlane.f32.xlu1 %v4398_v36  ;;  %v16770_v41 = vpop.f32.mrb[9].mxu0  ;;  %v4377_v62 = vmul.f32 %v16730_v56, %v16768_v19  ;;  %v16862_v47 = vpop.permute.xlu1 %4575  ;;  %4877 = vmatpush1.bf16.msra.mxu1 %v14011_v49  ;;  %v4552_v49 = vld [vmem:[%s20323_s7 + $0x38] sm:$0xff] }
 0x72b   :  { %v4378_v25 = vmul.f32 %v16727_v33, %v16770_v41  ;;  %v16774_v28 = vpop.f32.mrb[10].mxu0  ;;  %v16864_v59 = vpop.permute.xlu0 %4580  ;;  %4878 = vmatprep.subr.bf16.mxu1 %v14016_v35 }
 0x72c   :  { %v16778_v58 = vpop.f32.mrb[11].mxu0  ;;  %v4379_v20 = vmul.f32 %v16730_v56, %v16774_v28 }
 0x72d   :  { %v4401_v48 = vsel %vm1062_vm4, %v4378_v25, 0.0  ;;  %v4380_v27 = vmul.f32 %v16727_v33, %v16778_v58 }
 0x72e   :  { %v4402_v44 = vadd.f32 %v4401_v48, %v4377_v62  ;;  %4879 = vmatpush1.bf16.msra.mxu1 %v14014_v38 }
 0x72f   :  { %v4405_v53 = vsel %vm1062_vm4, %v4380_v27, 0.0  ;;  %4880 = vmatprep.subr.bf16.mxu1 %v14019_v1 }
 0x730   :  { %4403 = vadd.xlane.f32.xlu0 %v4402_v44  ;;  %v4406_v32 = vadd.f32 %v4405_v53, %v4379_v20 }
 0x731   :  { %v16786_v5 = vpop.f32.mrb[12].mxu0 }
 0x732   :  { %4407 = vadd.xlane.f32.xlu1 %v4406_v32  ;;  %v16788_v29 = vpop.f32.mrb[13].mxu0  ;;  %v4381_v34 = vmul.f32 %v16730_v56, %v16786_v5  ;;  %4881 = vmatpush1.bf16.msra.mxu1 %v14017_v2 }
 0x733   :  { %v4382_v39 = vmul.f32 %v16727_v33, %v16788_v29  ;;  %v16792_v37 = vpop.f32.mrb[14].mxu0  ;;  %4882 = vmatprep.subr.bf16.mxu1 %v14022_v0 }
 0x734   :  { %v16796_v23 = vpop.f32.mrb[15].mxu0  ;;  %v4383_v14 = vmul.f32 %v16730_v56, %v16792_v37 }
 0x735   :  { %v4409_v63 = vsel %vm1062_vm4, %v4382_v39, 0.0  ;;  %v4384_v55 = vmul.f32 %v16727_v33, %v16796_v23 }
 0x736   :  { %v4410_v21 = vadd.f32 %v4409_v63, %v4381_v34  ;;  %4883 = vmatpush1.bf16.msra.mxu1 %v14020_v51 }
 0x737   :  { %v4413_v9 = vsel %vm1062_vm4, %v4384_v55, 0.0 }
 0x738   :  { %4411 = vadd.xlane.f32.xlu0 %v4410_v21  ;;  %v4414_v16 = vadd.f32 %v4413_v9, %v4383_v14 }
 0x73a   :  { %4415 = vadd.xlane.f32.xlu1 %v4414_v16 }
 0x74b   :  { %4639 = vperm.xlu1 %13990, %v4613_v42  }
 0x74e   :  { %4644 = vperm.xlu0 %13989, %v4614_v10  }
 0x7ad   :  { %v4388_v52 = vpop.xlane.xlu1 %4387 }
 0x7ae   :  { %v4417_v36 = vmul.f32 0.010204081, %v4388_v52  ;;  %v14025_v52 = vld [vmem:[%s20326_s10 + $0x94] ss:$8 sps:$4 sm:$0xff]  }
 0x7af   :  { %v4392_v25 = vpop.xlane.xlu0 %4391  ;;  %4884 = vmatprep.subr.bf16.mxu1 %v14025_v52 }
 0x7b0   :  { %v16867_v62 = vsub.f32 %v16732_v26, %v4417_v36  ;;  %v16870_v48 = vsub.f32 %v16734_v4, %v4417_v36  ;;  %v4418_v27 = vmul.f32 0.010204081, %v4392_v25  ;;  %v14023_v36 = vld [vmem:[%s20326_s10 + $0x90] ss:$8 sps:$4 sm:$0xff]  }
 0x7b1   :  { %4885 = vmatpush1.bf16.msra.mxu1 %v14023_v36 }
 0x7b2   :  { %v4441_v20 = vmul.f32 %v16867_v62, %v16867_v62  ;;  %v4442_v44 = vmul.f32 %v16870_v48, %v16870_v48  ;;  %v16877_v53 = vsub.f32 %v16738_v31, %v4418_v27  ;;  %v16880_v32 = vsub.f32 %v16742_v43, %v4418_v27  ;;  %v14028_v27 = vld [vmem:[%s20326_s10 + $0xa4] ss:$8 sps:$4 sm:$0xff]  }
 0x7b3   :  { %4886 = vmatprep.subr.bf16.mxu1 %v14028_v27 }
 0x7b4   :  { %v4443_v26 = vmul.f32 %v16877_v53, %v16877_v53  ;;  %v4444_v4 = vmul.f32 %v16880_v32, %v16880_v32  ;;  %v4457_v39 = vmul.f32 %v4441_v20, %v16730_v56  ;;  %v4458_v34 = vmul.f32 %v4442_v44, %v16727_v33  ;;  %v14026_v44 = vld [vmem:[%s20326_s10 + $0xa0] ss:$8 sps:$4 sm:$0xff]  }
 0x7b5   :  { %v4396_v63 = vpop.xlane.xlu0 %4395  ;;  %4887 = vmatpush1.bf16.msra.mxu1 %v14026_v44 }
 0x7b6   :  { %v4419_v55 = vmul.f32 0.010204081, %v4396_v63  ;;  %v4473_v14 = vsel %vm1062_vm4, %v4458_v34, 0.0  ;;  %v4459_v31 = vmul.f32 %v4443_v26, %v16730_v56  ;;  %v4460_v21 = vmul.f32 %v4444_v4, %v16727_v33  ;;  %v14031_v4 = vld [vmem:[%s20326_s10 + $0xb4] ss:$8 sps:$4 sm:$0xff]  }
 0x7b7   :  { %v4474_v43 = vadd.f32 %v4473_v14, %v4457_v39  ;;  %v4400_v25 = vpop.xlane.xlu1 %4399  ;;  %v14029_v63 = vld [vmem:[%s20326_s10 + $0xb0] ss:$8 sps:$4 sm:$0xff]   ;;  %4888 = vmatprep.subr.bf16.mxu1 %v14031_v4 }
 0x7b8   :  { %v16892_v9 = vsub.f32 %v16750_v15, %v4419_v55  ;;  %v16895_v16 = vsub.f32 %v16752_v54, %v4419_v55  ;;  %v4477_v42 = vsel %vm1062_vm4, %v4460_v21, 0.0  ;;  %v4551_v54 = vld [vmem:[%s20323_s7 + $0x30] sm:$0xff]  ;;  %v4420_v20 = vmul.f32 0.010204081, %v4400_v25  ;;  %v4721_v55 = vld [vmem:[%s20326_s10 + $0xc0] sm:$0xff] }
 0x7b9   :  { %4475 = vadd.xlane.f32.xlu0 %v4474_v43  ;;  %v4478_v10 = vadd.f32 %v4477_v42, %v4459_v31  ;;  %v13080_v31 = vcombine.high %v4721_v55, %v4721_v55  ;;  %v13079_v21 = vcombine.low %v4721_v55, %v4721_v55  ;;  %4889 = vmatpush1.bf16.msra.mxu1 %v14029_v63 }
 0x7ba   :  { %v4445_v57 = vmul.f32 %v16892_v9, %v16892_v9  ;;  %v4446_v40 = vmul.f32 %v16895_v16, %v16895_v16  ;;  %v16945_v39 = vsub.f32 %v16760_v17, %v4420_v20  ;;  %v16954_v17 = vsub.f32 %v16756_v13, %v4420_v20 }
 0x7bb   :  { %4479 = vadd.xlane.f32.xlu1 %v4478_v10  ;;  %13081 = vmatprep.subr.msk.bf16.mxu1 %vm4859_vm10, %v13080_v31 }
 0x7bc   :  { %v4461_v60 = vmul.f32 %v4445_v57, %v16730_v56  ;;  %v4462_v18 = vmul.f32 %v4446_v40, %v16727_v33  ;;  %v4861_v57 = vsel %vm4859_vm10, %v13079_v21, 0  ;;  %v4448_v40 = vmul.f32 %v16945_v39, %v16945_v39 }
 0x7bd   :  { %v4404_v34 = vpop.xlane.xlu0 %4403  ;;  %4891 = vmatpush1.bf16.msra.mxu1 %v4861_v57  ;;  %vm7226_vm10 = vcmask 769024  }
 0x7be   :  { %v4481_v15 = vsel %vm1062_vm4, %v4462_v18, 0.0  ;;  %v4421_v42 = vmul.f32 0.010204081, %v4404_v34 }
 0x7bf   :  { %v4482_v61 = vadd.f32 %v4481_v15, %v4461_v60  ;;  %v4408_v26 = vpop.xlane.xlu1 %4407 }
 0x7c0   :  { %v4422_v14 = vmul.f32 0.010204081, %v4408_v26  ;;  %v16962_v15 = vsub.f32 %v16770_v41, %v4421_v42  ;;  %v16976_v1 = vsub.f32 %v16768_v19, %v4421_v42 }
 0x7c1   :  { %4483 = vadd.xlane.f32.xlu0 %v4482_v61 }
 0x7c2   :  { %v16959_v60 = vsub.f32 %v16778_v58, %v4422_v14  ;;  %v16967_v13 = vsub.f32 %v16774_v28, %v4422_v14  ;;  %v4464_v58 = vmul.f32 %v4448_v40, %v16727_v33  ;;  %v4450_v41 = vmul.f32 %v16962_v15, %v16962_v15  ;;  %v4616_v40 = vld [vmem:[%s20324_s8 + $0x38] sm:$0xff] }
 0x7c3   :  { %v4449_v52 = vmul.f32 %v16976_v1, %v16976_v1 }
 0x7c4   :  { %v4452_v35 = vmul.f32 %v16959_v60, %v16959_v60  ;;  %v4451_v28 = vmul.f32 %v16967_v13, %v16967_v13  ;;  %v4485_v19 = vsel %vm1062_vm4, %v4464_v58, 0.0 }
 0x7c5   :  { %v4412_v10 = vpop.xlane.xlu0 %4411 }
 0x7c6   :  { %v4423_v61 = vmul.f32 0.010204081, %v4412_v10  ;;  %v4467_v20 = vmul.f32 %v4451_v28, %v16730_v56 }
 0x7c7   :  { %v4416_v43 = vpop.xlane.xlu1 %4415 }
 0x7c8   :  { %v4424_v18 = vmul.f32 0.010204081, %v4416_v43  ;;  %v16981_v2 = vsub.f32 %v16788_v29, %v4423_v61  ;;  %v16996_v29 = vsub.f32 %v16786_v5, %v4423_v61  ;;  %v4465_v5 = vmul.f32 %v4449_v52, %v16730_v56 }
 0x7ca   :  { %v16972_v38 = vsub.f32 %v16796_v23, %v4424_v18  ;;  %v16986_v0 = vsub.f32 %v16792_v37, %v4424_v18  ;;  %v4454_v36 = vmul.f32 %v16981_v2, %v16981_v2  ;;  %v4466_v37 = vmul.f32 %v4450_v41, %v16727_v33 }
 0x7cb   :  { %v4453_v4 = vmul.f32 %v16996_v29, %v16996_v29 }
 0x7cc   :  { %4585 = vperm.xlu1 %13990, %v4551_v54   ;;  %v4447_v54 = vmul.f32 %v16954_v17, %v16954_v17  ;;  %v4456_v51 = vmul.f32 %v16972_v38, %v16972_v38  ;;  %v4455_v25 = vmul.f32 %v16986_v0, %v16986_v0  ;;  %v4489_v34 = vsel %vm1062_vm4, %v4466_v37, 0.0 }
 0x7cd   :  { %v4470_v63 = vmul.f32 %v4454_v36, %v16727_v33  ;;  %v4490_v21 = vadd.f32 %v4489_v34, %v4465_v5  ;;  %v4469_v43 = vmul.f32 %v4453_v4, %v16730_v56  ;;  %v17021_v18 = vpop.permute.xlu0 %4644 }
 0x7ce   :  { %v4463_v23 = vmul.f32 %v4447_v54, %v16730_v56  ;;  %v4472_v26 = vmul.f32 %v4456_v51, %v16727_v33  ;;  %v4471_v14 = vmul.f32 %v4455_v25, %v16730_v56  ;;  %v17023_v56 = vpop.permute.xlu1 %4639 }
 0x7cf   :  { %v4497_v42 = vsel %vm1062_vm4, %v4470_v63, 0.0 }
 0x7d0   :  { %v4486_v27 = vadd.f32 %v4485_v19, %v4463_v23  ;;  %v4501_v31 = vsel %vm1062_vm4, %v4472_v26, 0.0  ;;  %v4498_v57 = vadd.f32 %v4497_v42, %v4469_v43 }
 0x7d1   :  { %v4502_v10 = vadd.f32 %v4501_v31, %v4471_v14 }
 0x7d7   :  { %4590 = vperm.xlu0 %13989, %v4552_v49   ;;  %v4468_v49 = vmul.f32 %v4452_v35, %v16727_v33  ;;  %v4615_v33 = vld [vmem:[%s20324_s8 + $0x30] sm:$0xff]  ;;  %s14939_s8 = smov 119  }
 0x7d9   :  { %v4493_v44 = vsel %vm1062_vm4, %v4468_v49, 0.0 }
 0x7da   :  { %v4494_v55 = vadd.f32 %v4493_v44, %v4467_v20 }
 0x7f0   :  { %4487 = vadd.xlane.f32.xlu1 %v4486_v27 }
 0x7f4   :  { %4495 = vadd.xlane.f32.xlu1 %v4494_v55 }
 0x7f6   :  { %4491 = vadd.xlane.f32.xlu0 %v4490_v21 }
 0x7f8   :  { %4503 = vadd.xlane.f32.xlu1 %v4502_v10 }
 0x7fa   :  { %4499 = vadd.xlane.f32.xlu0 %v4498_v57 }
 0x809   :  { %4649 = vperm.xlu1 %13990, %v4615_v33  }
 0x810   :  { %4654 = vperm.xlu0 %13989, %v4616_v40  }
 0x846   :  { %v4476_v61 = vpop.xlane.xlu0 %4475 }
 0x847   :  { %v4505_v54 = vmul.f32 0.010204081, %v4476_v61 }
 0x848   :  { %v4480_v35 = vpop.xlane.xlu1 %4479 }
 0x849   :  { %v4513_v58 = vadd.f32 1e-05, %v4505_v54  ;;  %v4506_v41 = vmul.f32 0.010204081, %v4480_v35 }
 0x84b   :  { %14864 = vrsqrt.f32 %v4513_v58  ;;  %v4514_v28 = vadd.f32 1e-05, %v4506_v41 }
 0x84c   :  { %v17038_v14 = vpop.permute.xlu1 %4585 }
 0x84d   :  { %14866 = vrsqrt.f32 %v4514_v28 }
 0x855   :  { %v14865_v23 = vpop.eup %14864 }
 0x856   :  { %v4529_v51 = vmul.f32 %v14865_v23, %v16867_v62  ;;  %v4530_v19 = vmul.f32 %v14865_v23, %v16870_v48 }
 0x857   :  { %v14867_v49 = vpop.eup %14866 }
 0x858   :  { %v4593_v52 = vmul.f32 %v16818_v45, %v4529_v51  ;;  %v4531_v36 = vmul.f32 %v14867_v49, %v16877_v53  ;;  %v4532_v37 = vmul.f32 %v14867_v49, %v16880_v32  ;;  %v4594_v25 = vmul.f32 %v16818_v45, %v4530_v19  ;;  %v4484_v45 = vpop.xlane.xlu0 %4483 }
 0x859   :  { %v4507_v55 = vmul.f32 0.010204081, %v4484_v45 }
 0x85a   :  { %v4595_v27 = vmul.f32 %v16810_v11, %v4531_v36  ;;  %v4596_v20 = vmul.f32 %v16810_v11, %v4532_v37  ;;  %v4658_v44 = vadd.f32 %v16829_v30, %v4594_v25  ;;  %v4657_v26 = vadd.f32 %v16829_v30, %v4593_v52 }
 0x85b   :  { %v4515_v11 = vadd.f32 1e-05, %v4507_v55 }
 0x85c   :  { %v4660_v62 = vadd.f32 %v16837_v22, %v4596_v20  ;;  %v4659_v48 = vadd.f32 %v16837_v22, %v4595_v27  ;;  %v4674_v4 = vmax.f32 %v4658_v44, 0.0  ;;  %v4673_v34 = vmax.f32 %v4657_v26, 0.0  ;;  %v17040_v21 = vpop.permute.xlu0 %4590 }
 0x85d   :  { %14868 = vrsqrt.f32 %v4515_v11 }
 0x85e   :  { %v4676_v5 = vmax.f32 %v4660_v62, 0.0  ;;  %v4675_v53 = vmax.f32 %v4659_v48, 0.0 }
 0x860   :  { %v4690_v63 = vpack.c.bf16 %v4676_v5, %v4674_v4  ;;  %v4689_v32 = vpack.c.bf16 %v4675_v53, %v4673_v34 }
 0x862   :  { %13082 = vmatprep.mubr.msk.bf16.mxu1 %vm1062_vm4, %v4690_v63 }
 0x863   :  { %4899 = vmatmul.mubr.bf16.vlgmr.msra.gmra.mrb[48].mxu1 %v4689_v32 }
 0x867   :  { %v14869_v42 = vpop.eup %14868 }
 0x868   :  { %v4534_v61 = vmul.f32 %v14869_v42, %v16895_v16  ;;  %v4533_v41 = vmul.f32 %v14869_v42, %v16892_v9 }
 0x86a   :  { %v4598_v49 = vmul.f32 %v16839_v7, %v4534_v61  ;;  %v4597_v52 = vmul.f32 %v16839_v7, %v4533_v41 }
 0x86c   :  { %v4662_v25 = vadd.f32 %v16855_v12, %v4598_v49  ;;  %v4661_v9 = vadd.f32 %v16855_v12, %v4597_v52 }
 0x86e   :  { %v4678_v4 = vmax.f32 %v4662_v25, 0.0 }
 0x87d   :  { %v4488_v30 = vpop.xlane.xlu1 %4487 }
 0x87e   :  { %v4508_v31 = vmul.f32 0.010204081, %v4488_v30 }
 0x880   :  { %v4516_v22 = vadd.f32 1e-05, %v4508_v31 }
 0x881   :  { %v4496_v43 = vpop.xlane.xlu1 %4495 }
 0x882   :  { %14870 = vrsqrt.f32 %v4516_v22  ;;  %v4510_v10 = vmul.f32 0.010204081, %v4496_v43 }
 0x883   :  { %v4492_v57 = vpop.xlane.xlu0 %4491 }
 0x884   :  { %v4518_v33 = vadd.f32 1e-05, %v4510_v10  ;;  %v4509_v40 = vmul.f32 0.010204081, %v4492_v57 }
 0x885   :  { %v4504_v54 = vpop.xlane.xlu1 %4503 }
 0x886   :  { %14872 = vrsqrt.f32 %v4518_v33  ;;  %v4517_v35 = vadd.f32 1e-05, %v4509_v40  ;;  %v4512_v58 = vmul.f32 0.010204081, %v4504_v54 }
 0x887   :  { %v4500_v28 = vpop.xlane.xlu0 %4499 }
 0x888   :  { %14874 = vrsqrt.f32 %v4517_v35  ;;  %v4520_v23 = vadd.f32 1e-05, %v4512_v58  ;;  %v4511_v51 = vmul.f32 0.010204081, %v4500_v28 }
 0x88a   :  { %14876 = vrsqrt.f32 %v4520_v23  ;;  %v4519_v19 = vadd.f32 1e-05, %v4511_v51 }
 0x88c   :  { %v14871_v36 = vpop.eup %14870  ;;  %14878 = vrsqrt.f32 %v4519_v19 }
 0x88d   :  { %v4536_v16 = vmul.f32 %v14871_v36, %v16945_v39  ;;  %v4535_v37 = vmul.f32 %v14871_v36, %v16954_v17  ;;  %v4677_v17 = vmax.f32 %v4661_v9, 0.0 }
 0x88f   :  { %v4600_v27 = vmul.f32 %v16847_v50, %v4536_v16  ;;  %v4599_v20 = vmul.f32 %v16847_v50, %v4535_v37 }
 0x890   :  { %v14873_v44 = vpop.eup %14872 }
 0x891   :  { %v4540_v26 = vmul.f32 %v14873_v44, %v16959_v60  ;;  %v4664_v62 = vadd.f32 %v16857_v6, %v4600_v27  ;;  %v4663_v7 = vadd.f32 %v16857_v6, %v4599_v20  ;;  %v4539_v48 = vmul.f32 %v14873_v44, %v16967_v13 }
 0x892   :  { %v14875_v39 = vpop.eup %14874 }
 0x893   :  { %v4538_v5 = vmul.f32 %v14875_v39, %v16962_v15  ;;  %v4680_v34 = vmax.f32 %v4664_v62, 0.0  ;;  %v4679_v12 = vmax.f32 %v4663_v7, 0.0  ;;  %v4604_v53 = vmul.f32 %v16864_v59, %v4540_v26 }
 0x894   :  { %v14877_v63 = vpop.eup %14876  ;;  %v4537_v50 = vmul.f32 %v14875_v39, %v16976_v1  ;;  %v4603_v60 = vmul.f32 %v16864_v59, %v4539_v48 }
 0x895   :  { %v4544_v32 = vmul.f32 %v14877_v63, %v16972_v38  ;;  %v4692_v45 = vpack.c.bf16 %v4680_v34, %v4678_v4  ;;  %v4691_v6 = vpack.c.bf16 %v4679_v12, %v4677_v17  ;;  %v4602_v13 = vmul.f32 %v16862_v47, %v4538_v5  ;;  %v4655_v38 = vpop.permute.xlu0 %4654 }
 0x896   :  { %v14879_v55 = vpop.eup %14878  ;;  %v4668_v11 = vadd.f32 %v17021_v18, %v4604_v53  ;;  %v4601_v15 = vmul.f32 %v16862_v47, %v4537_v50  ;;  %v4543_v59 = vmul.f32 %v14877_v63, %v16986_v0  ;;  %v4667_v42 = vadd.f32 %v17021_v18, %v4603_v60 }
 0x897   :  { %v4541_v30 = vmul.f32 %v14879_v55, %v16996_v29  ;;  %v4542_v31 = vmul.f32 %v14879_v55, %v16981_v2  ;;  %v4608_v22 = vmul.f32 %v17040_v21, %v4544_v32  ;;  %13083 = vmatprep.mubr.msk.bf16.mxu1 %vm1062_vm4, %v4692_v45  ;;  %v4666_v1 = vadd.f32 %v17023_v56, %v4602_v13  ;;  %v4650_v29 = vpop.permute.xlu1 %4649 }
 0x898   :  { %4909 = vmatmul.mubr.bf16.gmra.mrb[52].mxu1 %v4691_v6  ;;  %v4665_v43 = vadd.f32 %v17023_v56, %v4601_v15  ;;  %v4684_v33 = vmax.f32 %v4668_v11, 0.0  ;;  %v4607_v0 = vmul.f32 %v17040_v21, %v4543_v59  ;;  %v4683_v35 = vmax.f32 %v4667_v42, 0.0 }
 0x899   :  { %v4606_v47 = vmul.f32 %v17038_v14, %v4542_v31  ;;  %v4672_v10 = vadd.f32 %v4655_v38, %v4608_v22  ;;  %v4605_v2 = vmul.f32 %v17038_v14, %v4541_v30  ;;  %v4682_v57 = vmax.f32 %v4666_v1, 0.0 }
 0x89a   :  { %v4681_v40 = vmax.f32 %v4665_v43, 0.0  ;;  %v4671_v23 = vadd.f32 %v4655_v38, %v4607_v0  ;;  %v14036_v38 = vld [vmem:[%s20327_s11 + $0x4] ss:$20 sps:$4 sm:$0xff]  }
 0x89b   :  { %v4670_v61 = vadd.f32 %v4650_v29, %v4606_v47  ;;  %v4694_v54 = vpack.c.bf16 %v4684_v33, %v4682_v57  ;;  %v4688_v41 = vmax.f32 %v4672_v10, 0.0  ;;  %v4669_v28 = vadd.f32 %v4650_v29, %v4605_v2 }
 0x89c   :  { %v4693_v18 = vpack.c.bf16 %v4683_v35, %v4681_v40  ;;  %v4687_v51 = vmax.f32 %v4671_v23, 0.0 }
 0x89d   :  { %v4686_v58 = vmax.f32 %v4670_v61, 0.0  ;;  %13084 = vmatprep.mubr.msk.bf16.mxu1 %vm1062_vm4, %v4694_v54  ;;  %v4685_v14 = vmax.f32 %v4669_v28, 0.0 }
 0x89f   :  { %v4696_v56 = vpack.c.bf16 %v4688_v41, %v4686_v58  ;;  %v4695_v19 = vpack.c.bf16 %v4687_v51, %v4685_v14 }
 0x8a0   :  { %4919 = vmatmul.mubr.bf16.gmra.mrb[56].mxu1 %v4693_v18 }
 0x8a1   :  { %13085 = vmatprep.mubr.msk.bf16.mxu1 %vm1062_vm4, %v4696_v56  ;;  %vm4981_vm4 = vcmask 277504  }
 0x8a8   :  { %4929 = vmatmul.mubr.bf16.gmra.mrb[60].mxu1 %v4695_v19 }
 0x8a9   :  { %5709 = vmatprep.mubr.bf16.mxu1 %v14036_v38 }
 0x936   :  { %v4900_v49 = vpop.f32.mrb[48].mxu1 }
 0x937   :  { %v4902_v21 = vpop.f32.mrb[49].mxu1 }
 0x938   :  { %4941 = vst.msk [vmem:[#allocation8 + $0x8] sm:$0xff] %vm4940_vm11, %v4902_v21  ;;  %v4904_v52 = vpop.f32.mrb[50].mxu1 }
 0x939   :  { %v17078_v36 = vpack.c.bf16 %v4904_v52, %v4900_v49  ;;  %v4906_v16 = vpop.f32.mrb[51].mxu1 }
 0x93a   :  { %4943 = vst.msk [vmem:[#allocation8 + $0x18] sm:$0xff] %vm4940_vm11, %v4906_v16 }
 0x93b   :  { %5021 = vrot.lane.b32.xlu1 %v17078_v36, %s14922_s30 }
 0x93f   :  { %v4957_v37 = vld [vmem:[#allocation8 + $0x8] sm:$0xff] }
 0x941   :  { %v4959_v25 = vld [vmem:[#allocation8 + $0x18] sm:$0xff] }
 0x942   :  { %v17083_v9 = vpack.c.bf16 %v4959_v25, %v4957_v37 }
 0x944   :  { %5023 = vrot.lane.b32.xlu0 %v17083_v9, %s14922_s30  ;;  %4982 = vst.msk [vmem:[#allocation4 + $0x8] sm:$0xff] %vm4981_vm4, %v17083_v9 }
 0x94b   :  { %v5549_v27 = vld [vmem:[#allocation4 + $0x8] sm:$0xff] }
 0x94c   :  { %5677 = vmatprep.subr.bf16.mxu1 %v5549_v27 }
 0x94d   :  { %5678 = vmatpush1.bf16.msra.mxu1 %v17078_v36 }
 0x96b   :  { %v4910_v20 = vpop.f32.mrb[52].mxu1 }
 0x96c   :  { %v4912_v44 = vpop.f32.mrb[53].mxu1 }
 0x96d   :  { %4945 = vst.msk [vmem:[#allocation8 + $0x28] sm:$0xff] %vm4940_vm11, %v4912_v44  ;;  %v4914_v26 = vpop.f32.mrb[54].mxu1 }
 0x96e   :  { %v17091_v62 = vpack.c.bf16 %v4914_v26, %v4910_v20  ;;  %v4916_v7 = vpop.f32.mrb[55].mxu1 }
 0x96f   :  { %4947 = vst.msk [vmem:[#allocation8 + $0x38] sm:$0xff] %vm4940_vm11, %v4916_v7 }
 0x970   :  { %5025 = vrot.lane.b32.xlu1 %v17091_v62, %s14922_s30 }
 0x973   :  { %v4920_v48 = vpop.f32.mrb[56].mxu1 }
 0x974   :  { %v4922_v39 = vpop.f32.mrb[57].mxu1  ;;  %v4961_v17 = vld [vmem:[#allocation8 + $0x28] sm:$0xff] }
 0x975   :  { %4949 = vst.msk [vmem:[#allocation8 + $0x48] sm:$0xff] %vm4940_vm11, %v4922_v39  ;;  %v4924_v4 = vpop.f32.mrb[58].mxu1 }
 0x976   :  { %v4963_v5 = vld [vmem:[#allocation8 + $0x38] sm:$0xff]  ;;  %v17097_v34 = vpack.c.bf16 %v4924_v4, %v4920_v48  ;;  %v4926_v12 = vpop.f32.mrb[59].mxu1 }
 0x977   :  { %v17099_v53 = vpack.c.bf16 %v4963_v5, %v4961_v17  ;;  %4951 = vst.msk [vmem:[#allocation8 + $0x58] sm:$0xff] %vm4940_vm11, %v4926_v12 }
 0x978   :  { %5029 = vrot.lane.b32.xlu1 %v17097_v34, %s14922_s30 }
 0x979   :  { %4984 = vst.msk [vmem:[#allocation4 + $0x18] sm:$0xff] %vm4981_vm4, %v17099_v53  ;;  %5027 = vrot.lane.b32.xlu0 %v17099_v53, %s14922_s30 }
 0x97b   :  { %v4930_v63 = vpop.f32.mrb[60].mxu1 }
 0x97c   :  { %v4932_v50 = vpop.f32.mrb[61].mxu1  ;;  %v4965_v32 = vld [vmem:[#allocation8 + $0x48] sm:$0xff] }
 0x97d   :  { %4953 = vst.msk [vmem:[#allocation8 + $0x68] sm:$0xff] %vm4940_vm11, %v4932_v50  ;;  %v4934_v60 = vpop.f32.mrb[62].mxu1 }
 0x97e   :  { %v4967_v45 = vld [vmem:[#allocation8 + $0x58] sm:$0xff]  ;;  %v17109_v6 = vpack.c.bf16 %v4934_v60, %v4930_v63  ;;  %v4936_v55 = vpop.f32.mrb[63].mxu1 }
 0x97f   :  { %v17111_v13 = vpack.c.bf16 %v4967_v45, %v4965_v32  ;;  %4955 = vst.msk [vmem:[#allocation8 + $0x78] sm:$0xff] %vm4940_vm11, %v4936_v55  ;;  %vm12409_vm11 = vcmask 539648  }
 0x980   :  { %v5551_v11 = vld [vmem:[#allocation4 + $0x18] sm:$0xff]  ;;  %5033 = vrot.lane.b32.xlu1 %v17109_v6, %s14922_s30 }
 0x981   :  { %4986 = vst.msk [vmem:[#allocation4 + $0x28] sm:$0xff] %vm4981_vm4, %v17111_v13  ;;  %5679 = vmatprep.subr.bf16.mxu1 %v5551_v11  ;;  %5031 = vrot.lane.b32.xlu0 %v17111_v13, %s14922_s30 }
 0x982   :  { %5680 = vmatpush1.bf16.msra.mxu1 %v17091_v62 }
 0x984   :  { %5089 = vrot.lane.b32.xlu1 %v17078_v36, %s14926_s27  ;;  %v4969_v15 = vld [vmem:[#allocation8 + $0x68] sm:$0xff] }
 0x986   :  { %v4971_v30 = vld [vmem:[#allocation8 + $0x78] sm:$0xff] }
 0x987   :  { %v17123_v31 = vpack.c.bf16 %v4971_v30, %v4969_v15 }
 0x988   :  { %v5553_v22 = vld [vmem:[#allocation4 + $0x28] sm:$0xff]  ;;  %5093 = vrot.lane.b32.xlu1 %v17091_v62, %s14926_s27 }
 0x989   :  { %4988 = vst.msk [vmem:[#allocation4 + $0x38] sm:$0xff] %vm4981_vm4, %v17123_v31  ;;  %5681 = vmatprep.subr.bf16.mxu1 %v5553_v22  ;;  %5035 = vrot.lane.b32.xlu0 %v17123_v31, %s14922_s30  ;;  %v14037_v22 = vld [vmem:[%s20327_s11 + $0x2c] ss:$20 sps:$4 sm:$0xff]  }
 0x98a   :  { %5682 = vmatpush1.bf16.msra.mxu1 %v17097_v34 }
 0x98c   :  { %5097 = vrot.lane.b32.xlu1 %v17097_v34, %s14926_s27 }
 0x98d   :  { %5091 = vrot.lane.b32.xlu0 %v17083_v9, %s14926_s27 }
 0x990   :  { %v5555_v59 = vld [vmem:[#allocation4 + $0x38] sm:$0xff]  ;;  %5101 = vrot.lane.b32.xlu1 %v17109_v6, %s14926_s27 }
 0x991   :  { %5095 = vrot.lane.b32.xlu0 %v17099_v53, %s14926_s27  ;;  %5683 = vmatprep.subr.bf16.mxu1 %v5555_v59 }
 0x992   :  { %5684 = vmatpush1.bf16.msra.mxu1 %v17109_v6 }
 0x994   :  { %5157 = vrot.lane.b32.xlu1 %v17078_v36, %s14939_s8 }
 0x995   :  { %5099 = vrot.lane.b32.xlu0 %v17111_v13, %s14926_s27 }
 0x998   :  { %5161 = vrot.lane.b32.xlu1 %v17091_v62, %s14939_s8 }
 0x999   :  { %5103 = vrot.lane.b32.xlu0 %v17123_v31, %s14926_s27 }
 0x99c   :  { %5165 = vrot.lane.b32.xlu1 %v17097_v34, %s14939_s8 }
 0x99d   :  { %5159 = vrot.lane.b32.xlu0 %v17083_v9, %s14939_s8 }
 0x9a0   :  { %5169 = vrot.lane.b32.xlu1 %v17109_v6, %s14939_s8 }
 0x9a1   :  { %5163 = vrot.lane.b32.xlu0 %v17099_v53, %s14939_s8 }
 0x9a4   :  { %5226 = vrot.lane.b32.xlu1 %v17078_v36, %s14927_s23 }
 0x9a5   :  { %5167 = vrot.lane.b32.xlu0 %v17111_v13, %s14939_s8 }
 0x9a8   :  { %5230 = vrot.lane.b32.xlu1 %v17091_v62, %s14927_s23 }
 0x9a9   :  { %5171 = vrot.lane.b32.xlu0 %v17123_v31, %s14939_s8 }
 0x9ac   :  { %5234 = vrot.lane.b32.xlu1 %v17097_v34, %s14927_s23 }
 0x9ad   :  { %5228 = vrot.lane.b32.xlu0 %v17083_v9, %s14927_s23  ;;  %v5022_v1 = vpop.permute.xlu1 %5021 }
 0x9b0   :  { %5238 = vrot.lane.b32.xlu1 %v17109_v6, %s14927_s23 }
 0x9b1   :  { %5232 = vrot.lane.b32.xlu0 %v17099_v53, %s14927_s23 }
 0x9b4   :  { %5294 = vrot.lane.b32.xlu1 %v17078_v36, %s14928_s5 }
 0x9b5   :  { %5236 = vrot.lane.b32.xlu0 %v17111_v13, %s14927_s23 }
 0x9b6   :  { %v5024_v43 = vpop.permute.xlu0 %5023 }
 0x9b7   :  { %v5037_v42 = vsel %vm1174_vm5, %v5022_v1, %v5024_v43  ;;  %5050 = vst.msk [vmem:[#allocation4 + $0x48] sm:$0xff] %vm4981_vm4, %v5024_v43 }
 0x9b8   :  { %5298 = vrot.lane.b32.xlu1 %v17091_v62, %s14928_s5 }
 0x9b9   :  { %5240 = vrot.lane.b32.xlu0 %v17123_v31, %s14927_s23  ;;  %s14941_s23 = smov 109  }
 0x9bc   :  { %5302 = vrot.lane.b32.xlu1 %v17097_v34, %s14928_s5 }
 0x9bd   :  { %5296 = vrot.lane.b32.xlu0 %v17083_v9, %s14928_s5 }
 0x9be   :  { %v5557_v47 = vld [vmem:[#allocation4 + $0x48] sm:$0xff] }
 0x9bf   :  { %5685 = vmatprep.subr.bf16.mxu1 %v5557_v47  ;;  %v5545_v47 = vld [vmem:[%s20327_s11 + $0x3c] sm:$0xff] }
 0x9c0   :  { %5686 = vmatpush1.bf16.msra.mxu1 %v5037_v42  ;;  %5306 = vrot.lane.b32.xlu1 %v17109_v6, %s14928_s5  ;;  %v5542_v42 = vld [vmem:[%s20327_s11 + $0x28] sm:$0xff] }
 0x9c1   :  { %5300 = vrot.lane.b32.xlu0 %v17099_v53, %s14928_s5 }
 0x9c4   :  { %5362 = vrot.lane.b32.xlu1 %v17078_v36, %s14940_s4 }
 0x9c5   :  { %5304 = vrot.lane.b32.xlu0 %v17111_v13, %s14928_s5 }
 0x9c8   :  { %5366 = vrot.lane.b32.xlu1 %v17091_v62, %s14940_s4 }
 0x9c9   :  { %5308 = vrot.lane.b32.xlu0 %v17123_v31, %s14928_s5  ;;  %s20366_s5 = smov 97  }
 0x9cc   :  { %5370 = vrot.lane.b32.xlu1 %v17097_v34, %s14940_s4 }
 0x9cd   :  { %5364 = vrot.lane.b32.xlu0 %v17083_v9, %s14940_s4 }
 0x9d0   :  { %5374 = vrot.lane.b32.xlu1 %v17109_v6, %s14940_s4 }
 0x9d1   :  { %5368 = vrot.lane.b32.xlu0 %v17099_v53, %s14940_s4 }
 0x9d4   :  { %5431 = vrot.lane.b32.xlu1 %v17078_v36, %s14941_s23 }
 0x9d5   :  { %5372 = vrot.lane.b32.xlu0 %v17111_v13, %s14940_s4 }
 0x9d8   :  { %5435 = vrot.lane.b32.xlu1 %v17091_v62, %s14941_s23 }
 0x9d9   :  { %5376 = vrot.lane.b32.xlu0 %v17123_v31, %s14940_s4 }
 0x9dc   :  { %5439 = vrot.lane.b32.xlu1 %v17097_v34, %s14941_s23 }
 0x9dd   :  { %5433 = vrot.lane.b32.xlu0 %v17083_v9, %s14941_s23 }
 0x9e0   :  { %5443 = vrot.lane.b32.xlu1 %v17109_v6, %s14941_s23 }
 0x9e1   :  { %5437 = vrot.lane.b32.xlu0 %v17099_v53, %s14941_s23 }
 0x9e2   :  { %v5026_v10 = vpop.permute.xlu1 %5025 }
 0x9e4   :  { %5500 = vrot.lane.b32.xlu1 %v17078_v36, %s14931_s26 }
 0x9e5   :  { %5441 = vrot.lane.b32.xlu0 %v17111_v13, %s14941_s23 }
 0x9e8   :  { %5504 = vrot.lane.b32.xlu1 %v17091_v62, %s14931_s26 }
 0x9e9   :  { %5445 = vrot.lane.b32.xlu0 %v17123_v31, %s14941_s23 }
 0x9ea   :  { %v5030_v57 = vpop.permute.xlu1 %5029 }
 0x9eb   :  { %v5028_v29 = vpop.permute.xlu0 %5027 }
 0x9ec   :  { %v5038_v2 = vsel %vm1174_vm5, %v5026_v10, %v5028_v29  ;;  %5052 = vst.msk [vmem:[#allocation4 + $0x58] sm:$0xff] %vm4981_vm4, %v5028_v29  ;;  %5508 = vrot.lane.b32.xlu1 %v17097_v34, %s14931_s26 }
 0x9ed   :  { %5502 = vrot.lane.b32.xlu0 %v17083_v9, %s14931_s26 }
 0x9f0   :  { %5512 = vrot.lane.b32.xlu1 %v17109_v6, %s14931_s26 }
 0x9f1   :  { %5506 = vrot.lane.b32.xlu0 %v17099_v53, %s14931_s26 }
 0x9f2   :  { %v5034_v33 = vpop.permute.xlu1 %5033 }
 0x9f3   :  { %v5032_v40 = vpop.permute.xlu0 %5031  ;;  %v5559_v61 = vld [vmem:[#allocation4 + $0x58] sm:$0xff] }
 0x9f4   :  { %v5039_v0 = vsel %vm1174_vm5, %v5030_v57, %v5032_v40  ;;  %5054 = vst.msk [vmem:[#allocation4 + $0x68] sm:$0xff] %vm4981_vm4, %v5032_v40  ;;  %5687 = vmatprep.subr.bf16.mxu1 %v5559_v61  ;;  %v14041_v40 = vld [vmem:[%s20327_s11 + $0xc] ss:$20 sps:$4 sm:$0xff]  }
 0x9f5   :  { %5510 = vrot.lane.b32.xlu0 %v17111_v13, %s14931_s26  ;;  %5688 = vmatpush1.bf16.msra.mxu1 %v5038_v2 }
 0x9f6   :  { %v5090_v54 = vpop.permute.xlu1 %5089 }
 0x9f9   :  { %5514 = vrot.lane.b32.xlu0 %v17123_v31, %s14931_s26  ;;  %v14034_v31 = vld [vmem:[%s20327_s11] ss:$20 sps:$4 sm:$0xff]   ;;  %s14943_s26 = smov 111  }
 0x9fa   :  { %v5094_v35 = vpop.permute.xlu1 %5093 }
 0x9fb   :  { %v5036_v58 = vpop.permute.xlu0 %5035  ;;  %v5561_v41 = vld [vmem:[#allocation4 + $0x68] sm:$0xff] }
 0x9fc   :  { %v5040_v28 = vsel %vm1174_vm5, %v5034_v33, %v5036_v58  ;;  %5056 = vst.msk [vmem:[#allocation4 + $0x78] sm:$0xff] %vm4981_vm4, %v5036_v58  ;;  %5689 = vmatprep.subr.bf16.mxu1 %v5561_v41  ;;  %v13091_v33 = vcombine.low %v5542_v42, %v5545_v47 }
 0x9fd   :  { %5690 = vmatpush1.bf16.msra.mxu1 %v5039_v0 }
 0x9fe   :  { %v5098_v18 = vpop.permute.xlu1 %5097 }
 0x9ff   :  { %v5092_v56 = vpop.permute.xlu0 %5091 }
 0xa00   :  { %v5105_v23 = vsel %vm1311_vm6, %v5090_v54, %v5092_v56  ;;  %5118 = vst.msk [vmem:[#allocation4 + $0x88] sm:$0xff] %vm4981_vm4, %v5092_v56 }
 0xa02   :  { %v5102_v14 = vpop.permute.xlu1 %5101 }
 0xa03   :  { %v5096_v51 = vpop.permute.xlu0 %5095  ;;  %v5563_v19 = vld [vmem:[#allocation4 + $0x78] sm:$0xff] }
 0xa04   :  { %v5106_v49 = vsel %vm1311_vm6, %v5094_v35, %v5096_v51  ;;  %5120 = vst.msk [vmem:[#allocation4 + $0x98] sm:$0xff] %vm4981_vm4, %v5096_v51  ;;  %5691 = vmatprep.subr.bf16.mxu1 %v5563_v19 }
 0xa05   :  { %5692 = vmatpush1.bf16.msra.mxu1 %v5040_v28 }
 0xa06   :  { %v5158_v21 = vpop.permute.xlu1 %5157 }
 0xa07   :  { %v5100_v52 = vpop.permute.xlu0 %5099  ;;  %v5565_v36 = vld [vmem:[#allocation4 + $0x88] sm:$0xff] }
 0xa08   :  { %v5107_v16 = vsel %vm1311_vm6, %v5098_v18, %v5100_v52  ;;  %5122 = vst.msk [vmem:[#allocation4 + $0xa8] sm:$0xff] %vm4981_vm4, %v5100_v52  ;;  %5693 = vmatprep.subr.bf16.mxu1 %v5565_v36 }
 0xa09   :  { %5694 = vmatpush1.bf16.msra.mxu1 %v5105_v23 }
 0xa0a   :  { %v5162_v37 = vpop.permute.xlu1 %5161 }
 0xa0b   :  { %v5104_v25 = vpop.permute.xlu0 %5103  ;;  %v5567_v9 = vld [vmem:[#allocation4 + $0x98] sm:$0xff] }
 0xa0c   :  { %v5108_v27 = vsel %vm1311_vm6, %v5102_v14, %v5104_v25  ;;  %5124 = vst.msk [vmem:[#allocation4 + $0xb8] sm:$0xff] %vm4981_vm4, %v5104_v25  ;;  %5695 = vmatprep.subr.bf16.mxu1 %v5567_v9 }
 0xa0d   :  { %5696 = vmatpush1.bf16.msra.mxu1 %v5106_v49 }
 0xa0e   :  { %v5166_v20 = vpop.permute.xlu1 %5165 }
 0xa0f   :  { %v5160_v44 = vpop.permute.xlu0 %5159  ;;  %v5569_v26 = vld [vmem:[#allocation4 + $0xa8] sm:$0xff] }
 0xa10   :  { %v5174_v62 = vsel %vm5173_vm13, %v5158_v21, %v5160_v44  ;;  %5187 = vst.msk [vmem:[#allocation4 + $0xc8] sm:$0xff] %vm4981_vm4, %v5160_v44  ;;  %5697 = vmatprep.subr.bf16.mxu1 %v5569_v26 }
 0xa11   :  { %5698 = vmatpush1.bf16.msra.mxu1 %v5107_v16 }
 0xa12   :  { %v5170_v7 = vpop.permute.xlu1 %5169 }
 0xa13   :  { %v5164_v48 = vpop.permute.xlu0 %5163  ;;  %v5571_v39 = vld [vmem:[#allocation4 + $0xb8] sm:$0xff] }
 0xa14   :  { %v5175_v4 = vsel %vm5173_vm13, %v5162_v37, %v5164_v48  ;;  %5189 = vst.msk [vmem:[#allocation4 + $0xd8] sm:$0xff] %vm4981_vm4, %v5164_v48  ;;  %5699 = vmatprep.subr.bf16.mxu1 %v5571_v39 }
 0xa15   :  { %5700 = vmatpush1.bf16.msra.mxu1 %v5108_v27 }
 0xa16   :  { %v5227_v17 = vpop.permute.xlu1 %5226 }
 0xa17   :  { %v5168_v5 = vpop.permute.xlu0 %5167  ;;  %v5573_v34 = vld [vmem:[#allocation4 + $0xc8] sm:$0xff] }
 0xa18   :  { %v5176_v12 = vsel %vm5173_vm13, %v5166_v20, %v5168_v5  ;;  %5191 = vst.msk [vmem:[#allocation4 + $0xe8] sm:$0xff] %vm4981_vm4, %v5168_v5  ;;  %5701 = vmatprep.subr.bf16.mxu1 %v5573_v34 }
 0xa19   :  { %5702 = vmatpush1.bf16.msra.mxu1 %v5174_v62 }
 0xa1a   :  { %v5231_v53 = vpop.permute.xlu1 %5230 }
 0xa1b   :  { %v5172_v63 = vpop.permute.xlu0 %5171  ;;  %v5575_v50 = vld [vmem:[#allocation4 + $0xd8] sm:$0xff] }
 0xa1c   :  { %v5177_v60 = vsel %vm5173_vm13, %v5170_v7, %v5172_v63  ;;  %5193 = vst.msk [vmem:[#allocation4 + $0xf8] sm:$0xff] %vm4981_vm4, %v5172_v63  ;;  %5703 = vmatprep.subr.bf16.mxu1 %v5575_v50  ;;  %vm11301_vm13 = vcmask 572416  }
 0xa1d   :  { %5704 = vmatpush1.bf16.msra.mxu1 %v5175_v4 }
 0xa1e   :  { %v5235_v32 = vpop.permute.xlu1 %5234 }
 0xa1f   :  { %v5229_v45 = vpop.permute.xlu0 %5228  ;;  %v5577_v6 = vld [vmem:[#allocation4 + $0xe8] sm:$0xff] }
 0xa20   :  { %v5242_v55 = vsel %vm1585_vm8, %v5227_v17, %v5229_v45  ;;  %5255 = vst.msk [vmem:[#allocation4 + $0x108] sm:$0xff] %vm4981_vm4, %v5229_v45  ;;  %5705 = vmatprep.subr.bf16.mxu1 %v5577_v6 }
 0xa21   :  { %5706 = vmatpush1.bf16.msra.mxu1 %v5176_v12 }
 0xa22   :  { %v5239_v13 = vpop.permute.xlu1 %5238 }
 0xa23   :  { %v5233_v11 = vpop.permute.xlu0 %5232  ;;  %v5579_v15 = vld [vmem:[#allocation4 + $0xf8] sm:$0xff] }
 0xa24   :  { %v5243_v30 = vsel %vm1585_vm8, %v5231_v53, %v5233_v11  ;;  %5257 = vst.msk [vmem:[#allocation4 + $0x118] sm:$0xff] %vm4981_vm4, %v5233_v11  ;;  %5707 = vmatprep.subr.bf16.mxu1 %v5579_v15 }
 0xa25   :  { %5708 = vmatpush1.bf16.msra.mxu1 %v5177_v60 }
 0xa26   :  { %v5295_v59 = vpop.permute.xlu1 %5294 }
 0xa27   :  { %v5237_v38 = vpop.permute.xlu0 %5236  ;;  %v5581_v1 = vld [vmem:[#allocation4 + $0x108] sm:$0xff] }
 0xa28   :  { %v5244_v43 = vsel %vm1585_vm8, %v5235_v32, %v5237_v38  ;;  %5259 = vst.msk [vmem:[#allocation4 + $0x128] sm:$0xff] %vm4981_vm4, %v5237_v38  ;;  %5730 = vmatprep.subr.bf16.mxu1 %v5581_v1  ;;  %5710 = vmatmul.mubr.bf16.vlgmr.msra.gmra.mrb[64].mxu1 %v14034_v31 }
 0xa29   :  { %5731 = vmatpush1.bf16.msra.mxu1 %v5242_v55  ;;  %5719 = vmatprep.mubr.bf16.mxu1 %v14037_v22 }
 0xa2a   :  { %v5299_v10 = vpop.permute.xlu1 %5298 }
 0xa2b   :  { %v5241_v29 = vpop.permute.xlu0 %5240  ;;  %v5583_v2 = vld [vmem:[#allocation4 + $0x118] sm:$0xff] }
 0xa2c   :  { %v5245_v57 = vsel %vm1585_vm8, %v5239_v13, %v5241_v29  ;;  %5261 = vst.msk [vmem:[#allocation4 + $0x138] sm:$0xff] %vm4981_vm4, %v5241_v29  ;;  %5732 = vmatprep.subr.bf16.mxu1 %v5583_v2  ;;  %vm5378_vm8 = vcmask 900096   ;;  %v14042_v2 = vld [vmem:[%s20327_s11 + $0x34] ss:$20 sps:$4 sm:$0xff]  }
 0xa2d   :  { %5733 = vmatpush1.bf16.msra.mxu1 %v5243_v30 }
 0xa2e   :  { %v5303_v61 = vpop.permute.xlu1 %5302 }
 0xa2f   :  { %v5297_v0 = vpop.permute.xlu0 %5296  ;;  %v5585_v54 = vld [vmem:[#allocation4 + $0x128] sm:$0xff] }
 0xa30   :  { %v5310_v35 = vsel %vm1722_vm9, %v5295_v59, %v5297_v0  ;;  %5323 = vst.msk [vmem:[#allocation4 + $0x148] sm:$0xff] %vm4981_vm4, %v5297_v0  ;;  %5734 = vmatprep.subr.bf16.mxu1 %v5585_v54  ;;  %5720 = vmatmul.mubr.bf16.gmra.mrb[68].mxu1 %v13091_v33 }
 0xa31   :  { %5735 = vmatpush1.bf16.msra.mxu1 %v5244_v43  ;;  %5762 = vmatprep.mubr.bf16.mxu1 %v14041_v40 }
 0xa32   :  { %v5307_v58 = vpop.permute.xlu1 %5306 }
 0xa33   :  { %v5301_v41 = vpop.permute.xlu0 %5300  ;;  %v5587_v28 = vld [vmem:[#allocation4 + $0x138] sm:$0xff] }
 0xa34   :  { %v5311_v18 = vsel %vm1722_vm9, %v5299_v10, %v5301_v41  ;;  %5325 = vst.msk [vmem:[#allocation4 + $0x158] sm:$0xff] %vm4981_vm4, %v5301_v41  ;;  %5736 = vmatprep.subr.bf16.mxu1 %v5587_v28  ;;  %v14039_v10 = vld [vmem:[%s20327_s11 + $0x8] ss:$20 sps:$4 sm:$0xff]  }
 0xa35   :  { %5737 = vmatpush1.bf16.msra.mxu1 %v5245_v57 }
 0xa36   :  { %v5363_v56 = vpop.permute.xlu1 %5362 }
 0xa37   :  { %v5305_v23 = vpop.permute.xlu0 %5304  ;;  %v5589_v14 = vld [vmem:[#allocation4 + $0x148] sm:$0xff] }
 0xa38   :  { %v5312_v51 = vsel %vm1722_vm9, %v5303_v61, %v5305_v23  ;;  %5327 = vst.msk [vmem:[#allocation4 + $0x168] sm:$0xff] %vm4981_vm4, %v5305_v23  ;;  %5738 = vmatprep.subr.bf16.mxu1 %v5589_v14  ;;  %v5836_v23 = vld [vmem:[%s20328_s14] sm:$0x3]  ;;  %s14947_s14 = smov 66  }
 0xa39   :  { %5739 = vmatpush1.bf16.msra.mxu1 %v5310_v35  ;;  %v17328_v14 = vrot.slane %v5836_v23, %v16718_v8 }
 0xa3a   :  { %v5367_v19 = vpop.permute.xlu1 %5366 }
 0xa3b   :  { %v5309_v49 = vpop.permute.xlu0 %5308  ;;  %v5591_v21 = vld [vmem:[#allocation4 + $0x158] sm:$0xff] }
 0xa3c   :  { %v5313_v52 = vsel %vm1722_vm9, %v5307_v58, %v5309_v49  ;;  %5329 = vst.msk [vmem:[#allocation4 + $0x178] sm:$0xff] %vm4981_vm4, %v5309_v49  ;;  %5740 = vmatprep.subr.bf16.mxu1 %v5591_v21  ;;  %vm5447_vm9 = vcmask 891904   ;;  %v14044_v58 = vld [vmem:[%s20327_s11 + $0x30] ss:$20 sps:$4 sm:$0xff]  }
 0xa3d   :  { %5741 = vmatpush1.bf16.msra.mxu1 %v5311_v18  ;;  %v14045_v18 = vld [vmem:[%s20327_s11 + $0x10] ss:$20 sps:$4 sm:$0xff]  }
 0xa3e   :  { %v5371_v36 = vpop.permute.xlu1 %5370 }
 0xa3f   :  { %v5365_v16 = vpop.permute.xlu0 %5364  ;;  %v5593_v37 = vld [vmem:[#allocation4 + $0x168] sm:$0xff] }
 0xa40   :  { %v5379_v25 = vsel %vm5378_vm8, %v5363_v56, %v5365_v16  ;;  %5392 = vst.msk [vmem:[#allocation4 + $0x188] sm:$0xff] %vm4981_vm4, %v5365_v16  ;;  %5742 = vmatprep.subr.bf16.mxu1 %v5593_v37  ;;  %v14046_v56 = vld [vmem:[%s20327_s11 + $0x38] ss:$20 sps:$4 sm:$0xff]  }
 0xa41   :  { %5743 = vmatpush1.bf16.msra.mxu1 %v5312_v51  ;;  %v17331_v51 = vrot.slane %v5836_v23, %v16724_v46  ;;  %v14061_v23 = vld [vmem:[%s20331_s15 + $0xa4] ss:$20 sps:$4 sm:$0xff]  }
 0xa42   :  { %v5375_v9 = vpop.permute.xlu1 %5374 }
 0xa43   :  { %v5369_v27 = vpop.permute.xlu0 %5368  ;;  %v5595_v20 = vld [vmem:[#allocation4 + $0x178] sm:$0xff] }
 0xa44   :  { %v5380_v44 = vsel %vm5378_vm8, %v5367_v19, %v5369_v27  ;;  %5394 = vst.msk [vmem:[#allocation4 + $0x198] sm:$0xff] %vm4981_vm4, %v5369_v27  ;;  %5744 = vmatprep.subr.bf16.mxu1 %v5595_v20 }
 0xa45   :  { %5745 = vmatpush1.bf16.msra.mxu1 %v5313_v52 }
 0xa46   :  { %v5432_v26 = vpop.permute.xlu1 %5431 }
 0xa47   :  { %v5373_v62 = vpop.permute.xlu0 %5372  ;;  %v5597_v7 = vld [vmem:[#allocation4 + $0x188] sm:$0xff] }
 0xa48   :  { %v5381_v48 = vsel %vm5378_vm8, %v5371_v36, %v5373_v62  ;;  %5396 = vst.msk [vmem:[#allocation4 + $0x1a8] sm:$0xff] %vm4981_vm4, %v5373_v62  ;;  %5746 = vmatprep.subr.bf16.mxu1 %v5597_v7 }
 0xa49   :  { %5747 = vmatpush1.bf16.msra.mxu1 %v5379_v25 }
 0xa4a   :  { %v5436_v39 = vpop.permute.xlu1 %5435 }
 0xa4b   :  { %v5377_v4 = vpop.permute.xlu0 %5376  ;;  %v5599_v17 = vld [vmem:[#allocation4 + $0x198] sm:$0xff] }
 0xa4c   :  { %v5382_v5 = vsel %vm5378_vm8, %v5375_v9, %v5377_v4  ;;  %5398 = vst.msk [vmem:[#allocation4 + $0x1b8] sm:$0xff] %vm4981_vm4, %v5377_v4  ;;  %5748 = vmatprep.subr.bf16.mxu1 %v5599_v17 }
 0xa4d   :  { %5749 = vmatpush1.bf16.msra.mxu1 %v5380_v44 }
 0xa4e   :  { %v5440_v34 = vpop.permute.xlu1 %5439 }
 0xa4f   :  { %v5434_v12 = vpop.permute.xlu0 %5433  ;;  %v5601_v53 = vld [vmem:[#allocation4 + $0x1a8] sm:$0xff] }
 0xa50   :  { %v5448_v63 = vsel %vm5447_vm9, %v5432_v26, %v5434_v12  ;;  %5461 = vst.msk [vmem:[#allocation4 + $0x1c8] sm:$0xff] %vm4981_vm4, %v5434_v12  ;;  %5750 = vmatprep.subr.bf16.mxu1 %v5601_v53 }
 0xa51   :  { %5751 = vmatpush1.bf16.msra.mxu1 %v5381_v48 }
 0xa52   :  { %v5444_v32 = vpop.permute.xlu1 %5443 }
 0xa53   :  { %v5438_v50 = vpop.permute.xlu0 %5437  ;;  %v5603_v60 = vld [vmem:[#allocation4 + $0x1b8] sm:$0xff] }
 0xa54   :  { %v5449_v45 = vsel %vm5447_vm9, %v5436_v39, %v5438_v50  ;;  %5463 = vst.msk [vmem:[#allocation4 + $0x1d8] sm:$0xff] %vm4981_vm4, %v5438_v50  ;;  %5752 = vmatprep.subr.bf16.mxu1 %v5603_v60  ;;  %v5937_v50 = vld [vmem:[%s20329_s12 + $0x8] sm:$0xff]  ;;  %v5936_v60 = vld [vmem:[%s20329_s12] sm:$0xff] }
 0xa55   :  { %5753 = vmatpush1.bf16.msra.mxu1 %v5382_v5 }
 0xa56   :  { %v5501_v11 = vpop.permute.xlu1 %5500 }
 0xa57   :  { %v5442_v6 = vpop.permute.xlu0 %5441  ;;  %v5605_v55 = vld [vmem:[#allocation4 + $0x1c8] sm:$0xff] }
 0xa58   :  { %v5450_v13 = vsel %vm5447_vm9, %v5440_v34, %v5442_v6  ;;  %5465 = vst.msk [vmem:[#allocation4 + $0x1e8] sm:$0xff] %vm4981_vm4, %v5442_v6  ;;  %5754 = vmatprep.subr.bf16.mxu1 %v5605_v55  ;;  %v14047_v6 = vld [vmem:[%s20331_s15] ss:$20 sps:$4 sm:$0xff]   ;;  %v14049_v55 = vld [vmem:[%s20331_s15 + $0x4] ss:$20 sps:$4 sm:$0xff]  }
 0xa59   :  { %5755 = vmatpush1.bf16.msra.mxu1 %v5448_v63 }
 0xa5a   :  { %v5505_v38 = vpop.permute.xlu1 %5504 }
 0xa5b   :  { %v5446_v15 = vpop.permute.xlu0 %5445  ;;  %v5607_v30 = vld [vmem:[#allocation4 + $0x1d8] sm:$0xff] }
 0xa5c   :  { %v5451_v31 = vsel %vm5447_vm9, %v5444_v32, %v5446_v15  ;;  %5467 = vst.msk [vmem:[#allocation4 + $0x1f8] sm:$0xff] %vm4981_vm4, %v5446_v15  ;;  %5756 = vmatprep.subr.bf16.mxu1 %v5607_v30  ;;  %v5968_v32 = vld [vmem:[%s20330_s13] sm:$0xff]  ;;  %v14055_v15 = vld [vmem:[%s20331_s15 + $0x54] ss:$20 sps:$4 sm:$0xff]  }
 0xa5d   :  { %5757 = vmatpush1.bf16.msra.mxu1 %v5449_v45  ;;  %v5969_v45 = vld [vmem:[%s20330_s13 + $0x8] sm:$0xff]  ;;  %v14053_v30 = vld [vmem:[%s20331_s15 + $0x50] ss:$20 sps:$4 sm:$0xff]  }
 0xa5e   :  { %v5509_v29 = vpop.permute.xlu1 %5508 }
 0xa5f   :  { %v5503_v22 = vpop.permute.xlu0 %5502  ;;  %v5609_v59 = vld [vmem:[#allocation4 + $0x1e8] sm:$0xff] }
 0xa60   :  { %v5516_v1 = vsel %vm2133_vm12, %v5501_v11, %v5503_v22  ;;  %5529 = vst.msk [vmem:[#allocation4 + $0x208] sm:$0xff] %vm4981_vm4, %v5503_v22  ;;  %5758 = vmatprep.subr.bf16.mxu1 %v5609_v59  ;;  %v14050_v11 = vld [vmem:[%s20331_s15 + $0x28] ss:$20 sps:$4 sm:$0xff]   ;;  %v14056_v22 = vld [vmem:[%s20331_s15 + $0x78] ss:$20 sps:$4 sm:$0xff]  }
 0xa61   :  { %5759 = vmatpush1.bf16.msra.mxu1 %v5450_v13  ;;  %v14052_v13 = vld [vmem:[%s20331_s15 + $0x2c] ss:$20 sps:$4 sm:$0xff]  }
 0xa62   :  { %v5513_v61 = vpop.permute.xlu1 %5512 }
 0xa63   :  { %v5507_v43 = vpop.permute.xlu0 %5506  ;;  %v5611_v42 = vld [vmem:[#allocation4 + $0x1f8] sm:$0xff] }
 0xa64   :  { %v5517_v47 = vsel %vm2133_vm12, %v5505_v38, %v5507_v43  ;;  %5531 = vst.msk [vmem:[#allocation4 + $0x218] sm:$0xff] %vm4981_vm4, %v5507_v43  ;;  %5760 = vmatprep.subr.bf16.mxu1 %v5611_v42 }
 0xa65   :  { %5761 = vmatpush1.bf16.msra.mxu1 %v5451_v31  ;;  %v14058_v31 = vld [vmem:[%s20331_s15 + $0x7c] ss:$20 sps:$4 sm:$0xff]  }
 0xa67   :  { %v5511_v57 = vpop.permute.xlu0 %5510  ;;  %v5613_v33 = vld [vmem:[#allocation4 + $0x208] sm:$0xff] }
 0xa68   :  { %v5518_v40 = vsel %vm2133_vm12, %v5509_v29, %v5511_v57  ;;  %5533 = vst.msk [vmem:[#allocation4 + $0x228] sm:$0xff] %vm4981_vm4, %v5511_v57  ;;  %5763 = vmatmul.mubr.bf16.vlgmr.msra.gmra.mrb[64].mxu1 %v14039_v10  ;;  %5783 = vmatprep.subr.bf16.mxu1 %v5613_v33 }
 0xa69   :  { %5784 = vmatpush1.bf16.msra.mxu1 %v5516_v1  ;;  %5772 = vmatprep.mubr.bf16.mxu1 %v14042_v2 }
 0xa6b   :  { %v5515_v0 = vpop.permute.xlu0 %5514  ;;  %v5615_v54 = vld [vmem:[#allocation4 + $0x218] sm:$0xff] }
 0xa6c   :  { %v5519_v35 = vsel %vm2133_vm12, %v5513_v61, %v5515_v0  ;;  %5535 = vst.msk [vmem:[#allocation4 + $0x238] sm:$0xff] %vm4981_vm4, %v5515_v0  ;;  %5785 = vmatprep.subr.bf16.mxu1 %v5615_v54  ;;  %vm5670_vm12 = vcmask 523264  }
 0xa6d   :  { %5786 = vmatpush1.bf16.msra.mxu1 %v5517_v47 }
 0xa6f   :  { %v5617_v41 = vld [vmem:[#allocation4 + $0x228] sm:$0xff] }
 0xa70   :  { %5773 = vmatmul.mubr.bf16.gmra.mrb[68].mxu1 %v14044_v58  ;;  %5787 = vmatprep.subr.bf16.mxu1 %v5617_v41 }
 0xa71   :  { %5788 = vmatpush1.bf16.msra.mxu1 %v5518_v40  ;;  %5815 = vmatprep.mubr.bf16.mxu1 %v14925_v3 }
 0xa73   :  { %v5619_v28 = vld [vmem:[#allocation4 + $0x238] sm:$0xff] }
 0xa74   :  { %5789 = vmatprep.subr.bf16.mxu1 %v5619_v28 }
 0xa75   :  { %5790 = vmatpush1.bf16.msra.mxu1 %v5519_v35 }
 0xa76   :  { %6369 = vmatprep.subr.bf16.mxu1 %v14049_v55 }
 0xa78   :  { %13096 = vmatmul.mubr.msk.bf16.vlgmr.msra.gmra.mrb[64].mxu1 %vm5670_vm12, %v14045_v18 }
 0xa79   :  { %5825 = vmatprep.mubr.bf16.mxu1 %v14925_v3  ;;  %6370 = vmatpush1.bf16.msra.mxu1 %v14047_v6 }
 0xa7a   :  { %6371 = vmatprep.subr.bf16.mxu1 %v14052_v13 }
 0xa7d   :  { %6372 = vmatpush1.bf16.msra.mxu1 %v14050_v11 }
 0xa7e   :  { %6373 = vmatprep.subr.bf16.mxu1 %v14055_v15 }
 0xa80   :  { %13097 = vmatmul.mubr.msk.bf16.gmra.mrb[68].mxu1 %vm5670_vm12, %v14046_v56  ;;  %v5939_v56 = vld [vmem:[%s20329_s12 + $0x18] sm:$0xff] }
 0xa81   :  { %6374 = vmatpush1.bf16.msra.mxu1 %v14053_v30 }
 0xa82   :  { %6375 = vmatprep.subr.bf16.mxu1 %v14058_v31 }
 0xa85   :  { %6376 = vmatpush1.bf16.msra.mxu1 %v14056_v22 }
 0xa86   :  { %6377 = vmatprep.subr.bf16.mxu1 %v14061_v23 }
 0xb4b   :  { %v5817_v19 = vpop.f32.mrb[64].mxu1 }
 0xb4c   :  { %v5819_v49 = vpop.f32.mrb[65].mxu1  ;;  %v5848_v36 = vmul.f32 %v17331_v51, %v5817_v19 }
 0xb4d   :  { %v5849_v21 = vmul.f32 %v17328_v14, %v5819_v49  ;;  %v5821_v52 = vpop.f32.mrb[66].mxu1 }
 0xb4e   :  { %v5823_v16 = vpop.f32.mrb[67].mxu1  ;;  %v5850_v9 = vmul.f32 %v17331_v51, %v5821_v52 }
 0xb4f   :  { %v5856_v37 = vsel %vm4981_vm4, %v5849_v21, 0.0  ;;  %v5851_v25 = vmul.f32 %v17328_v14, %v5823_v16  ;;  %v14064_v21 = vld [vmem:[%s20331_s15 + $0xcc] ss:$20 sps:$4 sm:$0xff]  }
 0xb50   :  { %v5857_v27 = vadd.f32 %v5856_v37, %v5848_v36  ;;  %v14067_v36 = vld [vmem:[%s20331_s15 + $0xf4] ss:$20 sps:$4 sm:$0xff]   ;;  %v14070_v37 = vld [vmem:[%s20331_s15 + $0x11c] ss:$20 sps:$4 sm:$0xff]  }
 0xb51   :  { %v5860_v20 = vsel %vm4981_vm4, %v5851_v25, 0.0  ;;  %v14068_v25 = vld [vmem:[%s20331_s15 + $0x118] ss:$20 sps:$4 sm:$0xff]  }
 0xb52   :  { %5858 = vadd.xlane.f32.xlu1 %v5857_v27  ;;  %v5861_v44 = vadd.f32 %v5860_v20, %v5850_v9  ;;  %v14073_v9 = vld [vmem:[%s20331_s15 + $0x144] ss:$20 sps:$4 sm:$0xff]   ;;  %v14071_v27 = vld [vmem:[%s20331_s15 + $0x140] ss:$20 sps:$4 sm:$0xff]  }
 0xb53   :  { %v17339_v26 = vpop.f32.mrb[68].mxu1  ;;  %v14076_v20 = vld [vmem:[%s20331_s15 + $0x16c] ss:$20 sps:$4 sm:$0xff]  }
 0xb54   :  { %5862 = vadd.xlane.f32.xlu0 %v5861_v44  ;;  %v17341_v62 = vpop.f32.mrb[69].mxu1  ;;  %v5852_v39 = vmul.f32 %v17331_v51, %v17339_v26  ;;  %v6072_v44 = vld [vmem:[%s20331_s15 + $0x190] sm:$0x11] }
 0xb55   :  { %v5853_v7 = vmul.f32 %v17328_v14, %v17341_v62  ;;  %v17345_v48 = vpop.f32.mrb[70].mxu1 }
 0xb56   :  { %v17349_v4 = vpop.f32.mrb[71].mxu1  ;;  %v5854_v34 = vmul.f32 %v17331_v51, %v17345_v48 }
 0xb57   :  { %v5864_v17 = vsel %vm4981_vm4, %v5853_v7, 0.0  ;;  %v5855_v5 = vmul.f32 %v17328_v14, %v17349_v4  ;;  %v14074_v7 = vld [vmem:[%s20331_s15 + $0x168] ss:$20 sps:$4 sm:$0xff]  }
 0xb58   :  { %v5865_v12 = vadd.f32 %v5864_v17, %v5852_v39  ;;  %v13149_v39 = vcombine.high %v6072_v44, %v6072_v44  ;;  %v13148_v17 = vcombine.low %v6072_v44, %v6072_v44  ;;  %v14082_v44 = vld [vmem:[%s20331_s15 + $0x30] ss:$20 sps:$4 sm:$0xff]  }
 0xb59   :  { %v5868_v53 = vsel %vm4981_vm4, %v5855_v5, 0.0 }
 0xb5a   :  { %v5869_v63 = vadd.f32 %v5868_v53, %v5854_v34 }
 0xb63   :  { %5947 = vperm.xlu1 %13990, %v5937_v50   ;;  %v14081_v50 = vld [vmem:[%s20331_s15 + $0xc] ss:$20 sps:$4 sm:$0xff]  }
 0xb6a   :  { %5942 = vperm.xlu0 %13989, %v5936_v60  }
 0xb87   :  { %5870 = vadd.xlane.f32.xlu1 %v5869_v63 }
 0xb89   :  { %5866 = vadd.xlane.f32.xlu0 %v5865_v12  ;;  %v6355_v12 = vsel %vm860_vm2, %v13148_v17, 0  ;;  %v14090_v17 = vld [vmem:[%s20331_s15 + $0x84] ss:$20 sps:$4 sm:$0xff]  }
 0xb98   :  { %5974 = vperm.xlu1 %13990, %v5968_v32  }
 0xb9f   :  { %5979 = vperm.xlu0 %13989, %v5969_v45  }
 0xbdf   :  { %v5859_v59 = vpop.xlane.xlu1 %5858 }
 0xbe0   :  { %v5872_v38 = vmul.f32 0.010204081, %v5859_v59 }
 0xbe1   :  { %v5863_v1 = vpop.xlane.xlu0 %5862 }
 0xbe2   :  { %v17393_v43 = vsub.f32 %v5817_v19, %v5872_v38  ;;  %v17395_v42 = vsub.f32 %v5819_v49, %v5872_v38  ;;  %v5873_v47 = vmul.f32 0.010204081, %v5863_v1  ;;  %v14059_v19 = vld [vmem:[%s20331_s15 + $0xa0] ss:$20 sps:$4 sm:$0xff]  }
 0xbe3   :  { %v5938_v49 = vld [vmem:[%s20329_s12 + $0x10] sm:$0xff]  ;;  %6378 = vmatpush1.bf16.msra.mxu1 %v14059_v19  ;;  %v5948_v5 = vpop.permute.xlu1 %5947 }
 0xbe4   :  { %v5884_v10 = vmul.f32 %v17393_v43, %v17393_v43  ;;  %v5885_v29 = vmul.f32 %v17395_v42, %v17395_v42  ;;  %v17401_v2 = vsub.f32 %v5821_v52, %v5873_v47  ;;  %v17403_v57 = vsub.f32 %v5823_v16, %v5873_v47  ;;  %v14062_v52 = vld [vmem:[%s20331_s15 + $0xc8] ss:$20 sps:$4 sm:$0xff]   ;;  %6379 = vmatprep.subr.bf16.mxu1 %v14064_v21  ;;  %v14065_v16 = vld [vmem:[%s20331_s15 + $0xf0] ss:$20 sps:$4 sm:$0xff]  }
 0xbe5   :  { %v5970_v47 = vld [vmem:[%s20330_s13 + $0x10] sm:$0xff] }
 0xbe6   :  { %v5886_v33 = vmul.f32 %v17401_v2, %v17401_v2  ;;  %v5887_v40 = vmul.f32 %v17403_v57, %v17403_v57  ;;  %v5892_v61 = vmul.f32 %v5884_v10, %v17331_v51  ;;  %v5893_v0 = vmul.f32 %v5885_v29, %v17328_v14  ;;  %v5971_v10 = vld [vmem:[%s20330_s13 + $0x18] sm:$0xff] }
 0xbe7   :  { %6380 = vmatpush1.bf16.msra.mxu1 %v14062_v52 }
 0xbe8   :  { %v5900_v54 = vsel %vm4981_vm4, %v5893_v0, 0.0  ;;  %v5894_v35 = vmul.f32 %v5886_v33, %v17331_v51  ;;  %v5895_v58 = vmul.f32 %v5887_v40, %v17328_v14  ;;  %6381 = vmatprep.subr.bf16.mxu1 %v14067_v36 }
 0xbe9   :  { %v5901_v41 = vadd.f32 %v5900_v54, %v5892_v61  ;;  %v5943_v34 = vpop.permute.xlu0 %5942 }
 0xbea   :  { %v5904_v28 = vsel %vm4981_vm4, %v5895_v58, 0.0 }
 0xbeb   :  { %5902 = vadd.xlane.f32.xlu0 %v5901_v41  ;;  %v5905_v18 = vadd.f32 %v5904_v28, %v5894_v35  ;;  %6382 = vmatpush1.bf16.msra.mxu1 %v14065_v16 }
 0xbec   :  { %6383 = vmatprep.subr.bf16.mxu1 %v14070_v37 }
 0xbed   :  { %5906 = vadd.xlane.f32.xlu1 %v5905_v18 }
 0xbef   :  { %6384 = vmatpush1.bf16.msra.mxu1 %v14068_v25 }
 0xbf0   :  { %6385 = vmatprep.subr.bf16.mxu1 %v14073_v9 }
 0xbf3   :  { %6386 = vmatpush1.bf16.msra.mxu1 %v14071_v27 }
 0xbf4   :  { %6387 = vmatprep.subr.bf16.mxu1 %v14076_v20 }
 0xbf7   :  { %6388 = vmatpush1.bf16.msra.mxu1 %v14074_v7  ;;  %v14087_v7 = vld [vmem:[%s20331_s15 + $0x5c] ss:$20 sps:$4 sm:$0xff]  }
 0xbf8   :  { %13153 = vmatprep.subr.msk.bf16.mxu1 %vm860_vm2, %v13149_v39  ;;  %v14085_v39 = vld [vmem:[%s20331_s15 + $0x58] ss:$20 sps:$4 sm:$0xff]  }
 0xbfb   :  { %6390 = vmatpush1.bf16.msra.mxu1 %v6355_v12  ;;  %v14091_v12 = vld [vmem:[%s20331_s15 + $0xa8] ss:$20 sps:$4 sm:$0xff]  }
 0xbfc   :  { %6422 = vmatprep.subr.bf16.mxu1 %v14081_v50  ;;  %v14099_v50 = vld [vmem:[%s20331_s15 + $0xfc] ss:$20 sps:$4 sm:$0xff]  }
 0xbfe   :  { %5957 = vperm.xlu1 %13990, %v5939_v56  }
 0xc01   :  { %5952 = vperm.xlu0 %13989, %v5938_v49  }
 0xc14   :  { %v5871_v53 = vpop.xlane.xlu1 %5870 }
 0xc15   :  { %v5875_v63 = vmul.f32 0.010204081, %v5871_v53  ;;  %v14096_v53 = vld [vmem:[%s20331_s15 + $0xd4] ss:$20 sps:$4 sm:$0xff]  }
 0xc16   :  { %v5867_v60 = vpop.xlane.xlu0 %5866 }
 0xc17   :  { %v17466_v32 = vsub.f32 %v17345_v48, %v5875_v63  ;;  %v17469_v45 = vsub.f32 %v17349_v4, %v5875_v63  ;;  %v5874_v6 = vmul.f32 0.010204081, %v5867_v60  ;;  %v14094_v63 = vld [vmem:[%s20331_s15 + $0xd0] ss:$20 sps:$4 sm:$0xff]  }
 0xc19   :  { %v5890_v55 = vmul.f32 %v17466_v32, %v17466_v32  ;;  %v5891_v13 = vmul.f32 %v17469_v45, %v17469_v45  ;;  %v17476_v11 = vsub.f32 %v17339_v26, %v5874_v6  ;;  %v17479_v15 = vsub.f32 %v17341_v62, %v5874_v6  ;;  %v14097_v6 = vld [vmem:[%s20331_s15 + $0xf8] ss:$20 sps:$4 sm:$0xff]  }
 0xc1b   :  { %v5888_v48 = vmul.f32 %v17476_v11, %v17476_v11  ;;  %v5889_v4 = vmul.f32 %v17479_v15, %v17479_v15  ;;  %v5898_v30 = vmul.f32 %v5890_v55, %v17331_v51  ;;  %v5899_v31 = vmul.f32 %v5891_v13, %v17328_v14  ;;  %v14102_v13 = vld [vmem:[%s20331_s15 + $0x124] ss:$20 sps:$4 sm:$0xff]  }
 0xc1d   :  { %v5912_v22 = vsel %vm4981_vm4, %v5899_v31, 0.0  ;;  %v5896_v59 = vmul.f32 %v5888_v48, %v17331_v51  ;;  %v5897_v26 = vmul.f32 %v5889_v4, %v17328_v14  ;;  %v5975_v51 = vpop.permute.xlu1 %5974 }
 0xc1e   :  { %v5913_v38 = vadd.f32 %v5912_v22, %v5898_v30  ;;  %v5980_v29 = vpop.permute.xlu0 %5979  ;;  %v14100_v30 = vld [vmem:[%s20331_s15 + $0x120] ss:$20 sps:$4 sm:$0xff]  }
 0xc1f   :  { %v5908_v62 = vsel %vm4981_vm4, %v5897_v26, 0.0  ;;  %v14105_v22 = vld [vmem:[%s20331_s15 + $0x14c] ss:$20 sps:$4 sm:$0xff]  }
 0xc20   :  { %5914 = vadd.xlane.f32.xlu0 %v5913_v38  ;;  %v5909_v1 = vadd.f32 %v5908_v62, %v5896_v59  ;;  %v14103_v62 = vld [vmem:[%s20331_s15 + $0x148] ss:$20 sps:$4 sm:$0xff]  }
 0xc22   :  { %5910 = vadd.xlane.f32.xlu1 %v5909_v1  ;;  %v14108_v1 = vld [vmem:[%s20331_s15 + $0x174] ss:$20 sps:$4 sm:$0xff]  }
 0xc33   :  { %5984 = vperm.xlu1 %13990, %v5970_v47   ;;  %v6073_v47 = vld [vmem:[%s20331_s15 + $0x198] sm:$0x11] }
 0xc36   :  { %5989 = vperm.xlu0 %13989, %v5971_v10   ;;  %v14106_v10 = vld [vmem:[%s20331_s15 + $0x170] ss:$20 sps:$4 sm:$0xff]  }
 0xc78   :  { %v5903_v33 = vpop.xlane.xlu0 %5902 }
 0xc79   :  { %v5916_v14 = vmul.f32 0.010204081, %v5903_v33 }
 0xc7a   :  { %v5907_v40 = vpop.xlane.xlu1 %5906 }
 0xc7b   :  { %v5920_v61 = vadd.f32 1e-05, %v5916_v14  ;;  %v5917_v0 = vmul.f32 0.010204081, %v5907_v40 }
 0xc7d   :  { %14880 = vrsqrt.f32 %v5920_v61  ;;  %v5921_v54 = vadd.f32 1e-05, %v5917_v0 }
 0xc7e   :  { %v5958_v55 = vpop.permute.xlu1 %5957 }
 0xc7f   :  { %14882 = vrsqrt.f32 %v5921_v54 }
 0xc80   :  { %v5953_v60 = vpop.permute.xlu0 %5952 }
 0xc87   :  { %v14881_v35 = vpop.eup %14880 }
 0xc88   :  { %v5928_v58 = vmul.f32 %v14881_v35, %v17393_v43  ;;  %v5929_v41 = vmul.f32 %v14881_v35, %v17395_v42 }
 0xc89   :  { %v14883_v28 = vpop.eup %14882 }
 0xc8a   :  { %v5960_v18 = vmul.f32 %v5943_v34, %v5928_v58  ;;  %v5930_v56 = vmul.f32 %v14883_v28, %v17401_v2  ;;  %v5931_v23 = vmul.f32 %v14883_v28, %v17403_v57  ;;  %v5961_v19 = vmul.f32 %v5943_v34, %v5929_v41  ;;  %v14079_v2 = vld [vmem:[%s20331_s15 + $0x8] ss:$20 sps:$4 sm:$0xff]   ;;  %v14093_v34 = vld [vmem:[%s20331_s15 + $0xac] ss:$20 sps:$4 sm:$0xff]  }
 0xc8b   :  { %v14084_v57 = vld [vmem:[%s20331_s15 + $0x34] ss:$20 sps:$4 sm:$0xff]  }
 0xc8c   :  { %v5962_v49 = vmul.f32 %v5948_v5, %v5930_v56  ;;  %v5963_v21 = vmul.f32 %v5948_v5, %v5931_v23  ;;  %v5993_v52 = vadd.f32 %v5975_v51, %v5961_v19  ;;  %v5992_v36 = vadd.f32 %v5975_v51, %v5960_v18  ;;  %v14088_v5 = vld [vmem:[%s20331_s15 + $0x80] ss:$20 sps:$4 sm:$0xff]  }
 0xc8d   :  { %v13150_v51 = vcombine.low %v6073_v47, %v6073_v47 }
 0xc8e   :  { %v5995_v16 = vadd.f32 %v5980_v29, %v5963_v21  ;;  %v5994_v37 = vadd.f32 %v5980_v29, %v5962_v49  ;;  %v6001_v25 = vmax.f32 %v5993_v52, 0.0  ;;  %v6000_v27 = vmax.f32 %v5992_v36, 0.0 }
 0xc8f   :  { %v13151_v29 = vcombine.high %v6073_v47, %v6073_v47  ;;  %v6361_v33 = vsel %vm860_vm2, %v13150_v51, 0 }
 0xc90   :  { %v6003_v9 = vmax.f32 %v5995_v16, 0.0  ;;  %v6002_v20 = vmax.f32 %v5994_v37, 0.0 }
 0xc92   :  { %v17501_v43 = vpack.c.bf16 %v6003_v9, %v6001_v25  ;;  %v17503_v42 = vpack.c.bf16 %v6002_v20, %v6000_v27  ;;  %v14112_v25 = vld [vmem:[%s20331_s15 + $0x38] ss:$20 sps:$4 sm:$0xff]   ;;  %v14113_v9 = vld [vmem:[%s20331_s15 + $0x60] ss:$20 sps:$4 sm:$0xff]   ;;  %v14114_v27 = vld [vmem:[%s20331_s15 + $0x88] ss:$20 sps:$4 sm:$0xff]  }
 0xc93   :  { %v14115_v20 = vld [vmem:[%s20331_s15 + $0xb0] ss:$20 sps:$4 sm:$0xff]  }
 0xc94   :  { %13154 = vmatprep.mubr.msk.bf16.mxu1 %vm4981_vm4, %v17501_v43 }
 0xc95   :  { %6402 = vmatmul.mubr.bf16.vlgmr.msra.gmra.mrb[72].mxu1 %v17503_v42 }
 0xc96   :  { %6423 = vmatpush1.bf16.msra.mxu1 %v14079_v2  ;;  %v14116_v2 = vld [vmem:[%s20331_s15 + $0xd8] ss:$20 sps:$4 sm:$0xff]  }
 0xc97   :  { %6424 = vmatprep.subr.bf16.mxu1 %v14084_v57  ;;  %v14118_v57 = vld [vmem:[%s20331_s15 + $0x128] ss:$20 sps:$4 sm:$0xff]  }
 0xc9a   :  { %6425 = vmatpush1.bf16.msra.mxu1 %v14082_v44  ;;  %v14119_v44 = vld [vmem:[%s20331_s15 + $0x150] ss:$20 sps:$4 sm:$0xff]  }
 0xc9b   :  { %6426 = vmatprep.subr.bf16.mxu1 %v14087_v7  ;;  %v14120_v7 = vld [vmem:[%s20331_s15 + $0x178] ss:$20 sps:$4 sm:$0xff]  }
 0xc9e   :  { %6427 = vmatpush1.bf16.msra.mxu1 %v14085_v39  ;;  %v14121_v39 = vld [vmem:[%s20331_s15 + $0x1a0] ss:$0 sps:$4 sm:$0x11]  }
 0xc9f   :  { %6428 = vmatprep.subr.bf16.mxu1 %v14090_v17  ;;  %v6367_v17 = vsel %vm860_vm2, %v14121_v39, 0 }
 0xca2   :  { %6429 = vmatpush1.bf16.msra.mxu1 %v14088_v5 }
 0xca3   :  { %6430 = vmatprep.subr.bf16.mxu1 %v14093_v34 }
 0xca6   :  { %6431 = vmatpush1.bf16.msra.mxu1 %v14091_v12 }
 0xca7   :  { %6432 = vmatprep.subr.bf16.mxu1 %v14096_v53 }
 0xcaa   :  { %6433 = vmatpush1.bf16.msra.mxu1 %v14094_v63 }
 0xcab   :  { %6434 = vmatprep.subr.bf16.mxu1 %v14099_v50 }
 0xcad   :  { %v5915_v48 = vpop.xlane.xlu0 %5914 }
 0xcae   :  { %v5919_v4 = vmul.f32 0.010204081, %v5915_v48  ;;  %6435 = vmatpush1.bf16.msra.mxu1 %v14097_v6 }
 0xcaf   :  { %v5911_v31 = vpop.xlane.xlu1 %5910  ;;  %6436 = vmatprep.subr.bf16.mxu1 %v14102_v13 }
 0xcb0   :  { %v5923_v59 = vadd.f32 1e-05, %v5919_v4  ;;  %v5918_v26 = vmul.f32 0.010204081, %v5911_v31 }
 0xcb2   :  { %14884 = vrsqrt.f32 %v5923_v59  ;;  %v5922_v38 = vadd.f32 1e-05, %v5918_v26  ;;  %6437 = vmatpush1.bf16.msra.mxu1 %v14100_v30 }
 0xcb3   :  { %6438 = vmatprep.subr.bf16.mxu1 %v14105_v22  ;;  %v5985_v49 = vpop.permute.xlu1 %5984 }
 0xcb4   :  { %14886 = vrsqrt.f32 %v5922_v38 }
 0xcb5   :  { %v5990_v28 = vpop.permute.xlu0 %5989 }
 0xcb6   :  { %6439 = vmatpush1.bf16.msra.mxu1 %v14103_v62 }
 0xcb7   :  { %6440 = vmatprep.subr.bf16.mxu1 %v14108_v1 }
 0xcba   :  { %6441 = vmatpush1.bf16.msra.mxu1 %v14106_v10 }
 0xcbb   :  { %13156 = vmatprep.subr.msk.bf16.mxu1 %vm860_vm2, %v13151_v29  ;;  %vm6804_vm2 = vcmask 916480  }
 0xcbc   :  { %v14885_v14 = vpop.eup %14884 }
 0xcbd   :  { %v5934_v40 = vmul.f32 %v14885_v14, %v17466_v32  ;;  %v5935_v61 = vmul.f32 %v14885_v14, %v17469_v45 }
 0xcbe   :  { %v14887_v0 = vpop.eup %14886  ;;  %6443 = vmatpush1.bf16.msra.mxu1 %v6361_v33 }
 0xcbf   :  { %v5932_v54 = vmul.f32 %v14887_v0, %v17476_v11  ;;  %v5933_v35 = vmul.f32 %v14887_v0, %v17479_v15  ;;  %v5966_v58 = vmul.f32 %v5958_v55, %v5934_v40  ;;  %v5967_v41 = vmul.f32 %v5958_v55, %v5935_v61  ;;  %6475 = vmatprep.subr.bf16.mxu1 %v14925_v3  ;;  %v14111_v15 = vld [vmem:[%s20331_s15 + $0x10] ss:$20 sps:$4 sm:$0xff]  }
 0xcc1   :  { %v5964_v18 = vmul.f32 %v5953_v60, %v5932_v54  ;;  %v5965_v56 = vmul.f32 %v5953_v60, %v5933_v35  ;;  %v5998_v23 = vadd.f32 %v5990_v28, %v5966_v58  ;;  %v5999_v19 = vadd.f32 %v5990_v28, %v5967_v41  ;;  %v17739_v58 = vld [vmem:[%s20332_s16 + $0x4] ss:$12 sps:$4 sm:$0xff]  }
 0xcc3   :  { %v5996_v21 = vadd.f32 %v5985_v49, %v5964_v18  ;;  %v5997_v32 = vadd.f32 %v5985_v49, %v5965_v56  ;;  %v6006_v36 = vmax.f32 %v5998_v23, 0.0  ;;  %v6007_v16 = vmax.f32 %v5999_v19, 0.0 }
 0xcc5   :  { %v6004_v52 = vmax.f32 %v5996_v21, 0.0  ;;  %v6005_v45 = vmax.f32 %v5997_v32, 0.0 }
 0xcc7   :  { %v6011_v37 = vpack.c.bf16 %v6007_v16, %v6005_v45  ;;  %v6010_v11 = vpack.c.bf16 %v6006_v36, %v6004_v52 }
 0xcc9   :  { %13155 = vmatprep.mubr.msk.bf16.mxu1 %vm4981_vm4, %v6011_v37 }
 0xcca   :  { %6412 = vmatmul.mubr.bf16.gmra.mrb[76].mxu1 %v6010_v11 }
 0xccb   :  { %13157 = vmatprep.mubr.msk.bf16.mxu1 %vm4981_vm4, %v17501_v43 }
 0xcd2   :  { %6455 = vmatmul.mubr.bf16.vlgmr.msra.gmra.mrb[80].mxu1 %v17503_v42 }
 0xcd3   :  { %6476 = vmatpush1.bf16.msra.mxu1 %v14111_v15  ;;  %13158 = vmatprep.mubr.msk.bf16.mxu1 %vm4981_vm4, %v6011_v37 }
 0xcd4   :  { %6477 = vmatprep.subr.bf16.mxu1 %v14925_v3 }
 0xcd7   :  { %6478 = vmatpush1.bf16.msra.mxu1 %v14112_v25 }
 0xcd8   :  { %6479 = vmatprep.subr.bf16.mxu1 %v14925_v3 }
 0xcda   :  { %6465 = vmatmul.mubr.bf16.gmra.mrb[84].mxu1 %v6010_v11 }
 0xcdb   :  { %6480 = vmatpush1.bf16.msra.mxu1 %v14113_v9  ;;  %13159 = vmatprep.mubr.msk.bf16.mxu1 %vm4981_vm4, %v17501_v43  ;;  %v14117_v43 = vld [vmem:[%s20331_s15 + $0x100] ss:$20 sps:$4 sm:$0xff]   ;;  %s14942_s15 = smov 112  }
 0xcdc   :  { %6481 = vmatprep.subr.bf16.mxu1 %v14925_v3 }
 0xcdf   :  { %6482 = vmatpush1.bf16.msra.mxu1 %v14114_v27 }
 0xce0   :  { %6483 = vmatprep.subr.bf16.mxu1 %v14925_v3 }
 0xce3   :  { %6484 = vmatpush1.bf16.msra.mxu1 %v14115_v20 }
 0xce4   :  { %6485 = vmatprep.subr.bf16.mxu1 %v14925_v3 }
 0xce7   :  { %6486 = vmatpush1.bf16.msra.mxu1 %v14116_v2 }
 0xce8   :  { %6487 = vmatprep.subr.bf16.mxu1 %v14925_v3 }
 0xceb   :  { %6488 = vmatpush1.bf16.msra.mxu1 %v14117_v43 }
 0xcec   :  { %6489 = vmatprep.subr.bf16.mxu1 %v14925_v3 }
 0xcef   :  { %6490 = vmatpush1.bf16.msra.mxu1 %v14118_v57 }
 0xcf0   :  { %6491 = vmatprep.subr.bf16.mxu1 %v14925_v3 }
 0xcf3   :  { %6492 = vmatpush1.bf16.msra.mxu1 %v14119_v44 }
 0xcf4   :  { %6493 = vmatprep.subr.bf16.mxu1 %v14925_v3 }
 0xcf7   :  { %6494 = vmatpush1.bf16.msra.mxu1 %v14120_v7 }
 0xcf8   :  { %6495 = vmatprep.subr.bf16.mxu1 %v14925_v3 }
 0xcfb   :  { %6496 = vmatpush1.bf16.msra.mxu1 %v6367_v17 }
 0xcfe   :  { %6508 = vmatmul.mubr.bf16.vlgmr.msra.gmra.mrb[88].mxu1 %v17503_v42 }
 0xcff   :  { %13160 = vmatprep.mubr.msk.bf16.mxu1 %vm4981_vm4, %v6011_v37 }
 0xd06   :  { %6516 = vmatmul.mubr.bf16.gmra.mrb[92].mxu1 %v6010_v11 }
 0xd07   :  { %7377 = vmatprep.mubr.bf16.mxu1 %v17739_v58 }
 0xd68   :  { %v6403_v5 = vpop.f32.mrb[72].mxu1 }
 0xd69   :  { %v6405_v34 = vpop.f32.mrb[73].mxu1 }
 0xd6a   :  { %v6407_v12 = vpop.f32.mrb[74].mxu1 }
 0xd6b   :  { %v6409_v53 = vpop.f32.mrb[75].mxu1  ;;  %v17628_v63 = vpack.c.bf16 %v6407_v12, %v6403_v5 }
 0xd6c   :  { %v17630_v50 = vpack.c.bf16 %v6409_v53, %v6405_v34 }
 0xd6d   :  { %6616 = vrot.lane.b32.xlu1 %v17628_v63, %s14922_s30 }
 0xd6e   :  { %7345 = vmatprep.subr.bf16.mxu1 %v17630_v50 }
 0xd6f   :  { %7346 = vmatpush1.bf16.msra.mxu1 %v17628_v63 }
 0xd71   :  { %6700 = vrot.lane.b32.xlu1 %v17628_v63, %s14926_s27 }
 0xd75   :  { %6784 = vrot.lane.b32.xlu1 %v17628_v63, %s14942_s15 }
 0xd79   :  { %6869 = vrot.lane.b32.xlu1 %v17628_v63, %s14943_s26 }
 0xd7d   :  { %6618 = vrot.lane.b32.xlu1 %v17630_v50, %s14922_s30 }
 0xd81   :  { %6702 = vrot.lane.b32.xlu1 %v17630_v50, %s14926_s27 }
 0xd85   :  { %6786 = vrot.lane.b32.xlu1 %v17630_v50, %s14942_s15 }
 0xd89   :  { %6871 = vrot.lane.b32.xlu1 %v17630_v50, %s14943_s26 }
 0xd9d   :  { %v6413_v42 = vpop.f32.mrb[76].mxu1 }
 0xd9e   :  { %v6415_v60 = vpop.f32.mrb[77].mxu1 }
 0xd9f   :  { %v6417_v6 = vpop.f32.mrb[78].mxu1 }
 0xda0   :  { %v6419_v55 = vpop.f32.mrb[79].mxu1  ;;  %v17650_v13 = vpack.c.bf16 %v6417_v6, %v6413_v42 }
 0xda1   :  { %v17652_v48 = vpack.c.bf16 %v6419_v55, %v6415_v60 }
 0xda2   :  { %6626 = vrot.lane.b32.xlu0 %v17650_v13, %s14922_s30 }
 0xda3   :  { %7347 = vmatprep.subr.bf16.mxu1 %v17652_v48 }
 0xda4   :  { %7348 = vmatpush1.bf16.msra.mxu1 %v17650_v13 }
 0xda5   :  { %v6456_v4 = vpop.f32.mrb[80].mxu1 }
 0xda6   :  { %v6458_v30 = vpop.f32.mrb[81].mxu1  ;;  %6710 = vrot.lane.b32.xlu0 %v17650_v13, %s14926_s27 }
 0xda7   :  { %v6460_v31 = vpop.f32.mrb[82].mxu1 }
 0xda8   :  { %v6462_v22 = vpop.f32.mrb[83].mxu1  ;;  %v17660_v59 = vpack.c.bf16 %v6460_v31, %v6456_v4 }
 0xda9   :  { %v17662_v26 = vpack.c.bf16 %v6462_v22, %v6458_v30 }
 0xdaa   :  { %6794 = vrot.lane.b32.xlu0 %v17650_v13, %s14942_s15 }
 0xdad   :  { %v6466_v38 = vpop.f32.mrb[84].mxu1 }
 0xdae   :  { %v6468_v62 = vpop.f32.mrb[85].mxu1  ;;  %6628 = vrot.lane.b32.xlu0 %v17652_v48, %s14922_s30 }
 0xdaf   :  { %v6470_v1 = vpop.f32.mrb[86].mxu1 }
 0xdb0   :  { %v6472_v47 = vpop.f32.mrb[87].mxu1  ;;  %v17668_v10 = vpack.c.bf16 %v6470_v1, %v6466_v38 }
 0xdb1   :  { %v17670_v29 = vpack.c.bf16 %v6472_v47, %v6468_v62 }
 0xdb2   :  { %6712 = vrot.lane.b32.xlu0 %v17652_v48, %s14926_s27  ;;  %6630 = vrot.lane.b32.xlu1 %v17668_v10, %s14922_s30 }
 0xdb6   :  { %6796 = vrot.lane.b32.xlu0 %v17652_v48, %s14942_s15  ;;  %6956 = vrot.lane.b32.xlu1 %v17630_v50, %s14940_s4 }
 0xdba   :  { %6881 = vrot.lane.b32.xlu0 %v17652_v48, %s14943_s26  ;;  %6714 = vrot.lane.b32.xlu1 %v17668_v10, %s14926_s27 }
 0xdbe   :  { %6620 = vrot.lane.b32.xlu0 %v17660_v59, %s14922_s30  ;;  %6954 = vrot.lane.b32.xlu1 %v17628_v63, %s14940_s4 }
 0xdc2   :  { %6879 = vrot.lane.b32.xlu0 %v17650_v13, %s14943_s26  ;;  %6798 = vrot.lane.b32.xlu1 %v17668_v10, %s14942_s15 }
 0xdc6   :  { %6704 = vrot.lane.b32.xlu0 %v17660_v59, %s14926_s27  ;;  %7040 = vrot.lane.b32.xlu1 %v17630_v50, %s20364_s24 }
 0xdca   :  { %6788 = vrot.lane.b32.xlu0 %v17660_v59, %s14942_s15  ;;  %6883 = vrot.lane.b32.xlu1 %v17668_v10, %s14943_s26 }
 0xdce   :  { %6873 = vrot.lane.b32.xlu0 %v17660_v59, %s14943_s26  ;;  %7038 = vrot.lane.b32.xlu1 %v17628_v63, %s20364_s24 }
 0xdd1   :  { %v6509_v51 = vpop.f32.mrb[88].mxu1 }
 0xdd2   :  { %6528 = vst.msk [vmem:[#allocation9 + $0x20] sm:$0xff] %vm4981_vm4, %v6509_v51  ;;  %v6511_v33 = vpop.f32.mrb[89].mxu1  ;;  %6958 = vrot.lane.b32.xlu0 %v17660_v59, %s14940_s4  ;;  %6968 = vrot.lane.b32.xlu1 %v17668_v10, %s14940_s4 }
 0xdd3   :  { %v6512_v14 = vpop.f32.mrb[90].mxu1 }
 0xdd4   :  { %6533 = vst.msk [vmem:[#allocation9 + $0x48] sm:$0xff] %vm4981_vm4, %v6512_v14  ;;  %v6514_v40 = vpop.f32.mrb[91].mxu1 }
 0xdd6   :  { %6966 = vrot.lane.b32.xlu0 %v17652_v48, %s14940_s4  ;;  %7124 = vrot.lane.b32.xlu1 %v17630_v50, %s14938_s0 }
 0xdd9   :  { %v6517_v61 = vpop.f32.mrb[92].mxu1  ;;  %v6580_v56 = vld [vmem:[#allocation9 + $0x20] sm:$0xff] }
 0xdda   :  { %6538 = vst.msk [vmem:[#allocation9 + $0x70] sm:$0xff] %vm4981_vm4, %v6517_v61  ;;  %v6519_v0 = vpop.f32.mrb[93].mxu1  ;;  %6964 = vrot.lane.b32.xlu0 %v17650_v13, %s14940_s4  ;;  %7052 = vrot.lane.b32.xlu1 %v17668_v10, %s20364_s24 }
 0xddb   :  { %v6520_v54 = vpop.f32.mrb[94].mxu1  ;;  %v6585_v18 = vld [vmem:[#allocation9 + $0x48] sm:$0xff] }
 0xddc   :  { %6543 = vst.msk [vmem:[#allocation9 + $0x98] sm:$0xff] %vm4981_vm4, %v6520_v54  ;;  %v6522_v35 = vpop.f32.mrb[95].mxu1  ;;  %v6600_v23 = vpack.c.bf16 %v6585_v18, %v6580_v56  ;;  %vm12274_vm4 = vcmask 547840  }
 0xdde   :  { %7042 = vrot.lane.b32.xlu0 %v17660_v59, %s20364_s24  ;;  %7122 = vrot.lane.b32.xlu1 %v17628_v63, %s14938_s0 }
 0xddf   :  { %v6617_v41 = vpop.permute.xlu1 %6616 }
 0xde1   :  { %v6590_v21 = vld [vmem:[#allocation9 + $0x70] sm:$0xff] }
 0xde2   :  { %7050 = vrot.lane.b32.xlu0 %v17652_v48, %s20364_s24  ;;  %7136 = vrot.lane.b32.xlu1 %v17668_v10, %s14938_s0 }
 0xde3   :  { %v17758_v28 = vpop.permute.xlu1 %6700  ;;  %v6595_v19 = vld [vmem:[#allocation9 + $0x98] sm:$0xff] }
 0xde4   :  { %v6605_v32 = vpack.c.bf16 %v6595_v19, %v6590_v21 }
 0xde6   :  { %7048 = vrot.lane.b32.xlu0 %v17650_v13, %s20364_s24  ;;  %7208 = vrot.lane.b32.xlu1 %v17630_v50, %s14944_s2 }
 0xde7   :  { %v17764_v49 = vpop.permute.xlu1 %6784 }
 0xdea   :  { %7126 = vrot.lane.b32.xlu0 %v17660_v59, %s14938_s0  ;;  %7206 = vrot.lane.b32.xlu1 %v17628_v63, %s14944_s2 }
 0xdeb   :  { %v17772_v52 = vpop.permute.xlu1 %6869 }
 0xdee   :  { %7134 = vrot.lane.b32.xlu0 %v17652_v48, %s14938_s0  ;;  %7220 = vrot.lane.b32.xlu1 %v17668_v10, %s14944_s2 }
 0xdef   :  { %v6619_v45 = vpop.permute.xlu1 %6618 }
 0xdf0   :  { %v6636_v5 = vsel %vm1174_vm5, %v6617_v41, %v6619_v45 }
 0xdf2   :  { %7132 = vrot.lane.b32.xlu0 %v17650_v13, %s14938_s0  ;;  %6622 = vrot.lane.b32.xlu1 %v17662_v26, %s14922_s30 }
 0xdf3   :  { %v6703_v36 = vpop.permute.xlu1 %6702 }
 0xdf4   :  { %v6720_v6 = vsel %vm1311_vm6, %v17758_v28, %v6703_v36 }
 0xdf6   :  { %7210 = vrot.lane.b32.xlu0 %v17660_v59, %s14944_s2  ;;  %6632 = vrot.lane.b32.xlu1 %v17670_v29, %s14922_s30 }
 0xdf7   :  { %v6787_v11 = vpop.permute.xlu1 %6786 }
 0xdf8   :  { %v6805_v38 = vsel %vm6804_vm2, %v17764_v49, %v6787_v11 }
 0xdfa   :  { %7218 = vrot.lane.b32.xlu0 %v17652_v48, %s14944_s2  ;;  %6706 = vrot.lane.b32.xlu1 %v17662_v26, %s14926_s27 }
 0xdfb   :  { %v17792_v25 = vpop.permute.xlu1 %6871 }
 0xdfc   :  { %v6890_v61 = vsel %vm6889_vm14, %v17772_v52, %v17792_v25 }
 0xdfe   :  { %7216 = vrot.lane.b32.xlu0 %v17650_v13, %s14944_s2  ;;  %6716 = vrot.lane.b32.xlu1 %v17670_v29, %s14926_s27 }
 0xe02   :  { %6790 = vrot.lane.b32.xlu1 %v17662_v26, %s14942_s15  ;;  %6624 = vrot.lane.b32.xlu0 %v6600_v23, %s14922_s30 }
 0xe06   :  { %6800 = vrot.lane.b32.xlu1 %v17670_v29, %s14942_s15  ;;  %6634 = vrot.lane.b32.xlu0 %v6605_v32, %s14922_s30 }
 0xe0a   :  { %6875 = vrot.lane.b32.xlu1 %v17662_v26, %s14943_s26  ;;  %6708 = vrot.lane.b32.xlu0 %v6600_v23, %s14926_s27 }
 0xe0e   :  { %6885 = vrot.lane.b32.xlu1 %v17670_v29, %s14943_s26  ;;  %6718 = vrot.lane.b32.xlu0 %v6605_v32, %s14926_s27 }
 0xe12   :  { %6960 = vrot.lane.b32.xlu1 %v17662_v26, %s14940_s4  ;;  %6792 = vrot.lane.b32.xlu0 %v6600_v23, %s14942_s15 }
 0xe14   :  { %v6627_v16 = vpop.permute.xlu0 %6626 }
 0xe16   :  { %6970 = vrot.lane.b32.xlu1 %v17670_v29, %s14940_s4  ;;  %6802 = vrot.lane.b32.xlu0 %v6605_v32, %s14942_s15 }
 0xe18   :  { %v6711_v37 = vpop.permute.xlu0 %6710 }
 0xe1a   :  { %7044 = vrot.lane.b32.xlu1 %v17662_v26, %s20364_s24  ;;  %6877 = vrot.lane.b32.xlu0 %v6600_v23, %s14943_s26 }
 0xe1c   :  { %v6795_v15 = vpop.permute.xlu0 %6794 }
 0xe1e   :  { %7054 = vrot.lane.b32.xlu1 %v17670_v29, %s20364_s24  ;;  %6887 = vrot.lane.b32.xlu0 %v6605_v32, %s14943_s26  ;;  %s14946_s26 = smov 67  }
 0xe20   :  { %v6629_v9 = vpop.permute.xlu0 %6628 }
 0xe21   :  { %v6640_v63 = vsel %vm1174_vm5, %v6627_v16, %v6629_v9 }
 0xe22   :  { %7128 = vrot.lane.b32.xlu1 %v17662_v26, %s14938_s0  ;;  %6962 = vrot.lane.b32.xlu0 %v6600_v23, %s14940_s4 }
 0xe24   :  { %v6713_v27 = vpop.permute.xlu0 %6712  ;;  %v17797_v20 = vpop.permute.xlu1 %6630 }
 0xe25   :  { %v6641_v34 = vsel %vm1174_vm5, %v6629_v9, %v17797_v20  ;;  %v6724_v4 = vsel %vm1311_vm6, %v6711_v37, %v6713_v27 }
 0xe26   :  { %7138 = vrot.lane.b32.xlu1 %v17670_v29, %s14938_s0  ;;  %6972 = vrot.lane.b32.xlu0 %v6605_v32, %s14940_s4 }
 0xe28   :  { %v6797_v2 = vpop.permute.xlu0 %6796  ;;  %v17802_v43 = vpop.permute.xlu1 %6956 }
 0xe29   :  { %v6809_v51 = vsel %vm6804_vm2, %v6795_v15, %v6797_v2 }
 0xe2a   :  { %7212 = vrot.lane.b32.xlu1 %v17662_v26, %s14944_s2  ;;  %7046 = vrot.lane.b32.xlu0 %v6600_v23, %s20364_s24 }
 0xe2c   :  { %v6882_v57 = vpop.permute.xlu0 %6881  ;;  %v17807_v44 = vpop.permute.xlu1 %6714 }
 0xe2d   :  { %v6725_v55 = vsel %vm1311_vm6, %v6713_v27, %v17807_v44 }
 0xe2e   :  { %7222 = vrot.lane.b32.xlu1 %v17670_v29, %s14944_s2  ;;  %7056 = vrot.lane.b32.xlu0 %v6605_v32, %s20364_s24 }
 0xe30   :  { %v17812_v7 = vpop.permute.xlu0 %6620  ;;  %v6955_v39 = vpop.permute.xlu1 %6954 }
 0xe31   :  { %v6637_v17 = vsel %vm1174_vm5, %v6619_v45, %v17812_v7 }
 0xe32   :  { %7130 = vrot.lane.b32.xlu0 %v6600_v23, %s14938_s0  ;;  %7349 = vmatprep.subr.bf16.mxu1 %v6637_v17 }
 0xe33   :  { %7350 = vmatpush1.bf16.msra.mxu1 %v6636_v5 }
 0xe34   :  { %v6880_v12 = vpop.permute.xlu0 %6879  ;;  %7351 = vmatprep.subr.bf16.mxu1 %v6641_v34  ;;  %v17820_v53 = vpop.permute.xlu1 %6798  ;;  %v17894_v34 = vld [vmem:[%s20332_s16] ss:$12 sps:$4 sm:$0xff]  }
 0xe35   :  { %v6810_v62 = vsel %vm6804_vm2, %v6797_v2, %v17820_v53  ;;  %v6894_v41 = vsel %vm6889_vm14, %v6880_v12, %v6882_v57 }
 0xe36   :  { %7140 = vrot.lane.b32.xlu0 %v6605_v32, %s14938_s0 }
 0xe37   :  { %7352 = vmatpush1.bf16.msra.mxu1 %v6640_v63 }
 0xe38   :  { %v17824_v50 = vpop.permute.xlu0 %6704  ;;  %v7041_v42 = vpop.permute.xlu1 %7040 }
 0xe39   :  { %v6721_v60 = vsel %vm1311_vm6, %v6703_v36, %v17824_v50 }
 0xe3a   :  { %7214 = vrot.lane.b32.xlu0 %v6600_v23, %s14944_s2  ;;  %7353 = vmatprep.subr.bf16.mxu1 %v6721_v60  ;;  %v6974_v23 = vsel %vm5378_vm8, %v6955_v39, %v17802_v43 }
 0xe3b   :  { %7354 = vmatpush1.bf16.msra.mxu1 %v6720_v6 }
 0xe3c   :  { %v17833_v13 = vpop.permute.xlu0 %6788  ;;  %7355 = vmatprep.subr.bf16.mxu1 %v6725_v55  ;;  %v17835_v48 = vpop.permute.xlu1 %6883 }
 0xe3d   :  { %v6806_v30 = vsel %vm6804_vm2, %v6787_v11, %v17833_v13  ;;  %v6895_v0 = vsel %vm6889_vm14, %v6882_v57, %v17835_v48 }
 0xe3e   :  { %7224 = vrot.lane.b32.xlu0 %v6605_v32, %s14944_s2 }
 0xe3f   :  { %7356 = vmatpush1.bf16.msra.mxu1 %v6724_v4 }
 0xe40   :  { %v17841_v31 = vpop.permute.xlu0 %6873  ;;  %7357 = vmatprep.subr.bf16.mxu1 %v6806_v30  ;;  %v7039_v22 = vpop.permute.xlu1 %7038 }
 0xe41   :  { %v6891_v33 = vsel %vm6889_vm14, %v17792_v25, %v17841_v31  ;;  %v7058_v16 = vsel %vm2955_vm3, %v7039_v22, %v7041_v42 }
 0xe43   :  { %7358 = vmatpush1.bf16.msra.mxu1 %v6805_v38 }
 0xe44   :  { %v17847_v1 = vpop.permute.xlu0 %6958  ;;  %7359 = vmatprep.subr.bf16.mxu1 %v6810_v62  ;;  %v17849_v47 = vpop.permute.xlu1 %6968  ;;  %v17909_v62 = vld [vmem:[%s20332_s16 + $0x8] ss:$12 sps:$4 sm:$0xff]  }
 0xe45   :  { %v6975_v28 = vsel %vm5378_vm8, %v17802_v43, %v17847_v1 }
 0xe47   :  { %7360 = vmatpush1.bf16.msra.mxu1 %v6809_v51 }
 0xe48   :  { %v6967_v14 = vpop.permute.xlu0 %6966  ;;  %7361 = vmatprep.subr.bf16.mxu1 %v6891_v33  ;;  %v7125_v40 = vpop.permute.xlu1 %7124 }
 0xe49   :  { %v6979_v19 = vsel %vm5378_vm8, %v6967_v14, %v17849_v47 }
 0xe4b   :  { %7362 = vmatpush1.bf16.msra.mxu1 %v6890_v61 }
 0xe4c   :  { %v6965_v54 = vpop.permute.xlu0 %6964  ;;  %7363 = vmatprep.subr.bf16.mxu1 %v6895_v0  ;;  %v17860_v35 = vpop.permute.xlu1 %7052 }
 0xe4d   :  { %v6978_v32 = vsel %vm5378_vm8, %v6965_v54, %v6967_v14 }
 0xe4f   :  { %7364 = vmatpush1.bf16.msra.mxu1 %v6894_v41 }
 0xe50   :  { %v17866_v18 = vpop.permute.xlu0 %7042  ;;  %7365 = vmatprep.subr.bf16.mxu1 %v6975_v28  ;;  %v7123_v56 = vpop.permute.xlu1 %7122 }
 0xe51   :  { %v7059_v52 = vsel %vm2955_vm3, %v7041_v42, %v17866_v18  ;;  %v7142_v43 = vsel %vm3092_vm7, %v7123_v56, %v7125_v40 }
 0xe53   :  { %7366 = vmatpush1.bf16.msra.mxu1 %v6974_v23 }
 0xe54   :  { %v7051_v49 = vpop.permute.xlu0 %7050  ;;  %7367 = vmatprep.subr.bf16.mxu1 %v6979_v19  ;;  %v17872_v21 = vpop.permute.xlu1 %7136 }
 0xe55   :  { %v7063_v37 = vsel %vm2955_vm3, %v7051_v49, %v17860_v35 }
 0xe57   :  { %7368 = vmatpush1.bf16.msra.mxu1 %v6978_v32 }
 0xe58   :  { %v7049_v45 = vpop.permute.xlu0 %7048  ;;  %7369 = vmatprep.subr.bf16.mxu1 %v7059_v52  ;;  %v7209_v36 = vpop.permute.xlu1 %7208 }
 0xe59   :  { %v7062_v25 = vsel %vm2955_vm3, %v7049_v45, %v7051_v49 }
 0xe5b   :  { %7370 = vmatpush1.bf16.msra.mxu1 %v7058_v16 }
 0xe5c   :  { %v17880_v11 = vpop.permute.xlu0 %7126  ;;  %7371 = vmatprep.subr.bf16.mxu1 %v7063_v37  ;;  %v7207_v15 = vpop.permute.xlu1 %7206 }
 0xe5d   :  { %v7143_v9 = vsel %vm3092_vm7, %v7125_v40, %v17880_v11  ;;  %v7227_v60 = vsel %vm7226_vm10, %v7207_v15, %v7209_v36 }
 0xe5f   :  { %7372 = vmatpush1.bf16.msra.mxu1 %v7062_v25 }
 0xe60   :  { %v7135_v27 = vpop.permute.xlu0 %7134  ;;  %7373 = vmatprep.subr.bf16.mxu1 %v7143_v9  ;;  %v17885_v2 = vpop.permute.xlu1 %7220 }
 0xe61   :  { %v7147_v57 = vsel %vm3092_vm7, %v7135_v27, %v17872_v21 }
 0xe63   :  { %7374 = vmatpush1.bf16.msra.mxu1 %v7142_v43 }
 0xe64   :  { %v7133_v39 = vpop.permute.xlu0 %7132  ;;  %7375 = vmatprep.subr.bf16.mxu1 %v7147_v57  ;;  %v6623_v17 = vpop.permute.xlu1 %6622 }
 0xe65   :  { %v7146_v5 = vsel %vm3092_vm7, %v7133_v39, %v7135_v27 }
 0xe67   :  { %7376 = vmatpush1.bf16.msra.mxu1 %v7146_v5 }
 0xe68   :  { %v17896_v12 = vpop.permute.xlu0 %7210  ;;  %v6633_v63 = vpop.permute.xlu1 %6632 }
 0xe69   :  { %v7228_v42 = vsel %vm7226_vm10, %v7209_v36, %v17896_v12 }
 0xe6a   :  { %7378 = vmatmul.mubr.bf16.vlgmr.msra.gmra.mrb[96].mxu1 %v17894_v34  ;;  %7388 = vmatprep.subr.bf16.mxu1 %v7228_v42 }
 0xe6b   :  { %7389 = vmatpush1.bf16.msra.mxu1 %v7227_v60  ;;  %7420 = vmatprep.mubr.bf16.mxu1 %v14925_v3 }
 0xe6c   :  { %v7219_v6 = vpop.permute.xlu0 %7218  ;;  %v6707_v55 = vpop.permute.xlu1 %6706 }
 0xe6d   :  { %v7232_v4 = vsel %vm7226_vm10, %v7219_v6, %v17885_v2  ;;  %v6722_v56 = vsel %vm1311_vm6, %v17824_v50, %v6707_v55 }
 0xe6e   :  { %7390 = vmatprep.subr.bf16.mxu1 %v7232_v4 }
 0xe70   :  { %v7217_v30 = vpop.permute.xlu0 %7216  ;;  %v6717_v22 = vpop.permute.xlu1 %6716 }
 0xe71   :  { %v7231_v38 = vsel %vm7226_vm10, %v7217_v30, %v7219_v6  ;;  %v6726_v19 = vsel %vm1311_vm6, %v17807_v44, %v6717_v22 }
 0xe72   :  { %7391 = vmatpush1.bf16.msra.mxu1 %v7231_v38 }
 0xe73   :  { %7431 = vmatprep.subr.bf16.mxu1 %v17662_v26  ;;  %v6638_v26 = vsel %vm1174_vm5, %v17812_v7, %v6623_v17 }
 0xe74   :  { %v6625_v51 = vpop.permute.xlu0 %6624  ;;  %v6791_v33 = vpop.permute.xlu1 %6790 }
 0xe75   :  { %v6639_v61 = vsel %vm1174_vm5, %v6623_v17, %v6625_v51  ;;  %v6807_v52 = vsel %vm6804_vm2, %v17833_v13, %v6791_v33 }
 0xe76   :  { %13164 = vmatmul.mubr.msk.bf16.vlgmr.msra.gmra.mrb[96].mxu1 %vm129_vm1, %v17909_v62 }
 0xe77   :  { %7432 = vmatpush1.bf16.msra.mxu1 %v17660_v59  ;;  %7463 = vmatprep.mubr.bf16.mxu1 %v17739_v58 }
 0xe78   :  { %7433 = vmatprep.subr.bf16.mxu1 %v17670_v29  ;;  %v6635_v14 = vpop.permute.xlu0 %6634  ;;  %v6801_v40 = vpop.permute.xlu1 %6800  ;;  %v6642_v29 = vsel %vm1174_vm5, %v17797_v20, %v6633_v63 }
 0xe79   :  { %v6643_v54 = vsel %vm1174_vm5, %v6633_v63, %v6635_v14  ;;  %v6811_v16 = vsel %vm6804_vm2, %v17820_v53, %v6801_v40 }
 0xe7b   :  { %7434 = vmatpush1.bf16.msra.mxu1 %v17668_v10 }
 0xe7c   :  { %7435 = vmatprep.subr.bf16.mxu1 %v6639_v61  ;;  %v6709_v0 = vpop.permute.xlu0 %6708  ;;  %v6876_v41 = vpop.permute.xlu1 %6875 }
 0xe7d   :  { %v6723_v58 = vsel %vm1311_vm6, %v6707_v55, %v6709_v0  ;;  %v6892_v15 = vsel %vm6889_vm14, %v17841_v31, %v6876_v41 }
 0xe7f   :  { %7436 = vmatpush1.bf16.msra.mxu1 %v6638_v26 }
 0xe80   :  { %7437 = vmatprep.subr.bf16.mxu1 %v6643_v54  ;;  %v6719_v59 = vpop.permute.xlu0 %6718  ;;  %v6886_v28 = vpop.permute.xlu1 %6885 }
 0xe81   :  { %v6727_v7 = vsel %vm1311_vm6, %v6717_v22, %v6719_v59  ;;  %v6896_v27 = vsel %vm6889_vm14, %v17835_v48, %v6886_v28 }
 0xe83   :  { %7438 = vmatpush1.bf16.msra.mxu1 %v6642_v29 }
 0xe84   :  { %7439 = vmatprep.subr.bf16.mxu1 %v6723_v58  ;;  %v6793_v10 = vpop.permute.xlu0 %6792  ;;  %v6961_v49 = vpop.permute.xlu1 %6960  ;;  %v7529_v58 = vsub.s32 2, %v16715_v24 }
 0xe85   :  { %v6808_v20 = vsel %vm6804_vm2, %v6791_v33, %v6793_v10  ;;  %v6976_v39 = vsel %vm5378_vm8, %v17847_v1, %v6961_v49  ;;  %v7533_v10 = vsub.s32 3, %v16715_v24 }
 0xe87   :  { %7440 = vmatpush1.bf16.msra.mxu1 %v6722_v56 }
 0xe88   :  { %7441 = vmatprep.subr.bf16.mxu1 %v6727_v7  ;;  %v6803_v23 = vpop.permute.xlu0 %6802  ;;  %v6971_v36 = vpop.permute.xlu1 %6970 }
 0xe89   :  { %v6812_v50 = vsel %vm6804_vm2, %v6801_v40, %v6803_v23  ;;  %v6980_v5 = vsel %vm5378_vm8, %v17849_v47, %v6971_v36 }
 0xe8b   :  { %7442 = vmatpush1.bf16.msra.mxu1 %v6726_v19 }
 0xe8c   :  { %7443 = vmatprep.subr.bf16.mxu1 %v6808_v20  ;;  %v6878_v32 = vpop.permute.xlu0 %6877  ;;  %v7045_v25 = vpop.permute.xlu1 %7044 }
 0xe8d   :  { %v6893_v44 = vsel %vm6889_vm14, %v6876_v41, %v6878_v32  ;;  %v7060_v60 = vsel %vm2955_vm3, %v17866_v18, %v7045_v25 }
 0xe8f   :  { %7444 = vmatpush1.bf16.msra.mxu1 %v6807_v52 }
 0xe90   :  { %7445 = vmatprep.subr.bf16.mxu1 %v6812_v50  ;;  %v6888_v45 = vpop.permute.xlu0 %6887  ;;  %v7055_v57 = vpop.permute.xlu1 %7054 }
 0xe91   :  { %v6897_v13 = vsel %vm6889_vm14, %v6886_v28, %v6888_v45  ;;  %v7064_v4 = vsel %vm2955_vm3, %v17860_v35, %v7055_v57 }
 0xe93   :  { %7446 = vmatpush1.bf16.msra.mxu1 %v6811_v16 }
 0xe94   :  { %7447 = vmatprep.subr.bf16.mxu1 %v6893_v44  ;;  %v6963_v37 = vpop.permute.xlu0 %6962  ;;  %v7129_v63 = vpop.permute.xlu1 %7128  ;;  %v7608_v44 = vld [vmem:[%s20334_s17 + $0x8] sm:$0xff] }
 0xe95   :  { %v6977_v53 = vsel %vm5378_vm8, %v6961_v49, %v6963_v37  ;;  %v7144_v22 = vsel %vm3092_vm7, %v17880_v11, %v7129_v63  ;;  %v7607_v37 = vld [vmem:[%s20334_s17] sm:$0xff] }
 0xe97   :  { %7448 = vmatpush1.bf16.msra.mxu1 %v6892_v15  ;;  %v14126_v15 = vld [vmem:[%s20335_s20] ss:$60 sps:$4 sm:$0xff]  }
 0xe98   :  { %7449 = vmatprep.subr.bf16.mxu1 %v6897_v13  ;;  %v6973_v9 = vpop.permute.xlu0 %6972  ;;  %v7139_v55 = vpop.permute.xlu1 %7138  ;;  %v14128_v13 = vld [vmem:[%s20335_s20 + $0x4] ss:$60 sps:$4 sm:$0xff]  }
 0xe99   :  { %v6981_v31 = vsel %vm5378_vm8, %v6971_v36, %v6973_v9  ;;  %v7148_v51 = vsel %vm3092_vm7, %v17872_v21, %v7139_v55  ;;  %v14131_v9 = vld [vmem:[%s20335_s20 + $0xc] ss:$60 sps:$4 sm:$0xff]   ;;  %vm11377_vm8 = vcmask 64512  }
 0xe9a   :  { %10689 = vmatprep.subr.bf16.mxu0 %v14131_v9 }
 0xe9b   :  { %7450 = vmatpush1.bf16.msra.mxu1 %v6896_v27  ;;  %v14132_v27 = vld [vmem:[%s20335_s20 + $0x78] ss:$60 sps:$4 sm:$0xff]  }
 0xe9c   :  { %7451 = vmatprep.subr.bf16.mxu1 %v6977_v53  ;;  %v7047_v43 = vpop.permute.xlu0 %7046  ;;  %v7213_v38 = vpop.permute.xlu1 %7212  ;;  %v14134_v53 = vld [vmem:[%s20335_s20 + $0x7c] ss:$60 sps:$4 sm:$0xff]  }
 0xe9d   :  { %v7061_v48 = vsel %vm2955_vm3, %v7045_v25, %v7047_v43  ;;  %v7229_v40 = vsel %vm7226_vm10, %v17896_v12, %v7213_v38  ;;  %v14129_v25 = vld [vmem:[%s20335_s20 + $0x8] ss:$60 sps:$4 sm:$0xff]   ;;  %v14135_v43 = vld [vmem:[%s20335_s20 + $0x80] ss:$60 sps:$4 sm:$0xff]  }
 0xe9e   :  { %10690 = vmatpush1.bf16.msra.mxu0 %v14129_v25 }
 0xe9f   :  { %7452 = vmatpush1.bf16.msra.mxu1 %v6976_v39  ;;  %v14140_v39 = vld [vmem:[%s20335_s20 + $0xf4] ss:$60 sps:$4 sm:$0xff]  }
 0xea0   :  { %7453 = vmatprep.subr.bf16.mxu1 %v6981_v31  ;;  %v7057_v17 = vpop.permute.xlu0 %7056  ;;  %v7223_v14 = vpop.permute.xlu1 %7222  ;;  %v14138_v31 = vld [vmem:[%s20335_s20 + $0xf0] ss:$60 sps:$4 sm:$0xff]  }
 0xea1   :  { %v7065_v1 = vsel %vm2955_vm3, %v7055_v57, %v7057_v17  ;;  %v7233_v21 = vsel %vm7226_vm10, %v17885_v2, %v7223_v14  ;;  %v14137_v57 = vld [vmem:[%s20335_s20 + $0x84] ss:$60 sps:$4 sm:$0xff]   ;;  %v14143_v17 = vld [vmem:[%s20335_s20 + $0xfc] ss:$60 sps:$4 sm:$0xff]  }
 0xea2   :  { %10691 = vmatprep.subr.bf16.mxu0 %v14137_v57 }
 0xea3   :  { %7454 = vmatpush1.bf16.msra.mxu1 %v6980_v5  ;;  %v14141_v5 = vld [vmem:[%s20335_s20 + $0xf8] ss:$60 sps:$4 sm:$0xff]   ;;  %10692 = vmatpush1.bf16.msra.mxu0 %v14135_v43 }
 0xea4   :  { %7455 = vmatprep.subr.bf16.mxu1 %v7061_v48  ;;  %v7131_v42 = vpop.permute.xlu0 %7130  ;;  %v14146_v48 = vld [vmem:[%s20335_s20 + $0x16c] ss:$60 sps:$4 sm:$0xff]   ;;  %10693 = vmatprep.subr.bf16.mxu0 %v14143_v17 }
 0xea5   :  { %v7145_v47 = vsel %vm3092_vm7, %v7129_v63, %v7131_v42  ;;  %v14149_v63 = vld [vmem:[%s20335_s20 + $0x174] ss:$60 sps:$4 sm:$0xff]   ;;  %v14144_v42 = vld [vmem:[%s20335_s20 + $0x168] ss:$60 sps:$4 sm:$0xff]  }
 0xea7   :  { %7456 = vmatpush1.bf16.msra.mxu1 %v7060_v60  ;;  %v14147_v60 = vld [vmem:[%s20335_s20 + $0x170] ss:$60 sps:$4 sm:$0xff]   ;;  %10694 = vmatpush1.bf16.msra.mxu0 %v14141_v5 }
 0xea8   :  { %7457 = vmatprep.subr.bf16.mxu1 %v7065_v1  ;;  %v7141_v6 = vpop.permute.xlu0 %7140  ;;  %v14152_v1 = vld [vmem:[%s20335_s20 + $0x1e4] ss:$60 sps:$4 sm:$0xff]   ;;  %10695 = vmatprep.subr.bf16.mxu0 %v14149_v63 }
 0xea9   :  { %v7149_v18 = vsel %vm3092_vm7, %v7139_v55, %v7141_v6  ;;  %v14155_v6 = vld [vmem:[%s20335_s20 + $0x1ec] ss:$60 sps:$4 sm:$0xff]   ;;  %v14150_v55 = vld [vmem:[%s20335_s20 + $0x1e0] ss:$60 sps:$4 sm:$0xff]   ;;  %vm12139_vm7 = vcmask 556032  }
 0xeab   :  { %7458 = vmatpush1.bf16.msra.mxu1 %v7064_v4  ;;  %v14153_v4 = vld [vmem:[%s20335_s20 + $0x1e8] ss:$60 sps:$4 sm:$0xff]   ;;  %10696 = vmatpush1.bf16.msra.mxu0 %v14147_v60 }
 0xeac   :  { %7459 = vmatprep.subr.bf16.mxu1 %v7145_v47  ;;  %v7215_v30 = vpop.permute.xlu0 %7214  ;;  %v14158_v47 = vld [vmem:[%s20335_s20 + $0x25c] ss:$60 sps:$4 sm:$0xff]   ;;  %10697 = vmatprep.subr.bf16.mxu0 %v14155_v6  ;;  %v7627_v60 = vld [vmem:[%s20336_s18] sm:$0xff]  ;;  %v14194_v6 = vld [vmem:[%s20335_s20 + $0x52c] ss:$60 sps:$4 sm:$0xff]  }
 0xead   :  { %v7230_v33 = vsel %vm7226_vm10, %v7213_v38, %v7215_v30  ;;  %v14161_v30 = vld [vmem:[%s20335_s20 + $0x264] ss:$60 sps:$4 sm:$0xff]   ;;  %v14164_v38 = vld [vmem:[%s20335_s20 + $0x2d4] ss:$60 sps:$4 sm:$0xff]  }
 0xeaf   :  { %7460 = vmatpush1.bf16.msra.mxu1 %v7144_v22  ;;  %v14156_v22 = vld [vmem:[%s20335_s20 + $0x258] ss:$60 sps:$4 sm:$0xff]   ;;  %10698 = vmatpush1.bf16.msra.mxu0 %v14153_v4  ;;  %v14192_v4 = vld [vmem:[%s20335_s20 + $0x528] ss:$60 sps:$4 sm:$0xff]  }
 0xeb0   :  { %7461 = vmatprep.subr.bf16.mxu1 %v7149_v18  ;;  %v7225_v35 = vpop.permute.xlu0 %7224  ;;  %v14159_v18 = vld [vmem:[%s20335_s20 + $0x260] ss:$60 sps:$4 sm:$0xff]   ;;  %10699 = vmatprep.subr.bf16.mxu0 %v14161_v30 }
 0xeb1   :  { %v7234_v11 = vsel %vm7226_vm10, %v7223_v14, %v7225_v35  ;;  %v14165_v35 = vld [vmem:[%s20335_s20 + $0x2d8] ss:$60 sps:$4 sm:$0xff]   ;;  %v14170_v14 = vld [vmem:[%s20335_s20 + $0x34c] ss:$60 sps:$4 sm:$0xff]   ;;  %v14200_v30 = vld [vmem:[%s20335_s20 + $0x5a4] ss:$60 sps:$4 sm:$0xff]  }
 0xeb3   :  { %7462 = vmatpush1.bf16.msra.mxu1 %v7148_v51  ;;  %v14167_v51 = vld [vmem:[%s20335_s20 + $0x2dc] ss:$60 sps:$4 sm:$0xff]   ;;  %10700 = vmatpush1.bf16.msra.mxu0 %v14159_v18 }
 0xeb4   :  { %7474 = vmatprep.subr.bf16.mxu1 %v7230_v33  ;;  %v14162_v33 = vld [vmem:[%s20335_s20 + $0x2d0] ss:$60 sps:$4 sm:$0xff]   ;;  %10701 = vmatprep.subr.bf16.mxu0 %v14167_v51  ;;  %v14198_v18 = vld [vmem:[%s20335_s20 + $0x5a0] ss:$60 sps:$4 sm:$0xff]  }
 0xeb5   :  { %v14206_v51 = vld [vmem:[%s20335_s20 + $0x61c] ss:$60 sps:$4 sm:$0xff]  }
 0xeb6   :  { %7464 = vmatmul.mubr.bf16.vlgmr.msra.gmra.mrb[100].mxu1 %v17894_v34  ;;  %v7517_v34 = vld [vmem:[%s20333_s19] sm:$0xf] }
 0xeb7   :  { %7475 = vmatpush1.bf16.msra.mxu1 %v7229_v40  ;;  %7506 = vmatprep.mubr.bf16.mxu1 %v14925_v3  ;;  %v17974_v61 = vrot.slane %v7517_v34, %v16724_v46  ;;  %v17977_v12 = vrot.slane %v7517_v34, %v16718_v8  ;;  %v17997_v28 = vrot.slane %v7517_v34, %v7529_v58  ;;  %v14168_v40 = vld [vmem:[%s20335_s20 + $0x348] ss:$60 sps:$4 sm:$0xff]   ;;  %v14183_v58 = vld [vmem:[%s20335_s20 + $0x440] ss:$60 sps:$4 sm:$0xff]  }
 0xeb8   :  { %7476 = vmatprep.subr.bf16.mxu1 %v7234_v11  ;;  %v17999_v56 = vrot.slane %v7517_v34, %v7533_v10  ;;  %v14173_v11 = vld [vmem:[%s20335_s20 + $0x354] ss:$60 sps:$4 sm:$0xff]   ;;  %v14176_v34 = vld [vmem:[%s20335_s20 + $0x3c4] ss:$60 sps:$4 sm:$0xff]   ;;  %10702 = vmatpush1.bf16.msra.mxu0 %v14165_v35 }
 0xeb9   :  { %10703 = vmatprep.subr.bf16.mxu0 %v14173_v11  ;;  %v14204_v35 = vld [vmem:[%s20335_s20 + $0x618] ss:$60 sps:$4 sm:$0xff]  }
 0xeba   :  { %v14215_v11 = vld [vmem:[%s20335_s20 + $0x69c] ss:$60 sps:$4 sm:$0xff]  }
 0xebb   :  { %7477 = vmatpush1.bf16.msra.mxu1 %v7233_v21  ;;  %v14171_v21 = vld [vmem:[%s20335_s20 + $0x350] ss:$60 sps:$4 sm:$0xff]  }
 0xebc   :  { %10603 = vmatprep.subr.bf16.mxu1 %v14128_v13  ;;  %10704 = vmatpush1.bf16.msra.mxu0 %v14171_v21  ;;  %v14210_v21 = vld [vmem:[%s20335_s20 + $0x690] ss:$60 sps:$4 sm:$0xff]  }
 0xec2   :  { %13165 = vmatmul.mubr.msk.bf16.vlgmr.msra.gmra.mrb[100].mxu1 %vm129_vm1, %v17909_v62  ;;  %vm12596_vm1 = vcmask 130048  }
 0xec3   :  { %10604 = vmatpush1.bf16.msra.mxu1 %v14126_v15 }
 0xec4   :  { %10605 = vmatprep.subr.bf16.mxu1 %v14134_v53 }
 0xec7   :  { %10606 = vmatpush1.bf16.msra.mxu1 %v14132_v27 }
 0xec8   :  { %10607 = vmatprep.subr.bf16.mxu1 %v14140_v39 }
 0xecb   :  { %10608 = vmatpush1.bf16.msra.mxu1 %v14138_v31 }
 0xecc   :  { %10609 = vmatprep.subr.bf16.mxu1 %v14146_v48 }
 0xecf   :  { %10610 = vmatpush1.bf16.msra.mxu1 %v14144_v42 }
 0xed0   :  { %10611 = vmatprep.subr.bf16.mxu1 %v14152_v1  ;;  %v14189_v1 = vld [vmem:[%s20335_s20 + $0x4b8] ss:$60 sps:$4 sm:$0xff]  }
 0xed3   :  { %10612 = vmatpush1.bf16.msra.mxu1 %v14150_v55  ;;  %v14197_v55 = vld [vmem:[%s20335_s20 + $0x534] ss:$60 sps:$4 sm:$0xff]  }
 0xed4   :  { %10613 = vmatprep.subr.bf16.mxu1 %v14158_v47  ;;  %v14195_v47 = vld [vmem:[%s20335_s20 + $0x530] ss:$60 sps:$4 sm:$0xff]  }
 0xed7   :  { %10614 = vmatpush1.bf16.msra.mxu1 %v14156_v22  ;;  %v14203_v22 = vld [vmem:[%s20335_s20 + $0x5ac] ss:$60 sps:$4 sm:$0xff]  }
 0xed8   :  { %10615 = vmatprep.subr.bf16.mxu1 %v14164_v38  ;;  %v14201_v38 = vld [vmem:[%s20335_s20 + $0x5a8] ss:$60 sps:$4 sm:$0xff]  }
 0xedb   :  { %10616 = vmatpush1.bf16.msra.mxu1 %v14162_v33  ;;  %v14209_v33 = vld [vmem:[%s20335_s20 + $0x624] ss:$60 sps:$4 sm:$0xff]  }
 0xedc   :  { %10617 = vmatprep.subr.bf16.mxu1 %v14170_v14  ;;  %v14207_v14 = vld [vmem:[%s20335_s20 + $0x620] ss:$60 sps:$4 sm:$0xff]  }
 0xedf   :  { %10618 = vmatpush1.bf16.msra.mxu1 %v14168_v40  ;;  %v14212_v40 = vld [vmem:[%s20335_s20 + $0x694] ss:$60 sps:$4 sm:$0xff]  }
 0xee0   :  { %10619 = vmatprep.subr.bf16.mxu1 %v14176_v34  ;;  %v14213_v34 = vld [vmem:[%s20335_s20 + $0x698] ss:$60 sps:$4 sm:$0xff]  }
 0xf49   :  { %v17979_v0 = vpop.f32.mrb[96].mxu1 }
 0xf4a   :  { %v7539_v26 = vmul.f32 %v17974_v61, %v17979_v0  ;;  %v17983_v2 = vpop.f32.mrb[97].mxu1 }
 0xf4b   :  { %v7540_v62 = vmul.f32 %v17977_v12, %v17983_v2  ;;  %v17987_v54 = vpop.f32.mrb[98].mxu1 }
 0xf4c   :  { %v7543_v41 = vmul.f32 %v17974_v61, %v17987_v54  ;;  %v17991_v46 = vpop.f32.mrb[99].mxu1 }
 0xf4d   :  { %v7547_v59 = vadd.f32 %v7540_v62, %v7539_v26  ;;  %v7544_v8 = vmul.f32 %v17977_v12, %v17991_v46  ;;  %v14179_v26 = vld [vmem:[%s20335_s20 + $0x3cc] ss:$60 sps:$4 sm:$0xff]   ;;  %v14174_v62 = vld [vmem:[%s20335_s20 + $0x3c0] ss:$60 sps:$4 sm:$0xff]  }
 0xf4e   :  { %10705 = vmatprep.subr.bf16.mxu0 %v14179_v26  ;;  %10620 = vmatpush1.bf16.msra.mxu1 %v14174_v62  ;;  %v14218_v26 = vld [vmem:[%s20335_s20 + $0x70c] ss:$60 sps:$4 sm:$0xff]   ;;  %v14221_v62 = vld [vmem:[%s20335_s20 + $0x714] ss:$60 sps:$4 sm:$0xff]  }
 0xf4f   :  { %v7552_v29 = vadd.f32 %v7544_v8, %v7543_v41  ;;  %v14177_v41 = vld [vmem:[%s20335_s20 + $0x3c8] ss:$60 sps:$4 sm:$0xff]  }
 0xf50   :  { %v14185_v8 = vld [vmem:[%s20335_s20 + $0x444] ss:$60 sps:$4 sm:$0xff]   ;;  %10706 = vmatpush1.bf16.msra.mxu0 %v14177_v41 }
 0xf51   :  { %10707 = vmatprep.subr.bf16.mxu0 %v14185_v8  ;;  %v14216_v41 = vld [vmem:[%s20335_s20 + $0x708] ss:$60 sps:$4 sm:$0xff]  }
 0xf52   :  { %v14224_v8 = vld [vmem:[%s20335_s20 + $0x784] ss:$60 sps:$4 sm:$0xff]  }
 0xf54   :  { %10708 = vmatpush1.bf16.msra.mxu0 %v14183_v58 }
 0xf95   :  { %v18001_v7 = vpop.f32.mrb[100].mxu1 }
 0xf96   :  { %v7541_v23 = vmul.f32 %v17997_v28, %v18001_v7  ;;  %v18005_v19 = vpop.f32.mrb[101].mxu1 }
 0xf97   :  { %v7542_v20 = vmul.f32 %v17999_v56, %v18005_v19  ;;  %v18009_v49 = vpop.f32.mrb[102].mxu1 }
 0xf98   :  { %v7548_v32 = vadd.f32 %v7547_v59, %v7541_v23  ;;  %v7545_v24 = vmul.f32 %v17997_v28, %v18009_v49  ;;  %v18013_v52 = vpop.f32.mrb[103].mxu1  ;;  %v14182_v59 = vld [vmem:[%s20335_s20 + $0x43c] ss:$60 sps:$4 sm:$0xff]  }
 0xf99   :  { %v7546_v50 = vmul.f32 %v17999_v56, %v18013_v52  ;;  %10621 = vmatprep.subr.bf16.mxu1 %v14182_v59  ;;  %v14219_v59 = vld [vmem:[%s20335_s20 + $0x710] ss:$60 sps:$4 sm:$0xff]  }
 0xf9a   :  { %v7549_v45 = vadd.f32 %v7548_v32, %v7542_v20  ;;  %v7553_v36 = vadd.f32 %v7552_v29, %v7545_v24  ;;  %v14180_v29 = vld [vmem:[%s20335_s20 + $0x438] ss:$60 sps:$4 sm:$0xff]  }
 0xf9b   :  { %10622 = vmatpush1.bf16.msra.mxu1 %v14180_v29  ;;  %v14227_v29 = vld [vmem:[%s20335_s20 + $0x78c] ss:$60 sps:$4 sm:$0xff]  }
 0xf9c   :  { %v7554_v16 = vadd.f32 %v7553_v36, %v7546_v50  ;;  %7550 = vadd.xlane.f32.xlu1 %v7549_v45 }
 0xf9e   :  { %7555 = vadd.xlane.f32.xlu0 %v7554_v16 }
 0xfad   :  { %7616 = vperm.xlu1 %13990, %v7608_v44  }
 0xfb4   :  { %7611 = vperm.xlu0 %13989, %v7607_v37  }
0x1029   :  { %v7551_v10 = vpop.xlane.xlu1 %7550 }
0x102a   :  { %v7557_v23 = vmul.f32 0.0025510204, %v7551_v10 }
0x102b   :  { %v7556_v20 = vpop.xlane.xlu0 %7555 }
0x102c   :  { %v18144_v32 = vsub.f32 %v17979_v0, %v7557_v23  ;;  %v18147_v24 = vsub.f32 %v17983_v2, %v7557_v23  ;;  %v18150_v50 = vsub.f32 %v18001_v7, %v7557_v23  ;;  %v18153_v45 = vsub.f32 %v18005_v19, %v7557_v23 }
0x102d   :  { %v7558_v36 = vmul.f32 0.0025510204, %v7556_v20  ;;  %v7617_v10 = vpop.permute.xlu1 %7616 }
0x102e   :  { %v7567_v16 = vmul.f32 %v18144_v32, %v18144_v32  ;;  %v7568_v44 = vmul.f32 %v18147_v24, %v18147_v24  ;;  %v7569_v0 = vmul.f32 %v18150_v50, %v18150_v50  ;;  %v7570_v15 = vmul.f32 %v18153_v45, %v18153_v45 }
0x102f   :  { %v18162_v37 = vsub.f32 %v17987_v54, %v7558_v36  ;;  %v18165_v2 = vsub.f32 %v17991_v46, %v7558_v36  ;;  %v18168_v7 = vsub.f32 %v18009_v49, %v7558_v36  ;;  %v18171_v19 = vsub.f32 %v18013_v52, %v7558_v36 }
0x1030   :  { %v7575_v13 = vmul.f32 %v7567_v16, %v17974_v61  ;;  %v7576_v25 = vmul.f32 %v7568_v44, %v17977_v12  ;;  %v7577_v9 = vmul.f32 %v7569_v0, %v17997_v28  ;;  %v7578_v57 = vmul.f32 %v7570_v15, %v17999_v56 }
0x1031   :  { %v7571_v54 = vmul.f32 %v18162_v37, %v18162_v37  ;;  %v7572_v46 = vmul.f32 %v18165_v2, %v18165_v2  ;;  %v7573_v49 = vmul.f32 %v18168_v7, %v18168_v7  ;;  %v7574_v27 = vmul.f32 %v18171_v19, %v18171_v19 }
0x1032   :  { %v7583_v52 = vadd.f32 %v7576_v25, %v7575_v13 }
0x1033   :  { %v7579_v53 = vmul.f32 %v7571_v54, %v17974_v61  ;;  %v7580_v43 = vmul.f32 %v7572_v46, %v17977_v12  ;;  %v7581_v31 = vmul.f32 %v7573_v49, %v17997_v28  ;;  %v7582_v48 = vmul.f32 %v7574_v27, %v17999_v56  ;;  %v7628_v61 = vld [vmem:[%s20336_s18 + $0x8] sm:$0xff]  ;;  %v14188_v12 = vld [vmem:[%s20335_s20 + $0x4b4] ss:$60 sps:$4 sm:$0xff]   ;;  %v14191_v28 = vld [vmem:[%s20335_s20 + $0x4bc] ss:$60 sps:$4 sm:$0xff]   ;;  %v7612_v58 = vpop.permute.xlu0 %7611 }
0x1034   :  { %v7584_v39 = vadd.f32 %v7583_v52, %v7577_v9  ;;  %v14186_v56 = vld [vmem:[%s20335_s20 + $0x4b0] ss:$60 sps:$4 sm:$0xff]   ;;  %10623 = vmatprep.subr.bf16.mxu1 %v14188_v12  ;;  %10709 = vmatprep.subr.bf16.mxu0 %v14191_v28 }
0x1035   :  { %v7588_v17 = vadd.f32 %v7580_v43, %v7579_v53  ;;  %10624 = vmatpush1.bf16.msra.mxu1 %v14186_v56  ;;  %10710 = vmatpush1.bf16.msra.mxu0 %v14189_v1 }
0x1036   :  { %v7585_v5 = vadd.f32 %v7584_v39, %v7578_v57  ;;  %10625 = vmatprep.subr.bf16.mxu1 %v14194_v6  ;;  %10711 = vmatprep.subr.bf16.mxu0 %v14197_v55 }
0x1037   :  { %v7589_v63 = vadd.f32 %v7588_v17, %v7581_v31 }
0x1038   :  { %7586 = vadd.xlane.f32.xlu0 %v7585_v5 }
0x1039   :  { %v7590_v42 = vadd.f32 %v7589_v63, %v7582_v48  ;;  %10626 = vmatpush1.bf16.msra.mxu1 %v14192_v4  ;;  %10712 = vmatpush1.bf16.msra.mxu0 %v14195_v47 }
0x103a   :  { %10627 = vmatprep.subr.bf16.mxu1 %v14200_v30  ;;  %10713 = vmatprep.subr.bf16.mxu0 %v14203_v22  ;;  %v14222_v22 = vld [vmem:[%s20335_s20 + $0x780] ss:$60 sps:$4 sm:$0xff]  }
0x103b   :  { %7591 = vadd.xlane.f32.xlu1 %v7590_v42 }
0x103d   :  { %10628 = vmatpush1.bf16.msra.mxu1 %v14198_v18  ;;  %10714 = vmatpush1.bf16.msra.mxu0 %v14201_v38  ;;  %v14225_v18 = vld [vmem:[%s20335_s20 + $0x788] ss:$60 sps:$4 sm:$0xff]  }
0x103e   :  { %10629 = vmatprep.subr.bf16.mxu1 %v14206_v51  ;;  %10715 = vmatprep.subr.bf16.mxu0 %v14209_v33  ;;  %v14230_v51 = vld [vmem:[%s20335_s20 + $0x7fc] ss:$60 sps:$4 sm:$0xff]   ;;  %v14233_v33 = vld [vmem:[%s20335_s20 + $0x804] ss:$60 sps:$4 sm:$0xff]  }
0x1041   :  { %10630 = vmatpush1.bf16.msra.mxu1 %v14204_v35  ;;  %10716 = vmatpush1.bf16.msra.mxu0 %v14207_v14  ;;  %v14228_v14 = vld [vmem:[%s20335_s20 + $0x7f8] ss:$60 sps:$4 sm:$0xff]  }
0x1042   :  { %10631 = vmatprep.subr.bf16.mxu1 %v14212_v40  ;;  %10717 = vmatprep.subr.bf16.mxu0 %v14215_v11  ;;  %v14231_v40 = vld [vmem:[%s20335_s20 + $0x800] ss:$60 sps:$4 sm:$0xff]   ;;  %v14236_v11 = vld [vmem:[%s20335_s20 + $0x874] ss:$60 sps:$4 sm:$0xff]  }
0x1045   :  { %10632 = vmatpush1.bf16.msra.mxu1 %v14210_v21  ;;  %10718 = vmatpush1.bf16.msra.mxu0 %v14213_v34  ;;  %v14239_v21 = vld [vmem:[%s20335_s20 + $0x87c] ss:$60 sps:$4 sm:$0xff]   ;;  %v14234_v34 = vld [vmem:[%s20335_s20 + $0x870] ss:$60 sps:$4 sm:$0xff]  }
0x1046   :  { %10633 = vmatprep.subr.bf16.mxu1 %v14218_v26  ;;  %10719 = vmatprep.subr.bf16.mxu0 %v14221_v62  ;;  %v14237_v26 = vld [vmem:[%s20335_s20 + $0x878] ss:$60 sps:$4 sm:$0xff]   ;;  %v14242_v62 = vld [vmem:[%s20335_s20 + $0x8ec] ss:$60 sps:$4 sm:$0xff]  }
0x1049   :  { %10634 = vmatpush1.bf16.msra.mxu1 %v14216_v41  ;;  %10720 = vmatpush1.bf16.msra.mxu0 %v14219_v59  ;;  %v14245_v41 = vld [vmem:[%s20335_s20 + $0x8f4] ss:$60 sps:$4 sm:$0xff]   ;;  %v14240_v59 = vld [vmem:[%s20335_s20 + $0x8e8] ss:$60 sps:$4 sm:$0xff]  }
0x104a   :  { %10646 = vmatprep.subr.bf16.mxu1 %v14224_v8  ;;  %10732 = vmatprep.subr.bf16.mxu0 %v14227_v29  ;;  %v14243_v8 = vld [vmem:[%s20335_s20 + $0x8f0] ss:$60 sps:$4 sm:$0xff]   ;;  %v14248_v29 = vld [vmem:[%s20335_s20 + $0x964] ss:$60 sps:$4 sm:$0xff]  }
0x104c   :  { %7631 = vperm.xlu1 %13990, %v7627_v60  }
0x104e   :  { %7636 = vperm.xlu0 %13989, %v7628_v61  }
0x10c5   :  { %v7587_v23 = vpop.xlane.xlu0 %7586 }
0x10c6   :  { %v7593_v20 = vmul.f32 0.0025510204, %v7587_v23  ;;  %v14249_v23 = vld [vmem:[%s20335_s20 + $0x968] ss:$60 sps:$4 sm:$0xff]  }
0x10c8   :  { %v7595_v36 = vadd.f32 1e-05, %v7593_v20  ;;  %v7592_v16 = vpop.xlane.xlu1 %7591  ;;  %v14254_v20 = vld [vmem:[%s20335_s20 + $0x9dc] ss:$60 sps:$4 sm:$0xff]  }
0x10c9   :  { %v7594_v44 = vmul.f32 0.0025510204, %v7592_v16  ;;  %v14252_v16 = vld [vmem:[%s20335_s20 + $0x9d8] ss:$60 sps:$4 sm:$0xff]  }
0x10ca   :  { %14888 = vrsqrt.f32 %v7595_v36  ;;  %v14257_v36 = vld [vmem:[%s20335_s20 + $0x9e4] ss:$60 sps:$4 sm:$0xff]  }
0x10cb   :  { %v7596_v0 = vadd.f32 1e-05, %v7594_v44  ;;  %v14255_v44 = vld [vmem:[%s20335_s20 + $0x9e0] ss:$60 sps:$4 sm:$0xff]  }
0x10cc   :  { %v7632_v53 = vpop.permute.xlu1 %7631 }
0x10cd   :  { %14890 = vrsqrt.f32 %v7596_v0  ;;  %v7637_v42 = vpop.permute.xlu0 %7636  ;;  %v14260_v0 = vld [vmem:[%s20335_s20 + $0xa54] ss:$60 sps:$4 sm:$0xff]  }
0x10d4   :  { %v14889_v15 = vpop.eup %14888 }
0x10d5   :  { %v7599_v13 = vmul.f32 %v14889_v15, %v18144_v32  ;;  %v7600_v25 = vmul.f32 %v14889_v15, %v18147_v24  ;;  %v7601_v54 = vmul.f32 %v14889_v15, %v18150_v50  ;;  %v7602_v46 = vmul.f32 %v14889_v15, %v18153_v45  ;;  %v14263_v15 = vld [vmem:[%s20335_s20 + $0xa5c] ss:$60 sps:$4 sm:$0xff]  }
0x10d7   :  { %v14891_v49 = vpop.eup %14890  ;;  %v7619_v9 = vmul.f32 %v7612_v58, %v7599_v13  ;;  %v7620_v52 = vmul.f32 %v7612_v58, %v7600_v25  ;;  %v7621_v27 = vmul.f32 %v7612_v58, %v7601_v54  ;;  %v7622_v32 = vmul.f32 %v7612_v58, %v7602_v46  ;;  %v14251_v58 = vld [vmem:[%s20335_s20 + $0x96c] ss:$60 sps:$4 sm:$0xff]   ;;  %v14261_v25 = vld [vmem:[%s20335_s20 + $0xa58] ss:$60 sps:$4 sm:$0xff]  }
0x10d8   :  { %v7603_v43 = vmul.f32 %v14891_v49, %v18162_v37  ;;  %v7604_v57 = vmul.f32 %v14891_v49, %v18165_v2  ;;  %v7605_v39 = vmul.f32 %v14891_v49, %v18168_v7  ;;  %v7606_v31 = vmul.f32 %v14891_v49, %v18171_v19  ;;  %v14258_v13 = vld [vmem:[%s20335_s20 + $0xa50] ss:$60 sps:$4 sm:$0xff]   ;;  %v14264_v49 = vld [vmem:[%s20335_s20 + $0xac8] ss:$60 sps:$4 sm:$0xff]  }
0x10d9   :  { %v7639_v17 = vadd.f32 %v7632_v53, %v7619_v9  ;;  %v7640_v24 = vadd.f32 %v7632_v53, %v7620_v52  ;;  %v7641_v5 = vadd.f32 %v7632_v53, %v7621_v27  ;;  %v7642_v37 = vadd.f32 %v7632_v53, %v7622_v32  ;;  %v14266_v54 = vld [vmem:[%s20335_s20 + $0xacc] ss:$60 sps:$4 sm:$0xff]   ;;  %v14269_v46 = vld [vmem:[%s20335_s20 + $0xad4] ss:$60 sps:$4 sm:$0xff]   ;;  %v14272_v52 = vld [vmem:[%s20335_s20 + $0xb44] ss:$60 sps:$4 sm:$0xff]  }
0x10da   :  { %v7623_v50 = vmul.f32 %v7617_v10, %v7603_v43  ;;  %v7624_v48 = vmul.f32 %v7617_v10, %v7604_v57  ;;  %v7625_v45 = vmul.f32 %v7617_v10, %v7605_v39  ;;  %v7626_v63 = vmul.f32 %v7617_v10, %v7606_v31  ;;  %v14246_v10 = vld [vmem:[%s20335_s20 + $0x960] ss:$60 sps:$4 sm:$0xff]   ;;  %v14267_v9 = vld [vmem:[%s20335_s20 + $0xad0] ss:$60 sps:$4 sm:$0xff]   ;;  %v14273_v43 = vld [vmem:[%s20335_s20 + $0xb48] ss:$60 sps:$4 sm:$0xff]  }
0x10db   :  { %v7647_v56 = vmax.f32 %v7639_v17, 0.0  ;;  %v7648_v2 = vmax.f32 %v7640_v24, 0.0  ;;  %v7649_v1 = vmax.f32 %v7641_v5, 0.0  ;;  %v7650_v38 = vmax.f32 %v7642_v37, 0.0  ;;  %v14275_v27 = vld [vmem:[%s20335_s20 + $0xb4c] ss:$60 sps:$4 sm:$0xff]  }
0x10dc   :  { %v7643_v60 = vadd.f32 %v7637_v42, %v7623_v50  ;;  %v7644_v61 = vadd.f32 %v7637_v42, %v7624_v48  ;;  %v7645_v12 = vadd.f32 %v7637_v42, %v7625_v45  ;;  %v7646_v28 = vadd.f32 %v7637_v42, %v7626_v63  ;;  %v14270_v53 = vld [vmem:[%s20335_s20 + $0xb40] ss:$60 sps:$4 sm:$0xff]   ;;  %v14276_v31 = vld [vmem:[%s20335_s20 + $0xbb8] ss:$60 sps:$4 sm:$0xff]   ;;  %v14282_v5 = vld [vmem:[%s20335_s20 + $0xc30] ss:$60 sps:$4 sm:$0xff]  }
0x10dd   :  { %v14278_v57 = vld [vmem:[%s20335_s20 + $0xbbc] ss:$60 sps:$4 sm:$0xff]   ;;  %v14281_v39 = vld [vmem:[%s20335_s20 + $0xbc4] ss:$60 sps:$4 sm:$0xff]   ;;  %v14284_v17 = vld [vmem:[%s20335_s20 + $0xc34] ss:$60 sps:$4 sm:$0xff]  }
0x10de   :  { %v7651_v7 = vmax.f32 %v7643_v60, 0.0  ;;  %v7652_v6 = vmax.f32 %v7644_v61, 0.0  ;;  %v7653_v19 = vmax.f32 %v7645_v12, 0.0  ;;  %v7654_v55 = vmax.f32 %v7646_v28, 0.0  ;;  %v14279_v32 = vld [vmem:[%s20335_s20 + $0xbc0] ss:$60 sps:$4 sm:$0xff]  }
0x10df   :  { %v14287_v24 = vld [vmem:[%s20335_s20 + $0xc3c] ss:$60 sps:$4 sm:$0xff]   ;;  %v14290_v48 = vld [vmem:[%s20335_s20 + $0xcac] ss:$60 sps:$4 sm:$0xff]   ;;  %v14293_v45 = vld [vmem:[%s20335_s20 + $0xcb4] ss:$60 sps:$4 sm:$0xff]  }
0x10e0   :  { %v18283_v4 = vpack.c.bf16 %v7651_v7, %v7647_v56  ;;  %v18285_v47 = vpack.c.bf16 %v7652_v6, %v7648_v2  ;;  %v18287_v30 = vpack.c.bf16 %v7653_v19, %v7649_v1  ;;  %v18303_v35 = vpack.c.bf16 %v7654_v55, %v7650_v38  ;;  %v14285_v50 = vld [vmem:[%s20335_s20 + $0xc38] ss:$60 sps:$4 sm:$0xff]   ;;  %v14288_v63 = vld [vmem:[%s20335_s20 + $0xca8] ss:$60 sps:$4 sm:$0xff]   ;;  %v14291_v42 = vld [vmem:[%s20335_s20 + $0xcb0] ss:$60 sps:$4 sm:$0xff]  }
0x10e1   :  { %v14296_v60 = vld [vmem:[%s20335_s20 + $0xd24] ss:$60 sps:$4 sm:$0xff]   ;;  %v14299_v61 = vld [vmem:[%s20335_s20 + $0xd2c] ss:$60 sps:$4 sm:$0xff]   ;;  %v14302_v37 = vld [vmem:[%s20335_s20 + $0xd9c] ss:$60 sps:$4 sm:$0xff]  }
0x10e2   :  { %10635 = vmatprep.mubr.bf16.mxu1 %v18285_v47  ;;  %10721 = vmatprep.mubr.bf16.mxu0 %v18285_v47  ;;  %v14294_v12 = vld [vmem:[%s20335_s20 + $0xd20] ss:$60 sps:$4 sm:$0xff]   ;;  %v14297_v28 = vld [vmem:[%s20335_s20 + $0xd28] ss:$60 sps:$4 sm:$0xff]   ;;  %v14300_v2 = vld [vmem:[%s20335_s20 + $0xd98] ss:$60 sps:$4 sm:$0xff]  }
0x10e3   :  { %10636 = vmatmul.mubr.bf16.vlgmr.msra.gmra.mrb[104].mxu1 %v18283_v4  ;;  %10722 = vmatmul.mubr.bf16.vlgmr.msra.gmra.mrb[16].mxu0 %v18283_v4  ;;  %v14305_v56 = vld [vmem:[%s20335_s20 + $0xda4] ss:$60 sps:$4 sm:$0xff]   ;;  %v14308_v7 = vld [vmem:[%s20335_s20 + $0xe14] ss:$60 sps:$4 sm:$0xff]   ;;  %v14311_v6 = vld [vmem:[%s20335_s20 + $0xe1c] ss:$60 sps:$4 sm:$0xff]  }
0x10e4   :  { %10647 = vmatpush1.bf16.msra.mxu1 %v14222_v22  ;;  %10733 = vmatpush1.bf16.msra.mxu0 %v14225_v18  ;;  %v14303_v1 = vld [vmem:[%s20335_s20 + $0xda0] ss:$60 sps:$4 sm:$0xff]   ;;  %v14306_v19 = vld [vmem:[%s20335_s20 + $0xe10] ss:$60 sps:$4 sm:$0xff]   ;;  %v14309_v55 = vld [vmem:[%s20335_s20 + $0xe18] ss:$60 sps:$4 sm:$0xff]  }
0x10e5   :  { %10678 = vmatprep.mubr.bf16.mxu1 %v18303_v35  ;;  %10764 = vmatprep.mubr.bf16.mxu0 %v18303_v35  ;;  %v14314_v22 = vld [vmem:[%s20335_s20 + $0xe8c] ss:$60 sps:$4 sm:$0xff]   ;;  %v14317_v18 = vld [vmem:[%s20335_s20 + $0xe94] ss:$60 sps:$4 sm:$0xff]  }
0x10e6   :  { %10648 = vmatprep.subr.bf16.mxu1 %v14230_v51  ;;  %10734 = vmatprep.subr.bf16.mxu0 %v14233_v33  ;;  %v14312_v38 = vld [vmem:[%s20335_s20 + $0xe88] ss:$60 sps:$4 sm:$0xff]   ;;  %v14315_v51 = vld [vmem:[%s20335_s20 + $0xe90] ss:$60 sps:$4 sm:$0xff]  }
0x10e7   :  { %v14320_v33 = vld [vmem:[%s20335_s20 + $0x14] ss:$60 sps:$4 sm:$0xff]  }
0x10e8   :  { %10649 = vmatpush1.bf16.msra.mxu1 %v14228_v14  ;;  %10735 = vmatpush1.bf16.msra.mxu0 %v14231_v40  ;;  %v14323_v14 = vld [vmem:[%s20335_s20 + $0x1c] ss:$60 sps:$4 sm:$0xff]   ;;  %v14318_v40 = vld [vmem:[%s20335_s20 + $0x10] ss:$60 sps:$4 sm:$0xff]  }
0x10e9   :  { %10650 = vmatprep.subr.bf16.mxu1 %v14236_v11  ;;  %10736 = vmatprep.subr.bf16.mxu0 %v14239_v21  ;;  %v14321_v11 = vld [vmem:[%s20335_s20 + $0x18] ss:$60 sps:$4 sm:$0xff]   ;;  %v14326_v21 = vld [vmem:[%s20335_s20 + $0x8c] ss:$60 sps:$4 sm:$0xff]  }
0x10ec   :  { %10651 = vmatpush1.bf16.msra.mxu1 %v14234_v34  ;;  %10737 = vmatpush1.bf16.msra.mxu0 %v14237_v26  ;;  %v14329_v34 = vld [vmem:[%s20335_s20 + $0x94] ss:$60 sps:$4 sm:$0xff]   ;;  %v14324_v26 = vld [vmem:[%s20335_s20 + $0x88] ss:$60 sps:$4 sm:$0xff]  }
0x10ed   :  { %10652 = vmatprep.subr.bf16.mxu1 %v14242_v62  ;;  %10738 = vmatprep.subr.bf16.mxu0 %v14245_v41  ;;  %v14327_v62 = vld [vmem:[%s20335_s20 + $0x90] ss:$60 sps:$4 sm:$0xff]   ;;  %v14332_v41 = vld [vmem:[%s20335_s20 + $0x104] ss:$60 sps:$4 sm:$0xff]  }
0x10f0   :  { %10653 = vmatpush1.bf16.msra.mxu1 %v14240_v59  ;;  %10739 = vmatpush1.bf16.msra.mxu0 %v14243_v8  ;;  %v14335_v59 = vld [vmem:[%s20335_s20 + $0x10c] ss:$60 sps:$4 sm:$0xff]   ;;  %v14330_v8 = vld [vmem:[%s20335_s20 + $0x100] ss:$60 sps:$4 sm:$0xff]  }
0x10f1   :  { %10654 = vmatprep.subr.bf16.mxu1 %v14248_v29  ;;  %10740 = vmatprep.subr.bf16.mxu0 %v14251_v58  ;;  %v14333_v29 = vld [vmem:[%s20335_s20 + $0x108] ss:$60 sps:$4 sm:$0xff]   ;;  %v14338_v58 = vld [vmem:[%s20335_s20 + $0x17c] ss:$60 sps:$4 sm:$0xff]  }
0x10f4   :  { %10655 = vmatpush1.bf16.msra.mxu1 %v14246_v10  ;;  %10741 = vmatpush1.bf16.msra.mxu0 %v14249_v23  ;;  %v14341_v10 = vld [vmem:[%s20335_s20 + $0x184] ss:$60 sps:$4 sm:$0xff]   ;;  %v14336_v23 = vld [vmem:[%s20335_s20 + $0x178] ss:$60 sps:$4 sm:$0xff]  }
0x10f5   :  { %10656 = vmatprep.subr.bf16.mxu1 %v14254_v20  ;;  %10742 = vmatprep.subr.bf16.mxu0 %v14257_v36  ;;  %v14339_v20 = vld [vmem:[%s20335_s20 + $0x180] ss:$60 sps:$4 sm:$0xff]   ;;  %v14344_v36 = vld [vmem:[%s20335_s20 + $0x1f4] ss:$60 sps:$4 sm:$0xff]  }
0x10f8   :  { %10657 = vmatpush1.bf16.msra.mxu1 %v14252_v16  ;;  %10743 = vmatpush1.bf16.msra.mxu0 %v14255_v44  ;;  %v14347_v16 = vld [vmem:[%s20335_s20 + $0x1fc] ss:$60 sps:$4 sm:$0xff]   ;;  %v14342_v44 = vld [vmem:[%s20335_s20 + $0x1f0] ss:$60 sps:$4 sm:$0xff]  }
0x10f9   :  { %10658 = vmatprep.subr.bf16.mxu1 %v14260_v0  ;;  %10744 = vmatprep.subr.bf16.mxu0 %v14263_v15  ;;  %v14345_v0 = vld [vmem:[%s20335_s20 + $0x1f8] ss:$60 sps:$4 sm:$0xff]   ;;  %v14350_v15 = vld [vmem:[%s20335_s20 + $0x26c] ss:$60 sps:$4 sm:$0xff]  }
0x10fc   :  { %10659 = vmatpush1.bf16.msra.mxu1 %v14258_v13  ;;  %10745 = vmatpush1.bf16.msra.mxu0 %v14261_v25  ;;  %v14353_v13 = vld [vmem:[%s20335_s20 + $0x274] ss:$60 sps:$4 sm:$0xff]   ;;  %v14348_v25 = vld [vmem:[%s20335_s20 + $0x268] ss:$60 sps:$4 sm:$0xff]  }
0x10fd   :  { %10660 = vmatprep.subr.bf16.mxu1 %v14266_v54  ;;  %10746 = vmatprep.subr.bf16.mxu0 %v14269_v46  ;;  %v14351_v54 = vld [vmem:[%s20335_s20 + $0x270] ss:$60 sps:$4 sm:$0xff]   ;;  %v14356_v46 = vld [vmem:[%s20335_s20 + $0x2e4] ss:$60 sps:$4 sm:$0xff]  }
0x1100   :  { %10661 = vmatpush1.bf16.msra.mxu1 %v14264_v49  ;;  %10747 = vmatpush1.bf16.msra.mxu0 %v14267_v9  ;;  %v14359_v49 = vld [vmem:[%s20335_s20 + $0x2ec] ss:$60 sps:$4 sm:$0xff]   ;;  %v14354_v9 = vld [vmem:[%s20335_s20 + $0x2e0] ss:$60 sps:$4 sm:$0xff]  }
0x1101   :  { %10662 = vmatprep.subr.bf16.mxu1 %v14272_v52  ;;  %10748 = vmatprep.subr.bf16.mxu0 %v14275_v27  ;;  %v14357_v52 = vld [vmem:[%s20335_s20 + $0x2e8] ss:$60 sps:$4 sm:$0xff]   ;;  %v14362_v27 = vld [vmem:[%s20335_s20 + $0x35c] ss:$60 sps:$4 sm:$0xff]  }
0x1104   :  { %10663 = vmatpush1.bf16.msra.mxu1 %v14270_v53  ;;  %10749 = vmatpush1.bf16.msra.mxu0 %v14273_v43  ;;  %v14365_v53 = vld [vmem:[%s20335_s20 + $0x364] ss:$60 sps:$4 sm:$0xff]   ;;  %v14360_v43 = vld [vmem:[%s20335_s20 + $0x358] ss:$60 sps:$4 sm:$0xff]  }
0x1105   :  { %10664 = vmatprep.subr.bf16.mxu1 %v14278_v57  ;;  %10750 = vmatprep.subr.bf16.mxu0 %v14281_v39  ;;  %v14363_v57 = vld [vmem:[%s20335_s20 + $0x360] ss:$60 sps:$4 sm:$0xff]   ;;  %v14368_v39 = vld [vmem:[%s20335_s20 + $0x3d4] ss:$60 sps:$4 sm:$0xff]  }
0x1108   :  { %10665 = vmatpush1.bf16.msra.mxu1 %v14276_v31  ;;  %10751 = vmatpush1.bf16.msra.mxu0 %v14279_v32  ;;  %v14371_v31 = vld [vmem:[%s20335_s20 + $0x3dc] ss:$60 sps:$4 sm:$0xff]   ;;  %v14366_v32 = vld [vmem:[%s20335_s20 + $0x3d0] ss:$60 sps:$4 sm:$0xff]  }
0x1109   :  { %10666 = vmatprep.subr.bf16.mxu1 %v14284_v17  ;;  %10752 = vmatprep.subr.bf16.mxu0 %v14287_v24  ;;  %v14369_v17 = vld [vmem:[%s20335_s20 + $0x3d8] ss:$60 sps:$4 sm:$0xff]   ;;  %v14374_v24 = vld [vmem:[%s20335_s20 + $0x44c] ss:$60 sps:$4 sm:$0xff]  }
0x110c   :  { %10667 = vmatpush1.bf16.msra.mxu1 %v14282_v5  ;;  %10753 = vmatpush1.bf16.msra.mxu0 %v14285_v50  ;;  %v14377_v5 = vld [vmem:[%s20335_s20 + $0x454] ss:$60 sps:$4 sm:$0xff]   ;;  %v14372_v50 = vld [vmem:[%s20335_s20 + $0x448] ss:$60 sps:$4 sm:$0xff]  }
0x110d   :  { %10668 = vmatprep.subr.bf16.mxu1 %v14290_v48  ;;  %10754 = vmatprep.subr.bf16.mxu0 %v14293_v45  ;;  %v14375_v48 = vld [vmem:[%s20335_s20 + $0x450] ss:$60 sps:$4 sm:$0xff]   ;;  %v14380_v45 = vld [vmem:[%s20335_s20 + $0x4c4] ss:$60 sps:$4 sm:$0xff]  }
0x1110   :  { %10669 = vmatpush1.bf16.msra.mxu1 %v14288_v63  ;;  %10755 = vmatpush1.bf16.msra.mxu0 %v14291_v42  ;;  %v14383_v63 = vld [vmem:[%s20335_s20 + $0x4cc] ss:$60 sps:$4 sm:$0xff]   ;;  %v14378_v42 = vld [vmem:[%s20335_s20 + $0x4c0] ss:$60 sps:$4 sm:$0xff]  }
0x1111   :  { %10670 = vmatprep.subr.bf16.mxu1 %v14296_v60  ;;  %10756 = vmatprep.subr.bf16.mxu0 %v14299_v61  ;;  %v14381_v60 = vld [vmem:[%s20335_s20 + $0x4c8] ss:$60 sps:$4 sm:$0xff]   ;;  %v14386_v61 = vld [vmem:[%s20335_s20 + $0x53c] ss:$60 sps:$4 sm:$0xff]  }
0x1114   :  { %10671 = vmatpush1.bf16.msra.mxu1 %v14294_v12  ;;  %10757 = vmatpush1.bf16.msra.mxu0 %v14297_v28  ;;  %v14389_v12 = vld [vmem:[%s20335_s20 + $0x544] ss:$60 sps:$4 sm:$0xff]   ;;  %v14384_v28 = vld [vmem:[%s20335_s20 + $0x538] ss:$60 sps:$4 sm:$0xff]  }
0x1115   :  { %10672 = vmatprep.subr.bf16.mxu1 %v14302_v37  ;;  %10758 = vmatprep.subr.bf16.mxu0 %v14305_v56  ;;  %v14387_v37 = vld [vmem:[%s20335_s20 + $0x540] ss:$60 sps:$4 sm:$0xff]   ;;  %v14392_v56 = vld [vmem:[%s20335_s20 + $0x5b4] ss:$60 sps:$4 sm:$0xff]  }
0x1118   :  { %10673 = vmatpush1.bf16.msra.mxu1 %v14300_v2  ;;  %10759 = vmatpush1.bf16.msra.mxu0 %v14303_v1  ;;  %v14395_v2 = vld [vmem:[%s20335_s20 + $0x5bc] ss:$60 sps:$4 sm:$0xff]   ;;  %v14390_v1 = vld [vmem:[%s20335_s20 + $0x5b0] ss:$60 sps:$4 sm:$0xff]  }
0x1119   :  { %10674 = vmatprep.subr.bf16.mxu1 %v14308_v7  ;;  %10760 = vmatprep.subr.bf16.mxu0 %v14311_v6  ;;  %v14393_v7 = vld [vmem:[%s20335_s20 + $0x5b8] ss:$60 sps:$4 sm:$0xff]   ;;  %v14398_v6 = vld [vmem:[%s20335_s20 + $0x62c] ss:$60 sps:$4 sm:$0xff]  }
0x111c   :  { %10675 = vmatpush1.bf16.msra.mxu1 %v14306_v19  ;;  %10761 = vmatpush1.bf16.msra.mxu0 %v14309_v55  ;;  %v14401_v19 = vld [vmem:[%s20335_s20 + $0x634] ss:$60 sps:$4 sm:$0xff]   ;;  %v14396_v55 = vld [vmem:[%s20335_s20 + $0x628] ss:$60 sps:$4 sm:$0xff]  }
0x111d   :  { %10676 = vmatprep.subr.bf16.mxu1 %v14314_v22  ;;  %10762 = vmatprep.subr.bf16.mxu0 %v14317_v18  ;;  %v14399_v22 = vld [vmem:[%s20335_s20 + $0x630] ss:$60 sps:$4 sm:$0xff]   ;;  %v14404_v18 = vld [vmem:[%s20335_s20 + $0x6a4] ss:$60 sps:$4 sm:$0xff]  }
0x1120   :  { %10677 = vmatpush1.bf16.msra.mxu1 %v14312_v38  ;;  %10763 = vmatpush1.bf16.msra.mxu0 %v14315_v51  ;;  %v14407_v38 = vld [vmem:[%s20335_s20 + $0x6ac] ss:$60 sps:$4 sm:$0xff]   ;;  %v14402_v51 = vld [vmem:[%s20335_s20 + $0x6a0] ss:$60 sps:$4 sm:$0xff]  }
0x1121   :  { %10775 = vmatprep.subr.bf16.mxu1 %v14320_v33  ;;  %10861 = vmatprep.subr.bf16.mxu0 %v14323_v14  ;;  %v14405_v33 = vld [vmem:[%s20335_s20 + $0x6a8] ss:$60 sps:$4 sm:$0xff]   ;;  %v14410_v14 = vld [vmem:[%s20335_s20 + $0x71c] ss:$60 sps:$4 sm:$0xff]  }
0x1123   :  { %10679 = vmatmul.mubr.bf16.vlgmr.msra.gmra.mrb[104].mxu1 %v18287_v30  ;;  %10765 = vmatmul.mubr.bf16.vlgmr.msra.gmra.mrb[16].mxu0 %v18287_v30 }
0x1124   :  { %10776 = vmatpush1.bf16.msra.mxu1 %v14318_v40  ;;  %10807 = vmatprep.mubr.bf16.mxu1 %v18285_v47  ;;  %v14413_v40 = vld [vmem:[%s20335_s20 + $0x724] ss:$60 sps:$4 sm:$0xff]  }
0x1125   :  { %10862 = vmatpush1.bf16.msra.mxu0 %v14321_v11  ;;  %10893 = vmatprep.mubr.bf16.mxu0 %v18285_v47  ;;  %v14408_v11 = vld [vmem:[%s20335_s20 + $0x718] ss:$60 sps:$4 sm:$0xff]  }
0x1126   :  { %10777 = vmatprep.subr.bf16.mxu1 %v14326_v21  ;;  %10863 = vmatprep.subr.bf16.mxu0 %v14329_v34  ;;  %v14411_v21 = vld [vmem:[%s20335_s20 + $0x720] ss:$60 sps:$4 sm:$0xff]   ;;  %v14416_v34 = vld [vmem:[%s20335_s20 + $0x794] ss:$60 sps:$4 sm:$0xff]  }
0x1128   :  { %10778 = vmatpush1.bf16.msra.mxu1 %v14324_v26  ;;  %v14419_v26 = vld [vmem:[%s20335_s20 + $0x79c] ss:$60 sps:$4 sm:$0xff]  }
0x1129   :  { %10864 = vmatpush1.bf16.msra.mxu0 %v14327_v62  ;;  %10779 = vmatprep.subr.bf16.mxu1 %v14332_v41  ;;  %v14414_v62 = vld [vmem:[%s20335_s20 + $0x790] ss:$60 sps:$4 sm:$0xff]   ;;  %v14417_v41 = vld [vmem:[%s20335_s20 + $0x798] ss:$60 sps:$4 sm:$0xff]  }
0x112a   :  { %10865 = vmatprep.subr.bf16.mxu0 %v14335_v59  ;;  %v14422_v59 = vld [vmem:[%s20335_s20 + $0x80c] ss:$60 sps:$4 sm:$0xff]  }
0x112c   :  { %10780 = vmatpush1.bf16.msra.mxu1 %v14330_v8  ;;  %v14425_v8 = vld [vmem:[%s20335_s20 + $0x814] ss:$60 sps:$4 sm:$0xff]  }
0x112d   :  { %10866 = vmatpush1.bf16.msra.mxu0 %v14333_v29  ;;  %10781 = vmatprep.subr.bf16.mxu1 %v14338_v58  ;;  %v14420_v29 = vld [vmem:[%s20335_s20 + $0x808] ss:$60 sps:$4 sm:$0xff]   ;;  %v14423_v58 = vld [vmem:[%s20335_s20 + $0x810] ss:$60 sps:$4 sm:$0xff]  }
0x112e   :  { %10867 = vmatprep.subr.bf16.mxu0 %v14341_v10  ;;  %v14428_v10 = vld [vmem:[%s20335_s20 + $0x884] ss:$60 sps:$4 sm:$0xff]  }
0x1130   :  { %10782 = vmatpush1.bf16.msra.mxu1 %v14336_v23  ;;  %v14431_v23 = vld [vmem:[%s20335_s20 + $0x88c] ss:$60 sps:$4 sm:$0xff]  }
0x1131   :  { %10868 = vmatpush1.bf16.msra.mxu0 %v14339_v20  ;;  %10783 = vmatprep.subr.bf16.mxu1 %v14344_v36  ;;  %v14426_v20 = vld [vmem:[%s20335_s20 + $0x880] ss:$60 sps:$4 sm:$0xff]   ;;  %v14429_v36 = vld [vmem:[%s20335_s20 + $0x888] ss:$60 sps:$4 sm:$0xff]  }
0x1132   :  { %10869 = vmatprep.subr.bf16.mxu0 %v14347_v16  ;;  %v14434_v16 = vld [vmem:[%s20335_s20 + $0x8fc] ss:$60 sps:$4 sm:$0xff]  }
0x1134   :  { %10784 = vmatpush1.bf16.msra.mxu1 %v14342_v44  ;;  %v14437_v44 = vld [vmem:[%s20335_s20 + $0x904] ss:$60 sps:$4 sm:$0xff]  }
0x1135   :  { %10870 = vmatpush1.bf16.msra.mxu0 %v14345_v0  ;;  %10785 = vmatprep.subr.bf16.mxu1 %v14350_v15  ;;  %v14432_v0 = vld [vmem:[%s20335_s20 + $0x8f8] ss:$60 sps:$4 sm:$0xff]   ;;  %v14435_v15 = vld [vmem:[%s20335_s20 + $0x900] ss:$60 sps:$4 sm:$0xff]  }
0x1136   :  { %10871 = vmatprep.subr.bf16.mxu0 %v14353_v13  ;;  %v14440_v13 = vld [vmem:[%s20335_s20 + $0x974] ss:$60 sps:$4 sm:$0xff]  }
0x1138   :  { %10786 = vmatpush1.bf16.msra.mxu1 %v14348_v25  ;;  %v14443_v25 = vld [vmem:[%s20335_s20 + $0x97c] ss:$60 sps:$4 sm:$0xff]  }
0x1139   :  { %10872 = vmatpush1.bf16.msra.mxu0 %v14351_v54  ;;  %10787 = vmatprep.subr.bf16.mxu1 %v14356_v46  ;;  %v14438_v54 = vld [vmem:[%s20335_s20 + $0x970] ss:$60 sps:$4 sm:$0xff]   ;;  %v14441_v46 = vld [vmem:[%s20335_s20 + $0x978] ss:$60 sps:$4 sm:$0xff]  }
0x113a   :  { %10873 = vmatprep.subr.bf16.mxu0 %v14359_v49  ;;  %v14446_v49 = vld [vmem:[%s20335_s20 + $0x9ec] ss:$60 sps:$4 sm:$0xff]  }
0x113c   :  { %10788 = vmatpush1.bf16.msra.mxu1 %v14354_v9  ;;  %v14449_v9 = vld [vmem:[%s20335_s20 + $0x9f4] ss:$60 sps:$4 sm:$0xff]  }
0x113d   :  { %10874 = vmatpush1.bf16.msra.mxu0 %v14357_v52  ;;  %10789 = vmatprep.subr.bf16.mxu1 %v14362_v27  ;;  %v14444_v52 = vld [vmem:[%s20335_s20 + $0x9e8] ss:$60 sps:$4 sm:$0xff]   ;;  %v14447_v27 = vld [vmem:[%s20335_s20 + $0x9f0] ss:$60 sps:$4 sm:$0xff]  }
0x113e   :  { %10875 = vmatprep.subr.bf16.mxu0 %v14365_v53  ;;  %v14452_v53 = vld [vmem:[%s20335_s20 + $0xa64] ss:$60 sps:$4 sm:$0xff]  }
0x1140   :  { %10790 = vmatpush1.bf16.msra.mxu1 %v14360_v43  ;;  %v14455_v43 = vld [vmem:[%s20335_s20 + $0xa6c] ss:$60 sps:$4 sm:$0xff]  }
0x1141   :  { %10876 = vmatpush1.bf16.msra.mxu0 %v14363_v57  ;;  %10791 = vmatprep.subr.bf16.mxu1 %v14368_v39  ;;  %v14450_v57 = vld [vmem:[%s20335_s20 + $0xa60] ss:$60 sps:$4 sm:$0xff]   ;;  %v14453_v39 = vld [vmem:[%s20335_s20 + $0xa68] ss:$60 sps:$4 sm:$0xff]  }
0x1142   :  { %10877 = vmatprep.subr.bf16.mxu0 %v14371_v31  ;;  %v14458_v31 = vld [vmem:[%s20335_s20 + $0xadc] ss:$60 sps:$4 sm:$0xff]  }
0x1144   :  { %10792 = vmatpush1.bf16.msra.mxu1 %v14366_v32  ;;  %v14461_v32 = vld [vmem:[%s20335_s20 + $0xae4] ss:$60 sps:$4 sm:$0xff]  }
0x1145   :  { %10878 = vmatpush1.bf16.msra.mxu0 %v14369_v17  ;;  %10793 = vmatprep.subr.bf16.mxu1 %v14374_v24  ;;  %v14456_v17 = vld [vmem:[%s20335_s20 + $0xad8] ss:$60 sps:$4 sm:$0xff]   ;;  %v14459_v24 = vld [vmem:[%s20335_s20 + $0xae0] ss:$60 sps:$4 sm:$0xff]  }
0x1146   :  { %10879 = vmatprep.subr.bf16.mxu0 %v14377_v5  ;;  %v14464_v5 = vld [vmem:[%s20335_s20 + $0xb54] ss:$60 sps:$4 sm:$0xff]  }
0x1148   :  { %10794 = vmatpush1.bf16.msra.mxu1 %v14372_v50  ;;  %v14467_v50 = vld [vmem:[%s20335_s20 + $0xb5c] ss:$60 sps:$4 sm:$0xff]  }
0x1149   :  { %10880 = vmatpush1.bf16.msra.mxu0 %v14375_v48  ;;  %10795 = vmatprep.subr.bf16.mxu1 %v14380_v45  ;;  %v14462_v48 = vld [vmem:[%s20335_s20 + $0xb50] ss:$60 sps:$4 sm:$0xff]   ;;  %v14465_v45 = vld [vmem:[%s20335_s20 + $0xb58] ss:$60 sps:$4 sm:$0xff]  }
0x114a   :  { %10881 = vmatprep.subr.bf16.mxu0 %v14383_v63  ;;  %v14470_v63 = vld [vmem:[%s20335_s20 + $0xbcc] ss:$60 sps:$4 sm:$0xff]  }
0x114c   :  { %10796 = vmatpush1.bf16.msra.mxu1 %v14378_v42  ;;  %v14473_v42 = vld [vmem:[%s20335_s20 + $0xbd4] ss:$60 sps:$4 sm:$0xff]  }
0x114d   :  { %10882 = vmatpush1.bf16.msra.mxu0 %v14381_v60  ;;  %10797 = vmatprep.subr.bf16.mxu1 %v14386_v61  ;;  %v14468_v60 = vld [vmem:[%s20335_s20 + $0xbc8] ss:$60 sps:$4 sm:$0xff]   ;;  %v14471_v61 = vld [vmem:[%s20335_s20 + $0xbd0] ss:$60 sps:$4 sm:$0xff]  }
0x114e   :  { %10883 = vmatprep.subr.bf16.mxu0 %v14389_v12  ;;  %v14476_v12 = vld [vmem:[%s20335_s20 + $0xc44] ss:$60 sps:$4 sm:$0xff]  }
0x1150   :  { %10798 = vmatpush1.bf16.msra.mxu1 %v14384_v28  ;;  %v14479_v28 = vld [vmem:[%s20335_s20 + $0xc4c] ss:$60 sps:$4 sm:$0xff]  }
0x1151   :  { %10884 = vmatpush1.bf16.msra.mxu0 %v14387_v37  ;;  %10799 = vmatprep.subr.bf16.mxu1 %v14392_v56  ;;  %v14474_v37 = vld [vmem:[%s20335_s20 + $0xc40] ss:$60 sps:$4 sm:$0xff]   ;;  %v14477_v56 = vld [vmem:[%s20335_s20 + $0xc48] ss:$60 sps:$4 sm:$0xff]  }
0x1152   :  { %10885 = vmatprep.subr.bf16.mxu0 %v14395_v2  ;;  %v14482_v2 = vld [vmem:[%s20335_s20 + $0xcbc] ss:$60 sps:$4 sm:$0xff]  }
0x1154   :  { %10800 = vmatpush1.bf16.msra.mxu1 %v14390_v1  ;;  %v14485_v1 = vld [vmem:[%s20335_s20 + $0xcc4] ss:$60 sps:$4 sm:$0xff]  }
0x1155   :  { %10886 = vmatpush1.bf16.msra.mxu0 %v14393_v7  ;;  %10801 = vmatprep.subr.bf16.mxu1 %v14398_v6  ;;  %v14480_v7 = vld [vmem:[%s20335_s20 + $0xcb8] ss:$60 sps:$4 sm:$0xff]   ;;  %v14483_v6 = vld [vmem:[%s20335_s20 + $0xcc0] ss:$60 sps:$4 sm:$0xff]  }
0x1156   :  { %10887 = vmatprep.subr.bf16.mxu0 %v14401_v19  ;;  %v14488_v19 = vld [vmem:[%s20335_s20 + $0xd34] ss:$60 sps:$4 sm:$0xff]  }
0x1158   :  { %10802 = vmatpush1.bf16.msra.mxu1 %v14396_v55  ;;  %v14491_v55 = vld [vmem:[%s20335_s20 + $0xd3c] ss:$60 sps:$4 sm:$0xff]  }
0x1159   :  { %10888 = vmatpush1.bf16.msra.mxu0 %v14399_v22  ;;  %10803 = vmatprep.subr.bf16.mxu1 %v14404_v18  ;;  %v14486_v22 = vld [vmem:[%s20335_s20 + $0xd30] ss:$60 sps:$4 sm:$0xff]   ;;  %v14489_v18 = vld [vmem:[%s20335_s20 + $0xd38] ss:$60 sps:$4 sm:$0xff]  }
0x115a   :  { %10889 = vmatprep.subr.bf16.mxu0 %v14407_v38  ;;  %v14494_v38 = vld [vmem:[%s20335_s20 + $0xdac] ss:$60 sps:$4 sm:$0xff]  }
0x115c   :  { %10804 = vmatpush1.bf16.msra.mxu1 %v14402_v51  ;;  %v14497_v51 = vld [vmem:[%s20335_s20 + $0xdb4] ss:$60 sps:$4 sm:$0xff]  }
0x115d   :  { %10890 = vmatpush1.bf16.msra.mxu0 %v14405_v33  ;;  %10805 = vmatprep.subr.bf16.mxu1 %v14410_v14  ;;  %v14492_v33 = vld [vmem:[%s20335_s20 + $0xda8] ss:$60 sps:$4 sm:$0xff]   ;;  %v14495_v14 = vld [vmem:[%s20335_s20 + $0xdb0] ss:$60 sps:$4 sm:$0xff]  }
0x115e   :  { %10891 = vmatprep.subr.bf16.mxu0 %v14413_v40  ;;  %v14500_v40 = vld [vmem:[%s20335_s20 + $0xe24] ss:$60 sps:$4 sm:$0xff]  }
0x1160   :  { %10806 = vmatpush1.bf16.msra.mxu1 %v14408_v11  ;;  %v14503_v11 = vld [vmem:[%s20335_s20 + $0xe2c] ss:$60 sps:$4 sm:$0xff]  }
0x1161   :  { %10892 = vmatpush1.bf16.msra.mxu0 %v14411_v21  ;;  %10818 = vmatprep.subr.bf16.mxu1 %v14416_v34  ;;  %v14498_v21 = vld [vmem:[%s20335_s20 + $0xe20] ss:$60 sps:$4 sm:$0xff]   ;;  %v14501_v34 = vld [vmem:[%s20335_s20 + $0xe28] ss:$60 sps:$4 sm:$0xff]  }
0x1162   :  { %10904 = vmatprep.subr.bf16.mxu0 %v14419_v26  ;;  %v14506_v26 = vld [vmem:[%s20335_s20 + $0xe9c] ss:$60 sps:$4 sm:$0xff]  }
0x1163   :  { %10808 = vmatmul.mubr.bf16.vlgmr.msra.gmra.mrb[108].mxu1 %v18283_v4 }
0x1164   :  { %10894 = vmatmul.mubr.bf16.vlgmr.msra.gmra.mrb[20].mxu0 %v18283_v4  ;;  %10819 = vmatpush1.bf16.msra.mxu1 %v14414_v62  ;;  %v14509_v62 = vld [vmem:[%s20335_s20 + $0xea4] ss:$60 sps:$4 sm:$0xff]  }
0x1165   :  { %10850 = vmatprep.mubr.bf16.mxu1 %v18303_v35  ;;  %10905 = vmatpush1.bf16.msra.mxu0 %v14417_v41  ;;  %v14504_v41 = vld [vmem:[%s20335_s20 + $0xe98] ss:$60 sps:$4 sm:$0xff]  }
0x1166   :  { %10936 = vmatprep.mubr.bf16.mxu0 %v18303_v35  ;;  %10820 = vmatprep.subr.bf16.mxu1 %v14422_v59  ;;  %v14507_v59 = vld [vmem:[%s20335_s20 + $0xea0] ss:$60 sps:$4 sm:$0xff]  }
0x1167   :  { %10906 = vmatprep.subr.bf16.mxu0 %v14425_v8  ;;  %v14512_v8 = vld [vmem:[%s20335_s20 + $0x24] ss:$60 sps:$4 sm:$0xff]  }
0x1168   :  { %10821 = vmatpush1.bf16.msra.mxu1 %v14420_v29  ;;  %v14515_v29 = vld [vmem:[%s20335_s20 + $0x2c] ss:$60 sps:$4 sm:$0xff]  }
0x1169   :  { %10907 = vmatpush1.bf16.msra.mxu0 %v14423_v58  ;;  %10822 = vmatprep.subr.bf16.mxu1 %v14428_v10  ;;  %v14510_v58 = vld [vmem:[%s20335_s20 + $0x20] ss:$60 sps:$4 sm:$0xff]   ;;  %v14513_v10 = vld [vmem:[%s20335_s20 + $0x28] ss:$60 sps:$4 sm:$0xff]  }
0x116a   :  { %10908 = vmatprep.subr.bf16.mxu0 %v14431_v23  ;;  %v14518_v23 = vld [vmem:[%s20335_s20 + $0x9c] ss:$60 sps:$4 sm:$0xff]  }
0x116c   :  { %10823 = vmatpush1.bf16.msra.mxu1 %v14426_v20  ;;  %v14521_v20 = vld [vmem:[%s20335_s20 + $0xa4] ss:$60 sps:$4 sm:$0xff]  }
0x116d   :  { %10909 = vmatpush1.bf16.msra.mxu0 %v14429_v36  ;;  %10824 = vmatprep.subr.bf16.mxu1 %v14434_v16  ;;  %v14516_v36 = vld [vmem:[%s20335_s20 + $0x98] ss:$60 sps:$4 sm:$0xff]   ;;  %v14519_v16 = vld [vmem:[%s20335_s20 + $0xa0] ss:$60 sps:$4 sm:$0xff]  }
0x116e   :  { %10910 = vmatprep.subr.bf16.mxu0 %v14437_v44  ;;  %v14524_v44 = vld [vmem:[%s20335_s20 + $0x114] ss:$60 sps:$4 sm:$0xff]  }
0x1170   :  { %10825 = vmatpush1.bf16.msra.mxu1 %v14432_v0  ;;  %v14527_v0 = vld [vmem:[%s20335_s20 + $0x11c] ss:$60 sps:$4 sm:$0xff]  }
0x1171   :  { %10911 = vmatpush1.bf16.msra.mxu0 %v14435_v15  ;;  %10826 = vmatprep.subr.bf16.mxu1 %v14440_v13  ;;  %v14522_v15 = vld [vmem:[%s20335_s20 + $0x110] ss:$60 sps:$4 sm:$0xff]   ;;  %v14525_v13 = vld [vmem:[%s20335_s20 + $0x118] ss:$60 sps:$4 sm:$0xff]  }
0x1172   :  { %10912 = vmatprep.subr.bf16.mxu0 %v14443_v25  ;;  %v14530_v25 = vld [vmem:[%s20335_s20 + $0x18c] ss:$60 sps:$4 sm:$0xff]  }
0x1174   :  { %10827 = vmatpush1.bf16.msra.mxu1 %v14438_v54  ;;  %v14533_v54 = vld [vmem:[%s20335_s20 + $0x194] ss:$60 sps:$4 sm:$0xff]  }
0x1175   :  { %10913 = vmatpush1.bf16.msra.mxu0 %v14441_v46  ;;  %10828 = vmatprep.subr.bf16.mxu1 %v14446_v49  ;;  %v14528_v46 = vld [vmem:[%s20335_s20 + $0x188] ss:$60 sps:$4 sm:$0xff]   ;;  %v14531_v49 = vld [vmem:[%s20335_s20 + $0x190] ss:$60 sps:$4 sm:$0xff]  }
0x1176   :  { %10914 = vmatprep.subr.bf16.mxu0 %v14449_v9  ;;  %v14536_v9 = vld [vmem:[%s20335_s20 + $0x204] ss:$60 sps:$4 sm:$0xff]  }
0x1178   :  { %10829 = vmatpush1.bf16.msra.mxu1 %v14444_v52  ;;  %v14539_v52 = vld [vmem:[%s20335_s20 + $0x20c] ss:$60 sps:$4 sm:$0xff]  }
0x1179   :  { %10915 = vmatpush1.bf16.msra.mxu0 %v14447_v27  ;;  %10830 = vmatprep.subr.bf16.mxu1 %v14452_v53  ;;  %v14534_v27 = vld [vmem:[%s20335_s20 + $0x200] ss:$60 sps:$4 sm:$0xff]   ;;  %v14537_v53 = vld [vmem:[%s20335_s20 + $0x208] ss:$60 sps:$4 sm:$0xff]  }
0x117a   :  { %10916 = vmatprep.subr.bf16.mxu0 %v14455_v43  ;;  %v14542_v43 = vld [vmem:[%s20335_s20 + $0x27c] ss:$60 sps:$4 sm:$0xff]  }
0x117c   :  { %10831 = vmatpush1.bf16.msra.mxu1 %v14450_v57  ;;  %v14545_v57 = vld [vmem:[%s20335_s20 + $0x284] ss:$60 sps:$4 sm:$0xff]  }
0x117d   :  { %10917 = vmatpush1.bf16.msra.mxu0 %v14453_v39  ;;  %10832 = vmatprep.subr.bf16.mxu1 %v14458_v31  ;;  %v14540_v39 = vld [vmem:[%s20335_s20 + $0x278] ss:$60 sps:$4 sm:$0xff]   ;;  %v14543_v31 = vld [vmem:[%s20335_s20 + $0x280] ss:$60 sps:$4 sm:$0xff]  }
0x117e   :  { %10918 = vmatprep.subr.bf16.mxu0 %v14461_v32  ;;  %v14548_v32 = vld [vmem:[%s20335_s20 + $0x2f4] ss:$60 sps:$4 sm:$0xff]  }
0x1180   :  { %10833 = vmatpush1.bf16.msra.mxu1 %v14456_v17  ;;  %v14551_v17 = vld [vmem:[%s20335_s20 + $0x2fc] ss:$60 sps:$4 sm:$0xff]  }
0x1181   :  { %10919 = vmatpush1.bf16.msra.mxu0 %v14459_v24  ;;  %10834 = vmatprep.subr.bf16.mxu1 %v14464_v5  ;;  %v14546_v24 = vld [vmem:[%s20335_s20 + $0x2f0] ss:$60 sps:$4 sm:$0xff]   ;;  %v14549_v5 = vld [vmem:[%s20335_s20 + $0x2f8] ss:$60 sps:$4 sm:$0xff]  }
0x1182   :  { %10920 = vmatprep.subr.bf16.mxu0 %v14467_v50  ;;  %v14554_v50 = vld [vmem:[%s20335_s20 + $0x36c] ss:$60 sps:$4 sm:$0xff]  }
0x1184   :  { %10835 = vmatpush1.bf16.msra.mxu1 %v14462_v48  ;;  %v14557_v48 = vld [vmem:[%s20335_s20 + $0x374] ss:$60 sps:$4 sm:$0xff]  }
0x1185   :  { %10921 = vmatpush1.bf16.msra.mxu0 %v14465_v45  ;;  %10836 = vmatprep.subr.bf16.mxu1 %v14470_v63  ;;  %v14552_v45 = vld [vmem:[%s20335_s20 + $0x368] ss:$60 sps:$4 sm:$0xff]   ;;  %v14555_v63 = vld [vmem:[%s20335_s20 + $0x370] ss:$60 sps:$4 sm:$0xff]  }
0x1186   :  { %10922 = vmatprep.subr.bf16.mxu0 %v14473_v42  ;;  %v14560_v42 = vld [vmem:[%s20335_s20 + $0x3e4] ss:$60 sps:$4 sm:$0xff]  }
0x1188   :  { %10837 = vmatpush1.bf16.msra.mxu1 %v14468_v60  ;;  %v14563_v60 = vld [vmem:[%s20335_s20 + $0x3ec] ss:$60 sps:$4 sm:$0xff]  }
0x1189   :  { %10923 = vmatpush1.bf16.msra.mxu0 %v14471_v61  ;;  %10838 = vmatprep.subr.bf16.mxu1 %v14476_v12  ;;  %v14558_v61 = vld [vmem:[%s20335_s20 + $0x3e0] ss:$60 sps:$4 sm:$0xff]   ;;  %v14561_v12 = vld [vmem:[%s20335_s20 + $0x3e8] ss:$60 sps:$4 sm:$0xff]  }
0x118a   :  { %10924 = vmatprep.subr.bf16.mxu0 %v14479_v28  ;;  %v14566_v28 = vld [vmem:[%s20335_s20 + $0x45c] ss:$60 sps:$4 sm:$0xff]  }
0x118c   :  { %10839 = vmatpush1.bf16.msra.mxu1 %v14474_v37  ;;  %v14569_v37 = vld [vmem:[%s20335_s20 + $0x464] ss:$60 sps:$4 sm:$0xff]  }
0x118d   :  { %10925 = vmatpush1.bf16.msra.mxu0 %v14477_v56  ;;  %10840 = vmatprep.subr.bf16.mxu1 %v14482_v2  ;;  %v14564_v56 = vld [vmem:[%s20335_s20 + $0x458] ss:$60 sps:$4 sm:$0xff]   ;;  %v14567_v2 = vld [vmem:[%s20335_s20 + $0x460] ss:$60 sps:$4 sm:$0xff]  }
0x118e   :  { %10926 = vmatprep.subr.bf16.mxu0 %v14485_v1  ;;  %v14572_v1 = vld [vmem:[%s20335_s20 + $0x4d4] ss:$60 sps:$4 sm:$0xff]  }
0x1190   :  { %10841 = vmatpush1.bf16.msra.mxu1 %v14480_v7  ;;  %v14575_v7 = vld [vmem:[%s20335_s20 + $0x4dc] ss:$60 sps:$4 sm:$0xff]  }
0x1191   :  { %10927 = vmatpush1.bf16.msra.mxu0 %v14483_v6  ;;  %10842 = vmatprep.subr.bf16.mxu1 %v14488_v19  ;;  %v14570_v6 = vld [vmem:[%s20335_s20 + $0x4d0] ss:$60 sps:$4 sm:$0xff]   ;;  %v14573_v19 = vld [vmem:[%s20335_s20 + $0x4d8] ss:$60 sps:$4 sm:$0xff]  }
0x1192   :  { %10928 = vmatprep.subr.bf16.mxu0 %v14491_v55  ;;  %v14578_v55 = vld [vmem:[%s20335_s20 + $0x54c] ss:$60 sps:$4 sm:$0xff]  }
0x1194   :  { %10843 = vmatpush1.bf16.msra.mxu1 %v14486_v22  ;;  %v14581_v22 = vld [vmem:[%s20335_s20 + $0x554] ss:$60 sps:$4 sm:$0xff]  }
0x1195   :  { %10929 = vmatpush1.bf16.msra.mxu0 %v14489_v18  ;;  %10844 = vmatprep.subr.bf16.mxu1 %v14494_v38  ;;  %v14576_v18 = vld [vmem:[%s20335_s20 + $0x548] ss:$60 sps:$4 sm:$0xff]   ;;  %v14579_v38 = vld [vmem:[%s20335_s20 + $0x550] ss:$60 sps:$4 sm:$0xff]  }
0x1196   :  { %10930 = vmatprep.subr.bf16.mxu0 %v14497_v51  ;;  %v14584_v51 = vld [vmem:[%s20335_s20 + $0x5c4] ss:$60 sps:$4 sm:$0xff]  }
0x1198   :  { %10845 = vmatpush1.bf16.msra.mxu1 %v14492_v33  ;;  %v14587_v33 = vld [vmem:[%s20335_s20 + $0x5cc] ss:$60 sps:$4 sm:$0xff]  }
0x1199   :  { %10931 = vmatpush1.bf16.msra.mxu0 %v14495_v14  ;;  %10846 = vmatprep.subr.bf16.mxu1 %v14500_v40  ;;  %v14582_v14 = vld [vmem:[%s20335_s20 + $0x5c0] ss:$60 sps:$4 sm:$0xff]   ;;  %v14585_v40 = vld [vmem:[%s20335_s20 + $0x5c8] ss:$60 sps:$4 sm:$0xff]  }
0x119a   :  { %10932 = vmatprep.subr.bf16.mxu0 %v14503_v11  ;;  %v14590_v11 = vld [vmem:[%s20335_s20 + $0x63c] ss:$60 sps:$4 sm:$0xff]  }
0x119c   :  { %10847 = vmatpush1.bf16.msra.mxu1 %v14498_v21  ;;  %v14593_v21 = vld [vmem:[%s20335_s20 + $0x644] ss:$60 sps:$4 sm:$0xff]  }
0x119d   :  { %10933 = vmatpush1.bf16.msra.mxu0 %v14501_v34  ;;  %10848 = vmatprep.subr.bf16.mxu1 %v14506_v26  ;;  %v14588_v34 = vld [vmem:[%s20335_s20 + $0x638] ss:$60 sps:$4 sm:$0xff]   ;;  %v14591_v26 = vld [vmem:[%s20335_s20 + $0x640] ss:$60 sps:$4 sm:$0xff]  }
0x119e   :  { %10934 = vmatprep.subr.bf16.mxu0 %v14509_v62  ;;  %v14596_v62 = vld [vmem:[%s20335_s20 + $0x6b4] ss:$60 sps:$4 sm:$0xff]  }
0x11a0   :  { %10849 = vmatpush1.bf16.msra.mxu1 %v14504_v41  ;;  %v14599_v41 = vld [vmem:[%s20335_s20 + $0x6bc] ss:$60 sps:$4 sm:$0xff]  }
0x11a1   :  { %10935 = vmatpush1.bf16.msra.mxu0 %v14507_v59  ;;  %10947 = vmatprep.subr.bf16.mxu1 %v14512_v8  ;;  %v14594_v59 = vld [vmem:[%s20335_s20 + $0x6b0] ss:$60 sps:$4 sm:$0xff]   ;;  %v14597_v8 = vld [vmem:[%s20335_s20 + $0x6b8] ss:$60 sps:$4 sm:$0xff]  }
0x11a2   :  { %11033 = vmatprep.subr.bf16.mxu0 %v14515_v29  ;;  %v14602_v29 = vld [vmem:[%s20335_s20 + $0x72c] ss:$60 sps:$4 sm:$0xff]  }
0x11a3   :  { %10851 = vmatmul.mubr.bf16.vlgmr.msra.gmra.mrb[108].mxu1 %v18287_v30 }
0x11a4   :  { %10937 = vmatmul.mubr.bf16.vlgmr.msra.gmra.mrb[20].mxu0 %v18287_v30  ;;  %10948 = vmatpush1.bf16.msra.mxu1 %v14510_v58  ;;  %v14605_v58 = vld [vmem:[%s20335_s20 + $0x734] ss:$60 sps:$4 sm:$0xff]  }
0x11a5   :  { %10979 = vmatprep.mubr.bf16.mxu1 %v18285_v47  ;;  %11034 = vmatpush1.bf16.msra.mxu0 %v14513_v10  ;;  %v14600_v10 = vld [vmem:[%s20335_s20 + $0x728] ss:$60 sps:$4 sm:$0xff]  }
0x11a6   :  { %11065 = vmatprep.mubr.bf16.mxu0 %v18285_v47  ;;  %10949 = vmatprep.subr.bf16.mxu1 %v14518_v23  ;;  %v14603_v23 = vld [vmem:[%s20335_s20 + $0x730] ss:$60 sps:$4 sm:$0xff]  }
0x11a7   :  { %11035 = vmatprep.subr.bf16.mxu0 %v14521_v20  ;;  %v14608_v20 = vld [vmem:[%s20335_s20 + $0x7a4] ss:$60 sps:$4 sm:$0xff]  }
0x11a8   :  { %10950 = vmatpush1.bf16.msra.mxu1 %v14516_v36  ;;  %v14611_v36 = vld [vmem:[%s20335_s20 + $0x7ac] ss:$60 sps:$4 sm:$0xff]  }
0x11a9   :  { %11036 = vmatpush1.bf16.msra.mxu0 %v14519_v16  ;;  %10951 = vmatprep.subr.bf16.mxu1 %v14524_v44  ;;  %v14606_v16 = vld [vmem:[%s20335_s20 + $0x7a0] ss:$60 sps:$4 sm:$0xff]   ;;  %v14609_v44 = vld [vmem:[%s20335_s20 + $0x7a8] ss:$60 sps:$4 sm:$0xff]  }
0x11aa   :  { %11037 = vmatprep.subr.bf16.mxu0 %v14527_v0  ;;  %v14614_v0 = vld [vmem:[%s20335_s20 + $0x81c] ss:$60 sps:$4 sm:$0xff]  }
0x11ac   :  { %10952 = vmatpush1.bf16.msra.mxu1 %v14522_v15  ;;  %v14617_v15 = vld [vmem:[%s20335_s20 + $0x824] ss:$60 sps:$4 sm:$0xff]  }
0x11ad   :  { %11038 = vmatpush1.bf16.msra.mxu0 %v14525_v13  ;;  %10953 = vmatprep.subr.bf16.mxu1 %v14530_v25  ;;  %v14612_v13 = vld [vmem:[%s20335_s20 + $0x818] ss:$60 sps:$4 sm:$0xff]   ;;  %v14615_v25 = vld [vmem:[%s20335_s20 + $0x820] ss:$60 sps:$4 sm:$0xff]  }
0x11ae   :  { %11039 = vmatprep.subr.bf16.mxu0 %v14533_v54  ;;  %v14620_v54 = vld [vmem:[%s20335_s20 + $0x894] ss:$60 sps:$4 sm:$0xff]  }
0x11b0   :  { %10954 = vmatpush1.bf16.msra.mxu1 %v14528_v46  ;;  %v14623_v46 = vld [vmem:[%s20335_s20 + $0x89c] ss:$60 sps:$4 sm:$0xff]  }
0x11b1   :  { %11040 = vmatpush1.bf16.msra.mxu0 %v14531_v49  ;;  %10955 = vmatprep.subr.bf16.mxu1 %v14536_v9  ;;  %v14618_v49 = vld [vmem:[%s20335_s20 + $0x890] ss:$60 sps:$4 sm:$0xff]   ;;  %v14621_v9 = vld [vmem:[%s20335_s20 + $0x898] ss:$60 sps:$4 sm:$0xff]  }
0x11b2   :  { %11041 = vmatprep.subr.bf16.mxu0 %v14539_v52  ;;  %v14626_v52 = vld [vmem:[%s20335_s20 + $0x90c] ss:$60 sps:$4 sm:$0xff]  }
0x11b4   :  { %10956 = vmatpush1.bf16.msra.mxu1 %v14534_v27  ;;  %v14629_v27 = vld [vmem:[%s20335_s20 + $0x914] ss:$60 sps:$4 sm:$0xff]  }
0x11b5   :  { %11042 = vmatpush1.bf16.msra.mxu0 %v14537_v53  ;;  %10957 = vmatprep.subr.bf16.mxu1 %v14542_v43  ;;  %v14624_v53 = vld [vmem:[%s20335_s20 + $0x908] ss:$60 sps:$4 sm:$0xff]   ;;  %v14627_v43 = vld [vmem:[%s20335_s20 + $0x910] ss:$60 sps:$4 sm:$0xff]  }
0x11b6   :  { %11043 = vmatprep.subr.bf16.mxu0 %v14545_v57  ;;  %v14632_v57 = vld [vmem:[%s20335_s20 + $0x984] ss:$60 sps:$4 sm:$0xff]  }
0x11b8   :  { %10958 = vmatpush1.bf16.msra.mxu1 %v14540_v39  ;;  %v14635_v39 = vld [vmem:[%s20335_s20 + $0x98c] ss:$60 sps:$4 sm:$0xff]  }
0x11b9   :  { %11044 = vmatpush1.bf16.msra.mxu0 %v14543_v31  ;;  %10959 = vmatprep.subr.bf16.mxu1 %v14548_v32  ;;  %v14630_v31 = vld [vmem:[%s20335_s20 + $0x980] ss:$60 sps:$4 sm:$0xff]   ;;  %v14633_v32 = vld [vmem:[%s20335_s20 + $0x988] ss:$60 sps:$4 sm:$0xff]  }
0x11ba   :  { %11045 = vmatprep.subr.bf16.mxu0 %v14551_v17  ;;  %v14638_v17 = vld [vmem:[%s20335_s20 + $0x9fc] ss:$60 sps:$4 sm:$0xff]  }
0x11bc   :  { %10960 = vmatpush1.bf16.msra.mxu1 %v14546_v24  ;;  %v14641_v24 = vld [vmem:[%s20335_s20 + $0xa04] ss:$60 sps:$4 sm:$0xff]  }
0x11bd   :  { %11046 = vmatpush1.bf16.msra.mxu0 %v14549_v5  ;;  %10961 = vmatprep.subr.bf16.mxu1 %v14554_v50  ;;  %v14636_v5 = vld [vmem:[%s20335_s20 + $0x9f8] ss:$60 sps:$4 sm:$0xff]   ;;  %v14639_v50 = vld [vmem:[%s20335_s20 + $0xa00] ss:$60 sps:$4 sm:$0xff]  }
0x11be   :  { %11047 = vmatprep.subr.bf16.mxu0 %v14557_v48  ;;  %v14644_v48 = vld [vmem:[%s20335_s20 + $0xa74] ss:$60 sps:$4 sm:$0xff]  }
0x11c0   :  { %10962 = vmatpush1.bf16.msra.mxu1 %v14552_v45 }
0x11c1   :  { %11048 = vmatpush1.bf16.msra.mxu0 %v14555_v63  ;;  %10963 = vmatprep.subr.bf16.mxu1 %v14560_v42  ;;  %v14647_v42 = vld [vmem:[%s20335_s20 + $0xa7c] ss:$60 sps:$4 sm:$0xff]  }
0x11c2   :  { %11049 = vmatprep.subr.bf16.mxu0 %v14563_v60 }
0x11c4   :  { %10964 = vmatpush1.bf16.msra.mxu1 %v14558_v61 }
0x11c5   :  { %11050 = vmatpush1.bf16.msra.mxu0 %v14561_v12  ;;  %10965 = vmatprep.subr.bf16.mxu1 %v14566_v28 }
0x11c6   :  { %11051 = vmatprep.subr.bf16.mxu0 %v14569_v37  ;;  %v14642_v37 = vld [vmem:[%s20335_s20 + $0xa70] ss:$60 sps:$4 sm:$0xff]  }
0x11c8   :  { %10966 = vmatpush1.bf16.msra.mxu1 %v14564_v56 }
0x11c9   :  { %11052 = vmatpush1.bf16.msra.mxu0 %v14567_v2  ;;  %10967 = vmatprep.subr.bf16.mxu1 %v14572_v1 }
0x11ca   :  { %11053 = vmatprep.subr.bf16.mxu0 %v14575_v7 }
0x11cc   :  { %10968 = vmatpush1.bf16.msra.mxu1 %v14570_v6  ;;  %v14645_v6 = vld [vmem:[%s20335_s20 + $0xa78] ss:$60 sps:$4 sm:$0xff]  }
0x11cd   :  { %11054 = vmatpush1.bf16.msra.mxu0 %v14573_v19  ;;  %10969 = vmatprep.subr.bf16.mxu1 %v14578_v55  ;;  %v14650_v19 = vld [vmem:[%s20335_s20 + $0xaec] ss:$60 sps:$4 sm:$0xff]  }
0x11ce   :  { %11055 = vmatprep.subr.bf16.mxu0 %v14581_v22 }
0x11d0   :  { %10970 = vmatpush1.bf16.msra.mxu1 %v14576_v18  ;;  %v14653_v18 = vld [vmem:[%s20335_s20 + $0xaf4] ss:$60 sps:$4 sm:$0xff]  }
0x11d1   :  { %11056 = vmatpush1.bf16.msra.mxu0 %v14579_v38  ;;  %10971 = vmatprep.subr.bf16.mxu1 %v14584_v51  ;;  %v14648_v38 = vld [vmem:[%s20335_s20 + $0xae8] ss:$60 sps:$4 sm:$0xff]   ;;  %v14651_v51 = vld [vmem:[%s20335_s20 + $0xaf0] ss:$60 sps:$4 sm:$0xff]  }
0x11d2   :  { %11057 = vmatprep.subr.bf16.mxu0 %v14587_v33  ;;  %v14659_v33 = vld [vmem:[%s20335_s20 + $0xb64] ss:$60 sps:$4 sm:$0xff]  }
0x11d4   :  { %10972 = vmatpush1.bf16.msra.mxu1 %v14582_v14  ;;  %v14656_v14 = vld [vmem:[%s20335_s20 + $0xb6c] ss:$60 sps:$4 sm:$0xff]  }
0x11d5   :  { %11058 = vmatpush1.bf16.msra.mxu0 %v14585_v40  ;;  %10973 = vmatprep.subr.bf16.mxu1 %v14590_v11  ;;  %v14657_v40 = vld [vmem:[%s20335_s20 + $0xb60] ss:$60 sps:$4 sm:$0xff]   ;;  %v14654_v11 = vld [vmem:[%s20335_s20 + $0xb68] ss:$60 sps:$4 sm:$0xff]  }
0x11d6   :  { %11059 = vmatprep.subr.bf16.mxu0 %v14593_v21  ;;  %v14662_v21 = vld [vmem:[%s20335_s20 + $0xbdc] ss:$60 sps:$4 sm:$0xff]  }
0x11d8   :  { %10974 = vmatpush1.bf16.msra.mxu1 %v14588_v34  ;;  %v14665_v34 = vld [vmem:[%s20335_s20 + $0xbe4] ss:$60 sps:$4 sm:$0xff]  }
0x11d9   :  { %11060 = vmatpush1.bf16.msra.mxu0 %v14591_v26  ;;  %10975 = vmatprep.subr.bf16.mxu1 %v14596_v62  ;;  %v14660_v26 = vld [vmem:[%s20335_s20 + $0xbd8] ss:$60 sps:$4 sm:$0xff]   ;;  %v14663_v62 = vld [vmem:[%s20335_s20 + $0xbe0] ss:$60 sps:$4 sm:$0xff]  }
0x11da   :  { %11061 = vmatprep.subr.bf16.mxu0 %v14599_v41  ;;  %v14668_v41 = vld [vmem:[%s20335_s20 + $0xc54] ss:$60 sps:$4 sm:$0xff]  }
0x11dc   :  { %10976 = vmatpush1.bf16.msra.mxu1 %v14594_v59  ;;  %v14671_v59 = vld [vmem:[%s20335_s20 + $0xc5c] ss:$60 sps:$4 sm:$0xff]  }
0x11dd   :  { %11062 = vmatpush1.bf16.msra.mxu0 %v14597_v8  ;;  %10977 = vmatprep.subr.bf16.mxu1 %v14602_v29  ;;  %v14666_v8 = vld [vmem:[%s20335_s20 + $0xc50] ss:$60 sps:$4 sm:$0xff]   ;;  %v14669_v29 = vld [vmem:[%s20335_s20 + $0xc58] ss:$60 sps:$4 sm:$0xff]  }
0x11de   :  { %11063 = vmatprep.subr.bf16.mxu0 %v14605_v58  ;;  %v14674_v58 = vld [vmem:[%s20335_s20 + $0xccc] ss:$60 sps:$4 sm:$0xff]  }
0x11e0   :  { %10978 = vmatpush1.bf16.msra.mxu1 %v14600_v10  ;;  %v14677_v10 = vld [vmem:[%s20335_s20 + $0xcd4] ss:$60 sps:$4 sm:$0xff]  }
0x11e1   :  { %11064 = vmatpush1.bf16.msra.mxu0 %v14603_v23  ;;  %10990 = vmatprep.subr.bf16.mxu1 %v14608_v20  ;;  %v14672_v23 = vld [vmem:[%s20335_s20 + $0xcc8] ss:$60 sps:$4 sm:$0xff]   ;;  %v14675_v20 = vld [vmem:[%s20335_s20 + $0xcd0] ss:$60 sps:$4 sm:$0xff]  }
0x11e2   :  { %11076 = vmatprep.subr.bf16.mxu0 %v14611_v36  ;;  %v14680_v36 = vld [vmem:[%s20335_s20 + $0xd44] ss:$60 sps:$4 sm:$0xff]  }
0x11e3   :  { %10980 = vmatmul.mubr.bf16.vlgmr.msra.gmra.mrb[112].mxu1 %v18283_v4 }
0x11e4   :  { %11066 = vmatmul.mubr.bf16.vlgmr.msra.gmra.mrb[24].mxu0 %v18283_v4  ;;  %10991 = vmatpush1.bf16.msra.mxu1 %v14606_v16  ;;  %v14683_v16 = vld [vmem:[%s20335_s20 + $0xd4c] ss:$60 sps:$4 sm:$0xff]  }
0x11e5   :  { %11022 = vmatprep.mubr.bf16.mxu1 %v18303_v35  ;;  %11077 = vmatpush1.bf16.msra.mxu0 %v14609_v44  ;;  %v14678_v44 = vld [vmem:[%s20335_s20 + $0xd40] ss:$60 sps:$4 sm:$0xff]  }
0x11e6   :  { %11108 = vmatprep.mubr.bf16.mxu0 %v18303_v35  ;;  %10992 = vmatprep.subr.bf16.mxu1 %v14614_v0  ;;  %v14681_v0 = vld [vmem:[%s20335_s20 + $0xd48] ss:$60 sps:$4 sm:$0xff]  }
0x11e7   :  { %11078 = vmatprep.subr.bf16.mxu0 %v14617_v15  ;;  %v14686_v15 = vld [vmem:[%s20335_s20 + $0xdbc] ss:$60 sps:$4 sm:$0xff]  }
0x11e8   :  { %10993 = vmatpush1.bf16.msra.mxu1 %v14612_v13  ;;  %v14689_v13 = vld [vmem:[%s20335_s20 + $0xdc4] ss:$60 sps:$4 sm:$0xff]  }
0x11e9   :  { %11079 = vmatpush1.bf16.msra.mxu0 %v14615_v25  ;;  %10994 = vmatprep.subr.bf16.mxu1 %v14620_v54  ;;  %v14684_v25 = vld [vmem:[%s20335_s20 + $0xdb8] ss:$60 sps:$4 sm:$0xff]   ;;  %v14687_v54 = vld [vmem:[%s20335_s20 + $0xdc0] ss:$60 sps:$4 sm:$0xff]  }
0x11ea   :  { %11080 = vmatprep.subr.bf16.mxu0 %v14623_v46  ;;  %v14692_v46 = vld [vmem:[%s20335_s20 + $0xe34] ss:$60 sps:$4 sm:$0xff]  }
0x11ec   :  { %10995 = vmatpush1.bf16.msra.mxu1 %v14618_v49  ;;  %v14695_v49 = vld [vmem:[%s20335_s20 + $0xe3c] ss:$60 sps:$4 sm:$0xff]  }
0x11ed   :  { %11081 = vmatpush1.bf16.msra.mxu0 %v14621_v9  ;;  %10996 = vmatprep.subr.bf16.mxu1 %v14626_v52  ;;  %v14690_v9 = vld [vmem:[%s20335_s20 + $0xe30] ss:$60 sps:$4 sm:$0xff]   ;;  %v14693_v52 = vld [vmem:[%s20335_s20 + $0xe38] ss:$60 sps:$4 sm:$0xff]  }
0x11ee   :  { %11082 = vmatprep.subr.bf16.mxu0 %v14629_v27  ;;  %v14698_v27 = vld [vmem:[%s20335_s20 + $0xeac] ss:$60 sps:$4 sm:$0xff]  }
0x11f0   :  { %10997 = vmatpush1.bf16.msra.mxu1 %v14624_v53  ;;  %v14701_v53 = vld [vmem:[%s20335_s20 + $0xeb4] ss:$60 sps:$4 sm:$0xff]  }
0x11f1   :  { %11083 = vmatpush1.bf16.msra.mxu0 %v14627_v43  ;;  %10998 = vmatprep.subr.bf16.mxu1 %v14632_v57  ;;  %v14696_v43 = vld [vmem:[%s20335_s20 + $0xea8] ss:$60 sps:$4 sm:$0xff]   ;;  %v14699_v57 = vld [vmem:[%s20335_s20 + $0xeb0] ss:$60 sps:$4 sm:$0xff]  }
0x11f2   :  { %11084 = vmatprep.subr.bf16.mxu0 %v14635_v39  ;;  %v14704_v39 = vld [vmem:[%s20335_s20 + $0x34] ss:$60 sps:$4 sm:$0xff]  }
0x11f4   :  { %10999 = vmatpush1.bf16.msra.mxu1 %v14630_v31  ;;  %v14705_v31 = vld [vmem:[%s20335_s20 + $0x3f8] ss:$60 sps:$4 sm:$0xff]  }
0x11f5   :  { %11085 = vmatpush1.bf16.msra.mxu0 %v14633_v32  ;;  %11000 = vmatprep.subr.bf16.mxu1 %v14638_v17  ;;  %v14702_v32 = vld [vmem:[%s20335_s20 + $0x30] ss:$60 sps:$4 sm:$0xff]   ;;  %v14706_v17 = vld [vmem:[%s20335_s20 + $0x38] ss:$60 sps:$4 sm:$0xff]  }
0x11f6   :  { %v10680_v45 = vpop.f32.mrb[104].mxu1  ;;  %v10766_v63 = vpop.f32.mrb[16].mxu0  ;;  %11086 = vmatprep.subr.bf16.mxu0 %v14641_v24  ;;  %v14709_v24 = vld [vmem:[%s20335_s20 + $0xac] ss:$60 sps:$4 sm:$0xff]  }
0x11f7   :  { %v10682_v60 = vpop.f32.mrb[105].mxu1  ;;  %v10768_v61 = vpop.f32.mrb[17].mxu0 }
0x11f8   :  { %v10684_v12 = vpop.f32.mrb[106].mxu1  ;;  %v10770_v28 = vpop.f32.mrb[18].mxu0  ;;  %11001 = vmatpush1.bf16.msra.mxu1 %v14636_v5  ;;  %v14710_v5 = vld [vmem:[%s20335_s20 + $0x470] ss:$60 sps:$4 sm:$0xff]  }
0x11f9   :  { %v19156_v56 = vpack.c.bf16 %v10684_v12, %v10680_v45  ;;  %v19158_v2 = vpack.c.bf16 %v10770_v28, %v10766_v63  ;;  %11087 = vmatpush1.bf16.msra.mxu0 %v14639_v50  ;;  %v10686_v1 = vpop.f32.mrb[107].mxu1  ;;  %v10772_v7 = vpop.f32.mrb[19].mxu0  ;;  %11002 = vmatprep.subr.bf16.mxu1 %v14644_v48  ;;  %v14707_v50 = vld [vmem:[%s20335_s20 + $0xa8] ss:$60 sps:$4 sm:$0xff]   ;;  %v14711_v48 = vld [vmem:[%s20335_s20 + $0xb0] ss:$60 sps:$4 sm:$0xff]  }
0x11fa   :  { %v19166_v55 = vpack.c.bf16 %v10686_v1, %v10682_v60  ;;  %v19168_v22 = vpack.c.bf16 %v10772_v7, %v10768_v61  ;;  %11088 = vmatprep.subr.bf16.mxu0 %v14647_v42  ;;  %v14714_v45 = vld [vmem:[%s20335_s20 + $0x124] ss:$60 sps:$4 sm:$0xff]   ;;  %v14719_v60 = vld [vmem:[%s20335_s20 + $0x19c] ss:$60 sps:$4 sm:$0xff]   ;;  %v14722_v1 = vld [vmem:[%s20335_s20 + $0x210] ss:$60 sps:$4 sm:$0xff]  }
0x11fb   :  { %11365 = vst [vmem:[#allocation6 + $0x10] sm:$0xff] %v19158_v2  ;;  %11443 = vrot.lane.b32.xlu0 %v19158_v2, %s14922_s30  ;;  %11439 = vrot.lane.b32.xlu1 %v19156_v56, %s14922_s30  ;;  %v14715_v63 = vld [vmem:[%s20335_s20 + $0x4e8] ss:$60 sps:$4 sm:$0xff]   ;;  %v14712_v42 = vld [vmem:[%s20335_s20 + $0x120] ss:$60 sps:$4 sm:$0xff]  }
0x11fc   :  { %11366 = vst [vmem:[#allocation6 + $0x18] sm:$0xff] %v19168_v22  ;;  %11003 = vmatpush1.bf16.msra.mxu1 %v14642_v37  ;;  %v14720_v61 = vld [vmem:[%s20335_s20 + $0x560] ss:$60 sps:$4 sm:$0xff]   ;;  %v14717_v12 = vld [vmem:[%s20335_s20 + $0x198] ss:$60 sps:$4 sm:$0xff]  }
0x11fd   :  { %11089 = vmatpush1.bf16.msra.mxu0 %v14645_v6  ;;  %11004 = vmatprep.subr.bf16.mxu1 %v14650_v19  ;;  %v14721_v28 = vld [vmem:[%s20335_s20 + $0x1a0] ss:$60 sps:$4 sm:$0xff]   ;;  %v14724_v37 = vld [vmem:[%s20335_s20 + $0x214] ss:$60 sps:$4 sm:$0xff]   ;;  %v14729_v6 = vld [vmem:[%s20335_s20 + $0x28c] ss:$60 sps:$4 sm:$0xff]  }
0x11fe   :  { %11090 = vmatprep.subr.bf16.mxu0 %v14653_v18  ;;  %v14726_v7 = vld [vmem:[%s20335_s20 + $0x218] ss:$60 sps:$4 sm:$0xff]   ;;  %v14730_v19 = vld [vmem:[%s20335_s20 + $0x650] ss:$60 sps:$4 sm:$0xff]   ;;  %v14727_v18 = vld [vmem:[%s20335_s20 + $0x288] ss:$60 sps:$4 sm:$0xff]  }
0x11ff   :  { %11573 = vrot.lane.b32.xlu0 %v19156_v56, %s14926_s27  ;;  %11577 = vrot.lane.b32.xlu1 %v19158_v2, %s14926_s27 }
0x1200   :  { %11005 = vmatpush1.bf16.msra.mxu1 %v14648_v38  ;;  %v14731_v38 = vld [vmem:[%s20335_s20 + $0x290] ss:$60 sps:$4 sm:$0xff]  }
0x1201   :  { %11091 = vmatpush1.bf16.msra.mxu0 %v14651_v51  ;;  %11006 = vmatprep.subr.bf16.mxu1 %v14659_v33  ;;  %v14734_v51 = vld [vmem:[%s20335_s20 + $0x304] ss:$60 sps:$4 sm:$0xff]  }
0x1202   :  { %11092 = vmatprep.subr.bf16.mxu0 %v14656_v14  ;;  %v14735_v33 = vld [vmem:[%s20335_s20 + $0x6c8] ss:$60 sps:$4 sm:$0xff]   ;;  %v14732_v14 = vld [vmem:[%s20335_s20 + $0x300] ss:$60 sps:$4 sm:$0xff]  }
0x1203   :  { %11711 = vrot.lane.b32.xlu0 %v19158_v2, %s20365_s29  ;;  %11707 = vrot.lane.b32.xlu1 %v19156_v56, %s20365_s29 }
0x1204   :  { %11007 = vmatpush1.bf16.msra.mxu1 %v14657_v40  ;;  %v14736_v40 = vld [vmem:[%s20335_s20 + $0x308] ss:$60 sps:$4 sm:$0xff]  }
0x1205   :  { %11093 = vmatpush1.bf16.msra.mxu0 %v14654_v11  ;;  %11008 = vmatprep.subr.bf16.mxu1 %v14662_v21  ;;  %v14739_v11 = vld [vmem:[%s20335_s20 + $0x37c] ss:$60 sps:$4 sm:$0xff]  }
0x1206   :  { %11094 = vmatprep.subr.bf16.mxu0 %v14665_v34  ;;  %v14740_v21 = vld [vmem:[%s20335_s20 + $0x740] ss:$60 sps:$4 sm:$0xff]   ;;  %v14737_v34 = vld [vmem:[%s20335_s20 + $0x378] ss:$60 sps:$4 sm:$0xff]  }
0x1207   :  { %11841 = vrot.lane.b32.xlu0 %v19156_v56, %s20366_s5  ;;  %11845 = vrot.lane.b32.xlu1 %v19158_v2, %s20366_s5 }
0x1208   :  { %11009 = vmatpush1.bf16.msra.mxu1 %v14660_v26  ;;  %v14741_v26 = vld [vmem:[%s20335_s20 + $0x380] ss:$60 sps:$4 sm:$0xff]  }
0x1209   :  { %11095 = vmatpush1.bf16.msra.mxu0 %v14663_v62  ;;  %11010 = vmatprep.subr.bf16.mxu1 %v14668_v41  ;;  %v14744_v62 = vld [vmem:[%s20335_s20 + $0x3f4] ss:$60 sps:$4 sm:$0xff]  }
0x120a   :  { %11096 = vmatprep.subr.bf16.mxu0 %v14671_v59  ;;  %v14745_v41 = vld [vmem:[%s20335_s20 + $0xb78] ss:$60 sps:$4 sm:$0xff]   ;;  %v14742_v59 = vld [vmem:[%s20335_s20 + $0x3f0] ss:$60 sps:$4 sm:$0xff]  }
0x120b   :  { %11979 = vrot.lane.b32.xlu0 %v19158_v2, %s20364_s24  ;;  %11975 = vrot.lane.b32.xlu1 %v19156_v56, %s20364_s24 }
0x120c   :  { %11011 = vmatpush1.bf16.msra.mxu1 %v14666_v8  ;;  %v14746_v8 = vld [vmem:[%s20335_s20 + $0x7b8] ss:$60 sps:$4 sm:$0xff]  }
0x120d   :  { %11097 = vmatpush1.bf16.msra.mxu0 %v14669_v29  ;;  %11012 = vmatprep.subr.bf16.mxu1 %v14674_v58  ;;  %v14749_v29 = vld [vmem:[%s20335_s20 + $0x46c] ss:$60 sps:$4 sm:$0xff]  }
0x120e   :  { %11098 = vmatprep.subr.bf16.mxu0 %v14677_v10  ;;  %v14750_v58 = vld [vmem:[%s20335_s20 + $0xbf0] ss:$60 sps:$4 sm:$0xff]   ;;  %v14747_v10 = vld [vmem:[%s20335_s20 + $0x468] ss:$60 sps:$4 sm:$0xff]  }
0x120f   :  { %12109 = vrot.lane.b32.xlu0 %v19156_v56, %s14945_s1  ;;  %12113 = vrot.lane.b32.xlu1 %v19158_v2, %s14945_s1 }
0x1210   :  { %11013 = vmatpush1.bf16.msra.mxu1 %v14672_v23  ;;  %v14751_v23 = vld [vmem:[%s20335_s20 + $0x830] ss:$60 sps:$4 sm:$0xff]  }
0x1211   :  { %11099 = vmatpush1.bf16.msra.mxu0 %v14675_v20  ;;  %11014 = vmatprep.subr.bf16.mxu1 %v14680_v36  ;;  %v14754_v20 = vld [vmem:[%s20335_s20 + $0x4e4] ss:$60 sps:$4 sm:$0xff]  }
0x1212   :  { %11100 = vmatprep.subr.bf16.mxu0 %v14683_v16  ;;  %v14755_v36 = vld [vmem:[%s20335_s20 + $0xc68] ss:$60 sps:$4 sm:$0xff]   ;;  %v14752_v16 = vld [vmem:[%s20335_s20 + $0x4e0] ss:$60 sps:$4 sm:$0xff]  }
0x1213   :  { %12248 = vrot.lane.b32.xlu0 %v19158_v2, %s14946_s26  ;;  %12244 = vrot.lane.b32.xlu1 %v19156_v56, %s14946_s26 }
0x1214   :  { %11015 = vmatpush1.bf16.msra.mxu1 %v14678_v44  ;;  %v14756_v44 = vld [vmem:[%s20335_s20 + $0x8a8] ss:$60 sps:$4 sm:$0xff]  }
0x1215   :  { %11101 = vmatpush1.bf16.msra.mxu0 %v14681_v0  ;;  %11016 = vmatprep.subr.bf16.mxu1 %v14686_v15  ;;  %v14759_v0 = vld [vmem:[%s20335_s20 + $0x55c] ss:$60 sps:$4 sm:$0xff]  }
0x1216   :  { %11102 = vmatprep.subr.bf16.mxu0 %v14689_v13  ;;  %v14760_v15 = vld [vmem:[%s20335_s20 + $0xce0] ss:$60 sps:$4 sm:$0xff]   ;;  %v14757_v13 = vld [vmem:[%s20335_s20 + $0x558] ss:$60 sps:$4 sm:$0xff]  }
0x1217   :  { %12379 = vrot.lane.b32.xlu0 %v19156_v56, %s14947_s14  ;;  %12383 = vrot.lane.b32.xlu1 %v19158_v2, %s14947_s14  ;;  %v14725_v2 = vld [vmem:[%s20335_s20 + $0x5d8] ss:$60 sps:$4 sm:$0xff]  }
0x1218   :  { %11017 = vmatpush1.bf16.msra.mxu1 %v14684_v25  ;;  %v14761_v25 = vld [vmem:[%s20335_s20 + $0x920] ss:$60 sps:$4 sm:$0xff]  }
0x1219   :  { %11103 = vmatpush1.bf16.msra.mxu0 %v14687_v54  ;;  %11018 = vmatprep.subr.bf16.mxu1 %v14692_v46  ;;  %v14764_v54 = vld [vmem:[%s20335_s20 + $0x5d4] ss:$60 sps:$4 sm:$0xff]  }
0x121a   :  { %11104 = vmatprep.subr.bf16.mxu0 %v14695_v49  ;;  %v14762_v46 = vld [vmem:[%s20335_s20 + $0x5d0] ss:$60 sps:$4 sm:$0xff]   ;;  %v14766_v49 = vld [vmem:[%s20335_s20 + $0x998] ss:$60 sps:$4 sm:$0xff]  }
0x121b   :  { %11575 = vrot.lane.b32.xlu0 %v19166_v55, %s14926_s27  ;;  %11441 = vrot.lane.b32.xlu1 %v19166_v55, %s14922_s30 }
0x121c   :  { %11019 = vmatpush1.bf16.msra.mxu1 %v14690_v9  ;;  %v14769_v9 = vld [vmem:[%s20335_s20 + $0x64c] ss:$60 sps:$4 sm:$0xff]  }
0x121d   :  { %11105 = vmatpush1.bf16.msra.mxu0 %v14693_v52  ;;  %11020 = vmatprep.subr.bf16.mxu1 %v14698_v27  ;;  %v14770_v52 = vld [vmem:[%s20335_s20 + $0xdd0] ss:$60 sps:$4 sm:$0xff]   ;;  %v14767_v27 = vld [vmem:[%s20335_s20 + $0x648] ss:$60 sps:$4 sm:$0xff]  }
0x121e   :  { %11106 = vmatprep.subr.bf16.mxu0 %v14701_v53  ;;  %v14771_v53 = vld [vmem:[%s20335_s20 + $0xa10] ss:$60 sps:$4 sm:$0xff]  }
0x121f   :  { %11843 = vrot.lane.b32.xlu0 %v19166_v55, %s20366_s5  ;;  %11709 = vrot.lane.b32.xlu1 %v19166_v55, %s20365_s29 }
0x1220   :  { %11021 = vmatpush1.bf16.msra.mxu1 %v14696_v43  ;;  %v14774_v43 = vld [vmem:[%s20335_s20 + $0x6c4] ss:$60 sps:$4 sm:$0xff]  }
0x1221   :  { %11107 = vmatpush1.bf16.msra.mxu0 %v14699_v57  ;;  %11119 = vmatprep.subr.bf16.mxu1 %v14704_v39  ;;  %v14775_v57 = vld [vmem:[%s20335_s20 + $0xe48] ss:$60 sps:$4 sm:$0xff]   ;;  %v14772_v39 = vld [vmem:[%s20335_s20 + $0x6c0] ss:$60 sps:$4 sm:$0xff]  }
0x1222   :  { %13715 = vmatprep.subr.bf16.mxu0 %v14705_v31  ;;  %v14776_v31 = vld [vmem:[%s20335_s20 + $0xa88] ss:$60 sps:$4 sm:$0xff]  }
0x1223   :  { %11023 = vmatmul.mubr.bf16.vlgmr.msra.gmra.mrb[112].mxu1 %v18287_v30  ;;  %12111 = vrot.lane.b32.xlu0 %v19166_v55, %s14945_s1 }
0x1224   :  { %11109 = vmatmul.mubr.bf16.vlgmr.msra.gmra.mrb[24].mxu0 %v18287_v30  ;;  %11120 = vmatpush1.bf16.msra.mxu1 %v14702_v32  ;;  %v14779_v32 = vld [vmem:[%s20335_s20 + $0x73c] ss:$60 sps:$4 sm:$0xff]  }
0x1225   :  { %11151 = vmatprep.mubr.bf16.mxu1 %v18285_v47  ;;  %13716 = vmatpush3.bf16.msra.mxu0 %v14706_v17  ;;  %v14780_v17 = vld [vmem:[%s20335_s20 + $0xec0] ss:$60 sps:$4 sm:$0xff]  }
0x1226   :  { %11237 = vmatprep.mubr.bf16.mxu0 %v18285_v47  ;;  %11121 = vmatprep.subr.bf16.mxu1 %v14709_v24  ;;  %v14716_v47 = vld [vmem:[%s20335_s20 + $0x128] ss:$60 sps:$4 sm:$0xff]   ;;  %v14777_v24 = vld [vmem:[%s20335_s20 + $0x738] ss:$60 sps:$4 sm:$0xff]  }
0x1227   :  { %13717 = vmatprep.subr.bf16.mxu0 %v14710_v5  ;;  %11977 = vrot.lane.b32.xlu1 %v19166_v55, %s20364_s24  ;;  %v14781_v5 = vld [vmem:[%s20335_s20 + $0xb00] ss:$60 sps:$4 sm:$0xff]  }
0x1228   :  { %11122 = vmatpush1.bf16.msra.mxu1 %v14707_v50  ;;  %12381 = vrot.lane.b32.xlu0 %v19166_v55, %s14947_s14  ;;  %v14784_v50 = vld [vmem:[%s20335_s20 + $0x7b4] ss:$60 sps:$4 sm:$0xff]  }
0x1229   :  { %13718 = vmatpush3.bf16.msra.mxu0 %v14711_v48  ;;  %11123 = vmatprep.subr.bf16.mxu1 %v14714_v45  ;;  %v19545_v48 = vld [vmem:[%s20337_s21] sm:$0xff]  ;;  %v14782_v45 = vld [vmem:[%s20335_s20 + $0x7b0] ss:$60 sps:$4 sm:$0xff]  }
0x122a   :  { %13719 = vmatprep.subr.bf16.mxu0 %v14715_v63  ;;  %v14787_v63 = vld [vmem:[%s20335_s20 + $0x82c] ss:$60 sps:$4 sm:$0xff]  }
0x122b   :  { %12246 = vrot.lane.b32.xlu1 %v19166_v55, %s14946_s26 }
0x122c   :  { %11124 = vmatpush1.bf16.msra.mxu1 %v14712_v42  ;;  %v19556_v42 = vcombine.high %v19545_v48, %v19545_v48 }
0x122d   :  { %13720 = vmatpush3.bf16.msra.mxu0 %v14716_v47  ;;  %11125 = vmatprep.subr.bf16.mxu1 %v14719_v60  ;;  %v14785_v47 = vld [vmem:[%s20335_s20 + $0x828] ss:$60 sps:$4 sm:$0xff]   ;;  %v14796_v60 = vld [vmem:[%s20335_s20 + $0x994] ss:$60 sps:$4 sm:$0xff]  }
0x122e   :  { %13721 = vmatprep.subr.bf16.mxu0 %v14720_v61 }
0x122f   :  { %11445 = vrot.lane.b32.xlu1 %v19168_v22, %s14922_s30 }
0x1230   :  { %11126 = vmatpush1.bf16.msra.mxu1 %v14717_v12 }
0x1231   :  { %13722 = vmatpush3.bf16.msra.mxu0 %v14721_v28  ;;  %11127 = vmatprep.subr.bf16.mxu1 %v14724_v37  ;;  %v14794_v28 = vld [vmem:[%s20335_s20 + $0x990] ss:$60 sps:$4 sm:$0xff]  }
0x1232   :  { %13723 = vmatprep.subr.bf16.mxu0 %v14725_v2  ;;  %v14799_v37 = vld [vmem:[%s20335_s20 + $0xa0c] ss:$60 sps:$4 sm:$0xff]  }
0x1233   :  { %11579 = vrot.lane.b32.xlu1 %v19168_v22, %s14926_s27 }
0x1234   :  { %11128 = vmatpush1.bf16.msra.mxu1 %v14722_v1 }
0x1235   :  { %13724 = vmatpush3.bf16.msra.mxu0 %v14726_v7  ;;  %11129 = vmatprep.subr.bf16.mxu1 %v14729_v6  ;;  %v14797_v7 = vld [vmem:[%s20335_s20 + $0xa08] ss:$60 sps:$4 sm:$0xff]  }
0x1236   :  { %13725 = vmatprep.subr.bf16.mxu0 %v14730_v19  ;;  %v14802_v6 = vld [vmem:[%s20335_s20 + $0xa84] ss:$60 sps:$4 sm:$0xff]  }
0x1237   :  { %11713 = vrot.lane.b32.xlu1 %v19168_v22, %s20365_s29 }
0x1238   :  { %11130 = vmatpush1.bf16.msra.mxu1 %v14727_v18 }
0x1239   :  { %13726 = vmatpush3.bf16.msra.mxu0 %v14731_v38  ;;  %11131 = vmatprep.subr.bf16.mxu1 %v14734_v51 }
0x123a   :  { %13727 = vmatprep.subr.bf16.mxu0 %v14735_v33 }
0x123b   :  { %11847 = vrot.lane.b32.xlu1 %v19168_v22, %s20366_s5 }
0x123c   :  { %11132 = vmatpush1.bf16.msra.mxu1 %v14732_v14 }
0x123d   :  { %13728 = vmatpush3.bf16.msra.mxu0 %v14736_v40  ;;  %11133 = vmatprep.subr.bf16.mxu1 %v14739_v11  ;;  %v14800_v11 = vld [vmem:[%s20335_s20 + $0xa80] ss:$60 sps:$4 sm:$0xff]  }
0x123e   :  { %13729 = vmatprep.subr.bf16.mxu0 %v14740_v21 }
0x123f   :  { %11981 = vrot.lane.b32.xlu1 %v19168_v22, %s20364_s24 }
0x1240   :  { %11134 = vmatpush1.bf16.msra.mxu1 %v14737_v34 }
0x1241   :  { %13730 = vmatpush3.bf16.msra.mxu0 %v14741_v26  ;;  %11135 = vmatprep.subr.bf16.mxu1 %v14744_v62  ;;  %v14805_v62 = vld [vmem:[%s20335_s20 + $0xafc] ss:$60 sps:$4 sm:$0xff]  }
0x1242   :  { %13737 = vmatprep.subr.bf16.mxu0 %v14745_v41 }
0x1243   :  { %12115 = vrot.lane.b32.xlu1 %v19168_v22, %s14945_s1 }
0x1244   :  { %11238 = vmatmul.mubr.bf16.vlgmr.msra.gmra.mrb[28].mxu0 %v18283_v4  ;;  %11136 = vmatpush1.bf16.msra.mxu1 %v14742_v59 }
0x1245   :  { %13738 = vmatpush3.bf16.msra.mxu0 %v14746_v8  ;;  %11278 = vmatprep.mubr.bf16.mxu0 %v18303_v35 }
0x1246   :  { %11137 = vmatprep.subr.bf16.mxu1 %v14749_v29  ;;  %13739 = vmatprep.subr.bf16.mxu0 %v14750_v58 }
0x1247   :  { %12250 = vrot.lane.b32.xlu1 %v19168_v22, %s14946_s26 }
0x1248   :  { %11138 = vmatpush1.bf16.msra.mxu1 %v14747_v10 }
0x1249   :  { %13740 = vmatpush3.bf16.msra.mxu0 %v14751_v23  ;;  %11139 = vmatprep.subr.bf16.mxu1 %v14754_v20  ;;  %v14803_v23 = vld [vmem:[%s20335_s20 + $0xaf8] ss:$60 sps:$4 sm:$0xff]  }
0x124a   :  { %13741 = vmatprep.subr.bf16.mxu0 %v14755_v36  ;;  %v14808_v20 = vld [vmem:[%s20335_s20 + $0xb74] ss:$60 sps:$4 sm:$0xff]  }
0x124b   :  { %12385 = vrot.lane.b32.xlu1 %v19168_v22, %s14947_s14  ;;  %v14765_v22 = vld [vmem:[%s20335_s20 + $0xd58] ss:$60 sps:$4 sm:$0xff]  }
0x124c   :  { %11140 = vmatpush1.bf16.msra.mxu1 %v14752_v16 }
0x124d   :  { %13742 = vmatpush3.bf16.msra.mxu0 %v14756_v44  ;;  %11141 = vmatprep.subr.bf16.mxu1 %v14759_v0  ;;  %v14806_v44 = vld [vmem:[%s20335_s20 + $0xb70] ss:$60 sps:$4 sm:$0xff]  }
0x124e   :  { %13743 = vmatprep.subr.bf16.mxu0 %v14760_v15  ;;  %v14811_v0 = vld [vmem:[%s20335_s20 + $0xbec] ss:$60 sps:$4 sm:$0xff]  }
0x1250   :  { %11142 = vmatpush1.bf16.msra.mxu1 %v14757_v13 }
0x1251   :  { %13744 = vmatpush3.bf16.msra.mxu0 %v14761_v25  ;;  %11143 = vmatprep.subr.bf16.mxu1 %v14764_v54  ;;  %v14809_v25 = vld [vmem:[%s20335_s20 + $0xbe8] ss:$60 sps:$4 sm:$0xff]  }
0x1252   :  { %13745 = vmatprep.subr.bf16.mxu0 %v14765_v22  ;;  %v14814_v54 = vld [vmem:[%s20335_s20 + $0xc64] ss:$60 sps:$4 sm:$0xff]  }
0x1254   :  { %11144 = vmatpush1.bf16.msra.mxu1 %v14762_v46 }
0x1255   :  { %13746 = vmatpush3.bf16.msra.mxu0 %v14766_v49  ;;  %11145 = vmatprep.subr.bf16.mxu1 %v14769_v9  ;;  %v14812_v49 = vld [vmem:[%s20335_s20 + $0xc60] ss:$60 sps:$4 sm:$0xff]  }
0x1256   :  { %13747 = vmatprep.subr.bf16.mxu0 %v14770_v52  ;;  %v14817_v9 = vld [vmem:[%s20335_s20 + $0xcdc] ss:$60 sps:$4 sm:$0xff]  }
0x1258   :  { %11146 = vmatpush1.bf16.msra.mxu1 %v14767_v27 }
0x1259   :  { %13748 = vmatpush3.bf16.msra.mxu0 %v14771_v53  ;;  %11147 = vmatprep.subr.bf16.mxu1 %v14774_v43  ;;  %v14815_v53 = vld [vmem:[%s20335_s20 + $0xcd8] ss:$60 sps:$4 sm:$0xff]  }
0x125a   :  { %13749 = vmatprep.subr.bf16.mxu0 %v14775_v57  ;;  %v14820_v43 = vld [vmem:[%s20335_s20 + $0xd54] ss:$60 sps:$4 sm:$0xff]  }
0x125c   :  { %11148 = vmatpush1.bf16.msra.mxu1 %v14772_v39 }
0x125d   :  { %13750 = vmatpush3.bf16.msra.mxu0 %v14776_v31  ;;  %11149 = vmatprep.subr.bf16.mxu1 %v14779_v32 }
0x125e   :  { %13751 = vmatprep.subr.bf16.mxu0 %v14780_v17  ;;  %v14818_v17 = vld [vmem:[%s20335_s20 + $0xd50] ss:$60 sps:$4 sm:$0xff]  }
0x1260   :  { %11150 = vmatpush1.bf16.msra.mxu1 %v14777_v24 }
0x1261   :  { %13752 = vmatpush3.bf16.msra.mxu0 %v14781_v5  ;;  %11162 = vmatprep.subr.bf16.mxu1 %v14784_v50  ;;  %v14823_v50 = vld [vmem:[%s20335_s20 + $0xdcc] ss:$60 sps:$4 sm:$0xff]  }
0x1262   :  { %12600 = vmatprep.subr.bf16.mxu0 %v19166_v55  ;;  %v14790_v55 = vld [vmem:[%s20335_s20 + $0x8a4] ss:$60 sps:$4 sm:$0xff]  }
0x1263   :  { %11152 = vmatmul.mubr.bf16.vlgmr.msra.gmra.mrb[116].mxu1 %v18283_v4  ;;  %v14788_v4 = vld [vmem:[%s20335_s20 + $0x8a0] ss:$60 sps:$4 sm:$0xff]  }
0x1264   :  { %11279 = vmatmul.mubr.bf16.vlgmr.msra.gmra.mrb[32].mxu0 %v18287_v30  ;;  %11163 = vmatpush1.bf16.msra.mxu1 %v14782_v45 }
0x1265   :  { %11194 = vmatprep.mubr.bf16.mxu1 %v18303_v35  ;;  %12601 = vmatpush1.bf16.msra.mxu0 %v19156_v56  ;;  %v14793_v35 = vld [vmem:[%s20335_s20 + $0x91c] ss:$60 sps:$4 sm:$0xff]  }
0x1266   :  { %11164 = vmatprep.subr.bf16.mxu1 %v14787_v63  ;;  %13648 = vmatprep.mubr.msk.bf16.mxu0 %vm12596_vm1, %v19556_v42  ;;  %v14791_v56 = vld [vmem:[%s20335_s20 + $0x918] ss:$60 sps:$4 sm:$0xff]  }
0x1268   :  { %11165 = vmatpush1.bf16.msra.mxu1 %v14785_v47 }
0x1269   :  { %11166 = vmatprep.subr.bf16.mxu1 %v14790_v55 }
0x126c   :  { %11167 = vmatpush1.bf16.msra.mxu1 %v14788_v4  ;;  %v14821_v4 = vld [vmem:[%s20335_s20 + $0xdc8] ss:$60 sps:$4 sm:$0xff]  }
0x126d   :  { %11168 = vmatprep.subr.bf16.mxu1 %v14793_v35  ;;  %v19582_v61 = vpop.permute.xlu0 %11443  ;;  %v19584_v12 = vpop.permute.xlu1 %11439 }
0x1270   :  { %11169 = vmatpush1.bf16.msra.mxu1 %v14791_v56 }
0x1271   :  { %11170 = vmatprep.subr.bf16.mxu1 %v14796_v60  ;;  %v19592_v2 = vpop.permute.xlu0 %11573  ;;  %v19594_v1 = vpop.permute.xlu1 %11577  ;;  %v14826_v60 = vld [vmem:[%s20335_s20 + $0xe44] ss:$60 sps:$4 sm:$0xff]  }
0x1274   :  { %11171 = vmatpush1.bf16.msra.mxu1 %v14794_v28 }
0x1275   :  { %11172 = vmatprep.subr.bf16.mxu1 %v14799_v37  ;;  %v19602_v19 = vpop.permute.xlu0 %11711  ;;  %v19604_v18 = vpop.permute.xlu1 %11707 }
0x1276   :  { %v10852_v38 = vpop.f32.mrb[108].mxu1 }
0x1277   :  { %v10938_v51 = vpop.f32.mrb[20].mxu0  ;;  %v10854_v33 = vpop.f32.mrb[109].mxu1 }
0x1278   :  { %v10940_v14 = vpop.f32.mrb[21].mxu0  ;;  %v10856_v40 = vpop.f32.mrb[110].mxu1  ;;  %11173 = vmatpush1.bf16.msra.mxu1 %v14797_v7 }
0x1279   :  { %v19609_v21 = vpack.c.bf16 %v10856_v40, %v10852_v38  ;;  %v10942_v34 = vpop.f32.mrb[22].mxu0  ;;  %v10858_v26 = vpop.f32.mrb[111].mxu1  ;;  %11174 = vmatprep.subr.bf16.mxu1 %v14802_v6  ;;  %v14829_v6 = vld [vmem:[%s20335_s20 + $0xebc] ss:$60 sps:$4 sm:$0xff]  }
0x127a   :  { %v19614_v41 = vpack.c.bf16 %v10942_v34, %v10938_v51  ;;  %v10944_v59 = vpop.f32.mrb[23].mxu0  ;;  %v19616_v8 = vpack.c.bf16 %v10858_v26, %v10854_v33  ;;  %v11842_v29 = vpop.permute.xlu0 %11841  ;;  %v14827_v40 = vld [vmem:[%s20335_s20 + $0xeb8] ss:$60 sps:$4 sm:$0xff]  }
0x127b   :  { %v19618_v58 = vpack.c.bf16 %v10944_v59, %v10940_v14  ;;  %v19620_v10 = vpop.permute.xlu1 %11845  ;;  %11447 = vrot.lane.b32.xlu0 %v19609_v21, %s14922_s30 }
0x127c   :  { %11369 = vst [vmem:[#allocation6 + $0x30] sm:$0xff] %v19614_v41  ;;  %11175 = vmatpush1.bf16.msra.mxu1 %v14800_v11  ;;  %11449 = vrot.lane.b32.xlu1 %v19616_v8, %s14922_s30 }
0x127d   :  { %11176 = vmatprep.subr.bf16.mxu1 %v14805_v62 }
0x127e   :  { %v19633_v36 = vpop.permute.xlu0 %11979 }
0x127f   :  { %v19635_v16 = vpop.permute.xlu1 %11975  ;;  %11581 = vrot.lane.b32.xlu0 %v19609_v21, %s14926_s27 }
0x1280   :  { %11177 = vmatpush1.bf16.msra.mxu1 %v14803_v23  ;;  %11453 = vrot.lane.b32.xlu1 %v19618_v58, %s14922_s30 }
0x1281   :  { %11178 = vmatprep.subr.bf16.mxu1 %v14808_v20 }
0x1282   :  { %v12110_v15 = vpop.permute.xlu0 %12109 }
0x1283   :  { %v19647_v13 = vpop.permute.xlu1 %12113  ;;  %11715 = vrot.lane.b32.xlu0 %v19609_v21, %s20365_s29 }
0x1284   :  { %11179 = vmatpush1.bf16.msra.mxu1 %v14806_v44  ;;  %11583 = vrot.lane.b32.xlu1 %v19616_v8, %s14926_s27  ;;  %v12457_v44 = vld [vmem:[#allocation6 + $0x10] sm:$0xff] }
0x1285   :  { %11180 = vmatprep.subr.bf16.mxu1 %v14811_v0 }
0x1286   :  { %v19659_v22 = vpop.permute.xlu0 %12248 }
0x1287   :  { %v19661_v46 = vpop.permute.xlu1 %12244  ;;  %11849 = vrot.lane.b32.xlu0 %v19609_v21, %s20366_s5 }
0x1288   :  { %11181 = vmatpush1.bf16.msra.mxu1 %v14809_v25  ;;  %11587 = vrot.lane.b32.xlu1 %v19618_v58, %s14926_s27 }
0x1289   :  { %11182 = vmatprep.subr.bf16.mxu1 %v14814_v54 }
0x128a   :  { %v12380_v52 = vpop.permute.xlu0 %12379 }
0x128b   :  { %v19673_v27 = vpop.permute.xlu1 %12383  ;;  %11983 = vrot.lane.b32.xlu0 %v19609_v21, %s20364_s24 }
0x128c   :  { %11183 = vmatpush1.bf16.msra.mxu1 %v14812_v49  ;;  %11717 = vrot.lane.b32.xlu1 %v19616_v8, %s20365_s29 }
0x128d   :  { %11184 = vmatprep.subr.bf16.mxu1 %v14817_v9 }
0x128e   :  { %v11576_v57 = vpop.permute.xlu0 %11575 }
0x128f   :  { %v11603_v39 = vsel %vm1311_vm6, %v19592_v2, %v11576_v57  ;;  %v11604_v31 = vsel %vm1311_vm6, %v11576_v57, %v19594_v1  ;;  %v11442_v32 = vpop.permute.xlu1 %11441  ;;  %12117 = vrot.lane.b32.xlu0 %v19609_v21, %s14945_s1  ;;  %v14824_v2 = vld [vmem:[%s20335_s20 + $0xe40] ss:$60 sps:$4 sm:$0xff]  }
0x1290   :  { %11185 = vmatpush1.bf16.msra.mxu1 %v14815_v53  ;;  %v11469_v24 = vsel %vm1174_vm5, %v19584_v12, %v11442_v32  ;;  %v11470_v5 = vsel %vm1174_vm5, %v11442_v32, %v19582_v61  ;;  %11721 = vrot.lane.b32.xlu1 %v19618_v58, %s20365_s29 }
0x1291   :  { %11186 = vmatprep.subr.bf16.mxu1 %v14820_v43  ;;  %12602 = vmatprep.subr.bf16.mxu0 %v11470_v5 }
0x1292   :  { %v11844_v45 = vpop.permute.xlu0 %11843  ;;  %12603 = vmatpush1.bf16.msra.mxu0 %v11469_v24 }
0x1293   :  { %v11871_v63 = vsel %vm2818_vm0, %v11842_v29, %v11844_v45  ;;  %v11872_v47 = vsel %vm2818_vm0, %v11844_v45, %v19620_v10  ;;  %v11710_v55 = vpop.permute.xlu1 %11709  ;;  %12252 = vrot.lane.b32.xlu0 %v19609_v21, %s14946_s26  ;;  %12604 = vmatprep.subr.bf16.mxu0 %v11604_v31 }
0x1294   :  { %11187 = vmatpush1.bf16.msra.mxu1 %v14818_v17  ;;  %v11737_v35 = vsel %vm2681_vm15, %v19604_v18, %v11710_v55  ;;  %v11738_v56 = vsel %vm2681_vm15, %v11710_v55, %v19602_v19  ;;  %11851 = vrot.lane.b32.xlu1 %v19616_v8, %s20366_s5 }
0x1295   :  { %11188 = vmatprep.subr.bf16.mxu1 %v14823_v50 }
0x1296   :  { %v12112_v12 = vpop.permute.xlu0 %12111  ;;  %12605 = vmatpush1.bf16.msra.mxu0 %v11603_v39 }
0x1297   :  { %v12140_v28 = vsel %vm12139_vm7, %v12110_v15, %v12112_v12  ;;  %v12141_v37 = vsel %vm12139_vm7, %v12112_v12, %v19647_v13  ;;  %12387 = vrot.lane.b32.xlu0 %v19609_v21, %s14947_s14  ;;  %12606 = vmatprep.subr.bf16.mxu0 %v11738_v56 }
0x1298   :  { %11189 = vmatpush1.bf16.msra.mxu1 %v14821_v4  ;;  %11855 = vrot.lane.b32.xlu1 %v19618_v58, %s20366_s5 }
0x1299   :  { %11190 = vmatprep.subr.bf16.mxu1 %v14826_v60  ;;  %v11978_v7 = vpop.permute.xlu1 %11977 }
0x129a   :  { %v12005_v18 = vsel %vm2955_vm3, %v19635_v16, %v11978_v7  ;;  %v12006_v38 = vsel %vm2955_vm3, %v11978_v7, %v19633_v36  ;;  %v12382_v51 = vpop.permute.xlu0 %12381  ;;  %12607 = vmatpush1.bf16.msra.mxu0 %v11737_v35  ;;  %v12458_v16 = vld [vmem:[#allocation6 + $0x18] sm:$0xff] }
0x129b   :  { %v12410_v33 = vsel %vm12409_vm11, %v12380_v52, %v12382_v51  ;;  %v12411_v14 = vsel %vm12409_vm11, %v12382_v51, %v19673_v27  ;;  %11451 = vrot.lane.b32.xlu0 %v19614_v41, %s14922_s30  ;;  %12608 = vmatprep.subr.bf16.mxu0 %v11872_v47 }
0x129c   :  { %11191 = vmatpush1.bf16.msra.mxu1 %v14824_v2  ;;  %11985 = vrot.lane.b32.xlu1 %v19616_v8, %s20364_s24 }
0x129d   :  { %11192 = vmatprep.subr.bf16.mxu1 %v14829_v6  ;;  %v12247_v11 = vpop.permute.xlu1 %12246 }
0x129e   :  { %v12275_v34 = vsel %vm12274_vm4, %v19661_v46, %v12247_v11  ;;  %v12276_v26 = vsel %vm12274_vm4, %v12247_v11, %v19659_v22  ;;  %12609 = vmatpush1.bf16.msra.mxu0 %v11871_v63 }
0x129f   :  { %11585 = vrot.lane.b32.xlu0 %v19614_v41, %s14926_s27  ;;  %12610 = vmatprep.subr.bf16.mxu0 %v12006_v38 }
0x12a0   :  { %11193 = vmatpush1.bf16.msra.mxu1 %v14827_v40  ;;  %11989 = vrot.lane.b32.xlu1 %v19618_v58, %s20364_s24 }
0x12a1   :  { %12682 = vmatprep.subr.bf16.mxu1 %v19616_v8  ;;  %v11446_v62 = vpop.permute.xlu1 %11445 }
0x12a2   :  { %v11471_v59 = vsel %vm1174_vm5, %v19582_v61, %v11446_v62  ;;  %12611 = vmatpush1.bf16.msra.mxu0 %v12005_v18 }
0x12a3   :  { %11195 = vmatmul.mubr.bf16.vlgmr.msra.gmra.mrb[116].mxu1 %v18287_v30  ;;  %11719 = vrot.lane.b32.xlu0 %v19614_v41, %s20365_s29 }
0x12a4   :  { %12683 = vmatpush1.bf16.msra.mxu1 %v19609_v21  ;;  %12119 = vrot.lane.b32.xlu1 %v19616_v8, %s14945_s1  ;;  %v19780_v21 = vcombine.low %v19545_v48, %v19545_v48 }
0x12a5   :  { %v11580_v29 = vpop.permute.xlu1 %11579  ;;  %12612 = vmatprep.subr.bf16.mxu0 %v12141_v37  ;;  %13650 = vmatprep.mubr.msk.bf16.mxu1 %vm12596_vm1, %v19556_v42 }
0x12a6   :  { %v11605_v23 = vsel %vm1311_vm6, %v19594_v1, %v11580_v29  ;;  %12613 = vmatpush1.bf16.msra.mxu0 %v12140_v28 }
0x12a7   :  { %11853 = vrot.lane.b32.xlu0 %v19614_v41, %s20366_s5  ;;  %12614 = vmatprep.subr.bf16.mxu0 %v12276_v26 }
0x12a8   :  { %12123 = vrot.lane.b32.xlu1 %v19618_v58, %s14945_s1 }
0x12a9   :  { %v11714_v30 = vpop.permute.xlu1 %11713 }
0x12aa   :  { %v11739_v61 = vsel %vm2681_vm15, %v19602_v19, %v11714_v30  ;;  %12615 = vmatpush1.bf16.msra.mxu0 %v12275_v34 }
0x12ab   :  { %11987 = vrot.lane.b32.xlu0 %v19614_v41, %s20364_s24  ;;  %12616 = vmatprep.subr.bf16.mxu0 %v12411_v14 }
0x12ac   :  { %12254 = vrot.lane.b32.xlu1 %v19616_v8, %s14946_s26 }
0x12ad   :  { %v11848_v1 = vpop.permute.xlu1 %11847 }
0x12ae   :  { %v11873_v20 = vsel %vm2818_vm0, %v19620_v10, %v11848_v1  ;;  %12617 = vmatpush1.bf16.msra.mxu0 %v12410_v33 }
0x12af   :  { %12121 = vrot.lane.b32.xlu0 %v19614_v41, %s14945_s1  ;;  %12641 = vmatprep.subr.bf16.mxu0 %v12458_v16 }
0x12b0   :  { %12258 = vrot.lane.b32.xlu1 %v19618_v58, %s14946_s26 }
0x12b1   :  { %v11982_v19 = vpop.permute.xlu1 %11981  ;;  %12633 = vmatmul.mubr.bf16.vlgmr.msra.gmra.mrb[36].mxu0 %v19780_v21 }
0x12b2   :  { %v12007_v48 = vsel %vm2955_vm3, %v19633_v36, %v11982_v19  ;;  %12642 = vmatpush1.bf16.msra.mxu0 %v12457_v44  ;;  %13649 = vmatprep.mubr.msk.bf16.mxu0 %vm12596_vm1, %v19556_v42 }
0x12b3   :  { %12256 = vrot.lane.b32.xlu0 %v19614_v41, %s14946_s26 }
0x12b4   :  { %12389 = vrot.lane.b32.xlu1 %v19616_v8, %s14947_s14 }
0x12b5   :  { %v12116_v10 = vpop.permute.xlu1 %12115 }
0x12b6   :  { %v12142_v0 = vsel %vm12139_vm7, %v19647_v13, %v12116_v10 }
0x12b7   :  { %12391 = vrot.lane.b32.xlu0 %v19614_v41, %s14947_s14 }
0x12b8   :  { %12393 = vrot.lane.b32.xlu1 %v19618_v58, %s14947_s14 }
0x12b9   :  { %v12251_v36 = vpop.permute.xlu1 %12250 }
0x12ba   :  { %v12277_v15 = vsel %vm12274_vm4, %v19659_v22, %v12251_v36 }
0x12bd   :  { %v19805_v25 = vpop.permute.xlu1 %12385 }
0x12be   :  { %v19810_v8 = vsel %vm12409_vm11, %v19673_v27, %v19805_v25 }
0x12ed   :  { %v11448_v54 = vpop.permute.xlu0 %11447 }
0x12ee   :  { %v11472_v13 = vsel %vm1174_vm5, %v11446_v62, %v11448_v54  ;;  %v19813_v46 = vpop.permute.xlu1 %11449 }
0x12ef   :  { %v19817_v41 = vsel %vm1174_vm5, %v11448_v54, %v19813_v46  ;;  %12643 = vmatprep.subr.bf16.mxu0 %v11472_v13 }
0x12f0   :  { %12644 = vmatpush1.bf16.msra.mxu0 %v11471_v59 }
0x12f1   :  { %v11582_v49 = vpop.permute.xlu0 %11581 }
0x12f2   :  { %v11606_v22 = vsel %vm1311_vm6, %v11580_v29, %v11582_v49  ;;  %v19820_v9 = vpop.permute.xlu1 %11453 }
0x12f3   :  { %12645 = vmatprep.subr.bf16.mxu0 %v11606_v22 }
0x12f4   :  { %12646 = vmatpush1.bf16.msra.mxu0 %v11605_v23 }
0x12f5   :  { %v11716_v52 = vpop.permute.xlu0 %11715 }
0x12f6   :  { %v11024_v27 = vpop.f32.mrb[112].mxu1  ;;  %v11740_v53 = vsel %vm2681_vm15, %v11714_v30, %v11716_v52  ;;  %v19823_v43 = vpop.permute.xlu1 %11583 }
0x12f7   :  { %v11110_v57 = vpop.f32.mrb[24].mxu0  ;;  %v11026_v39 = vpop.f32.mrb[113].mxu1  ;;  %v19827_v31 = vsel %vm1311_vm6, %v11582_v49, %v19823_v43  ;;  %12647 = vmatprep.subr.bf16.mxu0 %v11740_v53 }
0x12f8   :  { %v11112_v32 = vpop.f32.mrb[25].mxu0  ;;  %v11028_v17 = vpop.f32.mrb[114].mxu1  ;;  %12648 = vmatpush1.bf16.msra.mxu0 %v11739_v61 }
0x12f9   :  { %v19829_v24 = vpack.c.bf16 %v11028_v17, %v11024_v27  ;;  %v11114_v5 = vpop.f32.mrb[26].mxu0  ;;  %v11030_v50 = vpop.f32.mrb[115].mxu1 }
0x12fa   :  { %v19831_v45 = vpack.c.bf16 %v11114_v5, %v11110_v57  ;;  %v11116_v63 = vpop.f32.mrb[27].mxu0  ;;  %v19833_v47 = vpack.c.bf16 %v11030_v50, %v11026_v39  ;;  %v11850_v55 = vpop.permute.xlu0 %11849 }
0x12fb   :  { %v19835_v4 = vpack.c.bf16 %v11116_v63, %v11112_v32  ;;  %v11874_v35 = vsel %vm2818_vm0, %v11848_v1, %v11850_v55  ;;  %v19838_v56 = vpop.permute.xlu1 %11587  ;;  %11455 = vrot.lane.b32.xlu0 %v19829_v24, %s14922_s30 }
0x12fc   :  { %11457 = vrot.lane.b32.xlu1 %v19833_v47, %s14922_s30  ;;  %12649 = vmatprep.subr.bf16.mxu0 %v11874_v35 }
0x12fd   :  { %12650 = vmatpush1.bf16.msra.mxu0 %v11873_v20 }
0x12fe   :  { %v11984_v60 = vpop.permute.xlu0 %11983 }
0x12ff   :  { %v12008_v12 = vsel %vm2955_vm3, %v11982_v19, %v11984_v60  ;;  %v11718_v28 = vpop.permute.xlu1 %11717  ;;  %11589 = vrot.lane.b32.xlu0 %v19829_v24, %s14926_s27 }
0x1300   :  { %v11741_v37 = vsel %vm2681_vm15, %v11716_v52, %v11718_v28  ;;  %11461 = vrot.lane.b32.xlu1 %v19835_v4, %s14922_s30  ;;  %12651 = vmatprep.subr.bf16.mxu0 %v12008_v12 }
0x1301   :  { %12652 = vmatpush1.bf16.msra.mxu0 %v12007_v48 }
0x1302   :  { %v12118_v2 = vpop.permute.xlu0 %12117 }
0x1303   :  { %v12143_v7 = vsel %vm12139_vm7, %v12116_v10, %v12118_v2  ;;  %v19851_v6 = vpop.permute.xlu1 %11721  ;;  %11723 = vrot.lane.b32.xlu0 %v19829_v24, %s20365_s29 }
0x1304   :  { %11591 = vrot.lane.b32.xlu1 %v19833_v47, %s14926_s27  ;;  %12653 = vmatprep.subr.bf16.mxu0 %v12143_v7 }
0x1305   :  { %12654 = vmatpush1.bf16.msra.mxu0 %v12142_v0 }
0x1306   :  { %v19857_v18 = vpop.permute.xlu0 %12252 }
0x1307   :  { %v12278_v38 = vsel %vm12274_vm4, %v12251_v36, %v19857_v18  ;;  %v11852_v51 = vpop.permute.xlu1 %11851  ;;  %11857 = vrot.lane.b32.xlu0 %v19829_v24, %s20366_s5 }
0x1308   :  { %v11875_v33 = vsel %vm2818_vm0, %v11850_v55, %v11852_v51  ;;  %11595 = vrot.lane.b32.xlu1 %v19835_v4, %s14926_s27  ;;  %12655 = vmatprep.subr.bf16.mxu0 %v12278_v38 }
0x1309   :  { %12656 = vmatpush1.bf16.msra.mxu0 %v12277_v15 }
0x130a   :  { %v19866_v14 = vpop.permute.xlu0 %12387 }
0x130b   :  { %v12413_v40 = vsel %vm12409_vm11, %v19805_v25, %v19866_v14  ;;  %v19871_v11 = vpop.permute.xlu1 %11855  ;;  %11991 = vrot.lane.b32.xlu0 %v19829_v24, %s20364_s24 }
0x130c   :  { %11725 = vrot.lane.b32.xlu1 %v19833_v47, %s20365_s29  ;;  %12657 = vmatprep.subr.bf16.mxu0 %v12413_v40 }
0x130d   :  { %12658 = vmatpush1.bf16.msra.mxu0 %v19810_v8 }
0x130e   :  { %v11452_v34 = vpop.permute.xlu0 %11451  ;;  %12723 = vmatprep.subr.bf16.mxu0 %v19618_v58  ;;  %v12461_v58 = vld [vmem:[#allocation6 + $0x30] sm:$0xff] }
0x130f   :  { %v11474_v26 = vsel %vm1174_vm5, %v19813_v46, %v11452_v34  ;;  %v19883_v62 = vsel %vm1174_vm5, %v11452_v34, %v19820_v9  ;;  %v11986_v59 = vpop.permute.xlu1 %11985  ;;  %12125 = vrot.lane.b32.xlu0 %v19829_v24, %s14945_s1 }
0x1310   :  { %v12009_v29 = vsel %vm2955_vm3, %v11984_v60, %v11986_v59  ;;  %11729 = vrot.lane.b32.xlu1 %v19835_v4, %s20365_s29  ;;  %12684 = vmatprep.subr.bf16.mxu1 %v11474_v26 }
0x1311   :  { %12674 = vmatmul.mubr.bf16.vlgmr.msra.gmra.mrb[40].mxu0 %v19780_v21  ;;  %12685 = vmatpush1.bf16.msra.mxu1 %v19817_v41 }
0x1312   :  { %v11586_v23 = vpop.permute.xlu0 %11585  ;;  %12724 = vmatpush1.bf16.msra.mxu0 %v12461_v58  ;;  %13651 = vmatprep.mubr.msk.bf16.mxu0 %vm12596_vm1, %v19556_v42 }
0x1313   :  { %v11608_v30 = vsel %vm1311_vm6, %v19823_v43, %v11586_v23  ;;  %v19898_v61 = vsel %vm1311_vm6, %v11586_v23, %v19838_v56  ;;  %v19900_v1 = vpop.permute.xlu1 %11989  ;;  %12260 = vrot.lane.b32.xlu0 %v19829_v24, %s14946_s26 }
0x1314   :  { %11859 = vrot.lane.b32.xlu1 %v19833_v47, %s20366_s5  ;;  %12686 = vmatprep.subr.bf16.mxu1 %v11608_v30 }
0x1315   :  { %12687 = vmatpush1.bf16.msra.mxu1 %v19827_v31 }
0x1316   :  { %v11720_v20 = vpop.permute.xlu0 %11719 }
0x1317   :  { %v13731_v16 = vpop.f32.mrb[28].mxu0  ;;  %v11742_v19 = vsel %vm2681_vm15, %v11718_v28, %v11720_v20  ;;  %v19910_v44 = vsel %vm2681_vm15, %v11720_v20, %v19851_v6  ;;  %v12120_v48 = vpop.permute.xlu1 %12119  ;;  %12395 = vrot.lane.b32.xlu0 %v19829_v24, %s14947_s14 }
0x1318   :  { %v13732_v10 = vpop.f32.mrb[29].mxu0  ;;  %v12144_v0 = vsel %vm12139_vm7, %v12118_v2, %v12120_v48  ;;  %11863 = vrot.lane.b32.xlu1 %v19835_v4, %s20366_s5  ;;  %12688 = vmatprep.subr.bf16.mxu1 %v11742_v19 }
0x1319   :  { %v19917_v36 = vadd.f32 %v13732_v10, %v13731_v16  ;;  %v13734_v15 = vpop.f32.mrb[30].mxu0  ;;  %12689 = vmatpush1.bf16.msra.mxu1 %v11741_v37 }
0x131a   :  { %v13735_v25 = vpop.f32.mrb[31].mxu0  ;;  %v11854_v8 = vpop.permute.xlu0 %11853 }
0x131b   :  { %v13736_v54 = vadd.f32 %v13735_v25, %v13734_v15  ;;  %v11876_v13 = vsel %vm2818_vm0, %v11852_v51, %v11854_v8  ;;  %v19922_v46 = vsel %vm2818_vm0, %v11854_v8, %v19871_v11  ;;  %v19924_v41 = vpop.permute.xlu1 %12123  ;;  %11459 = vrot.lane.b32.xlu0 %v19831_v45, %s14922_s30 }
0x131c   :  { %11993 = vrot.lane.b32.xlu1 %v19833_v47, %s20364_s24  ;;  %12690 = vmatprep.subr.bf16.mxu1 %v11876_v13 }
0x131d   :  { %12691 = vmatpush1.bf16.msra.mxu1 %v11875_v33 }
0x131e   :  { %v11988_v49 = vpop.permute.xlu0 %11987 }
0x131f   :  { %v12010_v22 = vsel %vm2955_vm3, %v11986_v59, %v11988_v49  ;;  %v19933_v52 = vsel %vm2955_vm3, %v11988_v49, %v19900_v1  ;;  %v12255_v27 = vpop.permute.xlu1 %12254  ;;  %11593 = vrot.lane.b32.xlu0 %v19831_v45, %s14926_s27 }
0x1320   :  { %v12279_v53 = vsel %vm12274_vm4, %v19857_v18, %v12255_v27  ;;  %11997 = vrot.lane.b32.xlu1 %v19835_v4, %s20364_s24  ;;  %12692 = vmatprep.subr.bf16.mxu1 %v12010_v22 }
0x1321   :  { %12693 = vmatpush1.bf16.msra.mxu1 %v12009_v29 }
0x1322   :  { %v12122_v43 = vpop.permute.xlu0 %12121 }
0x1323   :  { %v12145_v57 = vsel %vm12139_vm7, %v12120_v48, %v12122_v43  ;;  %v19944_v39 = vsel %vm12139_vm7, %v12122_v43, %v19924_v41  ;;  %v19946_v31 = vpop.permute.xlu1 %12258  ;;  %11727 = vrot.lane.b32.xlu0 %v19831_v45, %s20365_s29 }
0x1324   :  { %12127 = vrot.lane.b32.xlu1 %v19833_v47, %s14945_s1  ;;  %12694 = vmatprep.subr.bf16.mxu1 %v12145_v57 }
0x1325   :  { %12695 = vmatpush1.bf16.msra.mxu1 %v12144_v0 }
0x1326   :  { %v12257_v32 = vpop.permute.xlu0 %12256 }
0x1327   :  { %v12280_v17 = vsel %vm12274_vm4, %v12255_v27, %v12257_v32  ;;  %v19955_v5 = vsel %vm12274_vm4, %v12257_v32, %v19946_v31  ;;  %v12390_v50 = vpop.permute.xlu1 %12389  ;;  %11861 = vrot.lane.b32.xlu0 %v19831_v45, %s20366_s5 }
0x1328   :  { %v12414_v63 = vsel %vm12409_vm11, %v19866_v14, %v12390_v50  ;;  %12131 = vrot.lane.b32.xlu1 %v19835_v4, %s14945_s1  ;;  %12696 = vmatprep.subr.bf16.mxu1 %v12280_v17 }
0x1329   :  { %12697 = vmatpush1.bf16.msra.mxu1 %v12279_v53 }
0x132a   :  { %v12392_v55 = vpop.permute.xlu0 %12391 }
0x132b   :  { %v12415_v35 = vsel %vm12409_vm11, %v12390_v50, %v12392_v55  ;;  %v19964_v60 = vpop.permute.xlu1 %12393  ;;  %11995 = vrot.lane.b32.xlu0 %v19831_v45, %s20364_s24 }
0x132c   :  { %v19970_v12 = vsel %vm12409_vm11, %v12392_v55, %v19964_v60  ;;  %12262 = vrot.lane.b32.xlu1 %v19833_v47, %s14946_s26  ;;  %12698 = vmatprep.subr.bf16.mxu1 %v12415_v35 }
0x132d   :  { %12699 = vmatpush1.bf16.msra.mxu1 %v12414_v63 }
0x132e   :  { %12764 = vmatprep.subr.bf16.mxu1 %v19833_v47 }
0x132f   :  { %12129 = vrot.lane.b32.xlu0 %v19831_v45, %s14945_s1 }
0x1330   :  { %12266 = vrot.lane.b32.xlu1 %v19835_v4, %s14946_s26  ;;  %12715 = vmatmul.mubr.bf16.vlgmr.msra.gmra.mrb[120].mxu1 %v19780_v21 }
0x1331   :  { %12765 = vmatpush1.bf16.msra.mxu1 %v19829_v24  ;;  %13652 = vmatprep.mubr.msk.bf16.mxu1 %vm12596_vm1, %v19556_v42 }
0x1333   :  { %12264 = vrot.lane.b32.xlu0 %v19831_v45, %s14946_s26 }
0x1334   :  { %12397 = vrot.lane.b32.xlu1 %v19833_v47, %s14947_s14 }
0x1337   :  { %v13753_v28 = vpop.f32.mrb[32].mxu0  ;;  %12399 = vrot.lane.b32.xlu0 %v19831_v45, %s14947_s14 }
0x1338   :  { %v13754_v37 = vpop.f32.mrb[33].mxu0  ;;  %12401 = vrot.lane.b32.xlu1 %v19835_v4, %s14947_s14 }
0x1339   :  { %v13755_v2 = vadd.f32 %v13754_v37, %v13753_v28  ;;  %v13756_v7 = vpop.f32.mrb[34].mxu0 }
0x133a   :  { %v13757_v24 = vpop.f32.mrb[35].mxu0 }
0x133b   :  { %v11281_v18 = vadd.f32 %v13755_v2, %v19917_v36  ;;  %v13758_v38 = vadd.f32 %v13757_v24, %v13756_v7 }
0x133d   :  { %11302 = vst.msk [vmem:[#allocation10 + $0x70] sm:$0xff] %vm11301_vm13, %v11281_v18  ;;  %v11284_v51 = vadd.f32 %v13758_v38, %v13736_v54 }
0x133f   :  { %11317 = vst.msk [vmem:[#allocation10 + $0xe8] sm:$0xff] %vm11301_vm13, %v11284_v51 }
0x1344   :  { %v11332_v33 = vld [vmem:[#allocation10 + $0x70] sm:$0xff] }
0x1346   :  { %v11347_v47 = vld [vmem:[#allocation10 + $0xe8] sm:$0xff] }
0x1347   :  { %v19992_v14 = vpack.c.bf16 %v11347_v47, %v11332_v33 }
0x1349   :  { %11378 = vst.msk [vmem:[#allocation6 + $0x70] sm:$0xff] %vm11377_vm8, %v19992_v14 }
0x136d   :  { %v11456_v40 = vpop.permute.xlu0 %11455 }
0x136e   :  { %v11476_v34 = vsel %vm1174_vm5, %v19820_v9, %v11456_v40  ;;  %v11458_v26 = vpop.permute.xlu1 %11457 }
0x136f   :  { %v19999_v59 = vsel %vm1174_vm5, %v11456_v40, %v11458_v26  ;;  %12725 = vmatprep.subr.bf16.mxu0 %v11476_v34 }
0x1370   :  { %12726 = vmatpush1.bf16.msra.mxu0 %v19883_v62 }
0x1371   :  { %v11590_v29 = vpop.permute.xlu0 %11589 }
0x1372   :  { %v11610_v58 = vsel %vm1311_vm6, %v19838_v56, %v11590_v29  ;;  %v20004_v23 = vpop.permute.xlu1 %11461 }
0x1373   :  { %12727 = vmatprep.subr.bf16.mxu0 %v11610_v58 }
0x1374   :  { %12728 = vmatpush1.bf16.msra.mxu0 %v19898_v61 }
0x1375   :  { %v11724_v30 = vpop.permute.xlu0 %11723 }
0x1376   :  { %v11196_v20 = vpop.f32.mrb[116].mxu1  ;;  %v11744_v9 = vsel %vm2681_vm15, %v19851_v6, %v11724_v30  ;;  %v11592_v16 = vpop.permute.xlu1 %11591 }
0x1377   :  { %v11198_v19 = vpop.f32.mrb[117].mxu1  ;;  %v20010_v48 = vsel %vm1311_vm6, %v11590_v29, %v11592_v16  ;;  %12729 = vmatprep.subr.bf16.mxu0 %v11744_v9 }
0x1378   :  { %v11200_v62 = vpop.f32.mrb[118].mxu1  ;;  %12730 = vmatpush1.bf16.msra.mxu0 %v19910_v44 }
0x1379   :  { %v20013_v56 = vpack.c.bf16 %v11200_v62, %v11196_v20  ;;  %v11202_v10 = vpop.f32.mrb[119].mxu1  ;;  %v11858_v0 = vpop.permute.xlu0 %11857 }
0x137a   :  { %v20015_v36 = vpack.c.bf16 %v11202_v10, %v11198_v19  ;;  %v11878_v61 = vsel %vm2818_vm0, %v19871_v11, %v11858_v0  ;;  %v20019_v15 = vpop.permute.xlu1 %11595 }
0x137b   :  { %11463 = vrot.lane.b32.xlu0 %v20013_v56, %s14922_s30  ;;  %12731 = vmatprep.subr.bf16.mxu0 %v11878_v61 }
0x137c   :  { %11465 = vrot.lane.b32.xlu1 %v20015_v36, %s14922_s30  ;;  %12732 = vmatpush1.bf16.msra.mxu0 %v19922_v46 }
0x137d   :  { %v11992_v6 = vpop.permute.xlu0 %11991 }
0x137e   :  { %v12012_v44 = vsel %vm2955_vm3, %v19900_v1, %v11992_v6  ;;  %v11726_v25 = vpop.permute.xlu1 %11725 }
0x137f   :  { %v11745_v8 = vsel %vm2681_vm15, %v11724_v30, %v11726_v25  ;;  %11597 = vrot.lane.b32.xlu0 %v20013_v56, %s14926_s27  ;;  %12733 = vmatprep.subr.bf16.mxu0 %v12012_v44 }
0x1380   :  { %11599 = vrot.lane.b32.xlu1 %v20015_v36, %s14926_s27  ;;  %12734 = vmatpush1.bf16.msra.mxu0 %v19933_v52 }
0x1381   :  { %v12126_v11 = vpop.permute.xlu0 %12125 }
0x1382   :  { %v12147_v54 = vsel %vm12139_vm7, %v19924_v41, %v12126_v11  ;;  %v20036_v13 = vpop.permute.xlu1 %11729 }
0x1383   :  { %11731 = vrot.lane.b32.xlu0 %v20013_v56, %s20365_s29  ;;  %12735 = vmatprep.subr.bf16.mxu0 %v12147_v54 }
0x1384   :  { %11733 = vrot.lane.b32.xlu1 %v20015_v36, %s20365_s29  ;;  %12736 = vmatpush1.bf16.msra.mxu0 %v19944_v39  ;;  %v12634_v19 = vpop.f32.mrb[36].mxu0 }
0x1385   :  { %v12261_v1 = vpop.permute.xlu0 %12260  ;;  %14892 = vtanh.f32 %v12634_v19 }
0x1386   :  { %v12282_v46 = vsel %vm12274_vm4, %v19946_v31, %v12261_v1  ;;  %v11860_v49 = vpop.permute.xlu1 %11859 }
0x1387   :  { %v11879_v22 = vsel %vm2818_vm0, %v11858_v0, %v11860_v49  ;;  %11865 = vrot.lane.b32.xlu0 %v20013_v56, %s20366_s5  ;;  %12737 = vmatprep.subr.bf16.mxu0 %v12282_v46 }
0x1388   :  { %11867 = vrot.lane.b32.xlu1 %v20015_v36, %s20366_s5  ;;  %12738 = vmatpush1.bf16.msra.mxu0 %v19955_v5 }
0x1389   :  { %v20051_v41 = vpop.permute.xlu0 %12395 }
0x138a   :  { %v12417_v52 = vsel %vm12409_vm11, %v19964_v60, %v20051_v41  ;;  %v20056_v27 = vpop.permute.xlu1 %11863 }
0x138b   :  { %11999 = vrot.lane.b32.xlu0 %v20013_v56, %s20364_s24  ;;  %12739 = vmatprep.subr.bf16.mxu0 %v12417_v52 }
0x138c   :  { %12001 = vrot.lane.b32.xlu1 %v20015_v36, %s20364_s24  ;;  %12740 = vmatpush1.bf16.msra.mxu0 %v19970_v12 }
0x138d   :  { %v11460_v53 = vpop.permute.xlu0 %11459  ;;  %12805 = vmatprep.subr.bf16.mxu0 %v19835_v4 }
0x138e   :  { %v11478_v43 = vsel %vm1174_vm5, %v11458_v26, %v11460_v53  ;;  %v20067_v57 = vsel %vm1174_vm5, %v11460_v53, %v20004_v23  ;;  %v11994_v39 = vpop.permute.xlu1 %11993 }
0x138f   :  { %v12013_v31 = vsel %vm2955_vm3, %v11992_v6, %v11994_v39  ;;  %12133 = vrot.lane.b32.xlu0 %v20013_v56, %s14945_s1  ;;  %12766 = vmatprep.subr.bf16.mxu1 %v11478_v43  ;;  %v14893_v0 = vpop.eup %14892 }
0x1390   :  { %12135 = vrot.lane.b32.xlu1 %v20015_v36, %s14945_s1  ;;  %12756 = vmatmul.mubr.bf16.vlgmr.msra.gmra.mrb[44].mxu0 %v19780_v21  ;;  %12942 = vst [vmem:[%s20338_s22] sm:$0xff] %v14893_v0 }
0x1391   :  { %v11594_v32 = vpop.permute.xlu0 %11593  ;;  %12767 = vmatpush1.bf16.msra.mxu1 %v19999_v59  ;;  %12806 = vmatpush1.bf16.msra.mxu0 %v19831_v45 }
0x1392   :  { %v11612_v4 = vsel %vm1311_vm6, %v11592_v16, %v11594_v32  ;;  %v20080_v17 = vsel %vm1311_vm6, %v11594_v32, %v20019_v15  ;;  %v20082_v5 = vpop.permute.xlu1 %11997  ;;  %13653 = vmatprep.mubr.msk.bf16.mxu0 %vm12596_vm1, %v19556_v42 }
0x1393   :  { %12268 = vrot.lane.b32.xlu0 %v20013_v56, %s14946_s26  ;;  %12768 = vmatprep.subr.bf16.mxu1 %v11612_v4 }
0x1394   :  { %12270 = vrot.lane.b32.xlu1 %v20015_v36, %s14946_s26 }
0x1395   :  { %v11728_v50 = vpop.permute.xlu0 %11727  ;;  %12769 = vmatpush1.bf16.msra.mxu1 %v20010_v48  ;;  %v12636_v48 = vpop.f32.mrb[37].mxu0 }
0x1396   :  { %v11746_v45 = vsel %vm2681_vm15, %v11726_v25, %v11728_v50  ;;  %v20094_v63 = vsel %vm2681_vm15, %v11728_v50, %v20036_v13  ;;  %v12128_v55 = vpop.permute.xlu1 %12127  ;;  %14894 = vtanh.f32 %v12636_v48  ;;  %v12638_v62 = vpop.f32.mrb[38].mxu0 }
0x1397   :  { %v12148_v35 = vsel %vm12139_vm7, %v12126_v11, %v12128_v55  ;;  %12403 = vrot.lane.b32.xlu0 %v20013_v56, %s14947_s14  ;;  %12770 = vmatprep.subr.bf16.mxu1 %v11746_v45  ;;  %v12639_v10 = vpop.f32.mrb[39].mxu0 }
0x1398   :  { %12405 = vrot.lane.b32.xlu1 %v20015_v36, %s14947_s14 }
0x1399   :  { %v11862_v60 = vpop.permute.xlu0 %11861  ;;  %12771 = vmatpush1.bf16.msra.mxu1 %v11745_v8 }
0x139a   :  { %v11880_v12 = vsel %vm2818_vm0, %v11860_v49, %v11862_v60  ;;  %v20104_v28 = vsel %vm2818_vm0, %v11862_v60, %v20056_v27  ;;  %v20106_v37 = vpop.permute.xlu1 %12131 }
0x139b   :  { %11467 = vrot.lane.b32.xlu0 %v19992_v14, %s14922_s30  ;;  %12772 = vmatprep.subr.bf16.mxu1 %v11880_v12 }
0x139d   :  { %v11996_v2 = vpop.permute.xlu0 %11995  ;;  %12773 = vmatpush1.bf16.msra.mxu1 %v11879_v22 }
0x139e   :  { %v12014_v7 = vsel %vm2955_vm3, %v11994_v39, %v11996_v2  ;;  %v20113_v24 = vsel %vm2955_vm3, %v11996_v2, %v20082_v5  ;;  %v12263_v18 = vpop.permute.xlu1 %12262 }
0x139f   :  { %v12283_v38 = vsel %vm12274_vm4, %v12261_v1, %v12263_v18  ;;  %11601 = vrot.lane.b32.xlu0 %v19992_v14, %s14926_s27  ;;  %12774 = vmatprep.subr.bf16.mxu1 %v12014_v7 }
0x13a1   :  { %v12130_v51 = vpop.permute.xlu0 %12129  ;;  %12775 = vmatpush1.bf16.msra.mxu1 %v12013_v31 }
0x13a2   :  { %v12149_v33 = vsel %vm12139_vm7, %v12128_v55, %v12130_v51  ;;  %v20121_v47 = vsel %vm12139_vm7, %v12130_v51, %v20106_v37  ;;  %v20123_v40 = vpop.permute.xlu1 %12266 }
0x13a3   :  { %11735 = vrot.lane.b32.xlu0 %v19992_v14, %s20365_s29  ;;  %12776 = vmatprep.subr.bf16.mxu1 %v12149_v33 }
0x13a5   :  { %v12265_v34 = vpop.permute.xlu0 %12264  ;;  %12777 = vmatpush1.bf16.msra.mxu1 %v12148_v35 }
0x13a6   :  { %v12284_v26 = vsel %vm12274_vm4, %v12263_v18, %v12265_v34  ;;  %v20130_v59 = vsel %vm12274_vm4, %v12265_v34, %v20123_v40  ;;  %v12398_v29 = vpop.permute.xlu1 %12397  ;;  %v12469_v34 = vld [vmem:[#allocation6 + $0x70] sm:$0xff] }
0x13a7   :  { %v12418_v58 = vsel %vm12409_vm11, %v20051_v41, %v12398_v29  ;;  %11869 = vrot.lane.b32.xlu0 %v19992_v14, %s20366_s5  ;;  %12778 = vmatprep.subr.bf16.mxu1 %v12284_v26 }
0x13a9   :  { %v12400_v30 = vpop.permute.xlu0 %12399  ;;  %12779 = vmatpush1.bf16.msra.mxu1 %v12283_v38 }
0x13aa   :  { %v12419_v20 = vsel %vm12409_vm11, %v12398_v29, %v12400_v30  ;;  %v20137_v9 = vpop.permute.xlu1 %12401 }
0x13ab   :  { %v20141_v16 = vsel %vm12409_vm11, %v12400_v30, %v20137_v9  ;;  %12003 = vrot.lane.b32.xlu0 %v19992_v14, %s20364_s24  ;;  %12780 = vmatprep.subr.bf16.mxu1 %v12419_v20 }
0x13ad   :  { %12781 = vmatpush1.bf16.msra.mxu1 %v12418_v58 }
0x13ae   :  { %12846 = vmatprep.subr.bf16.mxu1 %v20015_v36  ;;  %v14895_v36 = vpop.eup %14894 }
0x13af   :  { %12137 = vrot.lane.b32.xlu0 %v19992_v14, %s14945_s1  ;;  %12943 = vst [vmem:[%s20338_s22 + $0x8] sm:$0xff] %v14895_v36 }
0x13b0   :  { %12797 = vmatmul.mubr.bf16.vlgmr.msra.gmra.mrb[124].mxu1 %v19780_v21 }
0x13b1   :  { %12847 = vmatpush1.bf16.msra.mxu1 %v20013_v56  ;;  %13654 = vmatprep.mubr.msk.bf16.mxu1 %vm12596_vm1, %v19556_v42 }
0x13b3   :  { %12272 = vrot.lane.b32.xlu0 %v19992_v14, %s14946_s26 }
0x13b7   :  { %12407 = vrot.lane.b32.xlu0 %v19992_v14, %s14947_s14 }
0x13e4   :  { %v12675_v56 = vpop.f32.mrb[40].mxu0 }
0x13e5   :  { %14896 = vtanh.f32 %v12675_v56  ;;  %v12677_v61 = vpop.f32.mrb[41].mxu0 }
0x13e6   :  { %14898 = vtanh.f32 %v12677_v61  ;;  %v12679_v6 = vpop.f32.mrb[42].mxu0 }
0x13e7   :  { %v12680_v44 = vpop.f32.mrb[43].mxu0 }
0x13ed   :  { %v11464_v14 = vpop.permute.xlu0 %11463 }
0x13ee   :  { %v11480_v25 = vsel %vm1174_vm5, %v20004_v23, %v11464_v14  ;;  %v11466_v8 = vpop.permute.xlu1 %11465 }
0x13ef   :  { %v14897_v11 = vpop.eup %14896  ;;  %v20165_v54 = vsel %vm1174_vm5, %v11464_v14, %v11466_v8  ;;  %12807 = vmatprep.subr.bf16.mxu0 %v11480_v25 }
0x13f0   :  { %v14899_v1 = vpop.eup %14898  ;;  %12808 = vmatpush1.bf16.msra.mxu0 %v20067_v57  ;;  %12944 = vst [vmem:[%s20338_s22 + $0x10] sm:$0xff] %v14897_v11 }
0x13f1   :  { %v11598_v46 = vpop.permute.xlu0 %11597  ;;  %12945 = vst [vmem:[%s20338_s22 + $0x18] sm:$0xff] %v14899_v1 }
0x13f2   :  { %v11614_v23 = vsel %vm1311_vm6, %v20019_v15, %v11598_v46  ;;  %v20176_v49 = vpop.permute.xlu1 %11599 }
0x13f3   :  { %v20180_v22 = vsel %vm1311_vm6, %v11598_v46, %v20176_v49  ;;  %12809 = vmatprep.subr.bf16.mxu0 %v11614_v23 }
0x13f4   :  { %12810 = vmatpush1.bf16.msra.mxu0 %v20080_v17 }
0x13f5   :  { %v11732_v41 = vpop.permute.xlu0 %11731 }
0x13f6   :  { %v11748_v52 = vsel %vm2681_vm15, %v20036_v13, %v11732_v41  ;;  %v20185_v53 = vpop.permute.xlu1 %11733 }
0x13f7   :  { %v20189_v43 = vsel %vm2681_vm15, %v11732_v41, %v20185_v53  ;;  %12811 = vmatprep.subr.bf16.mxu0 %v11748_v52 }
0x13f8   :  { %12812 = vmatpush1.bf16.msra.mxu0 %v20094_v63 }
0x13f9   :  { %v11866_v15 = vpop.permute.xlu0 %11865 }
0x13fa   :  { %v11882_v57 = vsel %vm2818_vm0, %v20056_v27, %v11866_v15  ;;  %v20194_v39 = vpop.permute.xlu1 %11867 }
0x13fb   :  { %v20198_v31 = vsel %vm2818_vm0, %v11866_v15, %v20194_v39  ;;  %12813 = vmatprep.subr.bf16.mxu0 %v11882_v57 }
0x13fc   :  { %12814 = vmatpush1.bf16.msra.mxu0 %v20104_v28 }
0x13fd   :  { %v12000_v13 = vpop.permute.xlu0 %11999 }
0x13fe   :  { %v12016_v32 = vsel %vm2955_vm3, %v20082_v5, %v12000_v13  ;;  %v20203_v4 = vpop.permute.xlu1 %12001 }
0x13ff   :  { %v20207_v17 = vsel %vm2955_vm3, %v12000_v13, %v20203_v4  ;;  %12815 = vmatprep.subr.bf16.mxu0 %v12016_v32 }
0x1400   :  { %12816 = vmatpush1.bf16.msra.mxu0 %v20113_v24 }
0x1401   :  { %v12134_v27 = vpop.permute.xlu0 %12133 }
0x1402   :  { %v12151_v50 = vsel %vm12139_vm7, %v20106_v37, %v12134_v27  ;;  %v20212_v45 = vpop.permute.xlu1 %12135 }
0x1403   :  { %v20216_v63 = vsel %vm12139_vm7, %v12134_v27, %v20212_v45  ;;  %12817 = vmatprep.subr.bf16.mxu0 %v12151_v50  ;;  %v12716_v5 = vpop.f32.mrb[120].mxu1 }
0x1404   :  { %12818 = vmatpush1.bf16.msra.mxu0 %v20121_v47  ;;  %14900 = vtanh.f32 %v12716_v5  ;;  %v12718_v55 = vpop.f32.mrb[121].mxu1 }
0x1405   :  { %v12269_v35 = vpop.permute.xlu0 %12268  ;;  %14902 = vtanh.f32 %v12718_v55  ;;  %v12720_v60 = vpop.f32.mrb[122].mxu1 }
0x1406   :  { %v12286_v12 = vsel %vm12274_vm4, %v20123_v40, %v12269_v35  ;;  %v20221_v28 = vpop.permute.xlu1 %12270  ;;  %v12721_v37 = vpop.f32.mrb[123].mxu1 }
0x1407   :  { %v20225_v2 = vsel %vm12274_vm4, %v12269_v35, %v20221_v28  ;;  %12819 = vmatprep.subr.bf16.mxu0 %v12286_v12 }
0x1408   :  { %12820 = vmatpush1.bf16.msra.mxu0 %v20130_v59 }
0x1409   :  { %v12404_v7 = vpop.permute.xlu0 %12403 }
0x140a   :  { %v12421_v24 = vsel %vm12409_vm11, %v20137_v9, %v12404_v7  ;;  %v20230_v18 = vpop.permute.xlu1 %12405 }
0x140b   :  { %v20234_v38 = vsel %vm12409_vm11, %v12404_v7, %v20230_v18  ;;  %12821 = vmatprep.subr.bf16.mxu0 %v12421_v24 }
0x140c   :  { %12822 = vmatpush1.bf16.msra.mxu0 %v20141_v16 }
0x140d   :  { %v11468_v51 = vpop.permute.xlu0 %11467  ;;  %12887 = vmatprep.subr.bf16.mxu0 %v14925_v3 }
0x140e   :  { %v14901_v33 = vpop.eup %14900  ;;  %v11482_v47 = vsel %vm1174_vm5, %v11466_v8, %v11468_v51  ;;  %11512 = vst.msk [vmem:[#allocation6 + $0xe8] sm:$0xff] %vm11377_vm8, %v11468_v51 }
0x140f   :  { %v14903_v40 = vpop.eup %14902  ;;  %12838 = vmatmul.mubr.bf16.vlgmr.msra.gmra.mrb[48].mxu0 %v19780_v21  ;;  %12848 = vmatprep.subr.bf16.mxu1 %v11482_v47  ;;  %12946 = vst [vmem:[%s20338_s22 + $0x20] sm:$0xff] %v14901_v33 }
0x1410   :  { %12849 = vmatpush1.bf16.msra.mxu1 %v20165_v54  ;;  %12888 = vmatpush1.bf16.msra.mxu0 %v12469_v34  ;;  %12947 = vst [vmem:[%s20338_s22 + $0x28] sm:$0xff] %v14903_v40 }
0x1411   :  { %v11602_v26 = vpop.permute.xlu0 %11601  ;;  %12889 = vmatprep.subr.bf16.mxu0 %v14925_v3  ;;  %13655 = vmatprep.mubr.msk.bf16.mxu0 %vm12596_vm1, %v19556_v42 }
0x1412   :  { %v11616_v59 = vsel %vm1311_vm6, %v20176_v49, %v11602_v26  ;;  %11646 = vst.msk [vmem:[#allocation6 + $0x160] sm:$0xff] %vm11377_vm8, %v11602_v26 }
0x1413   :  { %12850 = vmatprep.subr.bf16.mxu1 %v11616_v59 }
0x1414   :  { %12851 = vmatpush1.bf16.msra.mxu1 %v20180_v22 }
0x1415   :  { %v11736_v29 = vpop.permute.xlu0 %11735  ;;  %v12484_v58 = vld [vmem:[#allocation6 + $0xe8] sm:$0xff] }
0x1416   :  { %v11750_v30 = vsel %vm2681_vm15, %v20185_v53, %v11736_v29  ;;  %11780 = vst.msk [vmem:[#allocation6 + $0x1d8] sm:$0xff] %vm11377_vm8, %v11736_v29  ;;  %12890 = vmatpush1.bf16.msra.mxu0 %v12484_v58 }
0x1417   :  { %12852 = vmatprep.subr.bf16.mxu1 %v11750_v30  ;;  %12891 = vmatprep.subr.bf16.mxu0 %v14925_v3 }
0x1418   :  { %12853 = vmatpush1.bf16.msra.mxu1 %v20189_v43 }
0x1419   :  { %v11870_v42 = vpop.permute.xlu0 %11869  ;;  %v12499_v20 = vld [vmem:[#allocation6 + $0x160] sm:$0xff] }
0x141a   :  { %v11884_v9 = vsel %vm2818_vm0, %v20194_v39, %v11870_v42  ;;  %11914 = vst.msk [vmem:[#allocation6 + $0x250] sm:$0xff] %vm11377_vm8, %v11870_v42  ;;  %12892 = vmatpush1.bf16.msra.mxu0 %v12499_v20 }
0x141b   :  { %12854 = vmatprep.subr.bf16.mxu1 %v11884_v9  ;;  %12893 = vmatprep.subr.bf16.mxu0 %v14925_v3 }
0x141c   :  { %12855 = vmatpush1.bf16.msra.mxu1 %v20198_v31 }
0x141d   :  { %v12004_v16 = vpop.permute.xlu0 %12003  ;;  %v12514_v19 = vld [vmem:[#allocation6 + $0x1d8] sm:$0xff] }
0x141e   :  { %v12018_v48 = vsel %vm2955_vm3, %v20203_v4, %v12004_v16  ;;  %12048 = vst.msk [vmem:[#allocation6 + $0x2c8] sm:$0xff] %vm11377_vm8, %v12004_v16  ;;  %12894 = vmatpush1.bf16.msra.mxu0 %v12514_v19 }
0x141f   :  { %12856 = vmatprep.subr.bf16.mxu1 %v12018_v48  ;;  %12895 = vmatprep.subr.bf16.mxu0 %v14925_v3 }
0x1420   :  { %12857 = vmatpush1.bf16.msra.mxu1 %v20207_v17 }
0x1421   :  { %v12138_v62 = vpop.permute.xlu0 %12137  ;;  %v12529_v10 = vld [vmem:[#allocation6 + $0x250] sm:$0xff] }
0x1422   :  { %v12153_v0 = vsel %vm12139_vm7, %v20212_v45, %v12138_v62  ;;  %12183 = vst.msk [vmem:[#allocation6 + $0x340] sm:$0xff] %vm11377_vm8, %v12138_v62  ;;  %12896 = vmatpush1.bf16.msra.mxu0 %v12529_v10 }
0x1423   :  { %12858 = vmatprep.subr.bf16.mxu1 %v12153_v0  ;;  %12897 = vmatprep.subr.bf16.mxu0 %v14925_v3 }
0x1424   :  { %12859 = vmatpush1.bf16.msra.mxu1 %v20216_v63 }
0x1425   :  { %v12273_v36 = vpop.permute.xlu0 %12272  ;;  %v12544_v56 = vld [vmem:[#allocation6 + $0x2c8] sm:$0xff] }
0x1426   :  { %v12288_v61 = vsel %vm12274_vm4, %v20221_v28, %v12273_v36  ;;  %12318 = vst.msk [vmem:[#allocation6 + $0x3b8] sm:$0xff] %vm11377_vm8, %v12273_v36  ;;  %12898 = vmatpush1.bf16.msra.mxu0 %v12544_v56 }
0x1427   :  { %12860 = vmatprep.subr.bf16.mxu1 %v12288_v61  ;;  %12899 = vmatprep.subr.bf16.mxu0 %v14925_v3 }
0x1428   :  { %12861 = vmatpush1.bf16.msra.mxu1 %v20225_v2 }
0x1429   :  { %v12408_v6 = vpop.permute.xlu0 %12407  ;;  %v12559_v44 = vld [vmem:[#allocation6 + $0x340] sm:$0xff] }
0x142a   :  { %v12423_v14 = vsel %vm12409_vm11, %v20230_v18, %v12408_v6  ;;  %12453 = vst.msk [vmem:[#allocation6 + $0x430] sm:$0xff] %vm11377_vm8, %v12408_v6  ;;  %12900 = vmatpush1.bf16.msra.mxu0 %v12559_v44 }
0x142b   :  { %12862 = vmatprep.subr.bf16.mxu1 %v12423_v14  ;;  %12901 = vmatprep.subr.bf16.mxu0 %v14925_v3 }
0x142c   :  { %12863 = vmatpush1.bf16.msra.mxu1 %v20234_v38 }
0x142d   :  { %v12574_v25 = vld [vmem:[#allocation6 + $0x3b8] sm:$0xff] }
0x142e   :  { %12902 = vmatpush1.bf16.msra.mxu0 %v12574_v25 }
0x142f   :  { %12903 = vmatprep.subr.bf16.mxu0 %v14925_v3  ;;  %12879 = vmatmul.mubr.bf16.vlgmr.msra.gmra.mrb[128].mxu1 %v19780_v21 }
0x1431   :  { %v12589_v8 = vld [vmem:[#allocation6 + $0x430] sm:$0xff] }
0x1432   :  { %12904 = vmatpush1.bf16.msra.mxu0 %v12589_v8 }
0x1435   :  { %12920 = vmatmul.mubr.bf16.vlgmr.msra.gmra.mrb[52].mxu0 %v19780_v21 }
0x1463   :  { %v12757_v11 = vpop.f32.mrb[44].mxu0 }
0x1464   :  { %14904 = vtanh.f32 %v12757_v11  ;;  %v12759_v54 = vpop.f32.mrb[45].mxu0 }
0x1465   :  { %14906 = vtanh.f32 %v12759_v54  ;;  %v12761_v1 = vpop.f32.mrb[46].mxu0 }
0x1466   :  { %v12762_v46 = vpop.f32.mrb[47].mxu0 }
0x146e   :  { %v14905_v23 = vpop.eup %14904 }
0x146f   :  { %v14907_v49 = vpop.eup %14906  ;;  %12948 = vst [vmem:[%s20338_s22 + $0x30] sm:$0xff] %v14905_v23 }
0x1470   :  { %12949 = vst [vmem:[%s20338_s22 + $0x38] sm:$0xff] %v14907_v49 }
0x1483   :  { %v12798_v3 = vpop.f32.mrb[124].mxu1 }
0x1484   :  { %14908 = vtanh.f32 %v12798_v3  ;;  %v12800_v22 = vpop.f32.mrb[125].mxu1 }
0x1485   :  { %14910 = vtanh.f32 %v12800_v22  ;;  %v12802_v21 = vpop.f32.mrb[126].mxu1 }
0x1486   :  { %v12803_v41 = vpop.f32.mrb[127].mxu1 }
0x148e   :  { %v14909_v52 = vpop.eup %14908 }
0x148f   :  { %v14911_v53 = vpop.eup %14910  ;;  %12950 = vst [vmem:[%s20338_s22 + $0x40] sm:$0xff] %v14909_v52 }
0x1490   :  { %12951 = vst [vmem:[%s20338_s22 + $0x48] sm:$0xff] %v14911_v53 }
0x14e2   :  { %v12839_v43 = vpop.f32.mrb[48].mxu0 }
0x14e3   :  { %14912 = vtanh.f32 %v12839_v43  ;;  %v12841_v15 = vpop.f32.mrb[49].mxu0 }
0x14e4   :  { %14914 = vtanh.f32 %v12841_v15  ;;  %v12843_v57 = vpop.f32.mrb[50].mxu0 }
0x14e5   :  { %v12844_v39 = vpop.f32.mrb[51].mxu0 }
0x14ed   :  { %v14913_v31 = vpop.eup %14912 }
0x14ee   :  { %v14915_v13 = vpop.eup %14914  ;;  %12952 = vst [vmem:[%s20338_s22 + $0x50] sm:$0xff] %v14913_v31 }
0x14ef   :  { %12953 = vst [vmem:[%s20338_s22 + $0x58] sm:$0xff] %v14915_v13 }
0x1502   :  { %v12880_v32 = vpop.f32.mrb[128].mxu1 }
0x1503   :  { %14916 = vtanh.f32 %v12880_v32  ;;  %v12882_v4 = vpop.f32.mrb[129].mxu1 }
0x1504   :  { %14918 = vtanh.f32 %v12882_v4  ;;  %v12884_v17 = vpop.f32.mrb[130].mxu1 }
0x1505   :  { %v12885_v27 = vpop.f32.mrb[131].mxu1 }
0x1508   :  { %v12921_v50 = vpop.f32.mrb[52].mxu0 }
0x1509   :  { %14920 = vtanh.f32 %v12921_v50  ;;  %v12923_v45 = vpop.f32.mrb[53].mxu0 }
0x150a   :  { %v12924_v63 = vpop.f32.mrb[54].mxu0 }
0x150b   :  { %v12925_v5 = vpop.f32.mrb[55].mxu0 }
0x150d   :  { %v14917_v55 = vpop.eup %14916 }
0x150e   :  { %v14919_v35 = vpop.eup %14918  ;;  %12954 = vst [vmem:[%s20338_s22 + $0x60] sm:$0xff] %v14917_v55 }
0x150f   :  { %12955 = vst [vmem:[%s20338_s22 + $0x68] sm:$0xff] %v14919_v35 }
0x1513   :  { %v14921_v60 = vpop.eup %14920 }
0x1514   :  { %12956 = vst.msk [vmem:[%s20338_s22 + $0x70] sm:$0xff] %vm11377_vm8, %v14921_v60 }

</bundles_post_ra>
